<compile_context>
chip_gen: v5e
topology: v5e:2x2
jax: 0.10.0
libtpu: 0.0.40
codegen_flags: <defaults>
</compile_context>

<pallas_src>
import jax
import jax.numpy as jnp
import numpy as np
from jax.experimental import pallas as pl
from jax.experimental.pallas import tpu as pltpu

BN_EPS = 1e-5


# ----------------------------------------------------------------------------
# Pallas kernels
# ----------------------------------------------------------------------------
def _conv_bn_relu_pool_kernel(p0_ref, p1_ref, p2_ref, p3_ref,
                              w_ref, scale_ref, shift_ref, o_ref):
    """o = max_{4 corners} relu((patches_corner @ W) * scale + shift).

    The four patch inputs are the im2col rows of the four positions of each
    2x2 pooling window, so the elementwise max IS MaxPool2d(2,2)."""
    w = w_ref[...]
    s = scale_ref[...]
    t = shift_ref[...]

    def branch(p_ref):
        acc = jnp.dot(p_ref[...], w, preferred_element_type=jnp.float32)
        return jnp.maximum(acc * s + t, 0.0)

    y = jnp.maximum(jnp.maximum(branch(p0_ref), branch(p1_ref)),
                    jnp.maximum(branch(p2_ref), branch(p3_ref)))
    o_ref[...] = y.astype(o_ref.dtype)


def _fc_fused_kernel(x_ref, w1_ref, b1_ref, w2_ref, b2_ref, o_ref):
    """o = relu(x @ W1 + b1) @ W2 + b2, fully fused (one launch, h never
    touches HBM)."""
    h = jnp.dot(x_ref[...], w1_ref[...], preferred_element_type=jnp.float32)
    h = jnp.maximum(h + b1_ref[...], 0.0)
    out = jnp.dot(h.astype(w2_ref.dtype), w2_ref[...],
                  preferred_element_type=jnp.float32)
    o_ref[...] = (out + b2_ref[...]).astype(o_ref.dtype)


def _pick_tile_m(m, cap=256):
    """Largest multiple-of-8 divisor of m that is <= cap (or m itself)."""
    t = min(m, cap)
    while t > 8 and m % t != 0:
        t -= 8
    if m % t != 0:
        return m
    return t


def conv_bn_relu_pool(corners, w, scale, shift):
    """Fused conv(3x3, pad1) + BN(eval) + ReLU + MaxPool(2,2).

    corners: list of 4 bf16 patch matrices, each [M, K] with
             M = B*Ho*Wo (pooled spatial positions).
    w:       bf16 [K, N] matmul weight.
    Returns bf16 [M, N] pooled activations (row order = (b, ho, wo))."""
    M, K = corners[0].shape
    K2, N = w.shape
    assert K == K2
    tm = _pick_tile_m(M)
    grid = (M // tm,)
    scale2 = scale.reshape(1, N).astype(jnp.float32)
    shift2 = shift.reshape(1, N).astype(jnp.float32)
    return pl.pallas_call(
        _conv_bn_relu_pool_kernel,
        out_shape=jax.ShapeDtypeStruct((M, N), jnp.bfloat16),
        grid=grid,
        in_specs=[pl.BlockSpec((tm, K), lambda i: (i, 0))] * 4 + [
            pl.BlockSpec((K, N), lambda i: (0, 0)),
            pl.BlockSpec((1, N), lambda i: (0, 0)),
            pl.BlockSpec((1, N), lambda i: (0, 0)),
        ],
        out_specs=pl.BlockSpec((tm, N), lambda i: (i, 0)),
        compiler_params=pltpu.CompilerParams(
            dimension_semantics=("parallel",)),
    )(*corners, w, scale2, shift2)


def fc_fused(x, w1, b1, w2, b2):
    """Fused fc1 + ReLU + fc2.  x bf16 [M, K1], w1 bf16 [K1, N1],
    w2 bf16 [N1, N2]."""
    M, K1 = x.shape
    _, N1 = w1.shape
    _, N2 = w2.shape
    tm = _pick_tile_m(M)
    grid = (M // tm,)
    return pl.pallas_call(
        _fc_fused_kernel,
        out_shape=jax.ShapeDtypeStruct((M, N2), jnp.float32),
        grid=grid,
        in_specs=[
            pl.BlockSpec((tm, K1), lambda i: (i, 0)),
            pl.BlockSpec((K1, N1), lambda i: (0, 0)),
            pl.BlockSpec((1, N1), lambda i: (0, 0)),
            pl.BlockSpec((N1, N2), lambda i: (0, 0)),
            pl.BlockSpec((1, N2), lambda i: (0, 0)),
        ],
        out_specs=pl.BlockSpec((tm, N2), lambda i: (i, 0)),
        compiler_params=pltpu.CompilerParams(
            dimension_semantics=("parallel",)),
    )(x, w1, b1, w2, b2)


# ----------------------------------------------------------------------------
# JAX glue: im2col (per pool-window corner), weight/BN preparation
# ----------------------------------------------------------------------------
def im2col_corners(x_nhwc, ksize=3, pad=1, k_pad_to=None):
    """3x3 / pad 1 / stride 1 patches, grouped by the four corners of each
    2x2 pooling window.  Returns 4 matrices [B*Ho*Wo, K] (feature order
    (kh, kw, c)), row order (b, ho, wo)."""
    B, H, W, C = x_nhwc.shape
    xp = jnp.pad(x_nhwc, ((0, 0), (pad, pad), (pad, pad), (0, 0)))
    cols = [xp[:, kh:kh + H, kw:kw + W, :]
            for kh in range(ksize) for kw in range(ksize)]
    patches = jnp.concatenate(cols, axis=-1)          # [B, H, W, 9*C]
    K = ksize * ksize * C
    if k_pad_to is not None and k_pad_to > K:
        patches = jnp.pad(patches,
                          ((0, 0), (0, 0), (0, 0), (0, k_pad_to - K)))
        K = k_pad_to
    Ho, Wo = H // 2, W // 2
    corners = []
    for dh in (0, 1):
        for dw in (0, 1):
            corners.append(
                patches[:, dh::2, dw::2, :].reshape(B * Ho * Wo, K))
    return corners


def conv_weight_to_matrix(w_oihw, k_pad_to=None):
    """PyTorch conv weight [O, C, kh, kw] -> matmul weight [kh*kw*C, O]
    matching the im2col feature ordering (zero-padded along K if asked)."""
    O, C, KH, KW = w_oihw.shape
    w = jnp.transpose(w_oihw, (2, 3, 1, 0)).reshape(KH * KW * C, O)
    if k_pad_to is not None and k_pad_to > KH * KW * C:
        w = jnp.pad(w, ((0, k_pad_to - KH * KW * C), (0, 0)))
    return w


def fold_bn(conv_bias, gamma, beta, mean, var):
    """Fold conv bias + eval-mode BatchNorm into per-channel scale/shift."""
    s = gamma / jnp.sqrt(var + BN_EPS)
    t = beta - mean * s
    return s, conv_bias * s + t


def prepare_params(p):
    """One-time weight prep: BN folding, matmul layouts, NCHW->NHWC column
    permutation of fc1, bf16 casts."""
    s1, t1 = fold_bn(p["conv1_b"], p["bn1_gamma"], p["bn1_beta"],
                     p["bn1_mean"], p["bn1_var"])
    s2, t2 = fold_bn(p["conv2_b"], p["bn2_gamma"], p["bn2_beta"],
                     p["bn2_mean"], p["bn2_var"])
    # fc1 expects PyTorch NCHW flatten (c*64 + h*8 + w); our activations are
    # NHWC-flattened ((h*8 + w)*64 + c) -> permute fc1's columns once.
    fc1 = p["fc1_w"].reshape(512, 64, 8, 8)           # [N, C, H, W]
    fc1 = jnp.transpose(fc1, (2, 3, 1, 0))            # [H, W, C, N]
    fc1 = fc1.reshape(64 * 8 * 8, 512)                # rows = NHWC features
    return {
        "conv1_w": conv_weight_to_matrix(p["conv1_w"], k_pad_to=32
                                         ).astype(jnp.bfloat16),
        "conv1_scale": s1.astype(jnp.float32),
        "conv1_shift": t1.astype(jnp.float32),
        "conv2_w": conv_weight_to_matrix(p["conv2_w"]).astype(jnp.bfloat16),
        "conv2_scale": s2.astype(jnp.float32),
        "conv2_shift": t2.astype(jnp.float32),
        "fc1_w": fc1.astype(jnp.bfloat16),
        "fc1_b": p["fc1_b"].reshape(1, 512).astype(jnp.float32),
        "fc2_w": p["fc2_w"].T.astype(jnp.bfloat16),
        "fc2_b": p["fc2_b"].reshape(1, 10).astype(jnp.float32),
    }


# ----------------------------------------------------------------------------
# Parameters (deterministic synthetic init, PyTorch shapes)
# ----------------------------------------------------------------------------
def init_params(key):
    ks = jax.random.split(key, 20)
    f32 = jnp.float32
    p = {}
    p["conv1_w"] = 0.05 * jax.random.normal(ks[0], (32, 3, 3, 3), f32)
    p["conv1_b"] = 0.05 * jax.random.normal(ks[1], (32,), f32)
    p["bn1_gamma"] = 1.0 + 0.1 * jax.random.normal(ks[2], (32,), f32)
    p["bn1_beta"] = 0.1 * jax.random.normal(ks[3], (32,), f32)
    p["bn1_mean"] = 0.1 * jax.random.normal(ks[4], (32,), f32)
    p["bn1_var"] = 0.5 + jnp.abs(jax.random.normal(ks[5], (32,), f32))
    p["conv2_w"] = 0.05 * jax.random.normal(ks[6], (64, 32, 3, 3), f32)
    p["conv2_b"] = 0.05 * jax.random.normal(ks[7], (64,), f32)
    p["bn2_gamma"] = 1.0 + 0.1 * jax.random.normal(ks[8], (64,), f32)
    p["bn2_beta"] = 0.1 * jax.random.normal(ks[9], (64,), f32)
    p["bn2_mean"] = 0.1 * jax.random.normal(ks[10], (64,), f32)
    p["bn2_var"] = 0.5 + jnp.abs(jax.random.normal(ks[11], (64,), f32))
    p["fc1_w"] = 0.02 * jax.random.normal(ks[12], (512, 64 * 8 * 8), f32)
    p["fc1_b"] = 0.02 * jax.random.normal(ks[13], (512,), f32)
    p["fc2_w"] = 0.02 * jax.random.normal(ks[14], (10, 512), f32)
    p["fc2_b"] = 0.02 * jax.random.normal(ks[15], (10,), f32)
    return p


# ----------------------------------------------------------------------------
# Forward pass (Pallas)
# ----------------------------------------------------------------------------
@jax.jit
def cnn10_forward(x_nchw, pp):
    x = jnp.transpose(x_nchw, (0, 2, 3, 1)).astype(jnp.bfloat16)  # NHWC bf16
    B = x.shape[0]

    # conv1 + bn1 + relu + pool (fused) -> [B*16*16, 32]
    corners = im2col_corners(x, k_pad_to=32)
    y = conv_bn_relu_pool(corners, pp["conv1_w"],
                          pp["conv1_scale"], pp["conv1_shift"])
    y = y.reshape(B, 16, 16, 32)

    # conv2 + bn2 + relu + pool (fused) -> [B*8*8, 64]
    corners = im2col_corners(y)
    y = conv_bn_relu_pool(corners, pp["conv2_w"],
                          pp["conv2_scale"], pp["conv2_shift"])

    # NHWC flatten (fc1 columns were pre-permuted to match)
    flat = y.reshape(B, 8 * 8 * 64)

    # fc1 + relu + fc2 (fused)
    return fc_fused(flat, pp["fc1_w"], pp["fc1_b"], pp["fc2_w"], pp["fc2_b"])


# ----------------------------------------------------------------------------
# Pure-JAX reference (for correctness check only)
# ----------------------------------------------------------------------------
def reference_forward(x_nchw, p):
    hi = jax.lax.Precision.HIGHEST

    def conv(x, w, b):
        y = jax.lax.conv_general_dilated(
            x, w, (1, 1), ((1, 1), (1, 1)),
            dimension_numbers=("NCHW", "OIHW", "NCHW"), precision=hi)
        return y + b[None, :, None, None]

    def bn(x, g, bta, m, v):
        return (g[None, :, None, None] * (x - m[None, :, None, None])
                / jnp.sqrt(v[None, :, None, None] + BN_EPS)
                + bta[None, :, None, None])

    def pool(x):
        B, C, H, W = x.shape
        return jnp.max(x.reshape(B, C, H // 2, 2, W // 2, 2), axis=(3, 5))

    x = jnp.maximum(bn(conv(x_nchw, p["conv1_w"], p["conv1_b"]),
                       p["bn1_gamma"], p["bn1_beta"], p["bn1_mean"],
                       p["bn1_var"]), 0.0)
    x = pool(x)
    x = jnp.maximum(bn(conv(x, p["conv2_w"], p["conv2_b"]),
                       p["bn2_gamma"], p["bn2_beta"], p["bn2_mean"],
                       p["bn2_var"]), 0.0)
    x = pool(x)
    x = x.reshape(x.shape[0], -1)
    x = jnp.maximum(jnp.dot(x, p["fc1_w"].T, precision=hi) + p["fc1_b"], 0.0)
    x = jnp.dot(x, p["fc2_w"].T, precision=hi) + p["fc2_b"]
    return x


if __name__ == "__main__":
    # CIFAR-sized input (32x32 is required by fc1 = Linear(64*8*8, 512)
    # after two 2x2 pools), NCHW like PyTorch.
    x = jax.random.normal(jax.random.PRNGKey(0), (2, 3, 32, 32),
                          dtype=jnp.float32)
    params = init_params(jax.random.PRNGKey(42))
    prepared = prepare_params(params)

    out = cnn10_forward(x, prepared)
    out = jax.block_until_ready(out)
    assert out.shape == (2, 10), out.shape

    ref = reference_forward(x, params)
    # bf16 MXU inputs (f32 accumulation) -> slightly looser tolerance than f32.
    np.testing.assert_allclose(np.asarray(out), np.asarray(ref),
                               rtol=2e-2, atol=2e-2)
    print("KERNEL_OK")
</pallas_src>

<mosaic_0001>
module attributes {stable_mosaic.version = 11 : i64} {
  func.func @_conv_bn_relu_pool_kernel(%arg0: i32, %arg1: memref<256x32xbf16, #tpu.memory_space<vmem>>, %arg2: memref<256x32xbf16, #tpu.memory_space<vmem>>, %arg3: memref<256x32xbf16, #tpu.memory_space<vmem>>, %arg4: memref<256x32xbf16, #tpu.memory_space<vmem>>, %arg5: memref<32x32xbf16, #tpu.memory_space<vmem>>, %arg6: memref<1x32xf32, #tpu.memory_space<vmem>>, %arg7: memref<1x32xf32, #tpu.memory_space<vmem>>, %arg8: memref<256x32xbf16, #tpu.memory_space<vmem>>) attributes {dimension_semantics = [#tpu.dimension_semantics<parallel>], iteration_bounds = array<i64: 2>, scalar_prefetch = 0 : i64, scratch_operands = 0 : i64, tpu.core_type = #tpu.core_type<tc>, window_params = [{transform_indices = @transform_0, window_bounds = array<i64: 256, 32>}, {transform_indices = @transform_1, window_bounds = array<i64: 256, 32>}, {transform_indices = @transform_2, window_bounds = array<i64: 256, 32>}, {transform_indices = @transform_3, window_bounds = array<i64: 256, 32>}, {pipeline_mode = #tpu.pipeline_mode<synchronous>, transform_indices = @transform_4, window_bounds = array<i64: 32, 32>}, {pipeline_mode = #tpu.pipeline_mode<synchronous>, transform_indices = @transform_5, window_bounds = array<i64: 1, 32>}, {pipeline_mode = #tpu.pipeline_mode<synchronous>, transform_indices = @transform_6, window_bounds = array<i64: 1, 32>}, {transform_indices = @transform_7, window_bounds = array<i64: 256, 32>}]} {
    %c0 = arith.constant 0 : index
    %c0_0 = arith.constant 0 : index
    %0 = vector.load %arg5[%c0, %c0_0] : memref<32x32xbf16, #tpu.memory_space<vmem>>, vector<32x32xbf16>
    %c0_1 = arith.constant 0 : index
    %c0_2 = arith.constant 0 : index
    %1 = vector.load %arg6[%c0_1, %c0_2] : memref<1x32xf32, #tpu.memory_space<vmem>>, vector<1x32xf32>
    %c0_3 = arith.constant 0 : index
    %c0_4 = arith.constant 0 : index
    %2 = vector.load %arg7[%c0_3, %c0_4] : memref<1x32xf32, #tpu.memory_space<vmem>>, vector<1x32xf32>
    %c0_5 = arith.constant 0 : index
    %c0_6 = arith.constant 0 : index
    %3 = vector.load %arg1[%c0_5, %c0_6] : memref<256x32xbf16, #tpu.memory_space<vmem>>, vector<256x32xbf16>
    %cst = arith.constant dense<0.000000e+00> : vector<256x32xf32>
    %4 = tpu.matmul %3, %0, %cst {dimension_numbers = #tpu.dot_dimension_numbers<[1], [0], [0], [1], [0, 0, 1, 1], [], []>} : vector<256x32xbf16>, vector<32x32xbf16>, vector<256x32xf32> -> vector<256x32xf32>
    %5 = vector.broadcast %1 : vector<1x32xf32> to vector<256x32xf32>
    %6 = arith.mulf %4, %5 : vector<256x32xf32>
    %7 = vector.broadcast %2 : vector<1x32xf32> to vector<256x32xf32>
    %8 = arith.addf %6, %7 : vector<256x32xf32>
    %cst_7 = arith.constant 0.000000e+00 : f32
    %9 = vector.broadcast %cst_7 : f32 to vector<256x32xf32>
    %10 = arith.maximumf %8, %9 : vector<256x32xf32>
    %c0_8 = arith.constant 0 : index
    %c0_9 = arith.constant 0 : index
    %11 = vector.load %arg2[%c0_8, %c0_9] : memref<256x32xbf16, #tpu.memory_space<vmem>>, vector<256x32xbf16>
    %cst_10 = arith.constant dense<0.000000e+00> : vector<256x32xf32>
    %12 = tpu.matmul %11, %0, %cst_10 {dimension_numbers = #tpu.dot_dimension_numbers<[1], [0], [0], [1], [0, 0, 1, 1], [], []>} : vector<256x32xbf16>, vector<32x32xbf16>, vector<256x32xf32> -> vector<256x32xf32>
    %13 = vector.broadcast %1 : vector<1x32xf32> to vector<256x32xf32>
    %14 = arith.mulf %12, %13 : vector<256x32xf32>
    %15 = vector.broadcast %2 : vector<1x32xf32> to vector<256x32xf32>
    %16 = arith.addf %14, %15 : vector<256x32xf32>
    %cst_11 = arith.constant 0.000000e+00 : f32
    %17 = vector.broadcast %cst_11 : f32 to vector<256x32xf32>
    %18 = arith.maximumf %16, %17 : vector<256x32xf32>
    %19 = arith.maximumf %10, %18 : vector<256x32xf32>
    %c0_12 = arith.constant 0 : index
    %c0_13 = arith.constant 0 : index
    %20 = vector.load %arg3[%c0_12, %c0_13] : memref<256x32xbf16, #tpu.memory_space<vmem>>, vector<256x32xbf16>
    %cst_14 = arith.constant dense<0.000000e+00> : vector<256x32xf32>
    %21 = tpu.matmul %20, %0, %cst_14 {dimension_numbers = #tpu.dot_dimension_numbers<[1], [0], [0], [1], [0, 0, 1, 1], [], []>} : vector<256x32xbf16>, vector<32x32xbf16>, vector<256x32xf32> -> vector<256x32xf32>
    %22 = vector.broadcast %1 : vector<1x32xf32> to vector<256x32xf32>
    %23 = arith.mulf %21, %22 : vector<256x32xf32>
    %24 = vector.broadcast %2 : vector<1x32xf32> to vector<256x32xf32>
    %25 = arith.addf %23, %24 : vector<256x32xf32>
    %cst_15 = arith.constant 0.000000e+00 : f32
    %26 = vector.broadcast %cst_15 : f32 to vector<256x32xf32>
    %27 = arith.maximumf %25, %26 : vector<256x32xf32>
    %c0_16 = arith.constant 0 : index
    %c0_17 = arith.constant 0 : index
    %28 = vector.load %arg4[%c0_16, %c0_17] : memref<256x32xbf16, #tpu.memory_space<vmem>>, vector<256x32xbf16>
    %cst_18 = arith.constant dense<0.000000e+00> : vector<256x32xf32>
    %29 = tpu.matmul %28, %0, %cst_18 {dimension_numbers = #tpu.dot_dimension_numbers<[1], [0], [0], [1], [0, 0, 1, 1], [], []>} : vector<256x32xbf16>, vector<32x32xbf16>, vector<256x32xf32> -> vector<256x32xf32>
    %30 = vector.broadcast %1 : vector<1x32xf32> to vector<256x32xf32>
    %31 = arith.mulf %29, %30 : vector<256x32xf32>
    %32 = vector.broadcast %2 : vector<1x32xf32> to vector<256x32xf32>
    %33 = arith.addf %31, %32 : vector<256x32xf32>
    %cst_19 = arith.constant 0.000000e+00 : f32
    %34 = vector.broadcast %cst_19 : f32 to vector<256x32xf32>
    %35 = arith.maximumf %33, %34 : vector<256x32xf32>
    %36 = arith.maximumf %27, %35 : vector<256x32xf32>
    %37 = arith.maximumf %19, %36 : vector<256x32xf32>
    %38 = arith.truncf %37 : vector<256x32xf32> to vector<256x32xbf16>
    %c0_20 = arith.constant 0 : index
    %c0_21 = arith.constant 0 : index
    %39 = vector.load %arg8[%c0_20, %c0_21] : memref<256x32xbf16, #tpu.memory_space<vmem>>, vector<256x32xbf16>
    tpu.vector_store %arg8[%c0_20, %c0_21], %38 {strides = array<i32>} : memref<256x32xbf16, #tpu.memory_space<vmem>>, vector<256x32xbf16>,
    return
  }
  func.func @transform_0(%arg0: i32) -> (i32, i32) {
    %c0_i32 = arith.constant 0 : i32
    %c0_i32_0 = arith.constant 0 : i32
    return %arg0, %c0_i32 : i32, i32
  }
  func.func @transform_1(%arg0: i32) -> (i32, i32) {
    %c0_i32 = arith.constant 0 : i32
    %c0_i32_0 = arith.constant 0 : i32
    return %arg0, %c0_i32 : i32, i32
  }
  func.func @transform_2(%arg0: i32) -> (i32, i32) {
    %c0_i32 = arith.constant 0 : i32
    %c0_i32_0 = arith.constant 0 : i32
    return %arg0, %c0_i32 : i32, i32
  }
  func.func @transform_3(%arg0: i32) -> (i32, i32) {
    %c0_i32 = arith.constant 0 : i32
    %c0_i32_0 = arith.constant 0 : i32
    return %arg0, %c0_i32 : i32, i32
  }
  func.func @transform_4(%arg0: i32) -> (i32, i32) {
    %c0_i32 = arith.constant 0 : i32
    %c0_i32_0 = arith.constant 0 : i32
    %c0_i32_1 = arith.constant 0 : i32
    return %c0_i32, %c0_i32_0 : i32, i32
  }
  func.func @transform_5(%arg0: i32) -> (i32, i32) {
    %c0_i32 = arith.constant 0 : i32
    %c0_i32_0 = arith.constant 0 : i32
    %c0_i32_1 = arith.constant 0 : i32
    return %c0_i32, %c0_i32_0 : i32, i32
  }
  func.func @transform_6(%arg0: i32) -> (i32, i32) {
    %c0_i32 = arith.constant 0 : i32
    %c0_i32_0 = arith.constant 0 : i32
    %c0_i32_1 = arith.constant 0 : i32
    return %c0_i32, %c0_i32_0 : i32, i32
  }
  func.func @transform_7(%arg0: i32) -> (i32, i32) {
    %c0_i32 = arith.constant 0 : i32
    %c0_i32_0 = arith.constant 0 : i32
    return %arg0, %c0_i32 : i32, i32
  }
}

module attributes {stable_mosaic.version = 11 : i64} {
  func.func @_conv_bn_relu_pool_kernel(%arg0: i32, %arg1: memref<128x288xbf16, #tpu.memory_space<vmem>>, %arg2: memref<128x288xbf16, #tpu.memory_space<vmem>>, %arg3: memref<128x288xbf16, #tpu.memory_space<vmem>>, %arg4: memref<128x288xbf16, #tpu.memory_space<vmem>>, %arg5: memref<288x64xbf16, #tpu.memory_space<vmem>>, %arg6: memref<1x64xf32, #tpu.memory_space<vmem>>, %arg7: memref<1x64xf32, #tpu.memory_space<vmem>>, %arg8: memref<128x64xbf16, #tpu.memory_space<vmem>>) attributes {dimension_semantics = [#tpu.dimension_semantics<parallel>], iteration_bounds = array<i64: 1>, scalar_prefetch = 0 : i64, scratch_operands = 0 : i64, tpu.core_type = #tpu.core_type<tc>, window_params = [{transform_indices = @transform_0, window_bounds = array<i64: 128, 288>}, {transform_indices = @transform_1, window_bounds = array<i64: 128, 288>}, {transform_indices = @transform_2, window_bounds = array<i64: 128, 288>}, {transform_indices = @transform_3, window_bounds = array<i64: 128, 288>}, {pipeline_mode = #tpu.pipeline_mode<synchronous>, transform_indices = @transform_4, window_bounds = array<i64: 288, 64>}, {pipeline_mode = #tpu.pipeline_mode<synchronous>, transform_indices = @transform_5, window_bounds = array<i64: 1, 64>}, {pipeline_mode = #tpu.pipeline_mode<synchronous>, transform_indices = @transform_6, window_bounds = array<i64: 1, 64>}, {transform_indices = @transform_7, window_bounds = array<i64: 128, 64>}]} {
    %c0 = arith.constant 0 : index
    %c0_0 = arith.constant 0 : index
    %0 = vector.load %arg5[%c0, %c0_0] : memref<288x64xbf16, #tpu.memory_space<vmem>>, vector<288x64xbf16>
    %c0_1 = arith.constant 0 : index
    %c0_2 = arith.constant 0 : index
    %1 = vector.load %arg6[%c0_1, %c0_2] : memref<1x64xf32, #tpu.memory_space<vmem>>, vector<1x64xf32>
    %c0_3 = arith.constant 0 : index
    %c0_4 = arith.constant 0 : index
    %2 = vector.load %arg7[%c0_3, %c0_4] : memref<1x64xf32, #tpu.memory_space<vmem>>, vector<1x64xf32>
    %c0_5 = arith.constant 0 : index
    %c0_6 = arith.constant 0 : index
    %3 = vector.load %arg1[%c0_5, %c0_6] : memref<128x288xbf16, #tpu.memory_space<vmem>>, vector<128x288xbf16>
    %cst = arith.constant dense<0.000000e+00> : vector<128x64xf32>
    %4 = tpu.matmul %3, %0, %cst {dimension_numbers = #tpu.dot_dimension_numbers<[1], [0], [0], [1], [0, 0, 1, 1], [], []>} : vector<128x288xbf16>, vector<288x64xbf16>, vector<128x64xf32> -> vector<128x64xf32>
    %5 = vector.broadcast %1 : vector<1x64xf32> to vector<128x64xf32>
    %6 = arith.mulf %4, %5 : vector<128x64xf32>
    %7 = vector.broadcast %2 : vector<1x64xf32> to vector<128x64xf32>
    %8 = arith.addf %6, %7 : vector<128x64xf32>
    %cst_7 = arith.constant 0.000000e+00 : f32
    %9 = vector.broadcast %cst_7 : f32 to vector<128x64xf32>
    %10 = arith.maximumf %8, %9 : vector<128x64xf32>
    %c0_8 = arith.constant 0 : index
    %c0_9 = arith.constant 0 : index
    %11 = vector.load %arg2[%c0_8, %c0_9] : memref<128x288xbf16, #tpu.memory_space<vmem>>, vector<128x288xbf16>
    %cst_10 = arith.constant dense<0.000000e+00> : vector<128x64xf32>
    %12 = tpu.matmul %11, %0, %cst_10 {dimension_numbers = #tpu.dot_dimension_numbers<[1], [0], [0], [1], [0, 0, 1, 1], [], []>} : vector<128x288xbf16>, vector<288x64xbf16>, vector<128x64xf32> -> vector<128x64xf32>
    %13 = vector.broadcast %1 : vector<1x64xf32> to vector<128x64xf32>
    %14 = arith.mulf %12, %13 : vector<128x64xf32>
    %15 = vector.broadcast %2 : vector<1x64xf32> to vector<128x64xf32>
    %16 = arith.addf %14, %15 : vector<128x64xf32>
    %cst_11 = arith.constant 0.000000e+00 : f32
    %17 = vector.broadcast %cst_11 : f32 to vector<128x64xf32>
    %18 = arith.maximumf %16, %17 : vector<128x64xf32>
    %19 = arith.maximumf %10, %18 : vector<128x64xf32>
    %c0_12 = arith.constant 0 : index
    %c0_13 = arith.constant 0 : index
    %20 = vector.load %arg3[%c0_12, %c0_13] : memref<128x288xbf16, #tpu.memory_space<vmem>>, vector<128x288xbf16>
    %cst_14 = arith.constant dense<0.000000e+00> : vector<128x64xf32>
    %21 = tpu.matmul %20, %0, %cst_14 {dimension_numbers = #tpu.dot_dimension_numbers<[1], [0], [0], [1], [0, 0, 1, 1], [], []>} : vector<128x288xbf16>, vector<288x64xbf16>, vector<128x64xf32> -> vector<128x64xf32>
    %22 = vector.broadcast %1 : vector<1x64xf32> to vector<128x64xf32>
    %23 = arith.mulf %21, %22 : vector<128x64xf32>
    %24 = vector.broadcast %2 : vector<1x64xf32> to vector<128x64xf32>
    %25 = arith.addf %23, %24 : vector<128x64xf32>
    %cst_15 = arith.constant 0.000000e+00 : f32
    %26 = vector.broadcast %cst_15 : f32 to vector<128x64xf32>
    %27 = arith.maximumf %25, %26 : vector<128x64xf32>
    %c0_16 = arith.constant 0 : index
    %c0_17 = arith.constant 0 : index
    %28 = vector.load %arg4[%c0_16, %c0_17] : memref<128x288xbf16, #tpu.memory_space<vmem>>, vector<128x288xbf16>
    %cst_18 = arith.constant dense<0.000000e+00> : vector<128x64xf32>
    %29 = tpu.matmul %28, %0, %cst_18 {dimension_numbers = #tpu.dot_dimension_numbers<[1], [0], [0], [1], [0, 0, 1, 1], [], []>} : vector<128x288xbf16>, vector<288x64xbf16>, vector<128x64xf32> -> vector<128x64xf32>
    %30 = vector.broadcast %1 : vector<1x64xf32> to vector<128x64xf32>
    %31 = arith.mulf %29, %30 : vector<128x64xf32>
    %32 = vector.broadcast %2 : vector<1x64xf32> to vector<128x64xf32>
    %33 = arith.addf %31, %32 : vector<128x64xf32>
    %cst_19 = arith.constant 0.000000e+00 : f32
    %34 = vector.broadcast %cst_19 : f32 to vector<128x64xf32>
    %35 = arith.maximumf %33, %34 : vector<128x64xf32>
    %36 = arith.maximumf %27, %35 : vector<128x64xf32>
    %37 = arith.maximumf %19, %36 : vector<128x64xf32>
    %38 = arith.truncf %37 : vector<128x64xf32> to vector<128x64xbf16>
    %c0_20 = arith.constant 0 : index
    %c0_21 = arith.constant 0 : index
    %39 = vector.load %arg8[%c0_20, %c0_21] : memref<128x64xbf16, #tpu.memory_space<vmem>>, vector<128x64xbf16>
    tpu.vector_store %arg8[%c0_20, %c0_21], %38 {strides = array<i32>} : memref<128x64xbf16, #tpu.memory_space<vmem>>, vector<128x64xbf16>,
    return
  }
  func.func @transform_0(%arg0: i32) -> (i32, i32) {
    %c0_i32 = arith.constant 0 : i32
    %c0_i32_0 = arith.constant 0 : i32
    return %arg0, %c0_i32 : i32, i32
  }
  func.func @transform_1(%arg0: i32) -> (i32, i32) {
    %c0_i32 = arith.constant 0 : i32
    %c0_i32_0 = arith.constant 0 : i32
    return %arg0, %c0_i32 : i32, i32
  }
  func.func @transform_2(%arg0: i32) -> (i32, i32) {
    %c0_i32 = arith.constant 0 : i32
    %c0_i32_0 = arith.constant 0 : i32
    return %arg0, %c0_i32 : i32, i32
  }
  func.func @transform_3(%arg0: i32) -> (i32, i32) {
    %c0_i32 = arith.constant 0 : i32
    %c0_i32_0 = arith.constant 0 : i32
    return %arg0, %c0_i32 : i32, i32
  }
  func.func @transform_4(%arg0: i32) -> (i32, i32) {
    %c0_i32 = arith.constant 0 : i32
    %c0_i32_0 = arith.constant 0 : i32
    %c0_i32_1 = arith.constant 0 : i32
    return %c0_i32, %c0_i32_0 : i32, i32
  }
  func.func @transform_5(%arg0: i32) -> (i32, i32) {
    %c0_i32 = arith.constant 0 : i32
    %c0_i32_0 = arith.constant 0 : i32
    %c0_i32_1 = arith.constant 0 : i32
    return %c0_i32, %c0_i32_0 : i32, i32
  }
  func.func @transform_6(%arg0: i32) -> (i32, i32) {
    %c0_i32 = arith.constant 0 : i32
    %c0_i32_0 = arith.constant 0 : i32
    %c0_i32_1 = arith.constant 0 : i32
    return %c0_i32, %c0_i32_0 : i32, i32
  }
  func.func @transform_7(%arg0: i32) -> (i32, i32) {
    %c0_i32 = arith.constant 0 : i32
    %c0_i32_0 = arith.constant 0 : i32
    return %arg0, %c0_i32 : i32, i32
  }
}

module attributes {stable_mosaic.version = 11 : i64} {
  func.func @_fc_fused_kernel(%arg0: i32, %arg1: memref<2x4096xbf16, #tpu.memory_space<vmem>>, %arg2: memref<4096x512xbf16, #tpu.memory_space<vmem>>, %arg3: memref<1x512xf32, #tpu.memory_space<vmem>>, %arg4: memref<512x10xbf16, #tpu.memory_space<vmem>>, %arg5: memref<1x10xf32, #tpu.memory_space<vmem>>, %arg6: memref<2x10xf32, #tpu.memory_space<vmem>>) attributes {dimension_semantics = [#tpu.dimension_semantics<parallel>], iteration_bounds = array<i64: 1>, scalar_prefetch = 0 : i64, scratch_operands = 0 : i64, tpu.core_type = #tpu.core_type<tc>, window_params = [{transform_indices = @transform_0, window_bounds = array<i64: 2, 4096>}, {pipeline_mode = #tpu.pipeline_mode<synchronous>, transform_indices = @transform_1, window_bounds = array<i64: 4096, 512>}, {pipeline_mode = #tpu.pipeline_mode<synchronous>, transform_indices = @transform_2, window_bounds = array<i64: 1, 512>}, {pipeline_mode = #tpu.pipeline_mode<synchronous>, transform_indices = @transform_3, window_bounds = array<i64: 512, 10>}, {pipeline_mode = #tpu.pipeline_mode<synchronous>, transform_indices = @transform_4, window_bounds = array<i64: 1, 10>}, {transform_indices = @transform_5, window_bounds = array<i64: 2, 10>}]} {
    %c0 = arith.constant 0 : index
    %c0_0 = arith.constant 0 : index
    %0 = vector.load %arg1[%c0, %c0_0] : memref<2x4096xbf16, #tpu.memory_space<vmem>>, vector<2x4096xbf16>
    %c0_1 = arith.constant 0 : index
    %c0_2 = arith.constant 0 : index
    %1 = vector.load %arg2[%c0_1, %c0_2] : memref<4096x512xbf16, #tpu.memory_space<vmem>>, vector<4096x512xbf16>
    %cst = arith.constant dense<0.000000e+00> : vector<2x512xf32>
    %2 = tpu.matmul %0, %1, %cst {dimension_numbers = #tpu.dot_dimension_numbers<[1], [0], [0], [1], [0, 0, 1, 1], [], []>} : vector<2x4096xbf16>, vector<4096x512xbf16>, vector<2x512xf32> -> vector<2x512xf32>
    %c0_3 = arith.constant 0 : index
    %c0_4 = arith.constant 0 : index
    %3 = vector.load %arg3[%c0_3, %c0_4] : memref<1x512xf32, #tpu.memory_space<vmem>>, vector<1x512xf32>
    %4 = vector.broadcast %3 : vector<1x512xf32> to vector<2x512xf32>
    %5 = arith.addf %2, %4 : vector<2x512xf32>
    %cst_5 = arith.constant 0.000000e+00 : f32
    %6 = vector.broadcast %cst_5 : f32 to vector<2x512xf32>
    %7 = arith.maximumf %5, %6 : vector<2x512xf32>
    %8 = arith.truncf %7 : vector<2x512xf32> to vector<2x512xbf16>
    %c0_6 = arith.constant 0 : index
    %c0_7 = arith.constant 0 : index
    %9 = vector.load %arg4[%c0_6, %c0_7] : memref<512x10xbf16, #tpu.memory_space<vmem>>, vector<512x10xbf16>
    %cst_8 = arith.constant dense<0.000000e+00> : vector<2x10xf32>
    %10 = tpu.matmul %8, %9, %cst_8 {dimension_numbers = #tpu.dot_dimension_numbers<[1], [0], [0], [1], [0, 0, 1, 1], [], []>} : vector<2x512xbf16>, vector<512x10xbf16>, vector<2x10xf32> -> vector<2x10xf32>
    %c0_9 = arith.constant 0 : index
    %c0_10 = arith.constant 0 : index
    %11 = vector.load %arg5[%c0_9, %c0_10] : memref<1x10xf32, #tpu.memory_space<vmem>>, vector<1x10xf32>
    %12 = vector.broadcast %11 : vector<1x10xf32> to vector<2x10xf32>
    %13 = arith.addf %10, %12 : vector<2x10xf32>
    %c0_11 = arith.constant 0 : index
    %c0_12 = arith.constant 0 : index
    %14 = vector.load %arg6[%c0_11, %c0_12] : memref<2x10xf32, #tpu.memory_space<vmem>>, vector<2x10xf32>
    tpu.vector_store %arg6[%c0_11, %c0_12], %13 {strides = array<i32>} : memref<2x10xf32, #tpu.memory_space<vmem>>, vector<2x10xf32>,
    return
  }
  func.func @transform_0(%arg0: i32) -> (i32, i32) {
    %c0_i32 = arith.constant 0 : i32
    %c0_i32_0 = arith.constant 0 : i32
    return %arg0, %c0_i32 : i32, i32
  }
  func.func @transform_1(%arg0: i32) -> (i32, i32) {
    %c0_i32 = arith.constant 0 : i32
    %c0_i32_0 = arith.constant 0 : i32
    %c0_i32_1 = arith.constant 0 : i32
    return %c0_i32, %c0_i32_0 : i32, i32
  }
  func.func @transform_2(%arg0: i32) -> (i32, i32) {
    %c0_i32 = arith.constant 0 : i32
    %c0_i32_0 = arith.constant 0 : i32
    %c0_i32_1 = arith.constant 0 : i32
    return %c0_i32, %c0_i32_0 : i32, i32
  }
  func.func @transform_3(%arg0: i32) -> (i32, i32) {
    %c0_i32 = arith.constant 0 : i32
    %c0_i32_0 = arith.constant 0 : i32
    %c0_i32_1 = arith.constant 0 : i32
    return %c0_i32, %c0_i32_0 : i32, i32
  }
  func.func @transform_4(%arg0: i32) -> (i32, i32) {
    %c0_i32 = arith.constant 0 : i32
    %c0_i32_0 = arith.constant 0 : i32
    %c0_i32_1 = arith.constant 0 : i32
    return %c0_i32, %c0_i32_0 : i32, i32
  }
  func.func @transform_5(%arg0: i32) -> (i32, i32) {
    %c0_i32 = arith.constant 0 : i32
    %c0_i32_0 = arith.constant 0 : i32
    return %arg0, %c0_i32 : i32, i32
  }
}

</mosaic_0001>

<bundles_post_ra>
// kernel: cnn10_forward.3
= control target key start
LH: loop header
LB: loop body
LE: loop exit
PB: predicated region body
PF: predicated region fallthrough
CT: control target
= control target key end

     0   :  { %s2478_s24 = smov 0   ;;  %s2995_s0 = inlined_call_operand.vmem [shape: bf16[512,32], index: 0, kind: input, shape index: {}]   ;;  %s2996_s1 = inlined_call_operand.vmem [shape: bf16[512,32], index: 1, kind: input, shape index: {}]   ;;  %s2997_s2 = inlined_call_operand.vmem [shape: bf16[512,32], index: 2, kind: input, shape index: {}]   ;;  %s2998_s3 = inlined_call_operand.vmem [shape: bf16[512,32], index: 3, kind: input, shape index: {}]   ;;  %s2999_s4 = inlined_call_operand.vmem [shape: bf16[32,32], index: 4, kind: input, shape index: {}]   ;;  %s3000_s5 = inlined_call_operand.vmem [shape: f32[1,32], index: 5, kind: input, shape index: {}]   ;;  %s3001_s6 = inlined_call_operand.vmem [shape: f32[1,32], index: 6, kind: input, shape index: {}]   ;;  %s3002_s7 = inlined_call_operand.vmem [shape: bf16[512,32], index: 7, kind: output, shape index: {}]  }
   0x1 LB: > { %s2007_s25 = sadd.s32 4294967295, %s2436_s24   ;;  %p2011_p0 = scmp.ge.s32.totalorder %s2436_s24, 1  ;;  %s2436_s24 = sphi %s2478_s24, %s17_s24  }
   0x2   : > { %p271_p1 = scmp.lt.s32.totalorder %s2436_s24, 3 }
   0x4   : > { %p272_p2 = pnand %p2011_p0, %p271_p1 }
   0x5   : > { %s2012_s28 = sshll.u32 (!%p272_p2), %s2007_s25, 5 }
   0x6   : > { %275 = sbr.rel (%p272_p2) target bundleno = 413 (0x19d), region = 48  ;;  %p319_p3 = scmp.lt.s32.totalorder (!%p272_p2), %s2012_s28, 63 }
   0xb   : > { %v2353_v0 = vld [vmem:[%s2999_s4 + $0x8] sm:$0xff]  ;;  %v2352_v1 = vld [vmem:[%s2999_s4] sm:$0xff]  ;;  %s3004_s28 = smov (!%p319_p3, %s2012_s28), 63  ;;  %vm479_vm0 = vcmask 261120   ;;  %vm1882_vm1 = vcmask 257024  }
   0xc   : > { %534 = vmatpush.bf16.msra.mxu0 %v2353_v0  ;;  %885 = vmatpush.bf16.msra.mxu1 %v2353_v0  ;;  %s2492_s8 = sshll.u32 %s3004_s28, 2  ;;  %v2585_v34 = vld [vmem:[%s3000_s5] ss:$0 sm:$0xff] }
   0xd   : > { %1262 = vmatpush.bf16.msra.mxu2 %v2353_v0  ;;  %1607 = vmatpush.bf16.msra.mxu3 %v2353_v0  ;;  %s2498_s11 = scalar_lea.vmem %s2995_s0, %s2492_s8  ;;  %s2504_s14 = scalar_lea.vmem %s2996_s1, %s2492_s8  ;;  %v2592_v38 = vld [vmem:[%s3001_s6] ss:$0 sm:$0xff] }
   0xe   : > { %v2354_v2 = vld [vmem:[%s2498_s11] sm:$0xff]  ;;  %s2512_s17 = scalar_lea.vmem %s2997_s2, %s2492_s8  ;;  %s2518_s20 = scalar_lea.vmem %s2998_s3, %s2492_s8  ;;  %v2355_v6 = vld [vmem:[%s2498_s11 + $0x8] sm:$0xff]  ;;  %v2356_v10 = vld [vmem:[%s2498_s11 + $0x10] sm:$0xff] }
   0xf   : > { %v2370_v3 = vld [vmem:[%s2504_s14] sm:$0xff]  ;;  %v2371_v7 = vld [vmem:[%s2504_s14 + $0x8] sm:$0xff]  ;;  %v2372_v11 = vld [vmem:[%s2504_s14 + $0x10] sm:$0xff]  ;;  %s2622_s28 = scalar_lea.vmem %s3002_s7, %s2492_s8 }
  0x10   : > { %535 = vmatpush.bf16.msra.mxu0 %v2352_v1  ;;  %886 = vmatpush.bf16.msra.mxu1 %v2352_v1  ;;  %v2386_v4 = vld [vmem:[%s2512_s17] sm:$0xff]  ;;  %v2387_v8 = vld [vmem:[%s2512_s17 + $0x8] sm:$0xff]  ;;  %v2388_v12 = vld [vmem:[%s2512_s17 + $0x10] sm:$0xff] }
  0x11   : > { %1263 = vmatpush.bf16.msra.mxu2 %v2352_v1  ;;  %1608 = vmatpush.bf16.msra.mxu3 %v2352_v1  ;;  %v2402_v5 = vld [vmem:[%s2518_s20] sm:$0xff]  ;;  %v2403_v9 = vld [vmem:[%s2518_s20 + $0x8] sm:$0xff]  ;;  %v2404_v13 = vld [vmem:[%s2518_s20 + $0x10] sm:$0xff] }
  0x12   : > { %v2357_v14 = vld [vmem:[%s2498_s11 + $0x18] sm:$0xff]  ;;  %v2358_v18 = vld [vmem:[%s2498_s11 + $0x20] sm:$0xff]  ;;  %v2359_v22 = vld [vmem:[%s2498_s11 + $0x28] sm:$0xff] }
  0x13   : > { %2094 = vmatmul.msk.bf16.vlgmr.msra.gmra.mxu0 %vm479_vm0, %v2354_v2  ;;  %2174 = vmatmul.msk.bf16.vlgmr.msra.gmra.mxu1 %vm479_vm0, %v2370_v3  ;;  %v2373_v15 = vld [vmem:[%s2504_s14 + $0x18] sm:$0xff]  ;;  %v2374_v19 = vld [vmem:[%s2504_s14 + $0x20] sm:$0xff]  ;;  %v2375_v23 = vld [vmem:[%s2504_s14 + $0x28] sm:$0xff] }
  0x14   : > { %2254 = vmatmul.msk.bf16.vlgmr.msra.gmra.mxu2 %vm479_vm0, %v2386_v4  ;;  %2334 = vmatmul.msk.bf16.vlgmr.msra.gmra.mxu3 %vm479_vm0, %v2402_v5  ;;  %v2389_v16 = vld [vmem:[%s2512_s17 + $0x18] sm:$0xff]  ;;  %v2390_v20 = vld [vmem:[%s2512_s17 + $0x20] sm:$0xff]  ;;  %v2391_v24 = vld [vmem:[%s2512_s17 + $0x28] sm:$0xff] }
  0x15   : > { %v2405_v17 = vld [vmem:[%s2518_s20 + $0x18] sm:$0xff]  ;;  %v2406_v21 = vld [vmem:[%s2518_s20 + $0x20] sm:$0xff]  ;;  %v2407_v25 = vld [vmem:[%s2518_s20 + $0x28] sm:$0xff] }
  0x16   : > { %v2360_v26 = vld [vmem:[%s2498_s11 + $0x30] sm:$0xff]  ;;  %v2361_v30 = vld [vmem:[%s2498_s11 + $0x38] sm:$0xff]  ;;  %v2362_v35 = vld [vmem:[%s2498_s11 + $0x40] sm:$0xff] }
  0x17   : > { %v2376_v27 = vld [vmem:[%s2504_s14 + $0x30] sm:$0xff]  ;;  %v2377_v31 = vld [vmem:[%s2504_s14 + $0x38] sm:$0xff]  ;;  %v2378_v36 = vld [vmem:[%s2504_s14 + $0x40] sm:$0xff] }
  0x18   : > { %v2392_v28 = vld [vmem:[%s2512_s17 + $0x30] sm:$0xff]  ;;  %v2393_v32 = vld [vmem:[%s2512_s17 + $0x38] sm:$0xff]  ;;  %v2394_v40 = vld [vmem:[%s2512_s17 + $0x40] sm:$0xff] }
  0x19   : > { %v2408_v29 = vld [vmem:[%s2518_s20 + $0x30] sm:$0xff]  ;;  %v2409_v33 = vld [vmem:[%s2518_s20 + $0x38] sm:$0xff]  ;;  %v2410_v41 = vld [vmem:[%s2518_s20 + $0x40] sm:$0xff] }
  0x1a   : > { %v2363_v2 = vld [vmem:[%s2498_s11 + $0x48] sm:$0xff] }
  0x1b   : > { %v2379_v3 = vld [vmem:[%s2504_s14 + $0x48] sm:$0xff] }
  0x23   : > { %2095 = vmatmul.msk.bf16.gmra.mxu0 %vm479_vm0, %v2355_v6  ;;  %2175 = vmatmul.msk.bf16.gmra.mxu1 %vm479_vm0, %v2371_v7 }
  0x24   : > { %2255 = vmatmul.msk.bf16.gmra.mxu2 %vm479_vm0, %v2387_v8  ;;  %2335 = vmatmul.msk.bf16.gmra.mxu3 %vm479_vm0, %v2403_v9  ;;  %v2395_v9 = vld [vmem:[%s2512_s17 + $0x48] sm:$0xff] }
  0x33   : > { %2096 = vmatmul.msk.bf16.gmra.mxu0 %vm479_vm0, %v2356_v10  ;;  %2176 = vmatmul.msk.bf16.gmra.mxu1 %vm479_vm0, %v2372_v11  ;;  %v2411_v10 = vld [vmem:[%s2518_s20 + $0x48] sm:$0xff] }
  0x34   : > { %2256 = vmatmul.msk.bf16.gmra.mxu2 %vm479_vm0, %v2388_v12  ;;  %2336 = vmatmul.msk.bf16.gmra.mxu3 %vm479_vm0, %v2404_v13 }
  0x43   : > { %2097 = vmatmul.msk.bf16.gmra.mxu0 %vm479_vm0, %v2357_v14  ;;  %2177 = vmatmul.msk.bf16.gmra.mxu1 %vm479_vm0, %v2373_v15 }
  0x44   : > { %2257 = vmatmul.msk.bf16.gmra.mxu2 %vm479_vm0, %v2389_v16  ;;  %2337 = vmatmul.msk.bf16.gmra.mxu3 %vm479_vm0, %v2405_v17 }
  0x53   : > { %2098 = vmatmul.msk.bf16.gmra.mxu0 %vm479_vm0, %v2358_v18  ;;  %2178 = vmatmul.msk.bf16.gmra.mxu1 %vm479_vm0, %v2374_v19 }
  0x54   : > { %2258 = vmatmul.msk.bf16.gmra.mxu2 %vm479_vm0, %v2390_v20  ;;  %2338 = vmatmul.msk.bf16.gmra.mxu3 %vm479_vm0, %v2406_v21 }
  0x63   : > { %2099 = vmatmul.msk.bf16.gmra.mxu0 %vm479_vm0, %v2359_v22  ;;  %2179 = vmatmul.msk.bf16.gmra.mxu1 %vm479_vm0, %v2375_v23 }
  0x64   : > { %2259 = vmatmul.msk.bf16.gmra.mxu2 %vm479_vm0, %v2391_v24  ;;  %2339 = vmatmul.msk.bf16.gmra.mxu3 %vm479_vm0, %v2407_v25 }
  0x73   : > { %2100 = vmatmul.msk.bf16.gmra.mxu0 %vm479_vm0, %v2360_v26  ;;  %2180 = vmatmul.msk.bf16.gmra.mxu1 %vm479_vm0, %v2376_v27 }
  0x74   : > { %2260 = vmatmul.msk.bf16.gmra.mxu2 %vm479_vm0, %v2392_v28  ;;  %2340 = vmatmul.msk.bf16.gmra.mxu3 %vm479_vm0, %v2408_v29 }
  0x83   : > { %2101 = vmatmul.msk.bf16.gmra.mxu0 %vm479_vm0, %v2361_v30  ;;  %2181 = vmatmul.msk.bf16.gmra.mxu1 %vm479_vm0, %v2377_v31 }
  0x84   : > { %2261 = vmatmul.msk.bf16.gmra.mxu2 %vm479_vm0, %v2393_v32  ;;  %2341 = vmatmul.msk.bf16.gmra.mxu3 %vm479_vm0, %v2409_v33 }
  0x90   : > { %v537_v37 = vpop.f32.mrf.mxu0  ;;  %v888_v39 = vpop.f32.mrf.mxu1 }
  0x91   : > { %v620_v42 = vmul.f32 %v2585_v34, %v537_v37  ;;  %v968_v43 = vmul.f32 %v2585_v34, %v888_v39 }
  0x93   : > { %2102 = vmatmul.msk.bf16.gmra.mxu0 %vm479_vm0, %v2362_v35  ;;  %2182 = vmatmul.msk.bf16.gmra.mxu1 %vm479_vm0, %v2378_v36  ;;  %v655_v44 = vadd.f32 %v2592_v38, %v620_v42  ;;  %v1000_v45 = vadd.f32 %v2592_v38, %v968_v43 }
  0x94   : > { %2262 = vmatmul.msk.bf16.gmra.mxu2 %vm479_vm0, %v2394_v40  ;;  %2342 = vmatmul.msk.bf16.gmra.mxu3 %vm479_vm0, %v2410_v41 }
  0x95   : > { %v687_v48 = vmax.f32 %v655_v44, 0.0  ;;  %v1032_v49 = vmax.f32 %v1000_v45, 0.0 }
  0x97   : > { %v1265_v46 = vpop.f32.mrf.mxu2  ;;  %v1610_v47 = vpop.f32.mrf.mxu3  ;;  %v1064_v58 = vmax.f32 %v687_v48, %v1032_v49  ;;  %v2364_v48 = vld [vmem:[%s2498_s11 + $0x50] sm:$0xff] }
  0x98   : > { %v1345_v50 = vmul.f32 %v2585_v34, %v1265_v46  ;;  %v1690_v51 = vmul.f32 %v2585_v34, %v1610_v47  ;;  %v539_v52 = vpop.f32.mrf.mxu0  ;;  %v890_v53 = vpop.f32.mrf.mxu1  ;;  %v2380_v49 = vld [vmem:[%s2504_s14 + $0x50] sm:$0xff] }
  0x99   : > { %v621_v54 = vmul.f32 %v2585_v34, %v539_v52  ;;  %v969_v57 = vmul.f32 %v2585_v34, %v890_v53 }
  0x9a   : > { %v1377_v55 = vadd.f32 %v2592_v38, %v1345_v50  ;;  %v1722_v56 = vadd.f32 %v2592_v38, %v1690_v51 }
  0x9b   : > { %v656_v61 = vadd.f32 %v2592_v38, %v621_v54  ;;  %v1001_v63 = vadd.f32 %v2592_v38, %v969_v57 }
  0x9c   : > { %v1409_v59 = vmax.f32 %v1377_v55, 0.0  ;;  %v1754_v60 = vmax.f32 %v1722_v56, 0.0  ;;  %v2396_v55 = vld [vmem:[%s2512_s17 + $0x50] sm:$0xff] }
  0x9d   : > { %v688_v11 = vmax.f32 %v656_v61, 0.0  ;;  %v1033_v15 = vmax.f32 %v1001_v63, 0.0  ;;  %v2412_v56 = vld [vmem:[%s2518_s20 + $0x50] sm:$0xff] }
  0x9e   : > { %v1786_v62 = vmax.f32 %v1409_v59, %v1754_v60 }
  0x9f   : > { %v1267_v0 = vpop.f32.mrf.mxu2  ;;  %v1612_v1 = vpop.f32.mrf.mxu3  ;;  %v1065_v22 = vmax.f32 %v688_v11, %v1033_v15 }
  0xa0   : > { %v1818_v4 = vmax.f32 %v1064_v58, %v1786_v62  ;;  %v1346_v5 = vmul.f32 %v2585_v34, %v1267_v0  ;;  %v1691_v6 = vmul.f32 %v2585_v34, %v1612_v1  ;;  %v542_v7 = vpop.f32.mrf.mxu0  ;;  %v893_v8 = vpop.f32.mrf.mxu1 }
  0xa1   : > { %v622_v12 = vmul.f32 %v2585_v34, %v542_v7  ;;  %v970_v13 = vmul.f32 %v2585_v34, %v893_v8 }
  0xa2   : > { %v1850_v14 = vpack.c.bf16 %v1818_v4, %v1818_v4  ;;  %v1378_v16 = vadd.f32 %v2592_v38, %v1346_v5  ;;  %v1723_v17 = vadd.f32 %v2592_v38, %v1691_v6 }
  0xa3   : > { %v657_v18 = vadd.f32 %v2592_v38, %v622_v12  ;;  %2103 = vmatmul.msk.bf16.gmra.mxu0 %vm479_vm0, %v2363_v2  ;;  %2183 = vmatmul.msk.bf16.gmra.mxu1 %vm479_vm0, %v2379_v3  ;;  %v1002_v21 = vadd.f32 %v2592_v38, %v970_v13 }
  0xa4   : > { %1883 = vst.msk [vmem:[%s2622_s28] sm:$0xf] %vm1882_vm1, %v1850_v14  ;;  %v1410_v19 = vmax.f32 %v1378_v16, 0.0  ;;  %v1755_v20 = vmax.f32 %v1723_v17, 0.0  ;;  %2263 = vmatmul.msk.bf16.gmra.mxu2 %vm479_vm0, %v2395_v9  ;;  %2343 = vmatmul.msk.bf16.gmra.mxu3 %vm479_vm0, %v2411_v10 }
  0xa5   : > { %v689_v24 = vmax.f32 %v657_v18, 0.0  ;;  %v1034_v28 = vmax.f32 %v1002_v21, 0.0 }
  0xa6   : > { %v1787_v23 = vmax.f32 %v1410_v19, %v1755_v20 }
  0xa7   : > { %v1270_v25 = vpop.f32.mrf.mxu2  ;;  %v1615_v26 = vpop.f32.mrf.mxu3  ;;  %v1066_v40 = vmax.f32 %v689_v24, %v1034_v28  ;;  %v2365_v28 = vld [vmem:[%s2498_s11 + $0x58] sm:$0xff] }
  0xa8   : > { %v1819_v27 = vmax.f32 %v1065_v22, %v1787_v23  ;;  %v1347_v29 = vmul.f32 %v2585_v34, %v1270_v25  ;;  %v1692_v30 = vmul.f32 %v2585_v34, %v1615_v26  ;;  %v544_v31 = vpop.f32.mrf.mxu0  ;;  %v895_v32 = vpop.f32.mrf.mxu1 }
  0xa9   : > { %v623_v33 = vmul.f32 %v2585_v34, %v544_v31  ;;  %v971_v39 = vmul.f32 %v2585_v34, %v895_v32 }
  0xaa   : > { %v1851_v35 = vpack.c.bf16 %v1819_v27, %v1819_v27  ;;  %v1379_v36 = vadd.f32 %v2592_v38, %v1347_v29  ;;  %v1724_v37 = vadd.f32 %v2592_v38, %v1692_v30  ;;  %v2381_v29 = vld [vmem:[%s2504_s14 + $0x58] sm:$0xff] }
  0xab   : > { %v658_v43 = vadd.f32 %v2592_v38, %v623_v33  ;;  %v1003_v45 = vadd.f32 %v2592_v38, %v971_v39 }
  0xac   : > { %1884 = vst.msk [vmem:[%s2622_s28 + $0x4] sm:$0xf] %vm1882_vm1, %v1851_v35  ;;  %v1411_v41 = vmax.f32 %v1379_v36, 0.0  ;;  %v1756_v42 = vmax.f32 %v1724_v37, 0.0  ;;  %v2397_v36 = vld [vmem:[%s2512_s17 + $0x58] sm:$0xff] }
  0xad   : > { %v690_v57 = vmax.f32 %v658_v43, 0.0  ;;  %v1035_v61 = vmax.f32 %v1003_v45, 0.0  ;;  %v2413_v37 = vld [vmem:[%s2518_s20 + $0x58] sm:$0xff] }
  0xae   : > { %v1788_v44 = vmax.f32 %v1411_v41, %v1756_v42 }
  0xaf   : > { %v1272_v46 = vpop.f32.mrf.mxu2  ;;  %v1617_v47 = vpop.f32.mrf.mxu3  ;;  %v1067_v4 = vmax.f32 %v690_v57, %v1035_v61 }
  0xb0   : > { %v1820_v50 = vmax.f32 %v1066_v40, %v1788_v44  ;;  %v1348_v51 = vmul.f32 %v2585_v34, %v1272_v46  ;;  %v1693_v52 = vmul.f32 %v2585_v34, %v1617_v47  ;;  %v547_v53 = vpop.f32.mrf.mxu0  ;;  %v898_v54 = vpop.f32.mrf.mxu1 }
  0xb1   : > { %v624_v58 = vmul.f32 %v2585_v34, %v547_v53  ;;  %v972_v59 = vmul.f32 %v2585_v34, %v898_v54 }
  0xb2   : > { %v1852_v60 = vpack.c.bf16 %v1820_v50, %v1820_v50  ;;  %v1380_v62 = vadd.f32 %v2592_v38, %v1348_v51  ;;  %v1725_v63 = vadd.f32 %v2592_v38, %v1693_v52 }
  0xb3   : > { %v659_v0 = vadd.f32 %v2592_v38, %v624_v58  ;;  %2104 = vmatmul.msk.bf16.gmra.mxu0 %vm479_vm0, %v2364_v48  ;;  %2184 = vmatmul.msk.bf16.gmra.mxu1 %vm479_vm0, %v2380_v49  ;;  %v1004_v3 = vadd.f32 %v2592_v38, %v972_v59 }
  0xb4   : > { %1885 = vst.msk [vmem:[%s2622_s28 + $0x8] sm:$0xf] %vm1882_vm1, %v1852_v60  ;;  %v1412_v1 = vmax.f32 %v1380_v62, 0.0  ;;  %v1757_v2 = vmax.f32 %v1725_v63, 0.0  ;;  %2264 = vmatmul.msk.bf16.gmra.mxu2 %vm479_vm0, %v2396_v55  ;;  %2344 = vmatmul.msk.bf16.gmra.mxu3 %vm479_vm0, %v2412_v56 }
  0xb5   : > { %v691_v6 = vmax.f32 %v659_v0, 0.0  ;;  %v1036_v10 = vmax.f32 %v1004_v3, 0.0 }
  0xb6   : > { %v1789_v5 = vmax.f32 %v1412_v1, %v1757_v2 }
  0xb7   : > { %v1275_v7 = vpop.f32.mrf.mxu2  ;;  %v1620_v8 = vpop.f32.mrf.mxu3  ;;  %v1068_v20 = vmax.f32 %v691_v6, %v1036_v10  ;;  %v2366_v10 = vld [vmem:[%s2498_s11 + $0x60] sm:$0xff] }
  0xb8   : > { %v1821_v9 = vmax.f32 %v1067_v4, %v1789_v5  ;;  %v1349_v11 = vmul.f32 %v2585_v34, %v1275_v7  ;;  %v1694_v12 = vmul.f32 %v2585_v34, %v1620_v8  ;;  %v549_v13 = vpop.f32.mrf.mxu0  ;;  %v900_v14 = vpop.f32.mrf.mxu1 }
  0xb9   : > { %v625_v15 = vmul.f32 %v2585_v34, %v549_v13  ;;  %v973_v19 = vmul.f32 %v2585_v34, %v900_v14 }
  0xba   : > { %v1853_v16 = vpack.c.bf16 %v1821_v9, %v1821_v9  ;;  %v1381_v17 = vadd.f32 %v2592_v38, %v1349_v11  ;;  %v1726_v18 = vadd.f32 %v2592_v38, %v1694_v12  ;;  %v2382_v11 = vld [vmem:[%s2504_s14 + $0x60] sm:$0xff] }
  0xbb   : > { %v660_v23 = vadd.f32 %v2592_v38, %v625_v15  ;;  %v1005_v25 = vadd.f32 %v2592_v38, %v973_v19 }
  0xbc   : > { %1886 = vst.msk [vmem:[%s2622_s28 + $0xc] sm:$0xf] %vm1882_vm1, %v1853_v16  ;;  %v1413_v21 = vmax.f32 %v1381_v17, 0.0  ;;  %v1758_v22 = vmax.f32 %v1726_v18, 0.0  ;;  %v2398_v17 = vld [vmem:[%s2512_s17 + $0x60] sm:$0xff] }
  0xbd   : > { %v692_v39 = vmax.f32 %v660_v23, 0.0  ;;  %v1037_v43 = vmax.f32 %v1005_v25, 0.0  ;;  %v2414_v18 = vld [vmem:[%s2518_s20 + $0x60] sm:$0xff] }
  0xbe   : > { %v1790_v24 = vmax.f32 %v1413_v21, %v1758_v22 }
  0xbf   : > { %v1277_v26 = vpop.f32.mrf.mxu2  ;;  %v1622_v27 = vpop.f32.mrf.mxu3  ;;  %v1069_v50 = vmax.f32 %v692_v39, %v1037_v43 }
  0xc0   : > { %v1822_v30 = vmax.f32 %v1068_v20, %v1790_v24  ;;  %v1350_v31 = vmul.f32 %v2585_v34, %v1277_v26  ;;  %v1695_v32 = vmul.f32 %v2585_v34, %v1622_v27  ;;  %v552_v33 = vpop.f32.mrf.mxu0  ;;  %v903_v35 = vpop.f32.mrf.mxu1 }
  0xc1   : > { %v626_v40 = vmul.f32 %v2585_v34, %v552_v33  ;;  %v974_v41 = vmul.f32 %v2585_v34, %v903_v35 }
  0xc2   : > { %v1854_v42 = vpack.c.bf16 %v1822_v30, %v1822_v30  ;;  %v1382_v44 = vadd.f32 %v2592_v38, %v1350_v31  ;;  %v1727_v45 = vadd.f32 %v2592_v38, %v1695_v32 }
  0xc3   : > { %v661_v46 = vadd.f32 %v2592_v38, %v626_v40  ;;  %2105 = vmatmul.msk.bf16.gmra.mxu0 %vm479_vm0, %v2365_v28  ;;  %2185 = vmatmul.msk.bf16.gmra.mxu1 %vm479_vm0, %v2381_v29  ;;  %v1006_v49 = vadd.f32 %v2592_v38, %v974_v41 }
  0xc4   : > { %1887 = vst.msk [vmem:[%s2622_s28 + $0x10] sm:$0xf] %vm1882_vm1, %v1854_v42  ;;  %v1414_v47 = vmax.f32 %v1382_v44, 0.0  ;;  %v1759_v48 = vmax.f32 %v1727_v45, 0.0  ;;  %2265 = vmatmul.msk.bf16.gmra.mxu2 %vm479_vm0, %v2397_v36  ;;  %2345 = vmatmul.msk.bf16.gmra.mxu3 %vm479_vm0, %v2413_v37 }
  0xc5   : > { %v693_v52 = vmax.f32 %v661_v46, 0.0  ;;  %v1038_v56 = vmax.f32 %v1006_v49, 0.0 }
  0xc6   : > { %v1791_v51 = vmax.f32 %v1414_v47, %v1759_v48 }
  0xc7   : > { %v1280_v53 = vpop.f32.mrf.mxu2  ;;  %v1625_v54 = vpop.f32.mrf.mxu3  ;;  %v1070_v2 = vmax.f32 %v693_v52, %v1038_v56  ;;  %v2367_v56 = vld [vmem:[%s2498_s11 + $0x68] sm:$0xff] }
  0xc8   : > { %v1823_v55 = vmax.f32 %v1069_v50, %v1791_v51  ;;  %v1351_v57 = vmul.f32 %v2585_v34, %v1280_v53  ;;  %v1696_v58 = vmul.f32 %v2585_v34, %v1625_v54  ;;  %v554_v59 = vpop.f32.mrf.mxu0  ;;  %v905_v60 = vpop.f32.mrf.mxu1 }
  0xc9   : > { %v627_v61 = vmul.f32 %v2585_v34, %v554_v59  ;;  %v975_v1 = vmul.f32 %v2585_v34, %v905_v60 }
  0xca   : > { %v1855_v62 = vpack.c.bf16 %v1823_v55, %v1823_v55  ;;  %v1383_v63 = vadd.f32 %v2592_v38, %v1351_v57  ;;  %v1728_v0 = vadd.f32 %v2592_v38, %v1696_v58  ;;  %v2383_v57 = vld [vmem:[%s2504_s14 + $0x68] sm:$0xff] }
  0xcb   : > { %v662_v5 = vadd.f32 %v2592_v38, %v627_v61  ;;  %v1007_v7 = vadd.f32 %v2592_v38, %v975_v1 }
  0xcc   : > { %1888 = vst.msk [vmem:[%s2622_s28 + $0x14] sm:$0xf] %vm1882_vm1, %v1855_v62  ;;  %v1415_v3 = vmax.f32 %v1383_v63, 0.0  ;;  %v1760_v4 = vmax.f32 %v1728_v0, 0.0  ;;  %v2399_v63 = vld [vmem:[%s2512_s17 + $0x68] sm:$0xff] }
  0xcd   : > { %v694_v19 = vmax.f32 %v662_v5, 0.0  ;;  %v1039_v23 = vmax.f32 %v1007_v7, 0.0  ;;  %v2415_v0 = vld [vmem:[%s2518_s20 + $0x68] sm:$0xff] }
  0xce   : > { %v1792_v6 = vmax.f32 %v1415_v3, %v1760_v4 }
  0xcf   : > { %v1282_v8 = vpop.f32.mrf.mxu2  ;;  %v1627_v9 = vpop.f32.mrf.mxu3  ;;  %v1071_v30 = vmax.f32 %v694_v19, %v1039_v23 }
  0xd0   : > { %v1824_v12 = vmax.f32 %v1070_v2, %v1792_v6  ;;  %v1352_v13 = vmul.f32 %v2585_v34, %v1282_v8  ;;  %v1697_v14 = vmul.f32 %v2585_v34, %v1627_v9  ;;  %v557_v15 = vpop.f32.mrf.mxu0  ;;  %v908_v16 = vpop.f32.mrf.mxu1 }
  0xd1   : > { %v628_v20 = vmul.f32 %v2585_v34, %v557_v15  ;;  %v976_v21 = vmul.f32 %v2585_v34, %v908_v16 }
  0xd2   : > { %v1856_v22 = vpack.c.bf16 %v1824_v12, %v1824_v12  ;;  %v1384_v24 = vadd.f32 %v2592_v38, %v1352_v13  ;;  %v1729_v25 = vadd.f32 %v2592_v38, %v1697_v14 }
  0xd3   : > { %v663_v26 = vadd.f32 %v2592_v38, %v628_v20  ;;  %2106 = vmatmul.msk.bf16.gmra.mxu0 %vm479_vm0, %v2366_v10  ;;  %2186 = vmatmul.msk.bf16.gmra.mxu1 %vm479_vm0, %v2382_v11  ;;  %v1008_v29 = vadd.f32 %v2592_v38, %v976_v21 }
  0xd4   : > { %1889 = vst.msk [vmem:[%s2622_s28 + $0x18] sm:$0xf] %vm1882_vm1, %v1856_v22  ;;  %v1416_v27 = vmax.f32 %v1384_v24, 0.0  ;;  %v1761_v28 = vmax.f32 %v1729_v25, 0.0  ;;  %2266 = vmatmul.msk.bf16.gmra.mxu2 %vm479_vm0, %v2398_v17  ;;  %2346 = vmatmul.msk.bf16.gmra.mxu3 %vm479_vm0, %v2414_v18 }
  0xd5   : > { %v695_v32 = vmax.f32 %v663_v26, 0.0  ;;  %v1040_v37 = vmax.f32 %v1008_v29, 0.0 }
  0xd6   : > { %v1793_v31 = vmax.f32 %v1416_v27, %v1761_v28 }
  0xd7   : > { %v1285_v33 = vpop.f32.mrf.mxu2  ;;  %v1630_v35 = vpop.f32.mrf.mxu3  ;;  %v1072_v48 = vmax.f32 %v695_v32, %v1040_v37  ;;  %v2368_v37 = vld [vmem:[%s2498_s11 + $0x70] sm:$0xff] }
  0xd8   : > { %v1825_v36 = vmax.f32 %v1071_v30, %v1793_v31  ;;  %v1353_v39 = vmul.f32 %v2585_v34, %v1285_v33  ;;  %v1698_v40 = vmul.f32 %v2585_v34, %v1630_v35  ;;  %v559_v41 = vpop.f32.mrf.mxu0  ;;  %v910_v42 = vpop.f32.mrf.mxu1 }
  0xd9   : > { %v629_v43 = vmul.f32 %v2585_v34, %v559_v41  ;;  %v977_v47 = vmul.f32 %v2585_v34, %v910_v42 }
  0xda   : > { %v1857_v44 = vpack.c.bf16 %v1825_v36, %v1825_v36  ;;  %v1385_v45 = vadd.f32 %v2592_v38, %v1353_v39  ;;  %v1730_v46 = vadd.f32 %v2592_v38, %v1698_v40  ;;  %v2384_v39 = vld [vmem:[%s2504_s14 + $0x70] sm:$0xff] }
  0xdb   : > { %v664_v51 = vadd.f32 %v2592_v38, %v629_v43  ;;  %v1009_v53 = vadd.f32 %v2592_v38, %v977_v47 }
  0xdc   : > { %1890 = vst.msk [vmem:[%s2622_s28 + $0x1c] sm:$0xf] %vm1882_vm1, %v1857_v44  ;;  %v1417_v49 = vmax.f32 %v1385_v45, 0.0  ;;  %v1762_v50 = vmax.f32 %v1730_v46, 0.0  ;;  %v2400_v45 = vld [vmem:[%s2512_s17 + $0x70] sm:$0xff] }
  0xdd   : > { %v696_v1 = vmax.f32 %v664_v51, 0.0  ;;  %v1041_v5 = vmax.f32 %v1009_v53, 0.0  ;;  %v2416_v46 = vld [vmem:[%s2518_s20 + $0x70] sm:$0xff] }
  0xde   : > { %v1794_v52 = vmax.f32 %v1417_v49, %v1762_v50 }
  0xdf   : > { %v1287_v54 = vpop.f32.mrf.mxu2  ;;  %v1632_v55 = vpop.f32.mrf.mxu3  ;;  %v1073_v12 = vmax.f32 %v696_v1, %v1041_v5 }
  0xe0   : > { %v1826_v58 = vmax.f32 %v1072_v48, %v1794_v52  ;;  %v1354_v59 = vmul.f32 %v2585_v34, %v1287_v54  ;;  %v1699_v60 = vmul.f32 %v2585_v34, %v1632_v55  ;;  %v562_v61 = vpop.f32.mrf.mxu0  ;;  %v913_v62 = vpop.f32.mrf.mxu1 }
  0xe1   : > { %v630_v2 = vmul.f32 %v2585_v34, %v562_v61  ;;  %v978_v3 = vmul.f32 %v2585_v34, %v913_v62 }
  0xe2   : > { %v1858_v4 = vpack.c.bf16 %v1826_v58, %v1826_v58  ;;  %v1386_v6 = vadd.f32 %v2592_v38, %v1354_v59  ;;  %v1731_v7 = vadd.f32 %v2592_v38, %v1699_v60 }
  0xe3   : > { %v665_v8 = vadd.f32 %v2592_v38, %v630_v2  ;;  %2107 = vmatmul.msk.bf16.gmra.mxu0 %vm479_vm0, %v2367_v56  ;;  %2187 = vmatmul.msk.bf16.gmra.mxu1 %vm479_vm0, %v2383_v57  ;;  %v1010_v11 = vadd.f32 %v2592_v38, %v978_v3 }
  0xe4   : > { %1891 = vst.msk [vmem:[%s2622_s28 + $0x20] sm:$0xf] %vm1882_vm1, %v1858_v4  ;;  %v1418_v9 = vmax.f32 %v1386_v6, 0.0  ;;  %v1763_v10 = vmax.f32 %v1731_v7, 0.0  ;;  %2267 = vmatmul.msk.bf16.gmra.mxu2 %vm479_vm0, %v2399_v63  ;;  %2347 = vmatmul.msk.bf16.gmra.mxu3 %vm479_vm0, %v2415_v0 }
  0xe5   : > { %v697_v14 = vmax.f32 %v665_v8, 0.0  ;;  %v1042_v18 = vmax.f32 %v1010_v11, 0.0 }
  0xe6   : > { %v1795_v13 = vmax.f32 %v1418_v9, %v1763_v10 }
  0xe7   : > { %v1290_v15 = vpop.f32.mrf.mxu2  ;;  %v1635_v16 = vpop.f32.mrf.mxu3  ;;  %v1074_v28 = vmax.f32 %v697_v14, %v1042_v18  ;;  %v2369_v18 = vld [vmem:[%s2498_s11 + $0x78] sm:$0xff] }
  0xe8   : > { %v1827_v17 = vmax.f32 %v1073_v12, %v1795_v13  ;;  %v1355_v19 = vmul.f32 %v2585_v34, %v1290_v15  ;;  %v1700_v20 = vmul.f32 %v2585_v34, %v1635_v16  ;;  %v564_v21 = vpop.f32.mrf.mxu0  ;;  %v915_v22 = vpop.f32.mrf.mxu1 }
  0xe9   : > { %v631_v23 = vmul.f32 %v2585_v34, %v564_v21  ;;  %v979_v27 = vmul.f32 %v2585_v34, %v915_v22 }
  0xea   : > { %v1859_v24 = vpack.c.bf16 %v1827_v17, %v1827_v17  ;;  %v1387_v25 = vadd.f32 %v2592_v38, %v1355_v19  ;;  %v1732_v26 = vadd.f32 %v2592_v38, %v1700_v20  ;;  %v2385_v19 = vld [vmem:[%s2504_s14 + $0x78] sm:$0xff] }
  0xeb   : > { %v666_v31 = vadd.f32 %v2592_v38, %v631_v23  ;;  %v1011_v33 = vadd.f32 %v2592_v38, %v979_v27 }
  0xec   : > { %1892 = vst.msk [vmem:[%s2622_s28 + $0x24] sm:$0xf] %vm1882_vm1, %v1859_v24  ;;  %v1419_v29 = vmax.f32 %v1387_v25, 0.0  ;;  %v1764_v30 = vmax.f32 %v1732_v26, 0.0  ;;  %v2401_v25 = vld [vmem:[%s2512_s17 + $0x78] sm:$0xff] }
  0xed   : > { %v698_v47 = vmax.f32 %v666_v31, 0.0  ;;  %v1043_v51 = vmax.f32 %v1011_v33, 0.0  ;;  %v2417_v26 = vld [vmem:[%s2518_s20 + $0x78] sm:$0xff] }
  0xee   : > { %v1796_v32 = vmax.f32 %v1419_v29, %v1764_v30 }
  0xef   : > { %v1292_v35 = vpop.f32.mrf.mxu2  ;;  %v1637_v36 = vpop.f32.mrf.mxu3  ;;  %v1075_v58 = vmax.f32 %v698_v47, %v1043_v51 }
  0xf0   : > { %v1828_v40 = vmax.f32 %v1074_v28, %v1796_v32  ;;  %v1356_v41 = vmul.f32 %v2585_v34, %v1292_v35  ;;  %v1701_v42 = vmul.f32 %v2585_v34, %v1637_v36  ;;  %v567_v43 = vpop.f32.mrf.mxu0  ;;  %v918_v44 = vpop.f32.mrf.mxu1 }
  0xf1   : > { %v632_v48 = vmul.f32 %v2585_v34, %v567_v43  ;;  %v980_v49 = vmul.f32 %v2585_v34, %v918_v44 }
  0xf2   : > { %v1860_v50 = vpack.c.bf16 %v1828_v40, %v1828_v40  ;;  %v1388_v52 = vadd.f32 %v2592_v38, %v1356_v41  ;;  %v1733_v53 = vadd.f32 %v2592_v38, %v1701_v42 }
  0xf3   : > { %v667_v54 = vadd.f32 %v2592_v38, %v632_v48  ;;  %2108 = vmatmul.msk.bf16.gmra.mxu0 %vm479_vm0, %v2368_v37  ;;  %2188 = vmatmul.msk.bf16.gmra.mxu1 %vm479_vm0, %v2384_v39  ;;  %v1012_v57 = vadd.f32 %v2592_v38, %v980_v49 }
  0xf4   : > { %1893 = vst.msk [vmem:[%s2622_s28 + $0x28] sm:$0xf] %vm1882_vm1, %v1860_v50  ;;  %v1420_v55 = vmax.f32 %v1388_v52, 0.0  ;;  %v1765_v56 = vmax.f32 %v1733_v53, 0.0  ;;  %2268 = vmatmul.msk.bf16.gmra.mxu2 %vm479_vm0, %v2400_v45  ;;  %2348 = vmatmul.msk.bf16.gmra.mxu3 %vm479_vm0, %v2416_v46 }
  0xf5   : > { %v699_v60 = vmax.f32 %v667_v54, 0.0  ;;  %v1044_v0 = vmax.f32 %v1012_v57, 0.0 }
  0xf6   : > { %v1797_v59 = vmax.f32 %v1420_v55, %v1765_v56 }
  0xf7   : > { %v1295_v61 = vpop.f32.mrf.mxu2  ;;  %v1640_v62 = vpop.f32.mrf.mxu3  ;;  %v1076_v10 = vmax.f32 %v699_v60, %v1044_v0 }
  0xf8   : > { %v1829_v63 = vmax.f32 %v1075_v58, %v1797_v59  ;;  %v1357_v1 = vmul.f32 %v2585_v34, %v1295_v61  ;;  %v1702_v2 = vmul.f32 %v2585_v34, %v1640_v62  ;;  %v569_v3 = vpop.f32.mrf.mxu0  ;;  %v920_v4 = vpop.f32.mrf.mxu1 }
  0xf9   : > { %v633_v5 = vmul.f32 %v2585_v34, %v569_v3  ;;  %v981_v9 = vmul.f32 %v2585_v34, %v920_v4 }
  0xfa   : > { %v1861_v6 = vpack.c.bf16 %v1829_v63, %v1829_v63  ;;  %v1389_v7 = vadd.f32 %v2592_v38, %v1357_v1  ;;  %v1734_v8 = vadd.f32 %v2592_v38, %v1702_v2 }
  0xfb   : > { %v668_v13 = vadd.f32 %v2592_v38, %v633_v5  ;;  %v1013_v15 = vadd.f32 %v2592_v38, %v981_v9 }
  0xfc   : > { %1894 = vst.msk [vmem:[%s2622_s28 + $0x2c] sm:$0xf] %vm1882_vm1, %v1861_v6  ;;  %v1421_v11 = vmax.f32 %v1389_v7, 0.0  ;;  %v1766_v12 = vmax.f32 %v1734_v8, 0.0 }
  0xfd   : > { %v700_v27 = vmax.f32 %v668_v13, 0.0  ;;  %v1045_v31 = vmax.f32 %v1013_v15, 0.0 }
  0xfe   : > { %v1798_v14 = vmax.f32 %v1421_v11, %v1766_v12 }
  0xff   : > { %v1297_v16 = vpop.f32.mrf.mxu2  ;;  %v1642_v17 = vpop.f32.mrf.mxu3  ;;  %v1077_v40 = vmax.f32 %v700_v27, %v1045_v31 }
 0x100   : > { %v1830_v20 = vmax.f32 %v1076_v10, %v1798_v14  ;;  %v1358_v21 = vmul.f32 %v2585_v34, %v1297_v16  ;;  %v1703_v22 = vmul.f32 %v2585_v34, %v1642_v17  ;;  %v572_v23 = vpop.f32.mrf.mxu0  ;;  %v923_v24 = vpop.f32.mrf.mxu1 }
 0x101   : > { %v634_v28 = vmul.f32 %v2585_v34, %v572_v23  ;;  %v982_v29 = vmul.f32 %v2585_v34, %v923_v24 }
 0x102   : > { %v1862_v30 = vpack.c.bf16 %v1830_v20, %v1830_v20  ;;  %v1390_v32 = vadd.f32 %v2592_v38, %v1358_v21  ;;  %v1735_v33 = vadd.f32 %v2592_v38, %v1703_v22 }
 0x103   : > { %v669_v35 = vadd.f32 %v2592_v38, %v634_v28  ;;  %2109 = vmatmul.msk.bf16.gmra.mxu0 %vm479_vm0, %v2369_v18  ;;  %2189 = vmatmul.msk.bf16.gmra.mxu1 %vm479_vm0, %v2385_v19  ;;  %v1014_v39 = vadd.f32 %v2592_v38, %v982_v29 }
 0x104   : > { %1895 = vst.msk [vmem:[%s2622_s28 + $0x30] sm:$0xf] %vm1882_vm1, %v1862_v30  ;;  %v1422_v36 = vmax.f32 %v1390_v32, 0.0  ;;  %v1767_v37 = vmax.f32 %v1735_v33, 0.0  ;;  %2269 = vmatmul.msk.bf16.gmra.mxu2 %vm479_vm0, %v2401_v25  ;;  %2349 = vmatmul.msk.bf16.gmra.mxu3 %vm479_vm0, %v2417_v26 }
 0x105   : > { %v701_v42 = vmax.f32 %v669_v35, 0.0  ;;  %v1046_v46 = vmax.f32 %v1014_v39, 0.0 }
 0x106   : > { %v1799_v41 = vmax.f32 %v1422_v36, %v1767_v37 }
 0x107   : > { %v1300_v43 = vpop.f32.mrf.mxu2  ;;  %v1645_v44 = vpop.f32.mrf.mxu3  ;;  %v1078_v56 = vmax.f32 %v701_v42, %v1046_v46 }
 0x108   : > { %v1831_v45 = vmax.f32 %v1077_v40, %v1799_v41  ;;  %v1359_v47 = vmul.f32 %v2585_v34, %v1300_v43  ;;  %v1704_v48 = vmul.f32 %v2585_v34, %v1645_v44  ;;  %v574_v49 = vpop.f32.mrf.mxu0  ;;  %v925_v50 = vpop.f32.mrf.mxu1 }
 0x109   : > { %v635_v51 = vmul.f32 %v2585_v34, %v574_v49  ;;  %v983_v55 = vmul.f32 %v2585_v34, %v925_v50 }
 0x10a   : > { %v1863_v52 = vpack.c.bf16 %v1831_v45, %v1831_v45  ;;  %v1391_v53 = vadd.f32 %v2592_v38, %v1359_v47  ;;  %v1736_v54 = vadd.f32 %v2592_v38, %v1704_v48 }
 0x10b   : > { %v670_v59 = vadd.f32 %v2592_v38, %v635_v51  ;;  %v1015_v61 = vadd.f32 %v2592_v38, %v983_v55 }
 0x10c   : > { %1896 = vst.msk [vmem:[%s2622_s28 + $0x34] sm:$0xf] %vm1882_vm1, %v1863_v52  ;;  %v1423_v57 = vmax.f32 %v1391_v53, 0.0  ;;  %v1768_v58 = vmax.f32 %v1736_v54, 0.0 }
 0x10d   : > { %v702_v5 = vmax.f32 %v670_v59, 0.0  ;;  %v1047_v9 = vmax.f32 %v1015_v61, 0.0 }
 0x10e   : > { %v1800_v60 = vmax.f32 %v1423_v57, %v1768_v58 }
 0x10f   : > { %v1302_v62 = vpop.f32.mrf.mxu2  ;;  %v1647_v63 = vpop.f32.mrf.mxu3  ;;  %v1079_v16 = vmax.f32 %v702_v5, %v1047_v9 }
 0x110   : > { %v1832_v0 = vmax.f32 %v1078_v56, %v1800_v60  ;;  %v1360_v1 = vmul.f32 %v2585_v34, %v1302_v62  ;;  %v1705_v2 = vmul.f32 %v2585_v34, %v1647_v63  ;;  %v577_v3 = vpop.f32.mrf.mxu0  ;;  %v928_v4 = vpop.f32.mrf.mxu1 }
 0x111   : > { %v636_v6 = vmul.f32 %v2585_v34, %v577_v3  ;;  %v984_v7 = vmul.f32 %v2585_v34, %v928_v4 }
 0x112   : > { %v1864_v8 = vpack.c.bf16 %v1832_v0, %v1832_v0  ;;  %v1392_v10 = vadd.f32 %v2592_v38, %v1360_v1  ;;  %v1737_v11 = vadd.f32 %v2592_v38, %v1705_v2 }
 0x113   : > { %v671_v12 = vadd.f32 %v2592_v38, %v636_v6  ;;  %v1016_v15 = vadd.f32 %v2592_v38, %v984_v7 }
 0x114   : > { %1897 = vst.msk [vmem:[%s2622_s28 + $0x38] sm:$0xf] %vm1882_vm1, %v1864_v8  ;;  %v1424_v13 = vmax.f32 %v1392_v10, 0.0  ;;  %v1769_v14 = vmax.f32 %v1737_v11, 0.0 }
 0x115   : > { %v703_v18 = vmax.f32 %v671_v12, 0.0  ;;  %v1048_v22 = vmax.f32 %v1016_v15, 0.0 }
 0x116   : > { %v1801_v17 = vmax.f32 %v1424_v13, %v1769_v14 }
 0x117   : > { %v1305_v19 = vpop.f32.mrf.mxu2  ;;  %v1650_v20 = vpop.f32.mrf.mxu3  ;;  %v1080_v32 = vmax.f32 %v703_v18, %v1048_v22 }
 0x118   : > { %v1833_v21 = vmax.f32 %v1079_v16, %v1801_v17  ;;  %v1361_v23 = vmul.f32 %v2585_v34, %v1305_v19  ;;  %v1706_v24 = vmul.f32 %v2585_v34, %v1650_v20  ;;  %v579_v25 = vpop.f32.mrf.mxu0  ;;  %v930_v26 = vpop.f32.mrf.mxu1 }
 0x119   : > { %v637_v27 = vmul.f32 %v2585_v34, %v579_v25  ;;  %v985_v31 = vmul.f32 %v2585_v34, %v930_v26 }
 0x11a   : > { %v1865_v28 = vpack.c.bf16 %v1833_v21, %v1833_v21  ;;  %v1393_v29 = vadd.f32 %v2592_v38, %v1361_v23  ;;  %v1738_v30 = vadd.f32 %v2592_v38, %v1706_v24 }
 0x11b   : > { %v672_v36 = vadd.f32 %v2592_v38, %v637_v27  ;;  %v1017_v39 = vadd.f32 %v2592_v38, %v985_v31 }
 0x11c   : > { %1898 = vst.msk [vmem:[%s2622_s28 + $0x3c] sm:$0xf] %vm1882_vm1, %v1865_v28  ;;  %v1425_v33 = vmax.f32 %v1393_v29, 0.0  ;;  %v1770_v35 = vmax.f32 %v1738_v30, 0.0 }
 0x11d   : > { %v704_v47 = vmax.f32 %v672_v36, 0.0  ;;  %v1049_v51 = vmax.f32 %v1017_v39, 0.0 }
 0x11e   : > { %v1802_v37 = vmax.f32 %v1425_v33, %v1770_v35 }
 0x11f   : > { %v1307_v40 = vpop.f32.mrf.mxu2  ;;  %v1652_v41 = vpop.f32.mrf.mxu3  ;;  %v1081_v58 = vmax.f32 %v704_v47, %v1049_v51 }
 0x120   : > { %v1834_v42 = vmax.f32 %v1080_v32, %v1802_v37  ;;  %v1362_v43 = vmul.f32 %v2585_v34, %v1307_v40  ;;  %v1707_v44 = vmul.f32 %v2585_v34, %v1652_v41  ;;  %v582_v45 = vpop.f32.mrf.mxu0  ;;  %v933_v46 = vpop.f32.mrf.mxu1 }
 0x121   : > { %v638_v48 = vmul.f32 %v2585_v34, %v582_v45  ;;  %v986_v49 = vmul.f32 %v2585_v34, %v933_v46 }
 0x122   : > { %v1866_v50 = vpack.c.bf16 %v1834_v42, %v1834_v42  ;;  %v1394_v52 = vadd.f32 %v2592_v38, %v1362_v43  ;;  %v1739_v53 = vadd.f32 %v2592_v38, %v1707_v44 }
 0x123   : > { %v673_v54 = vadd.f32 %v2592_v38, %v638_v48  ;;  %v1018_v57 = vadd.f32 %v2592_v38, %v986_v49 }
 0x124   : > { %1899 = vst.msk [vmem:[%s2622_s28 + $0x40] sm:$0xf] %vm1882_vm1, %v1866_v50  ;;  %v1426_v55 = vmax.f32 %v1394_v52, 0.0  ;;  %v1771_v56 = vmax.f32 %v1739_v53, 0.0 }
 0x125   : > { %v705_v60 = vmax.f32 %v673_v54, 0.0  ;;  %v1050_v0 = vmax.f32 %v1018_v57, 0.0 }
 0x126   : > { %v1803_v59 = vmax.f32 %v1426_v55, %v1771_v56 }
 0x127   : > { %v1310_v61 = vpop.f32.mrf.mxu2  ;;  %v1655_v62 = vpop.f32.mrf.mxu3  ;;  %v1082_v10 = vmax.f32 %v705_v60, %v1050_v0 }
 0x128   : > { %v1835_v63 = vmax.f32 %v1081_v58, %v1803_v59  ;;  %v1363_v1 = vmul.f32 %v2585_v34, %v1310_v61  ;;  %v1708_v2 = vmul.f32 %v2585_v34, %v1655_v62  ;;  %v584_v3 = vpop.f32.mrf.mxu0  ;;  %v935_v4 = vpop.f32.mrf.mxu1  ;;  %v2877_v61 = vld [vmem:[%s3000_s5] ss:$0 sm:$0xff] }
 0x129   : > { %v639_v5 = vmul.f32 %v2585_v34, %v584_v3  ;;  %v987_v9 = vmul.f32 %v2585_v34, %v935_v4 }
 0x12a   : > { %v1867_v6 = vpack.c.bf16 %v1835_v63, %v1835_v63  ;;  %v1395_v7 = vadd.f32 %v2592_v38, %v1363_v1  ;;  %v1740_v8 = vadd.f32 %v2592_v38, %v1708_v2 }
 0x12b   : > { %v674_v13 = vadd.f32 %v2592_v38, %v639_v5  ;;  %v1019_v15 = vadd.f32 %v2592_v38, %v987_v9  ;;  %v2886_v5 = vld [vmem:[%s3001_s6] ss:$0 sm:$0xff] }
 0x12c   : > { %1900 = vst.msk [vmem:[%s2622_s28 + $0x44] sm:$0xf] %vm1882_vm1, %v1867_v6  ;;  %v1427_v11 = vmax.f32 %v1395_v7, 0.0  ;;  %v1772_v12 = vmax.f32 %v1740_v8, 0.0 }
 0x12d   : > { %v706_v23 = vmax.f32 %v674_v13, 0.0  ;;  %v1051_v27 = vmax.f32 %v1019_v15, 0.0 }
 0x12e   : > { %v1804_v14 = vmax.f32 %v1427_v11, %v1772_v12 }
 0x12f   : > { %v1312_v16 = vpop.f32.mrf.mxu2  ;;  %v1657_v17 = vpop.f32.mrf.mxu3  ;;  %v1083_v35 = vmax.f32 %v706_v23, %v1051_v27 }
 0x130   : > { %v1836_v18 = vmax.f32 %v1082_v10, %v1804_v14  ;;  %v1364_v19 = vmul.f32 %v2585_v34, %v1312_v16  ;;  %v1709_v20 = vmul.f32 %v2585_v34, %v1657_v17  ;;  %v587_v21 = vpop.f32.mrf.mxu0  ;;  %v938_v22 = vpop.f32.mrf.mxu1 }
 0x131   : > { %v640_v24 = vmul.f32 %v2585_v34, %v587_v21  ;;  %v988_v25 = vmul.f32 %v2585_v34, %v938_v22 }
 0x132   : > { %v1868_v26 = vpack.c.bf16 %v1836_v18, %v1836_v18  ;;  %v1396_v28 = vadd.f32 %v2592_v38, %v1364_v19  ;;  %v1741_v29 = vadd.f32 %v2592_v38, %v1709_v20 }
 0x133   : > { %v675_v30 = vadd.f32 %v2592_v38, %v640_v24  ;;  %v1020_v33 = vadd.f32 %v2592_v38, %v988_v25 }
 0x134   : > { %1901 = vst.msk [vmem:[%s2622_s28 + $0x48] sm:$0xf] %vm1882_vm1, %v1868_v26  ;;  %v1428_v31 = vmax.f32 %v1396_v28, 0.0  ;;  %v1773_v32 = vmax.f32 %v1741_v29, 0.0 }
 0x135   : > { %v707_v37 = vmax.f32 %v675_v30, 0.0  ;;  %v1052_v42 = vmax.f32 %v1020_v33, 0.0 }
 0x136   : > { %v1805_v36 = vmax.f32 %v1428_v31, %v1773_v32 }
 0x137   : > { %v1315_v39 = vpop.f32.mrf.mxu2  ;;  %v1660_v40 = vpop.f32.mrf.mxu3  ;;  %v1084_v52 = vmax.f32 %v707_v37, %v1052_v42 }
 0x138   : > { %v1837_v41 = vmax.f32 %v1083_v35, %v1805_v36  ;;  %v1365_v43 = vmul.f32 %v2585_v34, %v1315_v39  ;;  %v1710_v44 = vmul.f32 %v2585_v34, %v1660_v40  ;;  %v589_v45 = vpop.f32.mrf.mxu0  ;;  %v940_v46 = vpop.f32.mrf.mxu1 }
 0x139   : > { %v641_v47 = vmul.f32 %v2585_v34, %v589_v45  ;;  %v989_v51 = vmul.f32 %v2585_v34, %v940_v46 }
 0x13a   : > { %v1869_v48 = vpack.c.bf16 %v1837_v41, %v1837_v41  ;;  %v1397_v49 = vadd.f32 %v2592_v38, %v1365_v43  ;;  %v1742_v50 = vadd.f32 %v2592_v38, %v1710_v44 }
 0x13b   : > { %v676_v55 = vadd.f32 %v2592_v38, %v641_v47  ;;  %v1021_v57 = vadd.f32 %v2592_v38, %v989_v51 }
 0x13c   : > { %1902 = vst.msk [vmem:[%s2622_s28 + $0x4c] sm:$0xf] %vm1882_vm1, %v1869_v48  ;;  %v1429_v53 = vmax.f32 %v1397_v49, 0.0  ;;  %v1774_v54 = vmax.f32 %v1742_v50, 0.0 }
 0x13d   : > { %v708_v1 = vmax.f32 %v676_v55, 0.0  ;;  %v1053_v4 = vmax.f32 %v1021_v57, 0.0 }
 0x13e   : > { %v1806_v56 = vmax.f32 %v1429_v53, %v1774_v54 }
 0x13f   : > { %v1317_v58 = vpop.f32.mrf.mxu2  ;;  %v1662_v59 = vpop.f32.mrf.mxu3  ;;  %v1085_v12 = vmax.f32 %v708_v1, %v1053_v4 }
 0x140   : > { %v1838_v60 = vmax.f32 %v1084_v52, %v1806_v56  ;;  %v1366_v34 = vmul.f32 %v2877_v61, %v1317_v58  ;;  %v1711_v62 = vmul.f32 %v2877_v61, %v1662_v59  ;;  %v592_v63 = vpop.f32.mrf.mxu0  ;;  %v943_v0 = vpop.f32.mrf.mxu1 }
 0x141   : > { %v642_v2 = vmul.f32 %v2877_v61, %v592_v63  ;;  %v990_v38 = vmul.f32 %v2877_v61, %v943_v0 }
 0x142   : > { %v1870_v3 = vpack.c.bf16 %v1838_v60, %v1838_v60  ;;  %v1398_v6 = vadd.f32 %v2886_v5, %v1366_v34  ;;  %v1743_v7 = vadd.f32 %v2886_v5, %v1711_v62 }
 0x143   : > { %v677_v8 = vadd.f32 %v2886_v5, %v642_v2  ;;  %v1022_v11 = vadd.f32 %v2886_v5, %v990_v38 }
 0x144   : > { %1903 = vst.msk [vmem:[%s2622_s28 + $0x50] sm:$0xf] %vm1882_vm1, %v1870_v3  ;;  %v1430_v9 = vmax.f32 %v1398_v6, 0.0  ;;  %v1775_v10 = vmax.f32 %v1743_v7, 0.0 }
 0x145   : > { %v709_v14 = vmax.f32 %v677_v8, 0.0  ;;  %v1054_v18 = vmax.f32 %v1022_v11, 0.0 }
 0x146   : > { %v1807_v13 = vmax.f32 %v1430_v9, %v1775_v10 }
 0x147   : > { %v1320_v15 = vpop.f32.mrf.mxu2  ;;  %v1665_v16 = vpop.f32.mrf.mxu3  ;;  %v1086_v28 = vmax.f32 %v709_v14, %v1054_v18 }
 0x148   : > { %v1839_v17 = vmax.f32 %v1085_v12, %v1807_v13  ;;  %v1367_v19 = vmul.f32 %v2877_v61, %v1320_v15  ;;  %v1712_v20 = vmul.f32 %v2877_v61, %v1665_v16  ;;  %v594_v21 = vpop.f32.mrf.mxu0  ;;  %v945_v22 = vpop.f32.mrf.mxu1 }
 0x149   : > { %v643_v23 = vmul.f32 %v2877_v61, %v594_v21  ;;  %v991_v27 = vmul.f32 %v2877_v61, %v945_v22 }
 0x14a   : > { %v1871_v24 = vpack.c.bf16 %v1839_v17, %v1839_v17  ;;  %v1399_v25 = vadd.f32 %v2886_v5, %v1367_v19  ;;  %v1744_v26 = vadd.f32 %v2886_v5, %v1712_v20 }
 0x14b   : > { %v678_v31 = vadd.f32 %v2886_v5, %v643_v23  ;;  %v1023_v33 = vadd.f32 %v2886_v5, %v991_v27 }
 0x14c   : > { %1904 = vst.msk [vmem:[%s2622_s28 + $0x54] sm:$0xf] %vm1882_vm1, %v1871_v24  ;;  %v1431_v29 = vmax.f32 %v1399_v25, 0.0  ;;  %v1776_v30 = vmax.f32 %v1744_v26, 0.0 }
 0x14d   : > { %v710_v43 = vmax.f32 %v678_v31, 0.0  ;;  %v1055_v47 = vmax.f32 %v1023_v33, 0.0 }
 0x14e   : > { %v1808_v32 = vmax.f32 %v1431_v29, %v1776_v30 }
 0x14f   : > { %v1322_v35 = vpop.f32.mrf.mxu2  ;;  %v1667_v36 = vpop.f32.mrf.mxu3  ;;  %v1087_v54 = vmax.f32 %v710_v43, %v1055_v47 }
 0x150   : > { %v1840_v37 = vmax.f32 %v1086_v28, %v1808_v32  ;;  %v1368_v39 = vmul.f32 %v2877_v61, %v1322_v35  ;;  %v1713_v40 = vmul.f32 %v2877_v61, %v1667_v36  ;;  %v597_v41 = vpop.f32.mrf.mxu0  ;;  %v948_v42 = vpop.f32.mrf.mxu1 }
 0x151   : > { %v644_v44 = vmul.f32 %v2877_v61, %v597_v41  ;;  %v992_v45 = vmul.f32 %v2877_v61, %v948_v42 }
 0x152   : > { %v1872_v46 = vpack.c.bf16 %v1840_v37, %v1840_v37  ;;  %v1400_v48 = vadd.f32 %v2886_v5, %v1368_v39  ;;  %v1745_v49 = vadd.f32 %v2886_v5, %v1713_v40 }
 0x153   : > { %v679_v50 = vadd.f32 %v2886_v5, %v644_v44  ;;  %v1024_v53 = vadd.f32 %v2886_v5, %v992_v45 }
 0x154   : > { %1905 = vst.msk [vmem:[%s2622_s28 + $0x58] sm:$0xf] %vm1882_vm1, %v1872_v46  ;;  %v1432_v51 = vmax.f32 %v1400_v48, 0.0  ;;  %v1777_v52 = vmax.f32 %v1745_v49, 0.0 }
 0x155   : > { %v711_v56 = vmax.f32 %v679_v50, 0.0  ;;  %v1056_v60 = vmax.f32 %v1024_v53, 0.0 }
 0x156   : > { %v1809_v55 = vmax.f32 %v1432_v51, %v1777_v52 }
 0x157   : > { %v1325_v57 = vpop.f32.mrf.mxu2  ;;  %v1670_v58 = vpop.f32.mrf.mxu3  ;;  %v1088_v6 = vmax.f32 %v711_v56, %v1056_v60 }
 0x158   : > { %v1841_v59 = vmax.f32 %v1087_v54, %v1809_v55  ;;  %v1369_v34 = vmul.f32 %v2877_v61, %v1325_v57  ;;  %v1714_v62 = vmul.f32 %v2877_v61, %v1670_v58  ;;  %v599_v63 = vpop.f32.mrf.mxu0  ;;  %v950_v0 = vpop.f32.mrf.mxu1 }
 0x159   : > { %v645_v1 = vmul.f32 %v2877_v61, %v599_v63  ;;  %v993_v4 = vmul.f32 %v2877_v61, %v950_v0 }
 0x15a   : > { %v1873_v2 = vpack.c.bf16 %v1841_v59, %v1841_v59  ;;  %v1401_v38 = vadd.f32 %v2886_v5, %v1369_v34  ;;  %v1746_v3 = vadd.f32 %v2886_v5, %v1714_v62 }
 0x15b   : > { %v680_v9 = vadd.f32 %v2886_v5, %v645_v1  ;;  %v1025_v11 = vadd.f32 %v2886_v5, %v993_v4 }
 0x15c   : > { %1906 = vst.msk [vmem:[%s2622_s28 + $0x5c] sm:$0xf] %vm1882_vm1, %v1873_v2  ;;  %v1433_v7 = vmax.f32 %v1401_v38, 0.0  ;;  %v1778_v8 = vmax.f32 %v1746_v3, 0.0 }
 0x15d   : > { %v712_v19 = vmax.f32 %v680_v9, 0.0  ;;  %v1057_v23 = vmax.f32 %v1025_v11, 0.0 }
 0x15e   : > { %v1810_v10 = vmax.f32 %v1433_v7, %v1778_v8 }
 0x15f   : > { %v1327_v12 = vpop.f32.mrf.mxu2  ;;  %v1672_v13 = vpop.f32.mrf.mxu3  ;;  %v1089_v30 = vmax.f32 %v712_v19, %v1057_v23 }
 0x160   : > { %v1842_v14 = vmax.f32 %v1088_v6, %v1810_v10  ;;  %v1370_v15 = vmul.f32 %v2877_v61, %v1327_v12  ;;  %v1715_v16 = vmul.f32 %v2877_v61, %v1672_v13  ;;  %v602_v17 = vpop.f32.mrf.mxu0  ;;  %v953_v18 = vpop.f32.mrf.mxu1 }
 0x161   : > { %v646_v20 = vmul.f32 %v2877_v61, %v602_v17  ;;  %v994_v21 = vmul.f32 %v2877_v61, %v953_v18 }
 0x162   : > { %v1874_v22 = vpack.c.bf16 %v1842_v14, %v1842_v14  ;;  %v1402_v24 = vadd.f32 %v2886_v5, %v1370_v15  ;;  %v1747_v25 = vadd.f32 %v2886_v5, %v1715_v16 }
 0x163   : > { %v681_v26 = vadd.f32 %v2886_v5, %v646_v20  ;;  %v1026_v29 = vadd.f32 %v2886_v5, %v994_v21 }
 0x164   : > { %1907 = vst.msk [vmem:[%s2622_s28 + $0x60] sm:$0xf] %vm1882_vm1, %v1874_v22  ;;  %v1434_v27 = vmax.f32 %v1402_v24, 0.0  ;;  %v1779_v28 = vmax.f32 %v1747_v25, 0.0 }
 0x165   : > { %v713_v32 = vmax.f32 %v681_v26, 0.0  ;;  %v1058_v37 = vmax.f32 %v1026_v29, 0.0 }
 0x166   : > { %v1811_v31 = vmax.f32 %v1434_v27, %v1779_v28 }
 0x167   : > { %v1330_v33 = vpop.f32.mrf.mxu2  ;;  %v1675_v35 = vpop.f32.mrf.mxu3  ;;  %v1090_v48 = vmax.f32 %v713_v32, %v1058_v37 }
 0x168   : > { %v1843_v36 = vmax.f32 %v1089_v30, %v1811_v31  ;;  %v1371_v39 = vmul.f32 %v2877_v61, %v1330_v33  ;;  %v1716_v40 = vmul.f32 %v2877_v61, %v1675_v35  ;;  %v604_v41 = vpop.f32.mrf.mxu0  ;;  %v955_v42 = vpop.f32.mrf.mxu1 }
 0x169   : > { %v647_v43 = vmul.f32 %v2877_v61, %v604_v41  ;;  %v995_v47 = vmul.f32 %v2877_v61, %v955_v42 }
 0x16a   : > { %v1875_v44 = vpack.c.bf16 %v1843_v36, %v1843_v36  ;;  %v1403_v45 = vadd.f32 %v2886_v5, %v1371_v39  ;;  %v1748_v46 = vadd.f32 %v2886_v5, %v1716_v40 }
 0x16b   : > { %v682_v51 = vadd.f32 %v2886_v5, %v647_v43  ;;  %v1027_v53 = vadd.f32 %v2886_v5, %v995_v47 }
 0x16c   : > { %1908 = vst.msk [vmem:[%s2622_s28 + $0x64] sm:$0xf] %vm1882_vm1, %v1875_v44  ;;  %v1435_v49 = vmax.f32 %v1403_v45, 0.0  ;;  %v1780_v50 = vmax.f32 %v1748_v46, 0.0 }
 0x16d   : > { %v714_v34 = vmax.f32 %v682_v51, 0.0  ;;  %v1059_v1 = vmax.f32 %v1027_v53, 0.0 }
 0x16e   : > { %v1812_v52 = vmax.f32 %v1435_v49, %v1780_v50 }
 0x16f   : > { %v1332_v54 = vpop.f32.mrf.mxu2  ;;  %v1677_v55 = vpop.f32.mrf.mxu3  ;;  %v1091_v8 = vmax.f32 %v714_v34, %v1059_v1 }
 0x170   : > { %v1844_v56 = vmax.f32 %v1090_v48, %v1812_v52  ;;  %v1372_v57 = vmul.f32 %v2877_v61, %v1332_v54  ;;  %v1717_v58 = vmul.f32 %v2877_v61, %v1677_v55  ;;  %v607_v59 = vpop.f32.mrf.mxu0  ;;  %v958_v60 = vpop.f32.mrf.mxu1 }
 0x171   : > { %v648_v62 = vmul.f32 %v2877_v61, %v607_v59  ;;  %v996_v63 = vmul.f32 %v2877_v61, %v958_v60 }
 0x172   : > { %v1876_v0 = vpack.c.bf16 %v1844_v56, %v1844_v56  ;;  %v1404_v2 = vadd.f32 %v2886_v5, %v1372_v57  ;;  %v1749_v38 = vadd.f32 %v2886_v5, %v1717_v58 }
 0x173   : > { %v683_v3 = vadd.f32 %v2886_v5, %v648_v62  ;;  %v1028_v7 = vadd.f32 %v2886_v5, %v996_v63 }
 0x174   : > { %1909 = vst.msk [vmem:[%s2622_s28 + $0x68] sm:$0xf] %vm1882_vm1, %v1876_v0  ;;  %v1436_v4 = vmax.f32 %v1404_v2, 0.0  ;;  %v1781_v6 = vmax.f32 %v1749_v38, 0.0 }
 0x175   : > { %v715_v10 = vmax.f32 %v683_v3, 0.0  ;;  %v1060_v14 = vmax.f32 %v1028_v7, 0.0 }
 0x176   : > { %v1813_v9 = vmax.f32 %v1436_v4, %v1781_v6 }
 0x177   : > { %v1335_v11 = vpop.f32.mrf.mxu2  ;;  %v1680_v12 = vpop.f32.mrf.mxu3  ;;  %v1092_v24 = vmax.f32 %v715_v10, %v1060_v14 }
 0x178   : > { %v1845_v13 = vmax.f32 %v1091_v8, %v1813_v9  ;;  %v1373_v15 = vmul.f32 %v2877_v61, %v1335_v11  ;;  %v1718_v16 = vmul.f32 %v2877_v61, %v1680_v12  ;;  %v609_v17 = vpop.f32.mrf.mxu0  ;;  %v960_v18 = vpop.f32.mrf.mxu1 }
 0x179   : > { %v649_v19 = vmul.f32 %v2877_v61, %v609_v17  ;;  %v997_v23 = vmul.f32 %v2877_v61, %v960_v18 }
 0x17a   : > { %v1877_v20 = vpack.c.bf16 %v1845_v13, %v1845_v13  ;;  %v1405_v21 = vadd.f32 %v2886_v5, %v1373_v15  ;;  %v1750_v22 = vadd.f32 %v2886_v5, %v1718_v16 }
 0x17b   : > { %v684_v27 = vadd.f32 %v2886_v5, %v649_v19  ;;  %v1029_v29 = vadd.f32 %v2886_v5, %v997_v23 }
 0x17c   : > { %1910 = vst.msk [vmem:[%s2622_s28 + $0x6c] sm:$0xf] %vm1882_vm1, %v1877_v20  ;;  %v1437_v25 = vmax.f32 %v1405_v21, 0.0  ;;  %v1782_v26 = vmax.f32 %v1750_v22, 0.0 }
 0x17d   : > { %v716_v39 = vmax.f32 %v684_v27, 0.0  ;;  %v1061_v43 = vmax.f32 %v1029_v29, 0.0 }
 0x17e   : > { %v1814_v28 = vmax.f32 %v1437_v25, %v1782_v26 }
 0x17f   : > { %v1337_v30 = vpop.f32.mrf.mxu2  ;;  %v1682_v31 = vpop.f32.mrf.mxu3  ;;  %v1093_v50 = vmax.f32 %v716_v39, %v1061_v43 }
 0x180   : > { %v1846_v32 = vmax.f32 %v1092_v24, %v1814_v28  ;;  %v1374_v33 = vmul.f32 %v2877_v61, %v1337_v30  ;;  %v1719_v35 = vmul.f32 %v2877_v61, %v1682_v31  ;;  %v612_v36 = vpop.f32.mrf.mxu0  ;;  %v963_v37 = vpop.f32.mrf.mxu1 }
 0x181   : > { %v650_v40 = vmul.f32 %v2877_v61, %v612_v36  ;;  %v998_v41 = vmul.f32 %v2877_v61, %v963_v37 }
 0x182   : > { %v1878_v42 = vpack.c.bf16 %v1846_v32, %v1846_v32  ;;  %v1406_v44 = vadd.f32 %v2886_v5, %v1374_v33  ;;  %v1751_v45 = vadd.f32 %v2886_v5, %v1719_v35 }
 0x183   : > { %v685_v46 = vadd.f32 %v2886_v5, %v650_v40  ;;  %v1030_v49 = vadd.f32 %v2886_v5, %v998_v41 }
 0x184   : > { %1911 = vst.msk [vmem:[%s2622_s28 + $0x70] sm:$0xf] %vm1882_vm1, %v1878_v42  ;;  %v1438_v47 = vmax.f32 %v1406_v44, 0.0  ;;  %v1783_v48 = vmax.f32 %v1751_v45, 0.0 }
 0x185   : > { %v717_v52 = vmax.f32 %v685_v46, 0.0  ;;  %v1062_v56 = vmax.f32 %v1030_v49, 0.0 }
 0x186   : > { %v1815_v51 = vmax.f32 %v1438_v47, %v1783_v48 }
 0x187   : > { %v1340_v53 = vpop.f32.mrf.mxu2  ;;  %v1685_v54 = vpop.f32.mrf.mxu3  ;;  %v1094_v2 = vmax.f32 %v717_v52, %v1062_v56 }
 0x188   : > { %v1847_v55 = vmax.f32 %v1093_v50, %v1815_v51  ;;  %v1375_v57 = vmul.f32 %v2877_v61, %v1340_v53  ;;  %v1720_v58 = vmul.f32 %v2877_v61, %v1685_v54  ;;  %v614_v59 = vpop.f32.mrf.mxu0  ;;  %v965_v60 = vpop.f32.mrf.mxu1 }
 0x189   : > { %v651_v34 = vmul.f32 %v2877_v61, %v614_v59  ;;  %v999_v1 = vmul.f32 %v2877_v61, %v965_v60 }
 0x18a   : > { %v1879_v62 = vpack.c.bf16 %v1847_v55, %v1847_v55  ;;  %v1407_v63 = vadd.f32 %v2886_v5, %v1375_v57  ;;  %v1752_v0 = vadd.f32 %v2886_v5, %v1720_v58 }
 0x18b   : > { %v686_v4 = vadd.f32 %v2886_v5, %v651_v34  ;;  %v1031_v7 = vadd.f32 %v2886_v5, %v999_v1 }
 0x18c   : > { %1912 = vst.msk [vmem:[%s2622_s28 + $0x74] sm:$0xf] %vm1882_vm1, %v1879_v62  ;;  %v1439_v38 = vmax.f32 %v1407_v63, 0.0  ;;  %v1784_v3 = vmax.f32 %v1752_v0, 0.0 }
 0x18d   : > { %v718_v13 = vmax.f32 %v686_v4, 0.0  ;;  %v1063_v15 = vmax.f32 %v1031_v7, 0.0 }
 0x18e   : > { %v1816_v6 = vmax.f32 %v1439_v38, %v1784_v3 }
 0x18f   : > { %v1342_v8 = vpop.f32.mrf.mxu2  ;;  %v1687_v9 = vpop.f32.mrf.mxu3  ;;  %v1095_v20 = vmax.f32 %v718_v13, %v1063_v15 }
 0x190   : > { %v1848_v10 = vmax.f32 %v1094_v2, %v1816_v6  ;;  %v1376_v11 = vmul.f32 %v2877_v61, %v1342_v8  ;;  %v1721_v12 = vmul.f32 %v2877_v61, %v1687_v9 }
 0x192   : > { %v1880_v14 = vpack.c.bf16 %v1848_v10, %v1848_v10  ;;  %v1408_v16 = vadd.f32 %v2886_v5, %v1376_v11  ;;  %v1753_v17 = vadd.f32 %v2886_v5, %v1721_v12 }
 0x194   : > { %1913 = vst.msk [vmem:[%s2622_s28 + $0x78] sm:$0xf] %vm1882_vm1, %v1880_v14  ;;  %v1440_v18 = vmax.f32 %v1408_v16, 0.0  ;;  %v1785_v19 = vmax.f32 %v1753_v17, 0.0 }
 0x196   : > { %v1817_v21 = vmax.f32 %v1440_v18, %v1785_v19 }
 0x198   : > { %v1849_v22 = vmax.f32 %v1095_v20, %v1817_v21 }
 0x19a   : > { %v1881_v23 = vpack.c.bf16 %v1849_v22, %v1849_v22 }
 0x19c   : > { %1914 = vst.msk [vmem:[%s2622_s28 + $0x7c] sm:$0xf] %vm1882_vm1, %v1881_v23 }
 0x19d PF: > { %s17_s24 = sadd.s32 1, %s2436_s24  }
 0x19e   : > { %p14_p4 = scmp.ge.s32.totalorder %s17_s24, 4  }
 0x1a0   :  { %16 = sbr.rel (!%p14_p4) target bundleno = 1 (0x1), region = 87 }

// kernel: cnn10_forward.4
= control target key start
LH: loop header
LB: loop body
LE: loop exit
PB: predicated region body
PF: predicated region fallthrough
CT: control target
= control target key end

     0   :  { %vm325_vm0 = vcmask 261120   ;;  %vm1728_vm1 = vcmask 519168   ;;  %s3569_s4 = inlined_call_operand.vmem [shape: bf16[288,64], index: 4, kind: input, shape index: {}]   ;;  %s3570_s0 = inlined_call_operand.vmem [shape: bf16[128,288], index: 0, kind: input, shape index: {}]   ;;  %s3571_s1 = inlined_call_operand.vmem [shape: bf16[128,288], index: 1, kind: input, shape index: {}]   ;;  %s3572_s5 = inlined_call_operand.vmem [shape: f32[1,64], index: 5, kind: input, shape index: {}]   ;;  %s3573_s6 = inlined_call_operand.vmem [shape: f32[1,64], index: 6, kind: input, shape index: {}]   ;;  %s3574_s2 = inlined_call_operand.vmem [shape: bf16[128,288], index: 2, kind: input, shape index: {}]   ;;  %s3575_s3 = inlined_call_operand.vmem [shape: bf16[128,288], index: 3, kind: input, shape index: {}]   ;;  %s3576_s7 = inlined_call_operand.vmem [shape: bf16[128,64], index: 7, kind: output, shape index: {}]  }
   0x1   :  { %v2398_v0 = vld [vmem:[%s3569_s4 + $0x38] sm:$0xff]  ;;  %v2408_v2 = vld [vmem:[%s3569_s4 + $0x88] sm:$0xff]  ;;  %v2415_v3 = vld [vmem:[%s3569_s4 + $0x30] sm:$0xff] }
   0x2   :  { %v2403_v1 = vld [vmem:[%s3569_s4 + $0x78] sm:$0xff]  ;;  %350 = vmatpush.bf16.msra.mxu0 %v2398_v0  ;;  %v2420_v4 = vld [vmem:[%s3569_s4 + $0x70] sm:$0xff]  ;;  %454 = vmatpush.bf16.msra.mxu2 %v2408_v2  ;;  %v2427_v5 = vld [vmem:[%s3569_s4 + $0x80] sm:$0xff] }
   0x3   :  { %399 = vmatpush.bf16.msra.mxu1 %v2403_v1  ;;  %727 = vmatpush.bf16.msra.mxu3 %v2398_v0  ;;  %v1759_v6 = vld [vmem:[%s3570_s0 + $0x8] sm:$0xf]  ;;  %v2257_v7 = vld [vmem:[%s3570_s0 + $0x10] sm:$0xf0]  ;;  %v2455_v11 = vld [vmem:[%s3569_s4 + $0x20] sm:$0xff] }
   0x4   :  { %v1760_v8 = vor.u32 %v2257_v7, %v1759_v6  ;;  %v2440_v9 = vld [vmem:[%s3569_s4 + $0x28] sm:$0xff]  ;;  %v2462_v12 = vld [vmem:[%s3569_s4 + $0x60] sm:$0xff]  ;;  %v2469_v13 = vld [vmem:[%s3569_s4 + $0x18] sm:$0xff] }
   0x5   :  { %v2447_v10 = vld [vmem:[%s3569_s4 + $0x68] sm:$0xff]  ;;  %v2476_v14 = vld [vmem:[%s3569_s4 + $0x58] sm:$0xff]  ;;  %v2483_v15 = vld [vmem:[%s3569_s4 + $0x10] sm:$0xff] }
   0x6   :  { %351 = vmatpush.bf16.msra.mxu0 %v2415_v3  ;;  %455 = vmatpush.bf16.msra.mxu2 %v2427_v5  ;;  %v2490_v16 = vld [vmem:[%s3569_s4 + $0x50] sm:$0xff]  ;;  %v1771_v17 = vld [vmem:[%s3570_s0 + $0x20] sm:$0xf]  ;;  %v2260_v18 = vld [vmem:[%s3570_s0 + $0x28] sm:$0xf0] }
   0x7   :  { %400 = vmatpush.bf16.msra.mxu1 %v2420_v4  ;;  %728 = vmatpush.bf16.msra.mxu3 %v2415_v3  ;;  %v1772_v19 = vor.u32 %v2260_v18, %v1771_v17  ;;  %v2503_v20 = vld [vmem:[%s3569_s4 + $0x8] sm:$0xff]  ;;  %v2516_v22 = vld [vmem:[%s3569_s4] sm:$0xff]  ;;  %v1753_v27 = vld [vmem:[%s3570_s0 + $0xc] sm:$0xf0] }
   0x8   :  { %v2510_v21 = vld [vmem:[%s3569_s4 + $0x48] sm:$0xff]  ;;  %v2521_v23 = vld [vmem:[%s3569_s4 + $0x40] sm:$0xff]  ;;  %v1783_v33 = vld [vmem:[%s3570_s0 + $0x38] sm:$0xf] }
   0x9   :  { %1917 = vmatmul.msk.bf16.vlgmr.msra.gmra.mxu2 %vm325_vm0, %v1760_v8  ;;  %v1751_v24 = vld [vmem:[%s3570_s0] sm:$0xf]  ;;  %v2256_v25 = vld [vmem:[%s3570_s0 + $0x8] sm:$0xf0]  ;;  %v2255_v26 = vld [vmem:[%s3570_s0 + $0x4] sm:$0xf] }
   0xa   :  { %776 = vmatpush.bf16.msrb.mxu2 %v2403_v1  ;;  %352 = vmatpush.bf16.msra.mxu0 %v2440_v9  ;;  %v1927_v28 = vld [vmem:[%s3571_s1] sm:$0xf]  ;;  %v2280_v29 = vld [vmem:[%s3571_s1 + $0x8] sm:$0xf0]  ;;  %v1752_v30 = vor.u32 %v2256_v25, %v1751_v24  ;;  %v1756_v31 = vor.u32 %v2255_v26, %v1753_v27  ;;  %v2263_v34 = vld [vmem:[%s3570_s0 + $0x40] sm:$0xf0] }
   0xb   :  { %401 = vmatpush.bf16.msra.mxu1 %v2447_v10  ;;  %729 = vmatpush.bf16.msra.mxu3 %v2440_v9  ;;  %v1928_v32 = vor.u32 %v2280_v29, %v1927_v28  ;;  %v1784_v35 = vor.u32 %v2263_v34, %v1783_v33  ;;  %v1763_v36 = vld [vmem:[%s3570_s0 + $0x18] sm:$0xf]  ;;  %v2259_v37 = vld [vmem:[%s3570_s0 + $0x20] sm:$0xf0]  ;;  %v2258_v38 = vld [vmem:[%s3570_s0 + $0x1c] sm:$0xf] }
   0xc   :  { %v1765_v39 = vld [vmem:[%s3570_s0 + $0x24] sm:$0xf0]  ;;  %v1939_v40 = vld [vmem:[%s3571_s1 + $0x18] sm:$0xf]  ;;  %v2283_v41 = vld [vmem:[%s3571_s1 + $0x20] sm:$0xf0]  ;;  %v1764_v42 = vor.u32 %v2259_v37, %v1763_v36 }
   0xd   :  { %v1768_v43 = vor.u32 %v2258_v38, %v1765_v39  ;;  %v1940_v44 = vor.u32 %v2283_v41, %v1939_v40  ;;  %v1795_v45 = vld [vmem:[%s3570_s0 + $0x50] sm:$0xf]  ;;  %v2266_v46 = vld [vmem:[%s3570_s0 + $0x58] sm:$0xf0]  ;;  %v2261_v50 = vld [vmem:[%s3570_s0 + $0x34] sm:$0xf] }
   0xe   :  { %777 = vmatpush.bf16.msrb.mxu2 %v2420_v4  ;;  %353 = vmatpush.bf16.msra.mxu0 %v2455_v11  ;;  %v1796_v47 = vor.u32 %v2266_v46, %v1795_v45  ;;  %v1775_v48 = vld [vmem:[%s3570_s0 + $0x30] sm:$0xf]  ;;  %v2262_v49 = vld [vmem:[%s3570_s0 + $0x38] sm:$0xf0]  ;;  %v1777_v51 = vld [vmem:[%s3570_s0 + $0x3c] sm:$0xf0] }
   0xf   :  { %402 = vmatpush.bf16.msra.mxu1 %v2462_v12  ;;  %730 = vmatpush.bf16.msra.mxu3 %v2455_v11  ;;  %v1951_v52 = vld [vmem:[%s3571_s1 + $0x30] sm:$0xf]  ;;  %v2286_v53 = vld [vmem:[%s3571_s1 + $0x38] sm:$0xf0]  ;;  %v1776_v54 = vor.u32 %v2262_v49, %v1775_v48  ;;  %v1780_v55 = vor.u32 %v2261_v50, %v1777_v51  ;;  %v1807_v57 = vld [vmem:[%s3570_s0 + $0x68] sm:$0xf] }
  0x10   :  { %v1952_v56 = vor.u32 %v2286_v53, %v1951_v52  ;;  %v2269_v58 = vld [vmem:[%s3570_s0 + $0x70] sm:$0xf0]  ;;  %v1787_v60 = vld [vmem:[%s3570_s0 + $0x48] sm:$0xf]  ;;  %v2264_v62 = vld [vmem:[%s3570_s0 + $0x4c] sm:$0xf] }
  0x11   :  { %v1808_v59 = vor.u32 %v2269_v58, %v1807_v57  ;;  %v2265_v61 = vld [vmem:[%s3570_s0 + $0x50] sm:$0xf0]  ;;  %v1789_v63 = vld [vmem:[%s3570_s0 + $0x54] sm:$0xf0]  ;;  %v2272_v6 = vld [vmem:[%s3570_s0 + $0x88] sm:$0xf0] }
  0x12   :  { %778 = vmatpush.bf16.msrb.mxu2 %v2447_v10  ;;  %354 = vmatpush.bf16.msra.mxu0 %v2469_v13  ;;  %v1799_v8 = vld [vmem:[%s3570_s0 + $0x60] sm:$0xf]  ;;  %v1831_v17 = vld [vmem:[%s3570_s0 + $0x98] sm:$0xf]  ;;  %v2275_v18 = vld [vmem:[%s3570_s0 + $0xa0] sm:$0xf0] }
  0x13   :  { %403 = vmatpush.bf16.msra.mxu1 %v2476_v14  ;;  %731 = vmatpush.bf16.msra.mxu3 %v2469_v13  ;;  %v1987_v24 = vld [vmem:[%s3571_s1 + $0x78] sm:$0xf]  ;;  %v2295_v25 = vld [vmem:[%s3571_s1 + $0x80] sm:$0xf0]  ;;  %v1843_v29 = vld [vmem:[%s3570_s0 + $0xb0] sm:$0xf] }
  0x14   :  { %v1988_v28 = vor.u32 %v2295_v25, %v1987_v24  ;;  %v2274_v33 = vld [vmem:[%s3570_s0 + $0x98] sm:$0xf0]  ;;  %v2273_v34 = vld [vmem:[%s3570_s0 + $0x94] sm:$0xf]  ;;  %v1999_v36 = vld [vmem:[%s3571_s1 + $0x90] sm:$0xf] }
  0x15   :  { %v2298_v37 = vld [vmem:[%s3571_s1 + $0x98] sm:$0xf0]  ;;  %v2279_v41 = vld [vmem:[%s3571_s1 + $0x4] sm:$0xf]  ;;  %v2277_v45 = vld [vmem:[%s3570_s0 + $0xb0] sm:$0xf0] }
  0x16   :  { %779 = vmatpush.bf16.msrb.mxu2 %v2462_v12  ;;  %355 = vmatpush.bf16.msra.mxu0 %v2483_v15  ;;  %v2000_v40 = vor.u32 %v2298_v37, %v1999_v36  ;;  %v2276_v46 = vld [vmem:[%s3570_s0 + $0xac] sm:$0xf]  ;;  %v2011_v48 = vld [vmem:[%s3571_s1 + $0xa8] sm:$0xf]  ;;  %v2301_v49 = vld [vmem:[%s3571_s1 + $0xb0] sm:$0xf0] }
  0x17   :  { %404 = vmatpush.bf16.msra.mxu1 %v2490_v16  ;;  %732 = vmatpush.bf16.msra.mxu3 %v2483_v15  ;;  %v2012_v53 = vor.u32 %v2301_v49, %v2011_v48  ;;  %v1935_v58 = vld [vmem:[%s3571_s1 + $0x8] sm:$0xf] }
  0x19   :  { %1918 = vmatmul.msk.bf16.gmra.mxu2 %vm325_vm0, %v1772_v19  ;;  %v1832_v19 = vor.u32 %v2275_v18, %v1831_v17  ;;  %v1947_v17 = vld [vmem:[%s3571_s1 + $0x20] sm:$0xf]  ;;  %v2284_v18 = vld [vmem:[%s3571_s1 + $0x28] sm:$0xf0] }
  0x1a   :  { %780 = vmatpush.bf16.msrb.mxu2 %v2476_v14  ;;  %356 = vmatpush.bf16.msra.mxu0 %v2503_v20  ;;  %v1948_v25 = vor.u32 %v2284_v18, %v1947_v17 }
  0x1b   :  { %405 = vmatpush.bf16.msra.mxu1 %v2510_v21  ;;  %733 = vmatpush.bf16.msra.mxu3 %v2503_v20 }
  0x1e   :  { %781 = vmatpush.bf16.msrb.mxu2 %v2490_v16  ;;  %357 = vmatpush.bf16.msra.mxu0 %v2516_v22 }
  0x1f   :  { %406 = vmatpush.bf16.msra.mxu1 %v2521_v23  ;;  %734 = vmatpush.bf16.msra.mxu3 %v2516_v22 }
  0x21   :  { %358 = vmatmul.bf16.vlgmr.msra.gmra.mxu0 %v1752_v30  ;;  %v2278_v30 = vld [vmem:[%s3570_s0 + $0xb8] sm:$0xf0] }
  0x22   :  { %831 = vmatpush.bf16.msrb.mxu0 %v2408_v2  ;;  %407 = vmatmul.bf16.vlgmr.msra.gmra.mxu1 %v1756_v31  ;;  %v1844_v31 = vor.u32 %v2278_v30, %v1843_v29 }
  0x23   :  { %1163 = vmatpush.bf16.msrb.mxu3 %v2403_v1  ;;  %1114 = vmatpush.bf16.msrb.mxu1 %v2398_v0 }
  0x24   :  { %735 = vmatmul.bf16.vlgmr.msra.gmra.mxu3 %v1928_v32  ;;  %782 = vmatpush.bf16.msrb.mxu2 %v2510_v21  ;;  %v1823_v32 = vld [vmem:[%s3570_s0 + $0x90] sm:$0xf] }
  0x25   :  { %v1824_v38 = vor.u32 %v2274_v33, %v1823_v32  ;;  %v2288_v32 = vld [vmem:[%s3571_s1 + $0x4c] sm:$0xf]  ;;  %v1965_v33 = vld [vmem:[%s3571_s1 + $0x54] sm:$0xf0] }
  0x26   :  { %832 = vmatpush.bf16.msrb.mxu0 %v2427_v5  ;;  %v1968_v37 = vor.u32 %v2288_v32, %v1965_v33  ;;  %v2079_v32 = vld [vmem:[%s3574_s2 + $0x60] sm:$0xf]  ;;  %v2316_v33 = vld [vmem:[%s3574_s2 + $0x68] sm:$0xf0] }
  0x27   :  { %1164 = vmatpush.bf16.msrb.mxu3 %v2420_v4  ;;  %1115 = vmatpush.bf16.msrb.mxu1 %v2415_v3 }
  0x28   :  { %783 = vmatpush.bf16.msrb.mxu2 %v2521_v23 }
  0x29   :  { %1919 = vmatmul.msk.bf16.gmra.mxu2 %vm325_vm0, %v1784_v35  ;;  %v1825_v35 = vld [vmem:[%s3570_s0 + $0x9c] sm:$0xf0] }
  0x2a   :  { %1485 = vmatpush.bf16.msra.mxu0 %v2398_v0  ;;  %v1963_v0 = vld [vmem:[%s3571_s1 + $0x48] sm:$0xf]  ;;  %v1828_v39 = vor.u32 %v2273_v34, %v1825_v35 }
  0x2b   :  { %1165 = vmatpush.bf16.msrb.mxu3 %v2447_v10  ;;  %1116 = vmatpush.bf16.msrb.mxu1 %v2440_v9 }
  0x2c   :  { %1218 = vmatpush.bf16.msra.mxu2 %v2408_v2 }
  0x2e   :  { %1486 = vmatpush.bf16.msra.mxu0 %v2415_v3  ;;  %v1792_v3 = vor.u32 %v2264_v62, %v1789_v63  ;;  %v2303_v62 = vld [vmem:[%s3574_s2 + $0x4] sm:$0xf]  ;;  %v2033_v63 = vld [vmem:[%s3574_s2 + $0xc] sm:$0xf0] }
  0x2f   :  { %1166 = vmatpush.bf16.msrb.mxu3 %v2462_v12  ;;  %1117 = vmatpush.bf16.msrb.mxu1 %v2455_v11 }
  0x30   :  { %1219 = vmatpush.bf16.msra.mxu2 %v2427_v5 }
  0x31   :  { %363 = vmatmul.bf16.gmra.mxu0 %v1764_v42  ;;  %v1929_v42 = vld [vmem:[%s3571_s1 + $0xc] sm:$0xf0] }
  0x32   :  { %1487 = vmatpush.bf16.msra.mxu0 %v2440_v9  ;;  %412 = vmatmul.bf16.gmra.mxu1 %v1768_v43  ;;  %v2268_v9 = vld [vmem:[%s3570_s0 + $0x68] sm:$0xf0]  ;;  %v1932_v43 = vor.u32 %v2279_v41, %v1929_v42  ;;  %v1959_v41 = vld [vmem:[%s3571_s1 + $0x38] sm:$0xf]  ;;  %v2287_v42 = vld [vmem:[%s3571_s1 + $0x40] sm:$0xf0] }
  0x33   :  { %1167 = vmatpush.bf16.msrb.mxu3 %v2476_v14  ;;  %1118 = vmatpush.bf16.msrb.mxu1 %v2469_v13  ;;  %v1960_v49 = vor.u32 %v2287_v42, %v1959_v41  ;;  %v2080_v42 = vor.u32 %v2316_v33, %v2079_v32  ;;  %v2322_v32 = vld [vmem:[%s3574_s2 + $0x98] sm:$0xf0]  ;;  %v2321_v33 = vld [vmem:[%s3574_s2 + $0x94] sm:$0xf] }
  0x34   :  { %740 = vmatmul.bf16.gmra.mxu3 %v1940_v44  ;;  %v1835_v44 = vld [vmem:[%s3570_s0 + $0xa8] sm:$0xf] }
  0x35   :  { %v1836_v51 = vor.u32 %v2277_v45, %v1835_v44  ;;  %v2310_v44 = vld [vmem:[%s3574_s2 + $0x38] sm:$0xf0]  ;;  %v2309_v45 = vld [vmem:[%s3574_s2 + $0x34] sm:$0xf] }
  0x36   :  { %1488 = vmatpush.bf16.msra.mxu0 %v2455_v11  ;;  %v1801_v11 = vld [vmem:[%s3570_s0 + $0x6c] sm:$0xf0] }
  0x37   :  { %1168 = vmatpush.bf16.msrb.mxu3 %v2490_v16  ;;  %1119 = vmatpush.bf16.msrb.mxu1 %v2483_v15 }
  0x39   :  { %1920 = vmatmul.msk.bf16.gmra.mxu2 %vm325_vm0, %v1796_v47  ;;  %v1837_v47 = vld [vmem:[%s3570_s0 + $0xb4] sm:$0xf0] }
  0x3a   :  { %1489 = vmatpush.bf16.msra.mxu0 %v2469_v13  ;;  %v2292_v13 = vld [vmem:[%s3571_s1 + $0x68] sm:$0xf0]  ;;  %v1840_v52 = vor.u32 %v2276_v46, %v1837_v47  ;;  %v2057_v46 = vld [vmem:[%s3574_s2 + $0x3c] sm:$0xf0] }
  0x3b   :  { %1169 = vmatpush.bf16.msrb.mxu3 %v2510_v21  ;;  %1120 = vmatpush.bf16.msrb.mxu1 %v2503_v20 }
  0x3e   :  { %1490 = vmatpush.bf16.msra.mxu0 %v2483_v15 }
  0x3f   :  { %1170 = vmatpush.bf16.msrb.mxu3 %v2521_v23  ;;  %1121 = vmatpush.bf16.msrb.mxu1 %v2516_v22 }
  0x41   :  { %368 = vmatmul.bf16.gmra.mxu0 %v1776_v54  ;;  %v2282_v54 = vld [vmem:[%s3571_s1 + $0x1c] sm:$0xf] }
  0x42   :  { %1491 = vmatpush.bf16.msra.mxu0 %v2503_v20  ;;  %417 = vmatmul.bf16.gmra.mxu1 %v1780_v55  ;;  %v1811_v20 = vld [vmem:[%s3570_s0 + $0x78] sm:$0xf]  ;;  %v1941_v55 = vld [vmem:[%s3571_s1 + $0x24] sm:$0xf0] }
  0x43   :  { %1589 = vmatpush.bf16.msra.mxu3 %v2408_v2  ;;  %1534 = vmatpush.bf16.msra.mxu1 %v2403_v1  ;;  %v2289_v1 = vld [vmem:[%s3571_s1 + $0x50] sm:$0xf0]  ;;  %v1788_v2 = vor.u32 %v2265_v61, %v1787_v60  ;;  %v1944_v57 = vor.u32 %v2282_v54, %v1941_v55  ;;  %v2031_v60 = vld [vmem:[%s3574_s2] sm:$0xf]  ;;  %v2304_v61 = vld [vmem:[%s3574_s2 + $0x8] sm:$0xf0] }
  0x44   :  { %745 = vmatmul.bf16.gmra.mxu3 %v1952_v56 }
  0x46   :  { %1492 = vmatpush.bf16.msra.mxu0 %v2516_v22  ;;  %v2270_v22 = vld [vmem:[%s3570_s0 + $0x7c] sm:$0xf] }
  0x47   :  { %1590 = vmatpush.bf16.msra.mxu3 %v2427_v5  ;;  %1535 = vmatpush.bf16.msra.mxu1 %v2420_v4  ;;  %v1964_v4 = vor.u32 %v2289_v1, %v1963_v0  ;;  %v1819_v5 = vld [vmem:[%s3570_s0 + $0x80] sm:$0xf] }
  0x48   :  { %v1820_v7 = vor.u32 %v2272_v6, %v1819_v5 }
  0x49   :  { %1921 = vmatmul.msk.bf16.gmra.mxu2 %vm325_vm0, %v1808_v59  ;;  %v2281_v59 = vld [vmem:[%s3571_s1 + $0x10] sm:$0xf0] }
  0x4a   :  { %v1936_v1 = vor.u32 %v2281_v59, %v1935_v58 }
  0x4b   :  { %1536 = vmatpush.bf16.msra.mxu1 %v2447_v10  ;;  %v2267_v10 = vld [vmem:[%s3570_s0 + $0x64] sm:$0xf] }
  0x4c   :  { %v1804_v15 = vor.u32 %v2267_v10, %v1801_v11 }
  0x4f   :  { %1537 = vmatpush.bf16.msra.mxu1 %v2462_v12  ;;  %v1975_v12 = vld [vmem:[%s3571_s1 + $0x60] sm:$0xf] }
  0x51   :  { %373 = vmatmul.bf16.gmra.mxu0 %v1788_v2 }
  0x52   :  { %422 = vmatmul.bf16.gmra.mxu1 %v1792_v3  ;;  %v2032_v3 = vor.u32 %v2304_v61, %v2031_v60 }
  0x53   :  { %1538 = vmatpush.bf16.msra.mxu1 %v2476_v14  ;;  %v1800_v14 = vor.u32 %v2268_v9, %v1799_v8  ;;  %v2285_v8 = vld [vmem:[%s3571_s1 + $0x34] sm:$0xf]  ;;  %v1953_v9 = vld [vmem:[%s3571_s1 + $0x3c] sm:$0xf0] }
  0x54   :  { %750 = vmatmul.bf16.gmra.mxu3 %v1964_v4  ;;  %v2036_v4 = vor.u32 %v2303_v62, %v2033_v63 }
  0x57   :  { %1539 = vmatpush.bf16.msra.mxu1 %v2490_v16  ;;  %v1976_v16 = vor.u32 %v2292_v13, %v1975_v12  ;;  %v1956_v13 = vor.u32 %v2285_v8, %v1953_v9 }
  0x59   :  { %1922 = vmatmul.msk.bf16.gmra.mxu2 %vm325_vm0, %v1820_v7 }
  0x5b   :  { %1540 = vmatpush.bf16.msra.mxu1 %v2510_v21  ;;  %v2271_v21 = vld [vmem:[%s3570_s0 + $0x80] sm:$0xf0] }
  0x5c   :  { %v1812_v26 = vor.u32 %v2271_v21, %v1811_v20  ;;  %v2307_v20 = vld [vmem:[%s3574_s2 + $0x20] sm:$0xf0]  ;;  %v2306_v21 = vld [vmem:[%s3574_s2 + $0x1c] sm:$0xf] }
  0x5f   :  { %1541 = vmatpush.bf16.msra.mxu1 %v2521_v23  ;;  %v1813_v23 = vld [vmem:[%s3570_s0 + $0x84] sm:$0xf0] }
  0x60   :  { %v1816_v27 = vor.u32 %v2270_v22, %v1813_v23  ;;  %v2045_v22 = vld [vmem:[%s3574_s2 + $0x24] sm:$0xf0] }
  0x61   :  { %378 = vmatmul.bf16.gmra.mxu0 %v1800_v14 }
  0x62   :  { %427 = vmatmul.bf16.gmra.mxu1 %v1804_v15 }
  0x64   :  { %755 = vmatmul.bf16.gmra.mxu3 %v1976_v16 }
  0x69   :  { %1923 = vmatmul.msk.bf16.gmra.mxu2 %vm325_vm0, %v1832_v19  ;;  %v2043_v19 = vld [vmem:[%s3574_s2 + $0x18] sm:$0xf] }
  0x71   :  { %383 = vmatmul.bf16.gmra.mxu0 %v1812_v26 }
  0x72   :  { %432 = vmatmul.bf16.gmra.mxu1 %v1816_v27  ;;  %v2044_v27 = vor.u32 %v2307_v20, %v2043_v19  ;;  %v2294_v19 = vld [vmem:[%s3571_s1 + $0x7c] sm:$0xf]  ;;  %v1989_v20 = vld [vmem:[%s3571_s1 + $0x84] sm:$0xf0] }
  0x74   :  { %760 = vmatmul.bf16.gmra.mxu3 %v1988_v28  ;;  %v2048_v28 = vor.u32 %v2306_v21, %v2045_v22 }
  0x79   :  { %1924 = vmatmul.msk.bf16.gmra.mxu2 %vm325_vm0, %v1844_v31 }
  0x81   :  { %388 = vmatmul.bf16.gmra.mxu0 %v1824_v38 }
  0x82   :  { %437 = vmatmul.bf16.gmra.mxu1 %v1828_v39 }
  0x84   :  { %765 = vmatmul.bf16.gmra.mxu3 %v2000_v40 }
  0x89   :  { %784 = vmatmul.bf16.vlgmr.msrb.gmra.mxu2 %v1932_v43  ;;  %v2055_v43 = vld [vmem:[%s3574_s2 + $0x30] sm:$0xf] }
  0x8c   :  { %v457_v50 = vpop.f32.mrf.mxu2 }
  0x91   :  { %393 = vmatmul.bf16.gmra.mxu0 %v1836_v51  ;;  %v2056_v51 = vor.u32 %v2310_v44, %v2055_v43 }
  0x92   :  { %442 = vmatmul.bf16.gmra.mxu1 %v1840_v52  ;;  %v2060_v52 = vor.u32 %v2309_v45, %v2057_v46 }
  0x94   :  { %770 = vmatmul.bf16.gmra.mxu3 %v2012_v53  ;;  %v459_v56 = vpop.f32.mrf.mxu2 }
  0x99   :  { %789 = vmatmul.bf16.gmra.mxu2 %v1944_v57  ;;  %v1977_v57 = vld [vmem:[%s3571_s1 + $0x6c] sm:$0xf0] }
  0x9c   :  { %v462_v0 = vpop.f32.mrf.mxu2 }
  0x9e   :  { %v359_v2 = vpop.f32.mrf.mxu0 }
  0x9f   :  { %v408_v5 = vpop.f32.mrf.mxu1 }
  0xa0   :  { %v409_v6 = vadd.f32 %v408_v5, %v359_v2  ;;  %v2290_v2 = vld [vmem:[%s3571_s1 + $0x58] sm:$0xf0]  ;;  %v2312_v5 = vld [vmem:[%s3574_s2 + $0x4c] sm:$0xf] }
  0xa1   :  { %2021 = vmatmul.msk.bf16.vlgmr.msrb.gmra.mxu0 %vm325_vm0, %v1936_v1  ;;  %v1971_v1 = vld [vmem:[%s3571_s1 + $0x50] sm:$0xf] }
  0xa2   :  { %v2788_v7 = vadd.f32 %v457_v50, %v409_v6  ;;  %1122 = vmatmul.bf16.vlgmr.msrb.gmra.mxu1 %v2032_v3  ;;  %v2067_v3 = vld [vmem:[%s3574_s2 + $0x48] sm:$0xf]  ;;  %v2069_v6 = vld [vmem:[%s3574_s2 + $0x54] sm:$0xf0] }
  0xa4   :  { %1171 = vmatmul.bf16.vlgmr.msrb.gmra.mxu3 %v2036_v4  ;;  %v464_v10 = vpop.f32.mrf.mxu2  ;;  %v2313_v4 = vld [vmem:[%s3574_s2 + $0x50] sm:$0xf0] }
  0xa6   :  { %v361_v12 = vpop.f32.mrf.mxu0 }
  0xa7   :  { %v2796_v11 = vpop.f32.mrf.mxu3  ;;  %v410_v14 = vpop.f32.mrf.mxu1 }
  0xa8   :  { %v411_v15 = vadd.f32 %v410_v14, %v361_v12  ;;  %v2072_v14 = vor.u32 %v2312_v5, %v2069_v6 }
  0xa9   :  { %794 = vmatmul.bf16.gmra.mxu2 %v1956_v13  ;;  %v2068_v13 = vor.u32 %v2313_v4, %v2067_v3 }
  0xaa   :  { %v2798_v16 = vadd.f32 %v459_v56, %v411_v15  ;;  %v2291_v56 = vld [vmem:[%s3571_s1 + $0x64] sm:$0xf] }
  0xab   :  { %v1980_v61 = vor.u32 %v2291_v56, %v1977_v57 }
  0xac   :  { %v467_v23 = vpop.f32.mrf.mxu2 }
  0xae   :  { %v364_v26 = vpop.f32.mrf.mxu0 }
  0xaf   :  { %v2818_v24 = vpop.f32.mrf.mxu3  ;;  %v413_v29 = vpop.f32.mrf.mxu1 }
  0xb0   :  { %v414_v30 = vadd.f32 %v413_v29, %v364_v26  ;;  %v1983_v29 = vld [vmem:[%s3571_s1 + $0x68] sm:$0xf] }
  0xb1   :  { %2022 = vmatmul.msk.bf16.gmra.mxu0 %vm325_vm0, %v1948_v25  ;;  %v1992_v25 = vor.u32 %v2294_v19, %v1989_v20 }
  0xb2   :  { %v2821_v31 = vadd.f32 %v462_v0, %v414_v30  ;;  %1127 = vmatmul.bf16.gmra.mxu1 %v2044_v27  ;;  %v2293_v30 = vld [vmem:[%s3571_s1 + $0x70] sm:$0xf0] }
  0xb4   :  { %1176 = vmatmul.bf16.gmra.mxu3 %v2048_v28  ;;  %v469_v34 = vpop.f32.mrf.mxu2 }
  0xb6   :  { %v366_v36 = vpop.f32.mrf.mxu0 }
  0xb7   :  { %v2829_v35 = vpop.f32.mrf.mxu3  ;;  %v415_v38 = vpop.f32.mrf.mxu1 }
  0xb8   :  { %v416_v39 = vadd.f32 %v415_v38, %v366_v36  ;;  %v2081_v36 = vld [vmem:[%s3574_s2 + $0x6c] sm:$0xf0] }
  0xb9   :  { %799 = vmatmul.bf16.gmra.mxu2 %v1968_v37 }
  0xba   :  { %v2831_v40 = vadd.f32 %v464_v10, %v416_v39  ;;  %v1972_v10 = vor.u32 %v2290_v2, %v1971_v1  ;;  %v1984_v39 = vor.u32 %v2293_v30, %v1983_v29  ;;  %v2093_v1 = vld [vmem:[%s3574_s2 + $0x84] sm:$0xf0]  ;;  %v2299_v29 = vld [vmem:[%s3571_s1 + $0xa0] sm:$0xf0]  ;;  %v2103_v30 = vld [vmem:[%s3574_s2 + $0x90] sm:$0xf] }
  0xbc   :  { %v472_v47 = vpop.f32.mrf.mxu2 }
  0xbe   :  { %v369_v50 = vpop.f32.mrf.mxu0 }
  0xbf   :  { %v2851_v48 = vpop.f32.mrf.mxu3  ;;  %v418_v53 = vpop.f32.mrf.mxu1 }
  0xc0   :  { %v419_v54 = vadd.f32 %v418_v53, %v369_v50 }
  0xc1   :  { %2023 = vmatmul.msk.bf16.gmra.mxu0 %vm325_vm0, %v1960_v49  ;;  %v2001_v49 = vld [vmem:[%s3571_s1 + $0x9c] sm:$0xf0] }
  0xc2   :  { %v2854_v55 = vadd.f32 %v467_v23, %v419_v54  ;;  %1132 = vmatmul.bf16.gmra.mxu1 %v2056_v51 }
  0xc4   :  { %1181 = vmatmul.bf16.gmra.mxu3 %v2060_v52  ;;  %v474_v58 = vpop.f32.mrf.mxu2 }
  0xc6   :  { %v371_v60 = vpop.f32.mrf.mxu0 }
  0xc7   :  { %v2862_v59 = vpop.f32.mrf.mxu3  ;;  %v420_v62 = vpop.f32.mrf.mxu1 }
  0xc8   :  { %v421_v63 = vadd.f32 %v420_v62, %v371_v60  ;;  %v2296_v60 = vld [vmem:[%s3571_s1 + $0x88] sm:$0xf0]  ;;  %v2319_v62 = vld [vmem:[%s3574_s2 + $0x80] sm:$0xf0] }
  0xc9   :  { %804 = vmatmul.bf16.gmra.mxu2 %v1980_v61  ;;  %v2091_v61 = vld [vmem:[%s3574_s2 + $0x78] sm:$0xf] }
  0xca   :  { %v2864_v0 = vadd.f32 %v469_v34, %v421_v63  ;;  %v2315_v34 = vld [vmem:[%s3574_s2 + $0x64] sm:$0xf]  ;;  %v2318_v63 = vld [vmem:[%s3574_s2 + $0x7c] sm:$0xf]  ;;  %v2092_v6 = vor.u32 %v2319_v62, %v2091_v61  ;;  %v2019_v62 = vld [vmem:[%s3571_s1 + $0xb0] sm:$0xf] }
  0xcb   :  { %v2084_v43 = vor.u32 %v2315_v34, %v2081_v36  ;;  %v2105_v34 = vld [vmem:[%s3574_s2 + $0x9c] sm:$0xf0] }
  0xcc   :  { %v477_v8 = vpop.f32.mrf.mxu2 }
  0xce   :  { %v374_v12 = vpop.f32.mrf.mxu0 }
  0xcf   :  { %v2884_v9 = vpop.f32.mrf.mxu3  ;;  %v423_v15 = vpop.f32.mrf.mxu1 }
  0xd0   :  { %v424_v17 = vadd.f32 %v423_v15, %v374_v12  ;;  %v2013_v15 = vld [vmem:[%s3571_s1 + $0xb4] sm:$0xf0] }
  0xd1   :  { %2024 = vmatmul.msk.bf16.gmra.mxu0 %vm325_vm0, %v1972_v10 }
  0xd2   :  { %v2887_v18 = vadd.f32 %v472_v47, %v424_v17  ;;  %1137 = vmatmul.bf16.gmra.mxu1 %v2068_v13  ;;  %v2297_v47 = vld [vmem:[%s3571_s1 + $0x94] sm:$0xf] }
  0xd3   :  { %v2004_v53 = vor.u32 %v2297_v47, %v2001_v49  ;;  %v2039_v49 = vld [vmem:[%s3574_s2 + $0x8] sm:$0xf] }
  0xd4   :  { %1186 = vmatmul.bf16.gmra.mxu3 %v2072_v14  ;;  %v479_v21 = vpop.f32.mrf.mxu2  ;;  %v2300_v14 = vld [vmem:[%s3571_s1 + $0xac] sm:$0xf] }
  0xd6   :  { %v376_v23 = vpop.f32.mrf.mxu0 }
  0xd7   :  { %v2895_v22 = vpop.f32.mrf.mxu3  ;;  %v425_v26 = vpop.f32.mrf.mxu1 }
  0xd8   :  { %v426_v27 = vadd.f32 %v425_v26, %v376_v23 }
  0xd9   :  { %809 = vmatmul.bf16.gmra.mxu2 %v1992_v25 }
  0xda   :  { %v2897_v28 = vadd.f32 %v474_v58, %v426_v27  ;;  %v1995_v58 = vld [vmem:[%s3571_s1 + $0x80] sm:$0xf]  ;;  %v2007_v27 = vld [vmem:[%s3571_s1 + $0x98] sm:$0xf] }
  0xdb   :  { %v1996_v4 = vor.u32 %v2296_v60, %v1995_v58 }
  0xdc   :  { %v482_v37 = vpop.f32.mrf.mxu2 }
  0xde   :  { %v379_v41 = vpop.f32.mrf.mxu0 }
  0xdf   :  { %v2917_v38 = vpop.f32.mrf.mxu3  ;;  %v428_v44 = vpop.f32.mrf.mxu1 }
  0xe0   :  { %v429_v45 = vadd.f32 %v428_v44, %v379_v41 }
  0xe1   :  { %2025 = vmatmul.msk.bf16.gmra.mxu0 %vm325_vm0, %v1984_v39  ;;  %v2008_v39 = vor.u32 %v2299_v29, %v2007_v27 }
  0xe2   :  { %v2920_v46 = vadd.f32 %v477_v8, %v429_v45  ;;  %1142 = vmatmul.bf16.gmra.mxu1 %v2080_v42  ;;  %v2096_v8 = vor.u32 %v2318_v63, %v2093_v1  ;;  %v2104_v42 = vor.u32 %v2322_v32, %v2103_v30  ;;  %v2302_v63 = vld [vmem:[%s3571_s1 + $0xb8] sm:$0xf0]  ;;  %v2115_v1 = vld [vmem:[%s3574_s2 + $0xa8] sm:$0xf] }
  0xe4   :  { %1191 = vmatmul.bf16.gmra.mxu3 %v2084_v43  ;;  %v484_v50 = vpop.f32.mrf.mxu2  ;;  %v2108_v43 = vor.u32 %v2321_v33, %v2105_v34 }
  0xe6   :  { %v381_v52 = vpop.f32.mrf.mxu0 }
  0xe7   :  { %v2928_v51 = vpop.f32.mrf.mxu3  ;;  %v430_v54 = vpop.f32.mrf.mxu1 }
  0xe8   :  { %v431_v56 = vadd.f32 %v430_v54, %v381_v52 }
  0xe9   :  { %814 = vmatmul.bf16.gmra.mxu2 %v2004_v53 }
  0xea   :  { %v2930_v57 = vadd.f32 %v479_v21, %v431_v56  ;;  %v2016_v21 = vor.u32 %v2300_v14, %v2013_v15 }
  0xec   :  { %v487_v2 = vpop.f32.mrf.mxu2 }
  0xee   :  { %v384_v5 = vpop.f32.mrf.mxu0 }
  0xef   :  { %v2950_v3 = vpop.f32.mrf.mxu3  ;;  %v433_v10 = vpop.f32.mrf.mxu1 }
  0xf0   :  { %v434_v12 = vadd.f32 %v433_v10, %v384_v5  ;;  %v2117_v5 = vld [vmem:[%s3574_s2 + $0xb4] sm:$0xf0]  ;;  %v2020_v10 = vor.u32 %v2302_v63, %v2019_v62 }
  0xf1   :  { %2026 = vmatmul.msk.bf16.gmra.mxu0 %vm325_vm0, %v1996_v4  ;;  %v2324_v4 = vld [vmem:[%s3574_s2 + $0xac] sm:$0xf] }
  0xf2   :  { %v2953_v13 = vadd.f32 %v482_v37, %v434_v12  ;;  %1147 = vmatmul.bf16.gmra.mxu1 %v2092_v6  ;;  %v2120_v15 = vor.u32 %v2324_v4, %v2117_v5 }
  0xf4   :  { %1196 = vmatmul.bf16.gmra.mxu3 %v2096_v8  ;;  %v489_v17 = vpop.f32.mrf.mxu2 }
  0xf6   :  { %v386_v20 = vpop.f32.mrf.mxu0 }
  0xf7   :  { %v2961_v19 = vpop.f32.mrf.mxu3  ;;  %v435_v23 = vpop.f32.mrf.mxu1 }
  0xf8   :  { %v436_v25 = vadd.f32 %v435_v23, %v386_v20  ;;  %v2051_v23 = vld [vmem:[%s3574_s2 + $0x20] sm:$0xf] }
  0xf9   :  { %819 = vmatmul.bf16.gmra.mxu2 %v2016_v21 }
  0xfa   :  { %v2963_v26 = vadd.f32 %v484_v50, %v436_v25  ;;  %v2305_v50 = vld [vmem:[%s3574_s2 + $0x10] sm:$0xf0]  ;;  %v2308_v25 = vld [vmem:[%s3574_s2 + $0x28] sm:$0xf0] }
  0xfb   :  { %v2040_v56 = vor.u32 %v2305_v50, %v2039_v49  ;;  %v2052_v32 = vor.u32 %v2308_v25, %v2051_v23  ;;  %v2329_v49 = vld [vmem:[%s3575_s3 + $0x10] sm:$0xf0] }
  0xfc   :  { %v492_v36 = vpop.f32.mrf.mxu2 }
  0xfe   :  { %v389_v41 = vpop.f32.mrf.mxu0 }
  0xff   :  { %v2983_v37 = vpop.f32.mrf.mxu3  ;;  %v438_v44 = vpop.f32.mrf.mxu1 }
 0x100   :  { %v439_v45 = vadd.f32 %v438_v44, %v389_v41  ;;  %v2135_v41 = vld [vmem:[%s3575_s3] sm:$0xf]  ;;  %v2137_v44 = vld [vmem:[%s3575_s3 + $0xc] sm:$0xf0] }
 0x101   :  { %2027 = vmatmul.msk.bf16.gmra.mxu0 %vm325_vm0, %v2008_v39 }
 0x102   :  { %v2986_v47 = vadd.f32 %v487_v2, %v439_v45  ;;  %1152 = vmatmul.bf16.gmra.mxu1 %v2104_v42  ;;  %v2325_v2 = vld [vmem:[%s3574_s2 + $0xb0] sm:$0xf0]  ;;  %v2328_v42 = vld [vmem:[%s3575_s3 + $0x8] sm:$0xf0]  ;;  %v2143_v45 = vld [vmem:[%s3575_s3 + $0x8] sm:$0xf] }
 0x103   :  { %v2116_v14 = vor.u32 %v2325_v2, %v2115_v1  ;;  %v2144_v1 = vor.u32 %v2329_v49, %v2143_v45  ;;  %v2149_v45 = vld [vmem:[%s3575_s3 + $0x24] sm:$0xf0]  ;;  %v2155_v49 = vld [vmem:[%s3575_s3 + $0x20] sm:$0xf] }
 0x104   :  { %1201 = vmatmul.bf16.gmra.mxu3 %v2108_v43  ;;  %v494_v52 = vpop.f32.mrf.mxu2  ;;  %v2327_v43 = vld [vmem:[%s3575_s3 + $0x4] sm:$0xf] }
 0x105   :  { %v2140_v63 = vor.u32 %v2327_v43, %v2137_v44 }
 0x106   :  { %v391_v54 = vpop.f32.mrf.mxu0 }
 0x107   :  { %v2994_v53 = vpop.f32.mrf.mxu3  ;;  %v440_v58 = vpop.f32.mrf.mxu1 }
 0x108   :  { %v441_v60 = vadd.f32 %v440_v58, %v391_v54 }
 0x109   :  { %2125 = vmatmul.msk.bf16.vlgmr.msra.gmra.mxu2 %vm325_vm0, %v2040_v56 }
 0x10a   :  { %v2996_v61 = vadd.f32 %v489_v17, %v441_v60  ;;  %v2136_v60 = vor.u32 %v2328_v42, %v2135_v41 }
 0x10c   :  { %v785_v8 = vpop.f32.mrf.mxu2 }
 0x10d   :  { %v786_v54 = vadd.f32 %v785_v8, %v2796_v11  ;;  %v2063_v11 = vld [vmem:[%s3574_s2 + $0x38] sm:$0xf]  ;;  %v2311_v8 = vld [vmem:[%s3574_s2 + $0x40] sm:$0xf0] }
 0x10e   :  { %v394_v12 = vpop.f32.mrf.mxu0 }
 0x10f   :  { %v3017_v6 = vpop.f32.mrf.mxu3  ;;  %v443_v17 = vpop.f32.mrf.mxu1 }
 0x110   :  { %v444_v20 = vadd.f32 %v443_v17, %v394_v12 }
 0x111   :  { %2028 = vmatmul.msk.bf16.gmra.mxu0 %vm325_vm0, %v2020_v10 }
 0x112   :  { %v3020_v21 = vadd.f32 %v492_v36, %v444_v20  ;;  %1157 = vmatmul.bf16.gmra.mxu1 %v2116_v14  ;;  %v3033_v36 = vld [vmem:[%s3572_s5] ss:$0 sm:$0xff] }
 0x113   :  { %v500_v50 = vmul.f32 %v3033_v36, %v2788_v7  ;;  %v501_v12 = vmul.f32 %v3033_v36, %v2798_v16  ;;  %v2147_v16 = vld [vmem:[%s3575_s3 + $0x18] sm:$0xf] }
 0x114   :  { %1206 = vmatmul.bf16.gmra.mxu3 %v2120_v15  ;;  %v787_v29 = vpop.f32.mrf.mxu2 }
 0x115   :  { %v788_v15 = vadd.f32 %v787_v29, %v2818_v24  ;;  %v2331_v24 = vld [vmem:[%s3575_s3 + $0x20] sm:$0xf0]  ;;  %v2330_v29 = vld [vmem:[%s3575_s3 + $0x1c] sm:$0xf] }
 0x116   :  { %v396_v30 = vpop.f32.mrf.mxu0 }
 0x117   :  { %v3028_v27 = vpop.f32.mrf.mxu3  ;;  %v445_v33 = vpop.f32.mrf.mxu1 }
 0x118   :  { %v446_v34 = vadd.f32 %v445_v33, %v396_v30 }
 0x119   :  { %2126 = vmatmul.msk.bf16.gmra.mxu2 %vm325_vm0, %v2052_v32  ;;  %v2064_v32 = vor.u32 %v2311_v8, %v2063_v11 }
 0x11a   :  { %v3035_v39 = vadd.f32 %v494_v52, %v446_v34  ;;  %v3061_v52 = vld [vmem:[%s3573_s6] ss:$0 sm:$0xff] }
 0x11b   :  { %v519_v5 = vadd.f32 %v3061_v52, %v500_v50  ;;  %v520_v42 = vadd.f32 %v3061_v52, %v501_v12  ;;  %v2332_v50 = vld [vmem:[%s3575_s3 + $0x28] sm:$0xf0] }
 0x11c   :  { %v790_v58 = vpop.f32.mrf.mxu2  ;;  %v2156_v11 = vor.u32 %v2332_v50, %v2155_v49 }
 0x11d   :  { %v535_v14 = vmax.f32 %v519_v5, 0.0 }
 0x11e   :  { %v834_v62 = vpop.f32.mrf.mxu0 }
 0x11f   :  { %v3064_v56 = vpop.f32.mrf.mxu3  ;;  %v835_v2 = vadd.f32 %v834_v62, %v786_v54  ;;  %v1123_v4 = vpop.f32.mrf.mxu1  ;;  %v536_v54 = vmax.f32 %v520_v42, 0.0  ;;  %v791_v62 = vadd.f32 %v790_v58, %v2829_v35  ;;  %v2075_v35 = vld [vmem:[%s3574_s2 + $0x50] sm:$0xf]  ;;  %v2314_v58 = vld [vmem:[%s3574_s2 + $0x58] sm:$0xf0] }
 0x121   :  { %v874_v7 = vmul.f32 %v3033_v36, %v835_v2  ;;  %1493 = vmatmul.bf16.vlgmr.msra.gmra.mxu0 %v2136_v60  ;;  %v502_v60 = vmul.f32 %v3033_v36, %v2821_v31 }
 0x122   :  { %1542 = vmatmul.bf16.vlgmr.msra.gmra.mxu1 %v2140_v63 }
 0x123   :  { %v890_v10 = vadd.f32 %v3061_v52, %v874_v7 }
 0x124   :  { %2229 = vmatmul.msk.bf16.vlgmr.msra.gmra.mxu3 %vm325_vm0, %v2144_v1  ;;  %v792_v20 = vpop.f32.mrf.mxu2 }
 0x125   :  { %v906_v17 = vmax.f32 %v890_v10, 0.0  ;;  %v2152_v10 = vor.u32 %v2330_v29, %v2149_v45 }
 0x126   :  { %v836_v30 = vpop.f32.mrf.mxu0 }
 0x127   :  { %v1172_v23 = vpop.f32.mrf.mxu3  ;;  %v3081_v33 = vmax.f32 %v535_v14, %v906_v17  ;;  %v837_v34 = vadd.f32 %v836_v30, %v788_v15  ;;  %v1125_v41 = vpop.f32.mrf.mxu1  ;;  %v521_v15 = vadd.f32 %v3061_v52, %v502_v60  ;;  %v2161_v60 = vld [vmem:[%s3575_s3 + $0x3c] sm:$0xf0] }
 0x128   :  { %v3079_v25 = vadd.f32 %v1172_v23, %v1123_v4  ;;  %v2148_v4 = vor.u32 %v2331_v24, %v2147_v16  ;;  %v503_v23 = vmul.f32 %v3033_v36, %v2831_v40  ;;  %v2076_v24 = vor.u32 %v2314_v58, %v2075_v35  ;;  %v2159_v40 = vld [vmem:[%s3575_s3 + $0x30] sm:$0xf] }
 0x129   :  { %v875_v43 = vmul.f32 %v3033_v36, %v837_v34  ;;  %2127 = vmatmul.msk.bf16.gmra.mxu2 %vm325_vm0, %v2064_v32  ;;  %v537_v30 = vmax.f32 %v521_v15, 0.0  ;;  %v793_v32 = vadd.f32 %v792_v20, %v2851_v48  ;;  %v2334_v48 = vld [vmem:[%s3575_s3 + $0x38] sm:$0xf0]  ;;  %v2333_v20 = vld [vmem:[%s3575_s3 + $0x34] sm:$0xf] }
 0x12a   :  { %v522_v49 = vadd.f32 %v3061_v52, %v503_v23 }
 0x12b   :  { %v891_v44 = vadd.f32 %v3061_v52, %v875_v43 }
 0x12c   :  { %v795_v1 = vpop.f32.mrf.mxu2 }
 0x12d   :  { %v907_v63 = vmax.f32 %v891_v44, 0.0 }
 0x12e   :  { %v839_v7 = vpop.f32.mrf.mxu0 }
 0x12f   :  { %v1174_v2 = vpop.f32.mrf.mxu3  ;;  %v3110_v8 = vmax.f32 %v536_v54, %v907_v63  ;;  %v840_v12 = vadd.f32 %v839_v7, %v791_v62  ;;  %v1128_v14 = vpop.f32.mrf.mxu1  ;;  %v2167_v62 = vld [vmem:[%s3575_s3 + $0x38] sm:$0xf]  ;;  %v2335_v63 = vld [vmem:[%s3575_s3 + $0x40] sm:$0xf0]  ;;  %v796_v7 = vadd.f32 %v795_v1, %v2862_v59  ;;  %v2087_v59 = vld [vmem:[%s3574_s2 + $0x68] sm:$0xf] }
 0x130   :  { %v3108_v5 = vadd.f32 %v1174_v2, %v1125_v41  ;;  %v538_v2 = vmax.f32 %v522_v49, 0.0  ;;  %v2168_v35 = vor.u32 %v2335_v63, %v2167_v62  ;;  %v2317_v1 = vld [vmem:[%s3574_s2 + $0x70] sm:$0xf0] }
 0x131   :  { %v876_v17 = vmul.f32 %v3033_v36, %v840_v12  ;;  %1498 = vmatmul.bf16.gmra.mxu0 %v2148_v4  ;;  %v504_v4 = vmul.f32 %v3033_v36, %v2854_v55 }
 0x132   :  { %1547 = vmatmul.bf16.gmra.mxu1 %v2152_v10 }
 0x133   :  { %v892_v31 = vadd.f32 %v3061_v52, %v876_v17 }
 0x134   :  { %2230 = vmatmul.msk.bf16.gmra.mxu3 %vm325_vm0, %v2156_v11  ;;  %v797_v41 = vpop.f32.mrf.mxu2 }
 0x135   :  { %v908_v34 = vmax.f32 %v892_v31, 0.0  ;;  %v2164_v31 = vor.u32 %v2333_v20, %v2161_v60 }
 0x136   :  { %v841_v16 = vpop.f32.mrf.mxu0 }
 0x137   :  { %v1177_v42 = vpop.f32.mrf.mxu3  ;;  %v3127_v29 = vmax.f32 %v537_v30, %v908_v34  ;;  %v842_v44 = vadd.f32 %v841_v16, %v793_v32  ;;  %v1130_v45 = vpop.f32.mrf.mxu1  ;;  %v523_v32 = vadd.f32 %v3061_v52, %v504_v4  ;;  %v2173_v4 = vld [vmem:[%s3575_s3 + $0x54] sm:$0xf0] }
 0x138   :  { %v3125_v43 = vadd.f32 %v1177_v42, %v1128_v14  ;;  %v2160_v14 = vor.u32 %v2334_v48, %v2159_v40  ;;  %v505_v42 = vmul.f32 %v3033_v36, %v2864_v0  ;;  %v2088_v48 = vor.u32 %v2317_v1, %v2087_v59  ;;  %v2171_v0 = vld [vmem:[%s3575_s3 + $0x48] sm:$0xf] }
 0x139   :  { %v877_v50 = vmul.f32 %v3033_v36, %v842_v44  ;;  %2128 = vmatmul.msk.bf16.gmra.mxu2 %vm325_vm0, %v2076_v24  ;;  %v539_v16 = vmax.f32 %v523_v32, 0.0  ;;  %v798_v24 = vadd.f32 %v797_v41, %v2884_v9  ;;  %v2337_v9 = vld [vmem:[%s3575_s3 + $0x50] sm:$0xf0]  ;;  %v2336_v41 = vld [vmem:[%s3575_s3 + $0x4c] sm:$0xf] }
 0x13a   :  { %v524_v62 = vadd.f32 %v3061_v52, %v505_v42 }
 0x13b   :  { %v893_v54 = vadd.f32 %v3061_v52, %v877_v50 }
 0x13c   :  { %v800_v11 = vpop.f32.mrf.mxu2 }
 0x13d   :  { %v909_v10 = vmax.f32 %v893_v54, 0.0 }
 0x13e   :  { %v844_v17 = vpop.f32.mrf.mxu0 }
 0x13f   :  { %v1179_v12 = vpop.f32.mrf.mxu3  ;;  %v3156_v58 = vmax.f32 %v538_v2, %v909_v10  ;;  %v845_v23 = vadd.f32 %v844_v17, %v796_v7  ;;  %v1133_v30 = vpop.f32.mrf.mxu1  ;;  %v2179_v7 = vld [vmem:[%s3575_s3 + $0x50] sm:$0xf]  ;;  %v2338_v10 = vld [vmem:[%s3575_s3 + $0x58] sm:$0xf0]  ;;  %v801_v17 = vadd.f32 %v800_v11, %v2895_v22  ;;  %v2099_v22 = vld [vmem:[%s3574_s2 + $0x80] sm:$0xf] }
 0x140   :  { %v3154_v15 = vadd.f32 %v1179_v12, %v1130_v45  ;;  %v540_v12 = vmax.f32 %v524_v62, 0.0  ;;  %v2180_v59 = vor.u32 %v2338_v10, %v2179_v7  ;;  %v2320_v11 = vld [vmem:[%s3574_s2 + $0x88] sm:$0xf0] }
 0x141   :  { %v878_v34 = vmul.f32 %v3033_v36, %v845_v23  ;;  %1503 = vmatmul.bf16.gmra.mxu0 %v2160_v14  ;;  %v506_v14 = vmul.f32 %v3033_v36, %v2887_v18 }
 0x142   :  { %1552 = vmatmul.bf16.gmra.mxu1 %v2164_v31 }
 0x143   :  { %v894_v55 = vadd.f32 %v3061_v52, %v878_v34 }
 0x144   :  { %2231 = vmatmul.msk.bf16.gmra.mxu3 %vm325_vm0, %v2168_v35  ;;  %v802_v45 = vpop.f32.mrf.mxu2 }
 0x145   :  { %v910_v44 = vmax.f32 %v894_v55, 0.0  ;;  %v2176_v55 = vor.u32 %v2336_v41, %v2173_v4 }
 0x146   :  { %v846_v40 = vpop.f32.mrf.mxu0 }
 0x147   :  { %v1182_v49 = vpop.f32.mrf.mxu3  ;;  %v3173_v20 = vmax.f32 %v539_v16, %v910_v44  ;;  %v847_v54 = vadd.f32 %v846_v40, %v798_v24  ;;  %v1135_v60 = vpop.f32.mrf.mxu1  ;;  %v525_v24 = vadd.f32 %v3061_v52, %v506_v14  ;;  %v2185_v14 = vld [vmem:[%s3575_s3 + $0x6c] sm:$0xf0] }
 0x148   :  { %v3171_v50 = vadd.f32 %v1182_v49, %v1133_v30  ;;  %v2172_v30 = vor.u32 %v2337_v9, %v2171_v0  ;;  %v507_v49 = vmul.f32 %v3033_v36, %v2897_v28  ;;  %v2100_v9 = vor.u32 %v2320_v11, %v2099_v22  ;;  %v2183_v28 = vld [vmem:[%s3575_s3 + $0x60] sm:$0xf] }
 0x149   :  { %v879_v63 = vmul.f32 %v3033_v36, %v847_v54  ;;  %2129 = vmatmul.msk.bf16.gmra.mxu2 %vm325_vm0, %v2088_v48  ;;  %v541_v40 = vmax.f32 %v525_v24, 0.0  ;;  %v803_v48 = vadd.f32 %v802_v45, %v2917_v38  ;;  %v2340_v38 = vld [vmem:[%s3575_s3 + $0x68] sm:$0xf0]  ;;  %v2339_v45 = vld [vmem:[%s3575_s3 + $0x64] sm:$0xf] }
 0x14a   :  { %v526_v7 = vadd.f32 %v3061_v52, %v507_v49 }
 0x14b   :  { %v895_v2 = vadd.f32 %v3061_v52, %v879_v63 }
 0x14c   :  { %v805_v35 = vpop.f32.mrf.mxu2 }
 0x14d   :  { %v911_v31 = vmax.f32 %v895_v2, 0.0 }
 0x14e   :  { %v849_v34 = vpop.f32.mrf.mxu0 }
 0x14f   :  { %v1184_v23 = vpop.f32.mrf.mxu3  ;;  %v3202_v1 = vmax.f32 %v540_v12, %v911_v31  ;;  %v850_v42 = vadd.f32 %v849_v34, %v801_v17  ;;  %v1138_v16 = vpop.f32.mrf.mxu1  ;;  %v2191_v17 = vld [vmem:[%s3575_s3 + $0x68] sm:$0xf]  ;;  %v2341_v31 = vld [vmem:[%s3575_s3 + $0x70] sm:$0xf0]  ;;  %v806_v34 = vadd.f32 %v805_v35, %v2928_v51  ;;  %v2111_v51 = vld [vmem:[%s3574_s2 + $0x98] sm:$0xf] }
 0x150   :  { %v3200_v32 = vadd.f32 %v1184_v23, %v1135_v60  ;;  %v542_v23 = vmax.f32 %v526_v7, 0.0  ;;  %v2192_v22 = vor.u32 %v2341_v31, %v2191_v17  ;;  %v2323_v35 = vld [vmem:[%s3574_s2 + $0xa0] sm:$0xf0] }
 0x151   :  { %v880_v44 = vmul.f32 %v3033_v36, %v850_v42  ;;  %1508 = vmatmul.bf16.gmra.mxu0 %v2172_v30  ;;  %v508_v30 = vmul.f32 %v3033_v36, %v2920_v46 }
 0x152   :  { %1557 = vmatmul.bf16.gmra.mxu1 %v2176_v55 }
 0x153   :  { %v896_v18 = vadd.f32 %v3061_v52, %v880_v44 }
 0x154   :  { %2232 = vmatmul.msk.bf16.gmra.mxu3 %vm325_vm0, %v2180_v59  ;;  %v807_v60 = vpop.f32.mrf.mxu2 }
 0x155   :  { %v912_v54 = vmax.f32 %v896_v18, 0.0  ;;  %v2188_v18 = vor.u32 %v2339_v45, %v2185_v14 }
 0x156   :  { %v851_v0 = vpop.f32.mrf.mxu0 }
 0x157   :  { %v1187_v62 = vpop.f32.mrf.mxu3  ;;  %v3219_v41 = vmax.f32 %v541_v40, %v912_v54  ;;  %v852_v2 = vadd.f32 %v851_v0, %v803_v48  ;;  %v1140_v4 = vpop.f32.mrf.mxu1  ;;  %v527_v48 = vadd.f32 %v3061_v52, %v508_v30  ;;  %v2197_v30 = vld [vmem:[%s3575_s3 + $0x84] sm:$0xf0] }
 0x158   :  { %v3217_v63 = vadd.f32 %v1187_v62, %v1138_v16  ;;  %v2184_v16 = vor.u32 %v2340_v38, %v2183_v28  ;;  %v509_v62 = vmul.f32 %v3033_v36, %v2930_v57  ;;  %v2112_v38 = vor.u32 %v2323_v35, %v2111_v51  ;;  %v2195_v57 = vld [vmem:[%s3575_s3 + $0x78] sm:$0xf] }
 0x159   :  { %v881_v10 = vmul.f32 %v3033_v36, %v852_v2  ;;  %2130 = vmatmul.msk.bf16.gmra.mxu2 %vm325_vm0, %v2100_v9  ;;  %v543_v0 = vmax.f32 %v527_v48, 0.0  ;;  %v808_v9 = vadd.f32 %v807_v60, %v2950_v3  ;;  %v2343_v3 = vld [vmem:[%s3575_s3 + $0x80] sm:$0xf0]  ;;  %v2342_v60 = vld [vmem:[%s3575_s3 + $0x7c] sm:$0xf] }
 0x15a   :  { %v528_v17 = vadd.f32 %v3061_v52, %v509_v62 }
 0x15b   :  { %v897_v12 = vadd.f32 %v3061_v52, %v881_v10 }
 0x15c   :  { %v810_v59 = vpop.f32.mrf.mxu2 }
 0x15d   :  { %v913_v55 = vmax.f32 %v897_v12, 0.0 }
 0x15e   :  { %v854_v44 = vpop.f32.mrf.mxu0 }
 0x15f   :  { %v1189_v42 = vpop.f32.mrf.mxu3  ;;  %v3248_v11 = vmax.f32 %v542_v23, %v913_v55  ;;  %v855_v49 = vadd.f32 %v854_v44, %v806_v34  ;;  %v1143_v40 = vpop.f32.mrf.mxu1  ;;  %v2203_v34 = vld [vmem:[%s3575_s3 + $0x80] sm:$0xf]  ;;  %v2344_v55 = vld [vmem:[%s3575_s3 + $0x88] sm:$0xf0]  ;;  %v811_v44 = vadd.f32 %v810_v59, %v2961_v19  ;;  %v2123_v19 = vld [vmem:[%s3574_s2 + $0xb0] sm:$0xf] }
 0x160   :  { %v3246_v24 = vadd.f32 %v1189_v42, %v1140_v4  ;;  %v544_v42 = vmax.f32 %v528_v17, 0.0  ;;  %v2204_v51 = vor.u32 %v2344_v55, %v2203_v34  ;;  %v2326_v59 = vld [vmem:[%s3574_s2 + $0xb8] sm:$0xf0] }
 0x161   :  { %v882_v54 = vmul.f32 %v3033_v36, %v855_v49  ;;  %1513 = vmatmul.bf16.gmra.mxu0 %v2184_v16  ;;  %v510_v16 = vmul.f32 %v3033_v36, %v2953_v13 }
 0x162   :  { %1562 = vmatmul.bf16.gmra.mxu1 %v2188_v18 }
 0x163   :  { %v898_v46 = vadd.f32 %v3061_v52, %v882_v54 }
 0x164   :  { %2233 = vmatmul.msk.bf16.gmra.mxu3 %vm325_vm0, %v2192_v22  ;;  %v812_v4 = vpop.f32.mrf.mxu2 }
 0x165   :  { %v914_v2 = vmax.f32 %v898_v46, 0.0  ;;  %v2200_v46 = vor.u32 %v2342_v60, %v2197_v30 }
 0x166   :  { %v856_v28 = vpop.f32.mrf.mxu0 }
 0x167   :  { %v1192_v7 = vpop.f32.mrf.mxu3  ;;  %v3265_v45 = vmax.f32 %v543_v0, %v914_v2  ;;  %v857_v12 = vadd.f32 %v856_v28, %v808_v9  ;;  %v1145_v14 = vpop.f32.mrf.mxu1  ;;  %v529_v9 = vadd.f32 %v3061_v52, %v510_v16  ;;  %v2209_v16 = vld [vmem:[%s3575_s3 + $0x9c] sm:$0xf0] }
 0x168   :  { %v3263_v10 = vadd.f32 %v1192_v7, %v1143_v40  ;;  %v2196_v40 = vor.u32 %v2343_v3, %v2195_v57  ;;  %v511_v7 = vmul.f32 %v3033_v36, %v2963_v26  ;;  %v2124_v3 = vor.u32 %v2326_v59, %v2123_v19  ;;  %v2207_v26 = vld [vmem:[%s3575_s3 + $0x90] sm:$0xf] }
 0x169   :  { %v883_v31 = vmul.f32 %v3033_v36, %v857_v12  ;;  %2131 = vmatmul.msk.bf16.gmra.mxu2 %vm325_vm0, %v2112_v38  ;;  %v545_v28 = vmax.f32 %v529_v9, 0.0  ;;  %v813_v38 = vadd.f32 %v812_v4, %v2983_v37  ;;  %v2346_v37 = vld [vmem:[%s3575_s3 + $0x98] sm:$0xf0]  ;;  %v2345_v4 = vld [vmem:[%s3575_s3 + $0x94] sm:$0xf] }
 0x16a   :  { %v530_v34 = vadd.f32 %v3061_v52, %v511_v7 }
 0x16b   :  { %v899_v23 = vadd.f32 %v3061_v52, %v883_v31 }
 0x16c   :  { %v815_v22 = vpop.f32.mrf.mxu2 }
 0x16d   :  { %v915_v18 = vmax.f32 %v899_v23, 0.0 }
 0x16e   :  { %v859_v54 = vpop.f32.mrf.mxu0 }
 0x16f   :  { %v1194_v49 = vpop.f32.mrf.mxu3  ;;  %v3294_v35 = vmax.f32 %v544_v42, %v915_v18  ;;  %v860_v62 = vadd.f32 %v859_v54, %v811_v44  ;;  %v1148_v0 = vpop.f32.mrf.mxu1  ;;  %v2215_v44 = vld [vmem:[%s3575_s3 + $0x98] sm:$0xf]  ;;  %v2347_v18 = vld [vmem:[%s3575_s3 + $0xa0] sm:$0xf0]  ;;  %v816_v54 = vadd.f32 %v815_v22, %v2994_v53  ;;  %v513_v53 = vmul.f32 %v3033_v36, %v2996_v61  ;;  %v2219_v61 = vld [vmem:[%s3575_s3 + $0xa8] sm:$0xf] }
 0x170   :  { %v3292_v48 = vadd.f32 %v1194_v49, %v1145_v14  ;;  %v546_v49 = vmax.f32 %v530_v34, 0.0  ;;  %v2216_v19 = vor.u32 %v2347_v18, %v2215_v44  ;;  %v2221_v44 = vld [vmem:[%s3575_s3 + $0xb4] sm:$0xf0]  ;;  %v2227_v18 = vld [vmem:[%s3575_s3 + $0xb0] sm:$0xf] }
 0x171   :  { %v884_v2 = vmul.f32 %v3033_v36, %v860_v62  ;;  %1518 = vmatmul.bf16.gmra.mxu0 %v2196_v40  ;;  %v512_v40 = vmul.f32 %v3033_v36, %v2986_v47 }
 0x172   :  { %1567 = vmatmul.bf16.gmra.mxu1 %v2200_v46 }
 0x173   :  { %v900_v13 = vadd.f32 %v3061_v52, %v884_v2 }
 0x174   :  { %2234 = vmatmul.msk.bf16.gmra.mxu3 %vm325_vm0, %v2204_v51  ;;  %v817_v14 = vpop.f32.mrf.mxu2 }
 0x175   :  { %v916_v12 = vmax.f32 %v900_v13, 0.0  ;;  %v2212_v13 = vor.u32 %v2345_v4, %v2209_v16  ;;  %v532_v4 = vadd.f32 %v3061_v52, %v513_v53 }
 0x176   :  { %v861_v57 = vpop.f32.mrf.mxu0 }
 0x177   :  { %v1197_v17 = vpop.f32.mrf.mxu3  ;;  %v3311_v60 = vmax.f32 %v545_v28, %v916_v12  ;;  %v862_v23 = vadd.f32 %v861_v57, %v813_v38  ;;  %v1150_v30 = vpop.f32.mrf.mxu1  ;;  %v531_v38 = vadd.f32 %v3061_v52, %v512_v40  ;;  %v548_v40 = vmax.f32 %v532_v4, 0.0 }
 0x178   :  { %v3309_v31 = vadd.f32 %v1197_v17, %v1148_v0  ;;  %v2208_v0 = vor.u32 %v2346_v37, %v2207_v26  ;;  %v818_v17 = vadd.f32 %v817_v14, %v3017_v6  ;;  %v2349_v6 = vld [vmem:[%s3575_s3 + $0xb0] sm:$0xf0]  ;;  %v2348_v14 = vld [vmem:[%s3575_s3 + $0xac] sm:$0xf] }
 0x179   :  { %v885_v55 = vmul.f32 %v3033_v36, %v862_v23  ;;  %2132 = vmatmul.msk.bf16.gmra.mxu2 %vm325_vm0, %v2124_v3  ;;  %v547_v22 = vmax.f32 %v531_v38, 0.0 }
 0x17b   :  { %v901_v42 = vadd.f32 %v3061_v52, %v885_v55 }
 0x17c   :  { %v820_v51 = vpop.f32.mrf.mxu2 }
 0x17d   :  { %v917_v46 = vmax.f32 %v901_v42, 0.0 }
 0x17e   :  { %v864_v2 = vpop.f32.mrf.mxu0 }
 0x17f   :  { %v1199_v62 = vpop.f32.mrf.mxu3  ;;  %v3340_v59 = vmax.f32 %v546_v49, %v917_v46  ;;  %v865_v7 = vadd.f32 %v864_v2, %v816_v54  ;;  %v1153_v28 = vpop.f32.mrf.mxu1  ;;  %v2350_v49 = vld [vmem:[%s3575_s3 + $0xb8] sm:$0xf0]  ;;  %v514_v54 = vmul.f32 %v3033_v36, %v3020_v21  ;;  %v821_v46 = vadd.f32 %v820_v51, %v3028_v27 }
 0x180   :  { %v3338_v9 = vadd.f32 %v1199_v62, %v1150_v30  ;;  %v2228_v38 = vor.u32 %v2350_v49, %v2227_v18  ;;  %v515_v51 = vmul.f32 %v3033_v36, %v3035_v39 }
 0x181   :  { %v886_v12 = vmul.f32 %v3033_v36, %v865_v7  ;;  %1523 = vmatmul.bf16.gmra.mxu0 %v2208_v0 }
 0x182   :  { %1572 = vmatmul.bf16.gmra.mxu1 %v2212_v13  ;;  %v2220_v13 = vor.u32 %v2349_v6, %v2219_v61 }
 0x183   :  { %v902_v47 = vadd.f32 %v3061_v52, %v886_v12 }
 0x184   :  { %2235 = vmatmul.msk.bf16.gmra.mxu3 %vm325_vm0, %v2216_v19  ;;  %v822_v3 = vpop.f32.mrf.mxu2 }
 0x185   :  { %v918_v57 = vmax.f32 %v902_v47, 0.0 }
 0x186   :  { %v866_v34 = vpop.f32.mrf.mxu0 }
 0x187   :  { %v1202_v23 = vpop.f32.mrf.mxu3  ;;  %v3351_v55 = vmax.f32 %v547_v22, %v918_v57  ;;  %v867_v26 = vadd.f32 %v866_v34, %v818_v17  ;;  %v1155_v37 = vpop.f32.mrf.mxu1  ;;  %v533_v22 = vadd.f32 %v3061_v52, %v514_v54  ;;  %v823_v57 = vadd.f32 %v822_v3, %v3064_v56 }
 0x188   :  { %v3349_v30 = vadd.f32 %v1202_v23, %v1153_v28  ;;  %v2224_v28 = vor.u32 %v2348_v14, %v2221_v44  ;;  %v534_v14 = vadd.f32 %v3061_v52, %v515_v51 }
 0x189   :  { %v887_v42 = vmul.f32 %v3033_v36, %v867_v26  ;;  %v549_v27 = vmax.f32 %v533_v22, 0.0 }
 0x18a   :  { %v550_v18 = vmax.f32 %v534_v14, 0.0 }
 0x18b   :  { %v903_v16 = vadd.f32 %v3061_v52, %v887_v42 }
 0x18c   :  { %v1221_v2 = vpop.f32.mrf.mxu2 }
 0x18d   :  { %v919_v62 = vmax.f32 %v903_v16, 0.0 }
 0x18e   :  { %v869_v7 = vpop.f32.mrf.mxu0 }
 0x18f   :  { %v1204_v0 = vpop.f32.mrf.mxu3  ;;  %v3379_v12 = vmax.f32 %v548_v40, %v919_v62  ;;  %v870_v47 = vadd.f32 %v869_v7, %v821_v46  ;;  %v1158_v53 = vpop.f32.mrf.mxu1  ;;  %v1222_v62 = vadd.f32 %v1221_v2, %v3079_v25 }
 0x190   :  { %v3377_v19 = vadd.f32 %v1204_v0, %v1155_v37 }
 0x191   :  { %v888_v17 = vmul.f32 %v3033_v36, %v870_v47  ;;  %1528 = vmatmul.bf16.gmra.mxu0 %v2220_v13  ;;  %v1261_v13 = vmul.f32 %v3033_v36, %v1222_v62 }
 0x192   :  { %1577 = vmatmul.bf16.gmra.mxu1 %v2224_v28 }
 0x193   :  { %v904_v21 = vadd.f32 %v3061_v52, %v888_v17  ;;  %v1277_v22 = vadd.f32 %v3061_v52, %v1261_v13 }
 0x194   :  { %2236 = vmatmul.msk.bf16.gmra.mxu3 %vm325_vm0, %v2228_v38  ;;  %v1223_v26 = vpop.f32.mrf.mxu2 }
 0x195   :  { %v920_v23 = vmax.f32 %v904_v21, 0.0  ;;  %v1224_v17 = vadd.f32 %v1223_v26, %v3108_v5  ;;  %v1293_v51 = vmax.f32 %v1277_v22, 0.0 }
 0x196   :  { %v871_v4 = vpop.f32.mrf.mxu0 }
 0x197   :  { %v1207_v34 = vpop.f32.mrf.mxu3  ;;  %v3390_v42 = vmax.f32 %v549_v27, %v920_v23  ;;  %v872_v61 = vadd.f32 %v871_v4, %v823_v57  ;;  %v1160_v6 = vpop.f32.mrf.mxu1  ;;  %v1262_v57 = vmul.f32 %v3033_v36, %v1224_v17 }
 0x198   :  { %v3388_v37 = vadd.f32 %v1207_v34, %v1158_v53 }
 0x199   :  { %v889_v16 = vmul.f32 %v3033_v36, %v872_v61 }
 0x19b   :  { %v905_v44 = vadd.f32 %v3061_v52, %v889_v16  ;;  %v1278_v16 = vadd.f32 %v3061_v52, %v1262_v57 }
 0x19c   :  { %v1226_v56 = vpop.f32.mrf.mxu2 }
 0x19d   :  { %v921_v39 = vmax.f32 %v905_v44, 0.0  ;;  %v1227_v44 = vadd.f32 %v1226_v56, %v3125_v43 }
 0x19e   :  { %v1494_v40 = vpop.f32.mrf.mxu0 }
 0x19f   :  { %v1209_v49 = vpop.f32.mrf.mxu3  ;;  %v3397_v54 = vmax.f32 %v550_v18, %v921_v39  ;;  %v1543_v46 = vpop.f32.mrf.mxu1 }
 0x1a0   :  { %v3395_v3 = vadd.f32 %v1209_v49, %v1160_v6  ;;  %v1544_v0 = vadd.f32 %v1543_v46, %v1494_v40  ;;  %v1294_v40 = vmax.f32 %v1278_v16, 0.0  ;;  %v1263_v46 = vmul.f32 %v3033_v36, %v1227_v44 }
 0x1a4   :  { %v1228_v7 = vpop.f32.mrf.mxu2 }
 0x1a6   :  { %v1496_v47 = vpop.f32.mrf.mxu0 }
 0x1a7   :  { %v1592_v28 = vpop.f32.mrf.mxu3  ;;  %v1545_v53 = vpop.f32.mrf.mxu1 }
 0x1a8   :  { %v1593_v38 = vadd.f32 %v1592_v28, %v1544_v0  ;;  %v1546_v2 = vadd.f32 %v1545_v53, %v1496_v47  ;;  %v1229_v47 = vadd.f32 %v1228_v7, %v3154_v15 }
 0x1aa   :  { %v1632_v21 = vmul.f32 %v3033_v36, %v1593_v38  ;;  %v1279_v38 = vadd.f32 %v3061_v52, %v1263_v46 }
 0x1ac   :  { %v1648_v27 = vadd.f32 %v3061_v52, %v1632_v21  ;;  %v1231_v23 = vpop.f32.mrf.mxu2 }
 0x1ae   :  { %v1664_v25 = vmax.f32 %v1648_v27, 0.0  ;;  %v1499_v6 = vpop.f32.mrf.mxu0  ;;  %v1295_v27 = vmax.f32 %v1279_v38, 0.0 }
 0x1af   :  { %v1594_v34 = vpop.f32.mrf.mxu3  ;;  %v1548_v14 = vpop.f32.mrf.mxu1 }
 0x1b0   :  { %v1680_v4 = vmax.f32 %v1293_v51, %v1664_v25  ;;  %v1595_v61 = vadd.f32 %v1594_v34, %v1546_v2  ;;  %v1549_v49 = vadd.f32 %v1548_v14, %v1499_v6  ;;  %v1264_v51 = vmul.f32 %v3033_v36, %v1229_v47 }
 0x1b1   :  { %v1232_v6 = vadd.f32 %v1231_v23, %v3171_v50 }
 0x1b2   :  { %v1696_v5 = vmax.f32 %v3081_v33, %v1680_v4  ;;  %v1633_v26 = vmul.f32 %v3033_v36, %v1595_v61  ;;  %v1280_v61 = vadd.f32 %v3061_v52, %v1264_v51 }
 0x1b4   :  { %v1712_v18 = vpack.c.bf16 %v1696_v5, %v1696_v5  ;;  %v1649_v39 = vadd.f32 %v3061_v52, %v1633_v26  ;;  %v1233_v0 = vpop.f32.mrf.mxu2 }
 0x1b6   :  { %1729 = vst.msk [vmem:[%s3576_s7] sm:$0xf] %vm1728_vm1, %v1712_v18  ;;  %v1665_v62 = vmax.f32 %v1649_v39, 0.0  ;;  %v1501_v13 = vpop.f32.mrf.mxu0  ;;  %v1296_v18 = vmax.f32 %v1280_v61, 0.0  ;;  %v1265_v39 = vmul.f32 %v3033_v36, %v1232_v6 }
 0x1b7   :  { %v1597_v43 = vpop.f32.mrf.mxu3  ;;  %v1550_v28 = vpop.f32.mrf.mxu1 }
 0x1b8   :  { %v1681_v56 = vmax.f32 %v1294_v40, %v1665_v62  ;;  %v1598_v33 = vadd.f32 %v1597_v43, %v1549_v49  ;;  %v1551_v25 = vadd.f32 %v1550_v28, %v1501_v13  ;;  %v1281_v43 = vadd.f32 %v3061_v52, %v1265_v39 }
 0x1ba   :  { %v1697_v53 = vmax.f32 %v3110_v8, %v1681_v56  ;;  %v1634_v22 = vmul.f32 %v3033_v36, %v1598_v33  ;;  %v1234_v56 = vadd.f32 %v1233_v0, %v3200_v32  ;;  %v1297_v47 = vmax.f32 %v1281_v43, 0.0 }
 0x1bc   :  { %v1713_v17 = vpack.c.bf16 %v1697_v53, %v1697_v53  ;;  %v1650_v21 = vadd.f32 %v3061_v52, %v1634_v22  ;;  %v1236_v2 = vpop.f32.mrf.mxu2  ;;  %v1266_v53 = vmul.f32 %v3033_v36, %v1234_v56 }
 0x1be   :  { %1730 = vst.msk [vmem:[%s3576_s7 + $0x4] sm:$0xf] %vm1728_vm1, %v1713_v17  ;;  %v1666_v57 = vmax.f32 %v1650_v21, 0.0  ;;  %v1504_v8 = vpop.f32.mrf.mxu0 }
 0x1bf   :  { %v1599_v34 = vpop.f32.mrf.mxu3  ;;  %v1553_v4 = vpop.f32.mrf.mxu1 }
 0x1c0   :  { %v1682_v15 = vmax.f32 %v1295_v27, %v1666_v57  ;;  %v1600_v7 = vadd.f32 %v1599_v34, %v1551_v25  ;;  %v1554_v26 = vadd.f32 %v1553_v4, %v1504_v8  ;;  %v1282_v57 = vadd.f32 %v3061_v52, %v1266_v53 }
 0x1c1   :  { %v1237_v25 = vadd.f32 %v1236_v2, %v3217_v63 }
 0x1c2   :  { %v1698_v14 = vmax.f32 %v3127_v29, %v1682_v15  ;;  %v1635_v16 = vmul.f32 %v3033_v36, %v1600_v7  ;;  %v1298_v61 = vmax.f32 %v1282_v57, 0.0 }
 0x1c3   :  { %v1267_v6 = vmul.f32 %v3033_v36, %v1237_v25 }
 0x1c4   :  { %v1714_v44 = vpack.c.bf16 %v1698_v14, %v1698_v14  ;;  %v1651_v5 = vadd.f32 %v3061_v52, %v1635_v16  ;;  %v1238_v40 = vpop.f32.mrf.mxu2 }
 0x1c6   :  { %1731 = vst.msk [vmem:[%s3576_s7 + $0x8] sm:$0xf] %vm1728_vm1, %v1714_v44  ;;  %v1667_v49 = vmax.f32 %v1651_v5, 0.0  ;;  %v1506_v29 = vpop.f32.mrf.mxu0  ;;  %v1283_v5 = vadd.f32 %v3061_v52, %v1267_v6 }
 0x1c7   :  { %v1602_v46 = vpop.f32.mrf.mxu3  ;;  %v1555_v62 = vpop.f32.mrf.mxu1 }
 0x1c8   :  { %v1683_v50 = vmax.f32 %v1296_v18, %v1667_v49  ;;  %v1603_v23 = vadd.f32 %v1602_v46, %v1554_v26  ;;  %v1556_v17 = vadd.f32 %v1555_v62, %v1506_v29  ;;  %v1239_v26 = vadd.f32 %v1238_v40, %v3246_v24 }
 0x1ca   :  { %v1699_v33 = vmax.f32 %v3156_v58, %v1683_v50  ;;  %v1636_v13 = vmul.f32 %v3033_v36, %v1603_v23  ;;  %v1299_v23 = vmax.f32 %v1283_v5, 0.0  ;;  %v1268_v29 = vmul.f32 %v3033_v36, %v1239_v26 }
 0x1cc   :  { %v1715_v28 = vpack.c.bf16 %v1699_v33, %v1699_v33  ;;  %v1652_v38 = vadd.f32 %v3061_v52, %v1636_v13  ;;  %v1241_v58 = vpop.f32.mrf.mxu2  ;;  %v1284_v13 = vadd.f32 %v3061_v52, %v1268_v29 }
 0x1ce   :  { %1732 = vst.msk [vmem:[%s3576_s7 + $0xc] sm:$0xf] %vm1728_vm1, %v1715_v28  ;;  %v1668_v22 = vmax.f32 %v1652_v38, 0.0  ;;  %v1509_v0 = vpop.f32.mrf.mxu0  ;;  %v1242_v28 = vadd.f32 %v1241_v58, %v3263_v10 }
 0x1cf   :  { %v1604_v21 = vpop.f32.mrf.mxu3  ;;  %v1558_v51 = vpop.f32.mrf.mxu1 }
 0x1d0   :  { %v1684_v27 = vmax.f32 %v1297_v47, %v1668_v22  ;;  %v1605_v32 = vadd.f32 %v1604_v21, %v1556_v17  ;;  %v1559_v4 = vadd.f32 %v1558_v51, %v1509_v0 }
 0x1d2   :  { %v1700_v34 = vmax.f32 %v3173_v20, %v1684_v27  ;;  %v1637_v15 = vmul.f32 %v3033_v36, %v1605_v32  ;;  %v1300_v27 = vmax.f32 %v1284_v13, 0.0  ;;  %v1269_v32 = vmul.f32 %v3033_v36, %v1242_v28 }
 0x1d4   :  { %v1716_v7 = vpack.c.bf16 %v1700_v34, %v1700_v34  ;;  %v1653_v8 = vadd.f32 %v3061_v52, %v1637_v15  ;;  %v1243_v49 = vpop.f32.mrf.mxu2  ;;  %v1285_v25 = vadd.f32 %v3061_v52, %v1269_v32 }
 0x1d5   :  { %v1244_v34 = vadd.f32 %v1243_v49, %v3292_v48 }
 0x1d6   :  { %1733 = vst.msk [vmem:[%s3576_s7 + $0x10] sm:$0xf] %vm1728_vm1, %v1716_v7  ;;  %v1669_v14 = vmax.f32 %v1653_v8, 0.0  ;;  %v1511_v2 = vpop.f32.mrf.mxu0 }
 0x1d7   :  { %v1607_v16 = vpop.f32.mrf.mxu3  ;;  %v1560_v20 = vpop.f32.mrf.mxu1  ;;  %v1270_v6 = vmul.f32 %v3033_v36, %v1244_v34 }
 0x1d8   :  { %v1685_v44 = vmax.f32 %v1298_v61, %v1669_v14  ;;  %v1608_v63 = vadd.f32 %v1607_v16, %v1559_v4  ;;  %v1561_v43 = vadd.f32 %v1560_v20, %v1511_v2  ;;  %v1301_v61 = vmax.f32 %v1285_v25, 0.0 }
 0x1d9   :  { %v1286_v5 = vadd.f32 %v3061_v52, %v1270_v6 }
 0x1da   :  { %v1701_v18 = vmax.f32 %v3202_v1, %v1685_v44  ;;  %v1638_v39 = vmul.f32 %v3033_v36, %v1608_v63 }
 0x1dc   :  { %v1717_v46 = vpack.c.bf16 %v1701_v18, %v1701_v18  ;;  %v1654_v50 = vadd.f32 %v3061_v52, %v1638_v39  ;;  %v1246_v21 = vpop.f32.mrf.mxu2 }
 0x1dd   :  { %v1247_v26 = vadd.f32 %v1246_v21, %v3309_v31 }
 0x1de   :  { %1734 = vst.msk [vmem:[%s3576_s7 + $0x14] sm:$0xf] %vm1728_vm1, %v1717_v46  ;;  %v1670_v62 = vmax.f32 %v1654_v50, 0.0  ;;  %v1514_v1 = vpop.f32.mrf.mxu0 }
 0x1df   :  { %v1609_v56 = vpop.f32.mrf.mxu3  ;;  %v1563_v33 = vpop.f32.mrf.mxu1 }
 0x1e0   :  { %v1686_v24 = vmax.f32 %v1299_v23, %v1670_v62  ;;  %v1610_v40 = vadd.f32 %v1609_v56, %v1561_v43  ;;  %v1564_v17 = vadd.f32 %v1563_v33, %v1514_v1  ;;  %v1302_v23 = vmax.f32 %v1286_v5, 0.0 }
 0x1e2   :  { %v1702_v38 = vmax.f32 %v3219_v41, %v1686_v24  ;;  %v1639_v47 = vmul.f32 %v3033_v36, %v1610_v40 }
 0x1e4   :  { %v1718_v53 = vpack.c.bf16 %v1702_v38, %v1702_v38  ;;  %v1655_v22 = vadd.f32 %v3061_v52, %v1639_v47  ;;  %v1248_v44 = vpop.f32.mrf.mxu2 }
 0x1e5   :  { %v1249_v33 = vadd.f32 %v1248_v44, %v3338_v9 }
 0x1e6   :  { %1735 = vst.msk [vmem:[%s3576_s7 + $0x18] sm:$0xf] %vm1728_vm1, %v1718_v53  ;;  %v1671_v0 = vmax.f32 %v1655_v22, 0.0  ;;  %v1516_v41 = vpop.f32.mrf.mxu0 }
 0x1e7   :  { %v1612_v51 = vpop.f32.mrf.mxu3  ;;  %v1565_v57 = vpop.f32.mrf.mxu1 }
 0x1e8   :  { %v1687_v10 = vmax.f32 %v1300_v27, %v1671_v0  ;;  %v1613_v58 = vadd.f32 %v1612_v51, %v1564_v17  ;;  %v1566_v16 = vadd.f32 %v1565_v57, %v1516_v41 }
 0x1ea   :  { %v1703_v15 = vmax.f32 %v3248_v11, %v1687_v10  ;;  %v1640_v7 = vmul.f32 %v3033_v36, %v1613_v58  ;;  %v3492_v36 = vld [vmem:[%s3572_s5] ss:$0 sm:$0xff] }
 0x1eb   :  { %v1271_v29 = vmul.f32 %v3492_v36, %v1247_v26  ;;  %v1272_v22 = vmul.f32 %v3492_v36, %v1249_v33 }
 0x1ec   :  { %v1719_v8 = vpack.c.bf16 %v1703_v15, %v1703_v15  ;;  %v1656_v4 = vadd.f32 %v3061_v52, %v1640_v7  ;;  %v1251_v24 = vpop.f32.mrf.mxu2 }
 0x1ed   :  { %v1252_v10 = vadd.f32 %v1251_v24, %v3349_v30 }
 0x1ee   :  { %1736 = vst.msk [vmem:[%s3576_s7 + $0x1c] sm:$0xf] %vm1728_vm1, %v1719_v8  ;;  %v1672_v14 = vmax.f32 %v1656_v4, 0.0  ;;  %v1519_v11 = vpop.f32.mrf.mxu0 }
 0x1ef   :  { %v1614_v63 = vpop.f32.mrf.mxu3  ;;  %v1568_v20 = vpop.f32.mrf.mxu1  ;;  %v1273_v8 = vmul.f32 %v3492_v36, %v1252_v10 }
 0x1f0   :  { %v1688_v48 = vmax.f32 %v1301_v61, %v1672_v14  ;;  %v1615_v2 = vadd.f32 %v1614_v63, %v1566_v16  ;;  %v1569_v50 = vadd.f32 %v1568_v20, %v1519_v11 }
 0x1f2   :  { %v1704_v18 = vmax.f32 %v3265_v45, %v1688_v48  ;;  %v1641_v39 = vmul.f32 %v3492_v36, %v1615_v2 }
 0x1f4   :  { %v1720_v49 = vpack.c.bf16 %v1704_v18, %v1704_v18  ;;  %v1657_v46 = vadd.f32 %v3061_v52, %v1641_v39  ;;  %v3504_v52 = vld [vmem:[%s3573_s6] ss:$0 sm:$0xff]  ;;  %v1253_v57 = vpop.f32.mrf.mxu2 }
 0x1f5   :  { %v1287_v1 = vadd.f32 %v3504_v52, %v1271_v29  ;;  %v1288_v51 = vadd.f32 %v3504_v52, %v1272_v22  ;;  %v1289_v16 = vadd.f32 %v3504_v52, %v1273_v8  ;;  %v1254_v44 = vadd.f32 %v1253_v57, %v3377_v19 }
 0x1f6   :  { %1737 = vst.msk [vmem:[%s3576_s7 + $0x20] sm:$0xf] %vm1728_vm1, %v1720_v49  ;;  %v1673_v45 = vmax.f32 %v1657_v46, 0.0  ;;  %v1521_v56 = vpop.f32.mrf.mxu0 }
 0x1f7   :  { %v1617_v31 = vpop.f32.mrf.mxu3  ;;  %v1570_v40 = vpop.f32.mrf.mxu1  ;;  %v1303_v53 = vmax.f32 %v1287_v1, 0.0  ;;  %v1304_v7 = vmax.f32 %v1288_v51, 0.0  ;;  %v1305_v5 = vmax.f32 %v1289_v16, 0.0  ;;  %v1274_v26 = vmul.f32 %v3492_v36, %v1254_v44 }
 0x1f8   :  { %v1689_v62 = vmax.f32 %v1302_v23, %v1673_v45  ;;  %v1618_v43 = vadd.f32 %v1617_v31, %v1569_v50  ;;  %v1571_v21 = vadd.f32 %v1570_v40, %v1521_v56 }
 0x1f9   :  { %v1290_v23 = vadd.f32 %v3504_v52, %v1274_v26 }
 0x1fa   :  { %v1705_v13 = vmax.f32 %v3294_v35, %v1689_v62  ;;  %v1642_v28 = vmul.f32 %v3492_v36, %v1618_v43 }
 0x1fb   :  { %v1306_v24 = vmax.f32 %v1290_v23, 0.0 }
 0x1fc   :  { %v1721_v38 = vpack.c.bf16 %v1705_v13, %v1705_v13  ;;  %v1658_v47 = vadd.f32 %v3504_v52, %v1642_v28  ;;  %v1256_v20 = vpop.f32.mrf.mxu2 }
 0x1fd   :  { %v1257_v29 = vadd.f32 %v1256_v20, %v3388_v37 }
 0x1fe   :  { %1738 = vst.msk [vmem:[%s3576_s7 + $0x24] sm:$0xf] %vm1728_vm1, %v1721_v38  ;;  %v1674_v17 = vmax.f32 %v1658_v47, 0.0  ;;  %v1524_v0 = vpop.f32.mrf.mxu0 }
 0x1ff   :  { %v1619_v27 = vpop.f32.mrf.mxu3  ;;  %v1573_v35 = vpop.f32.mrf.mxu1  ;;  %v1275_v40 = vmul.f32 %v3492_v36, %v1257_v29 }
 0x200   :  { %v1690_v32 = vmax.f32 %v1303_v53, %v1674_v17  ;;  %v1620_v9 = vadd.f32 %v1619_v27, %v1571_v21  ;;  %v1574_v15 = vadd.f32 %v1573_v35, %v1524_v0 }
 0x202   :  { %v1706_v58 = vmax.f32 %v3311_v60, %v1690_v32  ;;  %v1643_v41 = vmul.f32 %v3492_v36, %v1620_v9 }
 0x204   :  { %v1722_v25 = vpack.c.bf16 %v1706_v58, %v1706_v58  ;;  %v1659_v34 = vadd.f32 %v3504_v52, %v1643_v41  ;;  %v1258_v33 = vpop.f32.mrf.mxu2 }
 0x205   :  { %v1259_v38 = vadd.f32 %v1258_v33, %v3395_v3 }
 0x206   :  { %1739 = vst.msk [vmem:[%s3576_s7 + $0x28] sm:$0xf] %vm1728_vm1, %v1722_v25  ;;  %v1675_v4 = vmax.f32 %v1659_v34, 0.0  ;;  %v1526_v60 = vpop.f32.mrf.mxu0 }
 0x207   :  { %v1622_v61 = vpop.f32.mrf.mxu3  ;;  %v1575_v14 = vpop.f32.mrf.mxu1  ;;  %v1276_v9 = vmul.f32 %v3492_v36, %v1259_v38 }
 0x208   :  { %v1691_v30 = vmax.f32 %v1304_v7, %v1675_v4  ;;  %v1623_v6 = vadd.f32 %v1622_v61, %v1574_v15  ;;  %v1576_v39 = vadd.f32 %v1575_v14, %v1526_v60 }
 0x209   :  { %v1292_v10 = vadd.f32 %v3504_v52, %v1276_v9 }
 0x20a   :  { %v1707_v63 = vmax.f32 %v3340_v59, %v1691_v30  ;;  %v1644_v48 = vmul.f32 %v3492_v36, %v1623_v6 }
 0x20b   :  { %v1308_v34 = vmax.f32 %v1292_v10, 0.0 }
 0x20c   :  { %v1723_v2 = vpack.c.bf16 %v1707_v63, %v1707_v63  ;;  %v1660_v11 = vadd.f32 %v3504_v52, %v1644_v48 }
 0x20e   :  { %1740 = vst.msk [vmem:[%s3576_s7 + $0x2c] sm:$0xf] %vm1728_vm1, %v1723_v2  ;;  %v1676_v18 = vmax.f32 %v1660_v11, 0.0  ;;  %v1529_v59 = vpop.f32.mrf.mxu0 }
 0x20f   :  { %v1624_v49 = vpop.f32.mrf.mxu3  ;;  %v1578_v50 = vpop.f32.mrf.mxu1 }
 0x210   :  { %v1692_v19 = vmax.f32 %v1305_v5, %v1676_v18  ;;  %v1625_v46 = vadd.f32 %v1624_v49, %v1576_v39  ;;  %v1579_v56 = vadd.f32 %v1578_v50, %v1529_v59 }
 0x212   :  { %v1708_v45 = vmax.f32 %v3351_v55, %v1692_v19  ;;  %v1645_v31 = vmul.f32 %v3492_v36, %v1625_v46  ;;  %v1291_v55 = vadd.f32 %v3504_v52, %v1275_v40 }
 0x214   :  { %v1724_v62 = vpack.c.bf16 %v1708_v45, %v1708_v45  ;;  %v1661_v43 = vadd.f32 %v3504_v52, %v1645_v31  ;;  %v1307_v32 = vmax.f32 %v1291_v55, 0.0 }
 0x216   :  { %1741 = vst.msk [vmem:[%s3576_s7 + $0x30] sm:$0xf] %vm1728_vm1, %v1724_v62  ;;  %v1677_v1 = vmax.f32 %v1661_v43, 0.0  ;;  %v1531_v22 = vpop.f32.mrf.mxu0 }
 0x217   :  { %v1627_v13 = vpop.f32.mrf.mxu3  ;;  %v1580_v17 = vpop.f32.mrf.mxu1 }
 0x218   :  { %v1693_v37 = vmax.f32 %v1306_v24, %v1677_v1  ;;  %v1628_v28 = vadd.f32 %v1627_v13, %v1579_v56  ;;  %v1581_v35 = vadd.f32 %v1580_v17, %v1531_v22 }
 0x21a   :  { %v1709_v47 = vmax.f32 %v3379_v12, %v1693_v37  ;;  %v1646_v53 = vmul.f32 %v3492_v36, %v1628_v28 }
 0x21c   :  { %v1725_v21 = vpack.c.bf16 %v1709_v47, %v1709_v47  ;;  %v1662_v27 = vadd.f32 %v3504_v52, %v1646_v53 }
 0x21e   :  { %1742 = vst.msk [vmem:[%s3576_s7 + $0x34] sm:$0xf] %vm1728_vm1, %v1725_v21  ;;  %v1678_v0 = vmax.f32 %v1662_v27, 0.0 }
 0x21f   :  { %v1629_v3 = vpop.f32.mrf.mxu3 }
 0x220   :  { %v1694_v51 = vmax.f32 %v1307_v32, %v1678_v0  ;;  %v1630_v12 = vadd.f32 %v1629_v3, %v1581_v35 }
 0x222   :  { %v1710_v58 = vmax.f32 %v3390_v42, %v1694_v51  ;;  %v1647_v41 = vmul.f32 %v3492_v36, %v1630_v12 }
 0x224   :  { %v1726_v57 = vpack.c.bf16 %v1710_v58, %v1710_v58  ;;  %v1663_v25 = vadd.f32 %v3504_v52, %v1647_v41 }
 0x226   :  { %1743 = vst.msk [vmem:[%s3576_s7 + $0x38] sm:$0xf] %vm1728_vm1, %v1726_v57  ;;  %v1679_v15 = vmax.f32 %v1663_v25, 0.0 }
 0x228   :  { %v1695_v7 = vmax.f32 %v1308_v34, %v1679_v15 }
 0x22a   :  { %v1711_v8 = vmax.f32 %v3397_v54, %v1695_v7 }
 0x22c   :  { %v1727_v4 = vpack.c.bf16 %v1711_v8, %v1711_v8 }
 0x22e   :  { %1744 = vst.msk [vmem:[%s3576_s7 + $0x3c] sm:$0xf] %vm1728_vm1, %v1727_v4 }

// kernel: cnn10_forward.5
= control target key start
LH: loop header
LB: loop body
LE: loop exit
PB: predicated region body
PF: predicated region fallthrough
CT: control target
= control target key end

     0   :  { %s20111_s0 = inlined_call_operand.vmem [shape: bf16[2,4096], index: 0, kind: input, shape index: {}]   ;;  %s20112_s1 = inlined_call_operand.vmem [shape: bf16[4096,512], index: 1, kind: input, shape index: {}]   ;;  %s20113_s2 = inlined_call_operand.vmem [shape: f32[1,512], index: 2, kind: input, shape index: {}]   ;;  %s20114_s3 = inlined_call_operand.vmem [shape: bf16[512,10], index: 3, kind: input, shape index: {}]   ;;  %s20115_s4 = inlined_call_operand.vmem [shape: f32[1,10], index: 4, kind: input, shape index: {}]   ;;  %s20116_s5 = inlined_call_operand.hbm [shape: f32[2,10], index: 5, kind: output, shape index: {}]  }
   0x1   :  { %v8367_v0 = vld [vmem:[%s20112_s1 + $0xe0] sm:$0xf]  ;;  %v12507_v1 = vld [vmem:[%s20112_s1 + $0xec] sm:$0xf0] }
   0x2   :  { %v8495_v2 = vld [vmem:[%s20112_s1 + $0x1e0] sm:$0xf]  ;;  %v8368_v3 = vor.u32 %v12507_v1, %v8367_v0  ;;  %v12539_v4 = vld [vmem:[%s20112_s1 + $0x1ec] sm:$0xf0] }
   0x3   :  { %v8623_v5 = vld [vmem:[%s20112_s1 + $0x2e0] sm:$0xf]  ;;  %v12571_v6 = vld [vmem:[%s20112_s1 + $0x2ec] sm:$0xf0]  ;;  %v8496_v7 = vor.u32 %v12539_v4, %v8495_v2 }
   0x4   :  { %v8624_v8 = vor.u32 %v12571_v6, %v8623_v5  ;;  %v8751_v9 = vld [vmem:[%s20112_s1 + $0x3e0] sm:$0xf]  ;;  %v12603_v10 = vld [vmem:[%s20112_s1 + $0x3ec] sm:$0xf0]  ;;  %6251 = vmatpush.bf16.msra.mxu0 %v8368_v3 }
   0x5   :  { %v8351_v11 = vld [vmem:[%s20112_s1 + $0xc0] sm:$0xf]  ;;  %v8752_v12 = vor.u32 %v12603_v10, %v8751_v9  ;;  %v12503_v13 = vld [vmem:[%s20112_s1 + $0xcc] sm:$0xf0]  ;;  %6264 = vmatpush.bf16.msra.mxu1 %v8496_v7 }
   0x6   :  { %v8479_v14 = vld [vmem:[%s20112_s1 + $0x1c0] sm:$0xf]  ;;  %v12535_v15 = vld [vmem:[%s20112_s1 + $0x1cc] sm:$0xf0]  ;;  %6277 = vmatpush.bf16.msra.mxu2 %v8624_v8  ;;  %v8352_v16 = vor.u32 %v12503_v13, %v8351_v11 }
   0x7   :  { %v8480_v17 = vor.u32 %v12535_v15, %v8479_v14  ;;  %v8607_v18 = vld [vmem:[%s20112_s1 + $0x2c0] sm:$0xf]  ;;  %v12567_v19 = vld [vmem:[%s20112_s1 + $0x2cc] sm:$0xf0]  ;;  %6290 = vmatpush.bf16.msra.mxu3 %v8752_v12 }
   0x8   :  { %v8735_v20 = vld [vmem:[%s20112_s1 + $0x3c0] sm:$0xf]  ;;  %v8608_v21 = vor.u32 %v12567_v19, %v8607_v18  ;;  %v12599_v22 = vld [vmem:[%s20112_s1 + $0x3cc] sm:$0xf0]  ;;  %6252 = vmatpush.bf16.msra.mxu0 %v8352_v16 }
   0x9   :  { %v8335_v23 = vld [vmem:[%s20112_s1 + $0xa0] sm:$0xf]  ;;  %v12499_v24 = vld [vmem:[%s20112_s1 + $0xac] sm:$0xf0]  ;;  %v8736_v25 = vor.u32 %v12599_v22, %v8735_v20  ;;  %6265 = vmatpush.bf16.msra.mxu1 %v8480_v17 }
   0xa   :  { %v8463_v26 = vld [vmem:[%s20112_s1 + $0x1a0] sm:$0xf]  ;;  %v12531_v27 = vld [vmem:[%s20112_s1 + $0x1ac] sm:$0xf0]  ;;  %v8336_v29 = vor.u32 %v12499_v24, %v8335_v23  ;;  %6278 = vmatpush.bf16.msra.mxu2 %v8608_v21 }
   0xb   :  { %v8591_v28 = vld [vmem:[%s20112_s1 + $0x2a0] sm:$0xf]  ;;  %v12563_v30 = vld [vmem:[%s20112_s1 + $0x2ac] sm:$0xf0]  ;;  %v8464_v33 = vor.u32 %v12531_v27, %v8463_v26  ;;  %6291 = vmatpush.bf16.msra.mxu3 %v8736_v25 }
   0xc   :  { %v8719_v31 = vld [vmem:[%s20112_s1 + $0x3a0] sm:$0xf]  ;;  %v12595_v32 = vld [vmem:[%s20112_s1 + $0x3ac] sm:$0xf0]  ;;  %v8592_v34 = vor.u32 %v12563_v30, %v8591_v28  ;;  %6253 = vmatpush.bf16.msra.mxu0 %v8336_v29 }
   0xd   :  { %v8319_v35 = vld [vmem:[%s20112_s1 + $0x80] sm:$0xf]  ;;  %v12495_v36 = vld [vmem:[%s20112_s1 + $0x8c] sm:$0xf0]  ;;  %v8720_v38 = vor.u32 %v12595_v32, %v8719_v31  ;;  %6266 = vmatpush.bf16.msra.mxu1 %v8464_v33 }
   0xe   :  { %v8447_v37 = vld [vmem:[%s20112_s1 + $0x180] sm:$0xf]  ;;  %v12527_v39 = vld [vmem:[%s20112_s1 + $0x18c] sm:$0xf0]  ;;  %v8320_v44 = vor.u32 %v12495_v36, %v8319_v35  ;;  %6279 = vmatpush.bf16.msra.mxu2 %v8592_v34 }
   0xf   :  { %v8575_v40 = vld [vmem:[%s20112_s1 + $0x280] sm:$0xf]  ;;  %v12559_v41 = vld [vmem:[%s20112_s1 + $0x28c] sm:$0xf0]  ;;  %v8448_v45 = vor.u32 %v12527_v39, %v8447_v37  ;;  %6292 = vmatpush.bf16.msra.mxu3 %v8720_v38 }
  0x10   :  { %v8703_v42 = vld [vmem:[%s20112_s1 + $0x380] sm:$0xf]  ;;  %v12591_v43 = vld [vmem:[%s20112_s1 + $0x38c] sm:$0xf0]  ;;  %v8576_v46 = vor.u32 %v12559_v41, %v8575_v40  ;;  %6254 = vmatpush.bf16.msra.mxu0 %v8320_v44 }
  0x11   :  { %v8303_v47 = vld [vmem:[%s20112_s1 + $0x60] sm:$0xf]  ;;  %v12491_v48 = vld [vmem:[%s20112_s1 + $0x6c] sm:$0xf0]  ;;  %v8704_v50 = vor.u32 %v12591_v43, %v8703_v42  ;;  %6267 = vmatpush.bf16.msra.mxu1 %v8448_v45 }
  0x12   :  { %v8431_v49 = vld [vmem:[%s20112_s1 + $0x160] sm:$0xf]  ;;  %v12523_v51 = vld [vmem:[%s20112_s1 + $0x16c] sm:$0xf0]  ;;  %v8304_v56 = vor.u32 %v12491_v48, %v8303_v47  ;;  %6280 = vmatpush.bf16.msra.mxu2 %v8576_v46 }
  0x13   :  { %v8559_v52 = vld [vmem:[%s20112_s1 + $0x260] sm:$0xf]  ;;  %v12555_v53 = vld [vmem:[%s20112_s1 + $0x26c] sm:$0xf0]  ;;  %v8432_v57 = vor.u32 %v12523_v51, %v8431_v49  ;;  %6293 = vmatpush.bf16.msra.mxu3 %v8704_v50 }
  0x14   :  { %v8687_v54 = vld [vmem:[%s20112_s1 + $0x360] sm:$0xf]  ;;  %v12587_v55 = vld [vmem:[%s20112_s1 + $0x36c] sm:$0xf0]  ;;  %v8560_v58 = vor.u32 %v12555_v53, %v8559_v52  ;;  %6255 = vmatpush.bf16.msra.mxu0 %v8304_v56 }
  0x15   :  { %v8287_v59 = vld [vmem:[%s20112_s1 + $0x40] sm:$0xf]  ;;  %v12487_v60 = vld [vmem:[%s20112_s1 + $0x4c] sm:$0xf0]  ;;  %v8688_v62 = vor.u32 %v12587_v55, %v8687_v54  ;;  %6268 = vmatpush.bf16.msra.mxu1 %v8432_v57 }
  0x16   :  { %v8415_v61 = vld [vmem:[%s20112_s1 + $0x140] sm:$0xf]  ;;  %v12519_v63 = vld [vmem:[%s20112_s1 + $0x14c] sm:$0xf0]  ;;  %v8288_v4 = vor.u32 %v12487_v60, %v8287_v59  ;;  %6281 = vmatpush.bf16.msra.mxu2 %v8560_v58 }
  0x17   :  { %v8543_v0 = vld [vmem:[%s20112_s1 + $0x240] sm:$0xf]  ;;  %v12551_v1 = vld [vmem:[%s20112_s1 + $0x24c] sm:$0xf0]  ;;  %v8416_v5 = vor.u32 %v12519_v63, %v8415_v61  ;;  %6294 = vmatpush.bf16.msra.mxu3 %v8688_v62 }
  0x18   :  { %v8671_v2 = vld [vmem:[%s20112_s1 + $0x340] sm:$0xf]  ;;  %v12583_v3 = vld [vmem:[%s20112_s1 + $0x34c] sm:$0xf0]  ;;  %v8544_v6 = vor.u32 %v12551_v1, %v8543_v0  ;;  %6256 = vmatpush.bf16.msra.mxu0 %v8288_v4 }
  0x19   :  { %v8271_v7 = vld [vmem:[%s20112_s1 + $0x20] sm:$0xf]  ;;  %v12483_v8 = vld [vmem:[%s20112_s1 + $0x2c] sm:$0xf0]  ;;  %v8672_v10 = vor.u32 %v12583_v3, %v8671_v2  ;;  %6269 = vmatpush.bf16.msra.mxu1 %v8416_v5 }
  0x1a   :  { %v8399_v9 = vld [vmem:[%s20112_s1 + $0x120] sm:$0xf]  ;;  %v12515_v11 = vld [vmem:[%s20112_s1 + $0x12c] sm:$0xf0]  ;;  %v8272_v16 = vor.u32 %v12483_v8, %v8271_v7  ;;  %6282 = vmatpush.bf16.msra.mxu2 %v8544_v6 }
  0x1b   :  { %v8527_v12 = vld [vmem:[%s20112_s1 + $0x220] sm:$0xf]  ;;  %v12547_v13 = vld [vmem:[%s20112_s1 + $0x22c] sm:$0xf0]  ;;  %v8400_v19 = vor.u32 %v12515_v11, %v8399_v9  ;;  %6295 = vmatpush.bf16.msra.mxu3 %v8672_v10 }
  0x1c   :  { %v8655_v14 = vld [vmem:[%s20112_s1 + $0x320] sm:$0xf]  ;;  %v12579_v15 = vld [vmem:[%s20112_s1 + $0x32c] sm:$0xf0]  ;;  %v8528_v20 = vor.u32 %v12547_v13, %v8527_v12  ;;  %6257 = vmatpush.bf16.msra.mxu0 %v8272_v16 }
  0x1d   :  { %v8255_v17 = vld [vmem:[%s20112_s1] sm:$0xf]  ;;  %v12479_v18 = vld [vmem:[%s20112_s1 + $0xc] sm:$0xf0]  ;;  %v8656_v24 = vor.u32 %v12579_v15, %v8655_v14  ;;  %6270 = vmatpush.bf16.msra.mxu1 %v8400_v19 }
  0x1e   :  { %v8383_v21 = vld [vmem:[%s20112_s1 + $0x100] sm:$0xf]  ;;  %v12511_v22 = vld [vmem:[%s20112_s1 + $0x10c] sm:$0xf0]  ;;  %v8256_v31 = vor.u32 %v12479_v18, %v8255_v17  ;;  %6283 = vmatpush.bf16.msra.mxu2 %v8528_v20 }
  0x1f   :  { %v8511_v23 = vld [vmem:[%s20112_s1 + $0x200] sm:$0xf]  ;;  %v12543_v25 = vld [vmem:[%s20112_s1 + $0x20c] sm:$0xf0]  ;;  %v8384_v35 = vor.u32 %v12511_v22, %v8383_v21  ;;  %6296 = vmatpush.bf16.msra.mxu3 %v8656_v24 }
  0x20   :  { %v8639_v26 = vld [vmem:[%s20112_s1 + $0x300] sm:$0xf]  ;;  %v12575_v27 = vld [vmem:[%s20112_s1 + $0x30c] sm:$0xf0]  ;;  %v8512_v36 = vor.u32 %v12543_v25, %v8511_v23  ;;  %6258 = vmatpush.bf16.msra.mxu0 %v8256_v31 }
  0x21   :  { %v8879_v28 = vld [vmem:[%s20112_s1 + $0x4e0] sm:$0xf]  ;;  %v12635_v29 = vld [vmem:[%s20112_s1 + $0x4ec] sm:$0xf0]  ;;  %v8640_v39 = vor.u32 %v12575_v27, %v8639_v26  ;;  %6271 = vmatpush.bf16.msra.mxu1 %v8384_v35 }
  0x22   :  { %v9007_v30 = vld [vmem:[%s20112_s1 + $0x5e0] sm:$0xf]  ;;  %v12667_v32 = vld [vmem:[%s20112_s1 + $0x5ec] sm:$0xf0]  ;;  %v8880_v40 = vor.u32 %v12635_v29, %v8879_v28  ;;  %6284 = vmatpush.bf16.msra.mxu2 %v8512_v36 }
  0x23   :  { %v9135_v33 = vld [vmem:[%s20112_s1 + $0x6e0] sm:$0xf]  ;;  %v12699_v34 = vld [vmem:[%s20112_s1 + $0x6ec] sm:$0xf0]  ;;  %v9008_v41 = vor.u32 %v12667_v32, %v9007_v30  ;;  %6297 = vmatpush.bf16.msra.mxu3 %v8640_v39 }
  0x24   :  { %v9263_v37 = vld [vmem:[%s20112_s1 + $0x7e0] sm:$0xf]  ;;  %v12731_v38 = vld [vmem:[%s20112_s1 + $0x7ec] sm:$0xf0]  ;;  %v9136_v42 = vor.u32 %v12699_v34, %v9135_v33  ;;  %6303 = vmatpush.bf16.msrb.mxu0 %v8880_v40 }
  0x25   :  { %v8863_v43 = vld [vmem:[%s20112_s1 + $0x4c0] sm:$0xf]  ;;  %v12631_v44 = vld [vmem:[%s20112_s1 + $0x4cc] sm:$0xf0]  ;;  %v9264_v46 = vor.u32 %v12731_v38, %v9263_v37  ;;  %6316 = vmatpush.bf16.msrb.mxu1 %v9008_v41 }
  0x26   :  { %v8991_v45 = vld [vmem:[%s20112_s1 + $0x5c0] sm:$0xf]  ;;  %v12663_v47 = vld [vmem:[%s20112_s1 + $0x5cc] sm:$0xf0]  ;;  %v8864_v52 = vor.u32 %v12631_v44, %v8863_v43  ;;  %6329 = vmatpush.bf16.msrb.mxu2 %v9136_v42 }
  0x27   :  { %v9119_v48 = vld [vmem:[%s20112_s1 + $0x6c0] sm:$0xf]  ;;  %v12695_v49 = vld [vmem:[%s20112_s1 + $0x6cc] sm:$0xf0]  ;;  %v8992_v53 = vor.u32 %v12663_v47, %v8991_v45  ;;  %6342 = vmatpush.bf16.msrb.mxu3 %v9264_v46 }
  0x28   :  { %v9247_v50 = vld [vmem:[%s20112_s1 + $0x7c0] sm:$0xf]  ;;  %v12727_v51 = vld [vmem:[%s20112_s1 + $0x7cc] sm:$0xf0]  ;;  %v9120_v54 = vor.u32 %v12695_v49, %v9119_v48  ;;  %6304 = vmatpush.bf16.msrb.mxu0 %v8864_v52 }
  0x29   :  { %v8847_v55 = vld [vmem:[%s20112_s1 + $0x4a0] sm:$0xf]  ;;  %v12627_v56 = vld [vmem:[%s20112_s1 + $0x4ac] sm:$0xf0]  ;;  %v9248_v58 = vor.u32 %v12727_v51, %v9247_v50  ;;  %6317 = vmatpush.bf16.msrb.mxu1 %v8992_v53 }
  0x2a   :  { %v8975_v57 = vld [vmem:[%s20112_s1 + $0x5a0] sm:$0xf]  ;;  %v12659_v59 = vld [vmem:[%s20112_s1 + $0x5ac] sm:$0xf0]  ;;  %v8848_v0 = vor.u32 %v12627_v56, %v8847_v55  ;;  %6330 = vmatpush.bf16.msrb.mxu2 %v9120_v54 }
  0x2b   :  { %v9103_v60 = vld [vmem:[%s20112_s1 + $0x6a0] sm:$0xf]  ;;  %v12691_v61 = vld [vmem:[%s20112_s1 + $0x6ac] sm:$0xf0]  ;;  %v8976_v3 = vor.u32 %v12659_v59, %v8975_v57  ;;  %6343 = vmatpush.bf16.msrb.mxu3 %v9248_v58 }
  0x2c   :  { %v9231_v62 = vld [vmem:[%s20112_s1 + $0x7a0] sm:$0xf]  ;;  %v12723_v63 = vld [vmem:[%s20112_s1 + $0x7ac] sm:$0xf0]  ;;  %v9104_v4 = vor.u32 %v12691_v61, %v9103_v60  ;;  %6305 = vmatpush.bf16.msrb.mxu0 %v8848_v0  ;;  %v22_v61 = vld [vmem:[%s20111_s0 + $0x8] sm:$0xff] }
  0x2d   :  { %v8831_v1 = vld [vmem:[%s20112_s1 + $0x480] sm:$0xf]  ;;  %v12623_v5 = vld [vmem:[%s20112_s1 + $0x48c] sm:$0xf0]  ;;  %v9232_v7 = vor.u32 %v12723_v63, %v9231_v62  ;;  %6318 = vmatpush.bf16.msrb.mxu1 %v8976_v3 }
  0x2e   :  { %v21_v2 = vld [vmem:[%s20111_s0] sm:$0xff]  ;;  %v12655_v8 = vld [vmem:[%s20112_s1 + $0x58c] sm:$0xf0]  ;;  %v8832_v13 = vor.u32 %v12623_v5, %v8831_v1  ;;  %6331 = vmatpush.bf16.msrb.mxu2 %v9104_v4 }
  0x2f   :  { %v8959_v6 = vld [vmem:[%s20112_s1 + $0x580] sm:$0xf]  ;;  %1060 = vst [vmem:[#allocation1] ss:$9 sm:$0xff] %v21_v2  ;;  %v12687_v10 = vld [vmem:[%s20112_s1 + $0x68c] sm:$0xf0]  ;;  %6344 = vmatpush.bf16.msrb.mxu3 %v9232_v7 }
  0x30   :  { %v9087_v9 = vld [vmem:[%s20112_s1 + $0x680] sm:$0xf]  ;;  %v12719_v12 = vld [vmem:[%s20112_s1 + $0x78c] sm:$0xf0]  ;;  %v8960_v14 = vor.u32 %v12655_v8, %v8959_v6  ;;  %6306 = vmatpush.bf16.msrb.mxu0 %v8832_v13 }
  0x31   :  { %v9215_v11 = vld [vmem:[%s20112_s1 + $0x780] sm:$0xf]  ;;  %v9088_v15 = vor.u32 %v12687_v10, %v9087_v9  ;;  %v12619_v17 = vld [vmem:[%s20112_s1 + $0x46c] sm:$0xf0] }
  0x32   :  { %v8815_v16 = vld [vmem:[%s20112_s1 + $0x460] sm:$0xf]  ;;  %v9216_v19 = vor.u32 %v12719_v12, %v9215_v11  ;;  %v12651_v20 = vld [vmem:[%s20112_s1 + $0x56c] sm:$0xf0]  ;;  %6319 = vmatpush.bf16.msrb.mxu1 %v8960_v14 }
  0x33   :  { %v8943_v18 = vld [vmem:[%s20112_s1 + $0x560] sm:$0xf]  ;;  %v12683_v22 = vld [vmem:[%s20112_s1 + $0x66c] sm:$0xf0]  ;;  %v8816_v26 = vor.u32 %v12619_v17, %v8815_v16  ;;  %6332 = vmatpush.bf16.msrb.mxu2 %v9088_v15 }
  0x34   :  { %v9071_v21 = vld [vmem:[%s20112_s1 + $0x660] sm:$0xf]  ;;  %v12715_v24 = vld [vmem:[%s20112_s1 + $0x76c] sm:$0xf0]  ;;  %v8944_v30 = vor.u32 %v12651_v20, %v8943_v18  ;;  %6345 = vmatpush.bf16.msrb.mxu3 %v9216_v19 }
  0x35   :  { %v9199_v23 = vld [vmem:[%s20112_s1 + $0x760] sm:$0xf]  ;;  %v9072_v31 = vor.u32 %v12683_v22, %v9071_v21  ;;  %v12615_v32 = vld [vmem:[%s20112_s1 + $0x44c] sm:$0xf0]  ;;  %6307 = vmatpush.bf16.msrb.mxu0 %v8816_v26 }
  0x36   :  { %v8799_v25 = vld [vmem:[%s20112_s1 + $0x440] sm:$0xf]  ;;  %v13937_v27 = vld [vmem:[#allocation1 + $0x12] sm:$0xff]  ;;  %v13949_v34 = vld [vmem:[#allocation1 + $0x9] sm:$0xff]  ;;  %v9200_v35 = vor.u32 %v12715_v24, %v9199_v23  ;;  %6320 = vmatpush.bf16.msrb.mxu1 %v8944_v30 }
  0x37   :  { %v13939_v28 = vld [vmem:[#allocation1] sm:$0xff]  ;;  %v12647_v36 = vld [vmem:[%s20112_s1 + $0x54c] sm:$0xf0]  ;;  %6285 = vmatmul.bf16.vlgmr.msra.gmra.mxu2 %v13937_v27  ;;  %v8800_v41 = vor.u32 %v12615_v32, %v8799_v25  ;;  %6272 = vmatmul.bf16.vlgmr.msra.gmra.mxu1 %v13949_v34  ;;  %v14012_v60 = vld [vmem:[#allocation1 + $0x36] sm:$0xff] }
  0x38   :  { %v13941_v29 = vld [vmem:[#allocation1 + $0x1b] sm:$0xff]  ;;  %v12679_v38 = vld [vmem:[%s20112_s1 + $0x64c] sm:$0xf0]  ;;  %6259 = vmatmul.bf16.vlgmr.msra.gmra.mxu0 %v13939_v28  ;;  %6333 = vmatpush.bf16.msrb.mxu2 %v9072_v31  ;;  %v14017_v0 = vld [vmem:[#allocation1 + $0x24] sm:$0xff] }
  0x39   :  { %v8927_v33 = vld [vmem:[%s20112_s1 + $0x540] sm:$0xf]  ;;  %v12711_v40 = vld [vmem:[%s20112_s1 + $0x74c] sm:$0xf0]  ;;  %6298 = vmatmul.bf16.vlgmr.msra.gmra.mxu3 %v13941_v29  ;;  %6308 = vmatpush.bf16.msrb.mxu0 %v8800_v41 }
  0x3a   :  { %v9055_v37 = vld [vmem:[%s20112_s1 + $0x640] sm:$0xf]  ;;  %v8928_v43 = vor.u32 %v12647_v36, %v8927_v33  ;;  %v12611_v45 = vld [vmem:[%s20112_s1 + $0x42c] sm:$0xf0]  ;;  %6346 = vmatpush.bf16.msrb.mxu3 %v9200_v35 }
  0x3b   :  { %v9183_v39 = vld [vmem:[%s20112_s1 + $0x740] sm:$0xf]  ;;  %v9056_v44 = vor.u32 %v12679_v38, %v9055_v37  ;;  %v12643_v47 = vld [vmem:[%s20112_s1 + $0x52c] sm:$0xf0] }
  0x3c   :  { %v8783_v42 = vld [vmem:[%s20112_s1 + $0x420] sm:$0xf]  ;;  %v9184_v48 = vor.u32 %v12711_v40, %v9183_v39  ;;  %v12675_v50 = vld [vmem:[%s20112_s1 + $0x62c] sm:$0xf0]  ;;  %6321 = vmatpush.bf16.msrb.mxu1 %v8928_v43 }
  0x3d   :  { %v8911_v46 = vld [vmem:[%s20112_s1 + $0x520] sm:$0xf]  ;;  %v12707_v52 = vld [vmem:[%s20112_s1 + $0x72c] sm:$0xf0]  ;;  %v8784_v55 = vor.u32 %v12611_v45, %v8783_v42  ;;  %6334 = vmatpush.bf16.msrb.mxu2 %v9056_v44 }
  0x3e   :  { %v9039_v49 = vld [vmem:[%s20112_s1 + $0x620] sm:$0xf]  ;;  %v12607_v54 = vld [vmem:[%s20112_s1 + $0x40c] sm:$0xf0]  ;;  %v8912_v62 = vor.u32 %v12643_v47, %v8911_v46  ;;  %6347 = vmatpush.bf16.msrb.mxu3 %v9184_v48 }
  0x3f   :  { %v9167_v51 = vld [vmem:[%s20112_s1 + $0x720] sm:$0xf]  ;;  %v12639_v57 = vld [vmem:[%s20112_s1 + $0x50c] sm:$0xf0]  ;;  %v9040_v63 = vor.u32 %v12675_v50, %v9039_v49  ;;  %6309 = vmatpush.bf16.msrb.mxu0 %v8784_v55 }
  0x40   :  { %v8767_v53 = vld [vmem:[%s20112_s1 + $0x400] sm:$0xf]  ;;  %v12671_v59 = vld [vmem:[%s20112_s1 + $0x60c] sm:$0xf0]  ;;  %v9168_v3 = vor.u32 %v12707_v52, %v9167_v51  ;;  %6322 = vmatpush.bf16.msrb.mxu1 %v8912_v62 }
  0x41   :  { %v8895_v56 = vld [vmem:[%s20112_s1 + $0x500] sm:$0xf]  ;;  %v14021_v2 = vld [vmem:[#allocation1 + $0x2d] sm:$0xff]  ;;  %v8768_v9 = vor.u32 %v12607_v54, %v8767_v53  ;;  %6335 = vmatpush.bf16.msrb.mxu2 %v9040_v63 }
  0x42   :  { %v9023_v58 = vld [vmem:[%s20112_s1 + $0x600] sm:$0xf]  ;;  %v12703_v5 = vld [vmem:[%s20112_s1 + $0x70c] sm:$0xf0]  ;;  %v8896_v13 = vor.u32 %v12639_v57, %v8895_v56  ;;  %6348 = vmatpush.bf16.msrb.mxu3 %v9168_v3 }
  0x43   :  { %v14019_v1 = vld [vmem:[#allocation1 + $0x3f] sm:$0xff]  ;;  %v12763_v7 = vld [vmem:[%s20112_s1 + $0x8ec] sm:$0xf0]  ;;  %v9024_v14 = vor.u32 %v12671_v59, %v9023_v58  ;;  %6310 = vmatpush.bf16.msrb.mxu0 %v8768_v9 }
  0x44   :  { %v9151_v4 = vld [vmem:[%s20112_s1 + $0x700] sm:$0xf]  ;;  %1070 = vst [vmem:[#allocation1] ss:$9 sm:$0xff] %v22_v61  ;;  %v12795_v10 = vld [vmem:[%s20112_s1 + $0x9ec] sm:$0xf0]  ;;  %6323 = vmatpush.bf16.msrb.mxu1 %v8896_v13 }
  0x45   :  { %v9391_v6 = vld [vmem:[%s20112_s1 + $0x8e0] sm:$0xf]  ;;  %v12827_v12 = vld [vmem:[%s20112_s1 + $0xaec] sm:$0xf0]  ;;  %v9152_v17 = vor.u32 %v12703_v5, %v9151_v4  ;;  %6336 = vmatpush.bf16.msrb.mxu2 %v9024_v14 }
  0x46   :  { %v9519_v8 = vld [vmem:[%s20112_s1 + $0x9e0] sm:$0xf]  ;;  %v12859_v16 = vld [vmem:[%s20112_s1 + $0xbec] sm:$0xf0]  ;;  %v9392_v18 = vor.u32 %v12763_v7, %v9391_v6 }
  0x47   :  { %v9647_v11 = vld [vmem:[%s20112_s1 + $0xae0] sm:$0xf]  ;;  %v9520_v19 = vor.u32 %v12795_v10, %v9519_v8  ;;  %v12759_v22 = vld [vmem:[%s20112_s1 + $0x8cc] sm:$0xf0]  ;;  %6349 = vmatpush.bf16.msrb.mxu3 %v9152_v17  ;;  %6324 = vmatmul.bf16.vlgmr.msrb.gmra.mxu1 %v14021_v2 }
  0x48   :  { %v9775_v15 = vld [vmem:[%s20112_s1 + $0xbe0] sm:$0xf]  ;;  %v9648_v20 = vor.u32 %v12827_v12, %v9647_v11  ;;  %v12791_v25 = vld [vmem:[%s20112_s1 + $0x9cc] sm:$0xf0]  ;;  %6355 = vmatpush.bf16.msra.mxu0 %v9392_v18  ;;  %6337 = vmatmul.bf16.vlgmr.msrb.gmra.mxu2 %v14012_v60 }
  0x49   :  { %v9375_v21 = vld [vmem:[%s20112_s1 + $0x8c0] sm:$0xf]  ;;  %v9776_v24 = vor.u32 %v12859_v16, %v9775_v15  ;;  %v12823_v30 = vld [vmem:[%s20112_s1 + $0xacc] sm:$0xf0]  ;;  %6368 = vmatpush.bf16.msra.mxu1 %v9520_v19  ;;  %6311 = vmatmul.bf16.vlgmr.msrb.gmra.mxu0 %v14017_v0 }
  0x4a   :  { %v9503_v23 = vld [vmem:[%s20112_s1 + $0x9c0] sm:$0xf]  ;;  %v12855_v32 = vld [vmem:[%s20112_s1 + $0xbcc] sm:$0xf0]  ;;  %v9376_v33 = vor.u32 %v12759_v22, %v9375_v21  ;;  %6381 = vmatpush.bf16.msra.mxu2 %v9648_v20  ;;  %6350 = vmatmul.bf16.vlgmr.msrb.gmra.mxu3 %v14019_v1 }
  0x4b   :  { %v9631_v26 = vld [vmem:[%s20112_s1 + $0xac0] sm:$0xf]  ;;  %v9504_v35 = vor.u32 %v12791_v25, %v9503_v23  ;;  %v12755_v38 = vld [vmem:[%s20112_s1 + $0x8ac] sm:$0xf0]  ;;  %6394 = vmatpush.bf16.msra.mxu3 %v9776_v24 }
  0x4c   :  { %v9759_v31 = vld [vmem:[%s20112_s1 + $0xbc0] sm:$0xf]  ;;  %v9632_v36 = vor.u32 %v12823_v30, %v9631_v26  ;;  %v12787_v41 = vld [vmem:[%s20112_s1 + $0x9ac] sm:$0xf0]  ;;  %6356 = vmatpush.bf16.msra.mxu0 %v9376_v33 }
  0x4d   :  { %v9359_v37 = vld [vmem:[%s20112_s1 + $0x8a0] sm:$0xf]  ;;  %v9760_v40 = vor.u32 %v12855_v32, %v9759_v31  ;;  %v12819_v43 = vld [vmem:[%s20112_s1 + $0xaac] sm:$0xf0]  ;;  %6369 = vmatpush.bf16.msra.mxu1 %v9504_v35 }
  0x4e   :  { %v9487_v39 = vld [vmem:[%s20112_s1 + $0x9a0] sm:$0xf]  ;;  %v12851_v45 = vld [vmem:[%s20112_s1 + $0xbac] sm:$0xf0]  ;;  %v9360_v46 = vor.u32 %v12755_v38, %v9359_v37  ;;  %6382 = vmatpush.bf16.msra.mxu2 %v9632_v36 }
  0x4f   :  { %v9615_v42 = vld [vmem:[%s20112_s1 + $0xaa0] sm:$0xf]  ;;  %v9488_v47 = vor.u32 %v12787_v41, %v9487_v39  ;;  %v12751_v50 = vld [vmem:[%s20112_s1 + $0x88c] sm:$0xf0]  ;;  %6395 = vmatpush.bf16.msra.mxu3 %v9760_v40 }
  0x50   :  { %v9743_v44 = vld [vmem:[%s20112_s1 + $0xba0] sm:$0xf]  ;;  %v9616_v48 = vor.u32 %v12819_v43, %v9615_v42  ;;  %v12783_v53 = vld [vmem:[%s20112_s1 + $0x98c] sm:$0xf0]  ;;  %6357 = vmatpush.bf16.msra.mxu0 %v9360_v46 }
  0x51   :  { %v9343_v49 = vld [vmem:[%s20112_s1 + $0x880] sm:$0xf]  ;;  %v9744_v52 = vor.u32 %v12851_v45, %v9743_v44  ;;  %v12815_v55 = vld [vmem:[%s20112_s1 + $0xa8c] sm:$0xf0]  ;;  %6370 = vmatpush.bf16.msra.mxu1 %v9488_v47 }
  0x52   :  { %v9471_v51 = vld [vmem:[%s20112_s1 + $0x980] sm:$0xf]  ;;  %v12847_v57 = vld [vmem:[%s20112_s1 + $0xb8c] sm:$0xf0]  ;;  %v9344_v58 = vor.u32 %v12751_v50, %v9343_v49  ;;  %6383 = vmatpush.bf16.msra.mxu2 %v9616_v48 }
  0x53   :  { %v9599_v54 = vld [vmem:[%s20112_s1 + $0xa80] sm:$0xf]  ;;  %v9472_v59 = vor.u32 %v12783_v53, %v9471_v51  ;;  %v12747_v63 = vld [vmem:[%s20112_s1 + $0x86c] sm:$0xf0]  ;;  %6396 = vmatpush.bf16.msra.mxu3 %v9744_v52 }
  0x54   :  { %v9727_v56 = vld [vmem:[%s20112_s1 + $0xb80] sm:$0xf]  ;;  %v9600_v61 = vor.u32 %v12815_v55, %v9599_v54  ;;  %v12779_v5 = vld [vmem:[%s20112_s1 + $0x96c] sm:$0xf0]  ;;  %6358 = vmatpush.bf16.msra.mxu0 %v9344_v58 }
  0x55   :  { %v9327_v62 = vld [vmem:[%s20112_s1 + $0x860] sm:$0xf]  ;;  %v9728_v4 = vor.u32 %v12847_v57, %v9727_v56  ;;  %v12811_v7 = vld [vmem:[%s20112_s1 + $0xa6c] sm:$0xf0]  ;;  %6371 = vmatpush.bf16.msra.mxu1 %v9472_v59 }
  0x56   :  { %v9455_v3 = vld [vmem:[%s20112_s1 + $0x960] sm:$0xf]  ;;  %v12843_v9 = vld [vmem:[%s20112_s1 + $0xb6c] sm:$0xf0]  ;;  %v9328_v10 = vor.u32 %v12747_v63, %v9327_v62  ;;  %6384 = vmatpush.bf16.msra.mxu2 %v9600_v61 }
  0x57   :  { %v9583_v6 = vld [vmem:[%s20112_s1 + $0xa60] sm:$0xf]  ;;  %v9456_v11 = vor.u32 %v12779_v5, %v9455_v3  ;;  %v12743_v14 = vld [vmem:[%s20112_s1 + $0x84c] sm:$0xf0]  ;;  %6397 = vmatpush.bf16.msra.mxu3 %v9728_v4 }
  0x58   :  { %v9711_v8 = vld [vmem:[%s20112_s1 + $0xb60] sm:$0xf]  ;;  %v9584_v12 = vor.u32 %v12811_v7, %v9583_v6  ;;  %v12775_v17 = vld [vmem:[%s20112_s1 + $0x94c] sm:$0xf0]  ;;  %6359 = vmatpush.bf16.msra.mxu0 %v9328_v10 }
  0x59   :  { %v9311_v13 = vld [vmem:[%s20112_s1 + $0x840] sm:$0xf]  ;;  %v9712_v16 = vor.u32 %v12843_v9, %v9711_v8  ;;  %v12807_v19 = vld [vmem:[%s20112_s1 + $0xa4c] sm:$0xf0]  ;;  %6372 = vmatpush.bf16.msra.mxu1 %v9456_v11 }
  0x5a   :  { %v9439_v15 = vld [vmem:[%s20112_s1 + $0x940] sm:$0xf]  ;;  %v12839_v21 = vld [vmem:[%s20112_s1 + $0xb4c] sm:$0xf0]  ;;  %v9312_v22 = vor.u32 %v12743_v14, %v9311_v13  ;;  %6385 = vmatpush.bf16.msra.mxu2 %v9584_v12 }
  0x5b   :  { %v9567_v18 = vld [vmem:[%s20112_s1 + $0xa40] sm:$0xf]  ;;  %v9440_v23 = vor.u32 %v12775_v17, %v9439_v15  ;;  %v12739_v26 = vld [vmem:[%s20112_s1 + $0x82c] sm:$0xf0]  ;;  %6398 = vmatpush.bf16.msra.mxu3 %v9712_v16 }
  0x5c   :  { %v9695_v20 = vld [vmem:[%s20112_s1 + $0xb40] sm:$0xf]  ;;  %v9568_v24 = vor.u32 %v12807_v19, %v9567_v18  ;;  %v12771_v32 = vld [vmem:[%s20112_s1 + $0x92c] sm:$0xf0]  ;;  %6360 = vmatpush.bf16.msra.mxu0 %v9312_v22 }
  0x5d   :  { %v9295_v25 = vld [vmem:[%s20112_s1 + $0x820] sm:$0xf]  ;;  %v9696_v31 = vor.u32 %v12839_v21, %v9695_v20  ;;  %v12803_v35 = vld [vmem:[%s20112_s1 + $0xa2c] sm:$0xf0]  ;;  %6373 = vmatpush.bf16.msra.mxu1 %v9440_v23 }
  0x5e   :  { %v9423_v30 = vld [vmem:[%s20112_s1 + $0x920] sm:$0xf]  ;;  %v12835_v37 = vld [vmem:[%s20112_s1 + $0xb2c] sm:$0xf0]  ;;  %v9296_v38 = vor.u32 %v12739_v26, %v9295_v25  ;;  %6386 = vmatpush.bf16.msra.mxu2 %v9568_v24 }
  0x5f   :  { %v9551_v33 = vld [vmem:[%s20112_s1 + $0xa20] sm:$0xf]  ;;  %v12735_v40 = vld [vmem:[%s20112_s1 + $0x80c] sm:$0xf0]  ;;  %v9424_v41 = vor.u32 %v12771_v32, %v9423_v30  ;;  %6399 = vmatpush.bf16.msra.mxu3 %v9696_v31 }
  0x60   :  { %v9679_v36 = vld [vmem:[%s20112_s1 + $0xb20] sm:$0xf]  ;;  %v9552_v42 = vor.u32 %v12803_v35, %v9551_v33  ;;  %v12767_v44 = vld [vmem:[%s20112_s1 + $0x90c] sm:$0xf0]  ;;  %6361 = vmatpush.bf16.msra.mxu0 %v9296_v38 }
  0x61   :  { %v9279_v39 = vld [vmem:[%s20112_s1 + $0x800] sm:$0xf]  ;;  %v9680_v46 = vor.u32 %v12835_v37, %v9679_v36  ;;  %v12799_v47 = vld [vmem:[%s20112_s1 + $0xa0c] sm:$0xf0]  ;;  %6374 = vmatpush.bf16.msra.mxu1 %v9424_v41 }
  0x62   :  { %v9407_v43 = vld [vmem:[%s20112_s1 + $0x900] sm:$0xf]  ;;  %v12831_v49 = vld [vmem:[%s20112_s1 + $0xb0c] sm:$0xf0]  ;;  %v9280_v53 = vor.u32 %v12735_v40, %v9279_v39  ;;  %6387 = vmatpush.bf16.msra.mxu2 %v9552_v42 }
  0x63   :  { %v9535_v45 = vld [vmem:[%s20112_s1 + $0xa00] sm:$0xf]  ;;  %v12891_v51 = vld [vmem:[%s20112_s1 + $0xcec] sm:$0xf0]  ;;  %v9408_v57 = vor.u32 %v12767_v44, %v9407_v43  ;;  %6400 = vmatpush.bf16.msra.mxu3 %v9680_v46 }
  0x64   :  { %v9663_v48 = vld [vmem:[%s20112_s1 + $0xb00] sm:$0xf]  ;;  %v12923_v54 = vld [vmem:[%s20112_s1 + $0xdec] sm:$0xf0]  ;;  %v9536_v58 = vor.u32 %v12799_v47, %v9535_v45  ;;  %6362 = vmatpush.bf16.msra.mxu0 %v9280_v53 }
  0x65   :  { %v9903_v50 = vld [vmem:[%s20112_s1 + $0xce0] sm:$0xf]  ;;  %v12955_v56 = vld [vmem:[%s20112_s1 + $0xeec] sm:$0xf0]  ;;  %v9664_v62 = vor.u32 %v12831_v49, %v9663_v48  ;;  %6375 = vmatpush.bf16.msra.mxu1 %v9408_v57 }
  0x66   :  { %v10031_v52 = vld [vmem:[%s20112_s1 + $0xde0] sm:$0xf]  ;;  %v12987_v61 = vld [vmem:[%s20112_s1 + $0xfec] sm:$0xf0]  ;;  %v9904_v63 = vor.u32 %v12891_v51, %v9903_v50  ;;  %6388 = vmatpush.bf16.msra.mxu2 %v9536_v58 }
  0x67   :  { %v10159_v55 = vld [vmem:[%s20112_s1 + $0xee0] sm:$0xf]  ;;  %v10032_v3 = vor.u32 %v12923_v54, %v10031_v52  ;;  %v12887_v6 = vld [vmem:[%s20112_s1 + $0xccc] sm:$0xf0]  ;;  %6401 = vmatpush.bf16.msra.mxu3 %v9664_v62 }
  0x68   :  { %v10287_v59 = vld [vmem:[%s20112_s1 + $0xfe0] sm:$0xf]  ;;  %v10160_v4 = vor.u32 %v12955_v56, %v10159_v55  ;;  %v12919_v9 = vld [vmem:[%s20112_s1 + $0xdcc] sm:$0xf0]  ;;  %6407 = vmatpush.bf16.msrb.mxu0 %v9904_v63 }
  0x69   :  { %v9887_v5 = vld [vmem:[%s20112_s1 + $0xcc0] sm:$0xf]  ;;  %v10288_v8 = vor.u32 %v12987_v61, %v10287_v59  ;;  %v12951_v11 = vld [vmem:[%s20112_s1 + $0xecc] sm:$0xf0]  ;;  %6420 = vmatpush.bf16.msrb.mxu1 %v10032_v3 }
  0x6a   :  { %v10015_v7 = vld [vmem:[%s20112_s1 + $0xdc0] sm:$0xf]  ;;  %v12983_v14 = vld [vmem:[%s20112_s1 + $0xfcc] sm:$0xf0]  ;;  %v9888_v18 = vor.u32 %v12887_v6, %v9887_v5  ;;  %6433 = vmatpush.bf16.msrb.mxu2 %v10160_v4 }
  0x6b   :  { %v10143_v10 = vld [vmem:[%s20112_s1 + $0xec0] sm:$0xf]  ;;  %v14275_v15 = vld [vmem:[#allocation1 + $0x12] sm:$0xff]  ;;  %v14277_v16 = vld [vmem:[#allocation1 + $0x9] sm:$0xff]  ;;  %v10016_v19 = vor.u32 %v12919_v9, %v10015_v7  ;;  %6446 = vmatpush.bf16.msrb.mxu3 %v10288_v8 }
  0x6c   :  { %v14267_v12 = vld [vmem:[#allocation1] sm:$0xff]  ;;  %v10144_v20 = vor.u32 %v12951_v11, %v10143_v10  ;;  %v12883_v22 = vld [vmem:[%s20112_s1 + $0xcac] sm:$0xf0]  ;;  %6389 = vmatmul.bf16.vlgmr.msra.gmra.mxu2 %v14275_v15  ;;  %6376 = vmatmul.bf16.vlgmr.msra.gmra.mxu1 %v14277_v16 }
  0x6d   :  { %v10271_v13 = vld [vmem:[%s20112_s1 + $0xfc0] sm:$0xf]  ;;  %6363 = vmatmul.bf16.vlgmr.msra.gmra.mxu0 %v14267_v12  ;;  %v12915_v25 = vld [vmem:[%s20112_s1 + $0xdac] sm:$0xf0]  ;;  %6421 = vmatpush.bf16.msrb.mxu1 %v10016_v19 }
  0x6e   :  { %v14279_v17 = vld [vmem:[#allocation1 + $0x1b] sm:$0xff]  ;;  %v10272_v24 = vor.u32 %v12983_v14, %v10271_v13  ;;  %v12947_v30 = vld [vmem:[%s20112_s1 + $0xeac] sm:$0xf0]  ;;  %6408 = vmatpush.bf16.msrb.mxu0 %v9888_v18  ;;  %6434 = vmatpush.bf16.msrb.mxu2 %v10144_v20 }
  0x6f   :  { %v9871_v21 = vld [vmem:[%s20112_s1 + $0xca0] sm:$0xf]  ;;  %v12979_v32 = vld [vmem:[%s20112_s1 + $0xfac] sm:$0xf0]  ;;  %6402 = vmatmul.bf16.vlgmr.msra.gmra.mxu3 %v14279_v17 }
  0x70   :  { %v9999_v23 = vld [vmem:[%s20112_s1 + $0xda0] sm:$0xf]  ;;  %v9872_v33 = vor.u32 %v12883_v22, %v9871_v21  ;;  %v12879_v38 = vld [vmem:[%s20112_s1 + $0xc8c] sm:$0xf0]  ;;  %6447 = vmatpush.bf16.msrb.mxu3 %v10272_v24 }
  0x71   :  { %v10127_v26 = vld [vmem:[%s20112_s1 + $0xea0] sm:$0xf]  ;;  %v10000_v36 = vor.u32 %v12915_v25, %v9999_v23  ;;  %v12911_v40 = vld [vmem:[%s20112_s1 + $0xd8c] sm:$0xf0] }
  0x72   :  { %v10255_v31 = vld [vmem:[%s20112_s1 + $0xfa0] sm:$0xf]  ;;  %v10128_v37 = vor.u32 %v12947_v30, %v10127_v26  ;;  %v12943_v43 = vld [vmem:[%s20112_s1 + $0xe8c] sm:$0xf0] }
  0x73   :  { %v9855_v35 = vld [vmem:[%s20112_s1 + $0xc80] sm:$0xf]  ;;  %v10256_v41 = vor.u32 %v12979_v32, %v10255_v31  ;;  %v12975_v45 = vld [vmem:[%s20112_s1 + $0xf8c] sm:$0xf0] }
  0x74   :  { %v9983_v39 = vld [vmem:[%s20112_s1 + $0xd80] sm:$0xf] }
  0x75   :  { %v10111_v42 = vld [vmem:[%s20112_s1 + $0xe80] sm:$0xf] }
  0x76   :  { %v10239_v44 = vld [vmem:[%s20112_s1 + $0xf80] sm:$0xf] }
  0x77   :  { %10 = vsyncpa [#allocation3], 0  ;;  %6409 = vmatpush.bf16.msrb.mxu0 %v9872_v33  ;;  %v9856_v46 = vor.u32 %v12879_v38, %v9855_v35  ;;  %6422 = vmatpush.bf16.msrb.mxu1 %v10000_v36  ;;  %v9984_v47 = vor.u32 %v12911_v40, %v9983_v39  ;;  %v10112_v48 = vor.u32 %v12943_v43, %v10111_v42  ;;  %v9839_v49 = vld [vmem:[%s20112_s1 + $0xc60] sm:$0xf]  ;;  %v12875_v50 = vld [vmem:[%s20112_s1 + $0xc6c] sm:$0xf0] }
  0x78   :  { %6435 = vmatpush.bf16.msrb.mxu2 %v10128_v37  ;;  %v9967_v51 = vld [vmem:[%s20112_s1 + $0xd60] sm:$0xf]  ;;  %6448 = vmatpush.bf16.msrb.mxu3 %v10256_v41  ;;  %v10240_v52 = vor.u32 %v12975_v45, %v10239_v44  ;;  %v12907_v53 = vld [vmem:[%s20112_s1 + $0xd6c] sm:$0xf0]  ;;  %v9840_v58 = vor.u32 %v12875_v50, %v9839_v49  ;;  %s13588_s22 = smov [#allocation2]   ;;  %s8244_s26 = sshll.u32 %s20116_s5, 4  ;;  %s8245_s26 = int_to_ptr.hbm [resolvable:$true] %s8244_s26 }
  0x79   :  { %v10095_v54 = vld [vmem:[%s20112_s1 + $0xe60] sm:$0xf]  ;;  %v12939_v55 = vld [vmem:[%s20112_s1 + $0xe6c] sm:$0xf0]  ;;  %v9968_v59 = vor.u32 %v12907_v53, %v9967_v51  ;;  %s8242_s23 = sshll.u32 %s13588_s22, 4  ;;  %vm8235_vm0 = vcmask 74752   ;;  %s8243_s23 = int_to_ptr.vmem [resolvable:$true] %s8242_s23 }
  0x7a   :  { %v10223_v56 = vld [vmem:[%s20112_s1 + $0xf60] sm:$0xf]  ;;  %v12971_v57 = vld [vmem:[%s20112_s1 + $0xf6c] sm:$0xf0]  ;;  %v10096_v61 = vor.u32 %v12939_v55, %v10095_v54 }
  0x7b   :  { %6410 = vmatpush.bf16.msrb.mxu0 %v9856_v46  ;;  %6423 = vmatpush.bf16.msrb.mxu1 %v9984_v47  ;;  %v9823_v62 = vld [vmem:[%s20112_s1 + $0xc40] sm:$0xf]  ;;  %v12871_v63 = vld [vmem:[%s20112_s1 + $0xc4c] sm:$0xf0]  ;;  %v10224_v4 = vor.u32 %v12971_v57, %v10223_v56  ;;  %v14441_v46 = vld [vmem:[#allocation1 + $0x24] sm:$0xff] }
  0x7c   :  { %6436 = vmatpush.bf16.msrb.mxu2 %v10112_v48  ;;  %v9951_v3 = vld [vmem:[%s20112_s1 + $0xd40] sm:$0xf]  ;;  %6449 = vmatpush.bf16.msrb.mxu3 %v10240_v52  ;;  %v12903_v5 = vld [vmem:[%s20112_s1 + $0xd4c] sm:$0xf0]  ;;  %v9824_v10 = vor.u32 %v12871_v63, %v9823_v62  ;;  %v14443_v47 = vld [vmem:[#allocation1 + $0x36] sm:$0xff] }
  0x7d   :  { %v10079_v6 = vld [vmem:[%s20112_s1 + $0xe40] sm:$0xf]  ;;  %v12935_v7 = vld [vmem:[%s20112_s1 + $0xe4c] sm:$0xf0]  ;;  %v9952_v13 = vor.u32 %v12903_v5, %v9951_v3 }
  0x7e   :  { %v10207_v8 = vld [vmem:[%s20112_s1 + $0xf40] sm:$0xf]  ;;  %v12967_v9 = vld [vmem:[%s20112_s1 + $0xf4c] sm:$0xf0]  ;;  %v10080_v14 = vor.u32 %v12935_v7, %v10079_v6 }
  0x7f   :  { %6411 = vmatpush.bf16.msrb.mxu0 %v9840_v58  ;;  %v9807_v11 = vld [vmem:[%s20112_s1 + $0xc20] sm:$0xf]  ;;  %6424 = vmatpush.bf16.msrb.mxu1 %v9968_v59  ;;  %v12867_v18 = vld [vmem:[%s20112_s1 + $0xc2c] sm:$0xf0]  ;;  %v10208_v21 = vor.u32 %v12967_v9, %v10207_v8 }
  0x80   :  { %6437 = vmatpush.bf16.msrb.mxu2 %v10096_v61  ;;  %v9935_v19 = vld [vmem:[%s20112_s1 + $0xd20] sm:$0xf]  ;;  %v12899_v20 = vld [vmem:[%s20112_s1 + $0xd2c] sm:$0xf0]  ;;  %6450 = vmatpush.bf16.msrb.mxu3 %v10224_v4  ;;  %v9808_v31 = vor.u32 %v12867_v18, %v9807_v11 }
  0x81   :  { %v10063_v22 = vld [vmem:[%s20112_s1 + $0xe20] sm:$0xf]  ;;  %v12931_v23 = vld [vmem:[%s20112_s1 + $0xe2c] sm:$0xf0]  ;;  %v9936_v37 = vor.u32 %v12899_v20, %v9935_v19 }
  0x82   :  { %v10191_v24 = vld [vmem:[%s20112_s1 + $0xf20] sm:$0xf]  ;;  %v12963_v25 = vld [vmem:[%s20112_s1 + $0xf2c] sm:$0xf0]  ;;  %v10064_v38 = vor.u32 %v12931_v23, %v10063_v22 }
  0x83   :  { %v9791_v26 = vld [vmem:[%s20112_s1 + $0xc00] sm:$0xf]  ;;  %v12863_v30 = vld [vmem:[%s20112_s1 + $0xc0c] sm:$0xf0]  ;;  %6412 = vmatpush.bf16.msrb.mxu0 %v9824_v10  ;;  %6425 = vmatpush.bf16.msrb.mxu1 %v9952_v13  ;;  %v10192_v43 = vor.u32 %v12963_v25, %v10191_v24 }
  0x84   :  { %v9919_v32 = vld [vmem:[%s20112_s1 + $0xd00] sm:$0xf]  ;;  %v12895_v33 = vld [vmem:[%s20112_s1 + $0xd0c] sm:$0xf0]  ;;  %6438 = vmatpush.bf16.msrb.mxu2 %v10080_v14  ;;  %6451 = vmatpush.bf16.msrb.mxu3 %v10208_v21  ;;  %v9792_v51 = vor.u32 %v12863_v30, %v9791_v26 }
  0x85   :  { %v10047_v35 = vld [vmem:[%s20112_s1 + $0xe00] sm:$0xf]  ;;  %v12927_v36 = vld [vmem:[%s20112_s1 + $0xe0c] sm:$0xf0]  ;;  %v9920_v54 = vor.u32 %v12895_v33, %v9919_v32 }
  0x86   :  { %v10175_v39 = vld [vmem:[%s20112_s1 + $0xf00] sm:$0xf]  ;;  %v12959_v40 = vld [vmem:[%s20112_s1 + $0xf0c] sm:$0xf0]  ;;  %v10048_v55 = vor.u32 %v12927_v36, %v10047_v35 }
  0x87   :  { %v10415_v41 = vld [vmem:[%s20112_s1 + $0x10e0] sm:$0xf]  ;;  %v13019_v42 = vld [vmem:[%s20112_s1 + $0x10ec] sm:$0xf0]  ;;  %6413 = vmatpush.bf16.msrb.mxu0 %v9808_v31  ;;  %6426 = vmatpush.bf16.msrb.mxu1 %v9936_v37  ;;  %v10176_v58 = vor.u32 %v12959_v40, %v10175_v39 }
  0x88   :  { %v10543_v44 = vld [vmem:[%s20112_s1 + $0x11e0] sm:$0xf]  ;;  %v13051_v45 = vld [vmem:[%s20112_s1 + $0x11ec] sm:$0xf0]  ;;  %6439 = vmatpush.bf16.msrb.mxu2 %v10064_v38  ;;  %6452 = vmatpush.bf16.msrb.mxu3 %v10192_v43  ;;  %v10416_v59 = vor.u32 %v13019_v42, %v10415_v41 }
  0x89   :  { %v14445_v48 = vld [vmem:[#allocation1 + $0x2d] sm:$0xff]  ;;  %v14447_v49 = vld [vmem:[#allocation1 + $0x3f] sm:$0xff]  ;;  %v10544_v61 = vor.u32 %v13051_v45, %v10543_v44 }
  0x8a   :  { %v23_v50 = vld [vmem:[%s20111_s0 + $0x10] sm:$0xff]  ;;  %v10671_v52 = vld [vmem:[%s20112_s1 + $0x12e0] sm:$0xf] }
  0x8b   :  { %v13083_v53 = vld [vmem:[%s20112_s1 + $0x12ec] sm:$0xf0]  ;;  %1080 = vst [vmem:[#allocation1] ss:$9 sm:$0xff] %v23_v50  ;;  %v10799_v56 = vld [vmem:[%s20112_s1 + $0x13e0] sm:$0xf]  ;;  %6414 = vmatpush.bf16.msrb.mxu0 %v9792_v51  ;;  %6427 = vmatpush.bf16.msrb.mxu1 %v9920_v54 }
  0x8c   :  { %v13115_v57 = vld [vmem:[%s20112_s1 + $0x13ec] sm:$0xf0]  ;;  %v10672_v62 = vor.u32 %v13083_v53, %v10671_v52  ;;  %v10399_v63 = vld [vmem:[%s20112_s1 + $0x10c0] sm:$0xf]  ;;  %6440 = vmatpush.bf16.msrb.mxu2 %v10048_v55  ;;  %6453 = vmatpush.bf16.msrb.mxu3 %v10176_v58 }
  0x8d   :  { %v13015_v3 = vld [vmem:[%s20112_s1 + $0x10cc] sm:$0xf0]  ;;  %v10527_v4 = vld [vmem:[%s20112_s1 + $0x11c0] sm:$0xf]  ;;  %v10800_v5 = vor.u32 %v13115_v57, %v10799_v56 }
  0x8e   :  { %v13047_v6 = vld [vmem:[%s20112_s1 + $0x11cc] sm:$0xf0]  ;;  %v10655_v7 = vld [vmem:[%s20112_s1 + $0x12c0] sm:$0xf]  ;;  %v10400_v11 = vor.u32 %v13015_v3, %v10399_v63  ;;  %6415 = vmatmul.bf16.vlgmr.msrb.gmra.mxu0 %v14441_v46  ;;  %6428 = vmatmul.bf16.vlgmr.msrb.gmra.mxu1 %v14445_v48 }
  0x8f   :  { %v13079_v8 = vld [vmem:[%s20112_s1 + $0x12cc] sm:$0xf0]  ;;  %v10783_v9 = vld [vmem:[%s20112_s1 + $0x13c0] sm:$0xf]  ;;  %6459 = vmatpush.bf16.msra.mxu0 %v10416_v59  ;;  %6472 = vmatpush.bf16.msra.mxu1 %v10544_v61  ;;  %v10528_v13 = vor.u32 %v13047_v6, %v10527_v4 }
  0x90   :  { %v13111_v10 = vld [vmem:[%s20112_s1 + $0x13cc] sm:$0xf0]  ;;  %6485 = vmatpush.bf16.msra.mxu2 %v10672_v62  ;;  %v10656_v14 = vor.u32 %v13079_v8, %v10655_v7  ;;  %v10383_v18 = vld [vmem:[%s20112_s1 + $0x10a0] sm:$0xf]  ;;  %6498 = vmatpush.bf16.msra.mxu3 %v10800_v5 }
  0x91   :  { %v13011_v19 = vld [vmem:[%s20112_s1 + $0x10ac] sm:$0xf0]  ;;  %v10511_v20 = vld [vmem:[%s20112_s1 + $0x11a0] sm:$0xf]  ;;  %v10784_v21 = vor.u32 %v13111_v10, %v10783_v9  ;;  %6441 = vmatmul.bf16.vlgmr.msrb.gmra.mxu2 %v14443_v47  ;;  %6454 = vmatmul.bf16.vlgmr.msrb.gmra.mxu3 %v14447_v49 }
  0x92   :  { %v13043_v22 = vld [vmem:[%s20112_s1 + $0x11ac] sm:$0xf0]  ;;  %v10639_v23 = vld [vmem:[%s20112_s1 + $0x12a0] sm:$0xf]  ;;  %v10384_v30 = vor.u32 %v13011_v19, %v10383_v18 }
  0x93   :  { %v13075_v24 = vld [vmem:[%s20112_s1 + $0x12ac] sm:$0xf0]  ;;  %v10767_v25 = vld [vmem:[%s20112_s1 + $0x13a0] sm:$0xf]  ;;  %6460 = vmatpush.bf16.msra.mxu0 %v10400_v11  ;;  %6473 = vmatpush.bf16.msra.mxu1 %v10528_v13  ;;  %v10512_v31 = vor.u32 %v13043_v22, %v10511_v20 }
  0x94   :  { %v13107_v26 = vld [vmem:[%s20112_s1 + $0x13ac] sm:$0xf0]  ;;  %6486 = vmatpush.bf16.msra.mxu2 %v10656_v14  ;;  %v10640_v32 = vor.u32 %v13075_v24, %v10639_v23  ;;  %v10367_v33 = vld [vmem:[%s20112_s1 + $0x1080] sm:$0xf]  ;;  %6499 = vmatpush.bf16.msra.mxu3 %v10784_v21 }
  0x95   :  { %v13007_v35 = vld [vmem:[%s20112_s1 + $0x108c] sm:$0xf0]  ;;  %v10495_v36 = vld [vmem:[%s20112_s1 + $0x1180] sm:$0xf]  ;;  %v10768_v37 = vor.u32 %v13107_v26, %v10767_v25 }
  0x96   :  { %v13039_v38 = vld [vmem:[%s20112_s1 + $0x118c] sm:$0xf0]  ;;  %v10623_v39 = vld [vmem:[%s20112_s1 + $0x1280] sm:$0xf]  ;;  %v10368_v43 = vor.u32 %v13007_v35, %v10367_v33 }
  0x97   :  { %v13071_v40 = vld [vmem:[%s20112_s1 + $0x128c] sm:$0xf0]  ;;  %v10751_v41 = vld [vmem:[%s20112_s1 + $0x1380] sm:$0xf]  ;;  %6461 = vmatpush.bf16.msra.mxu0 %v10384_v30  ;;  %6474 = vmatpush.bf16.msra.mxu1 %v10512_v31  ;;  %v10496_v44 = vor.u32 %v13039_v38, %v10495_v36 }
  0x98   :  { %v13103_v42 = vld [vmem:[%s20112_s1 + $0x138c] sm:$0xf0]  ;;  %6487 = vmatpush.bf16.msra.mxu2 %v10640_v32  ;;  %v10624_v45 = vor.u32 %v13071_v40, %v10623_v39  ;;  %v10351_v50 = vld [vmem:[%s20112_s1 + $0x1060] sm:$0xf]  ;;  %6500 = vmatpush.bf16.msra.mxu3 %v10768_v37 }
  0x99   :  { %v13003_v51 = vld [vmem:[%s20112_s1 + $0x106c] sm:$0xf0]  ;;  %v10479_v52 = vld [vmem:[%s20112_s1 + $0x1160] sm:$0xf]  ;;  %v10752_v53 = vor.u32 %v13103_v42, %v10751_v41 }
  0x9a   :  { %v13035_v54 = vld [vmem:[%s20112_s1 + $0x116c] sm:$0xf0]  ;;  %v10607_v55 = vld [vmem:[%s20112_s1 + $0x1260] sm:$0xf]  ;;  %v10352_v59 = vor.u32 %v13003_v51, %v10351_v50 }
  0x9b   :  { %v13067_v56 = vld [vmem:[%s20112_s1 + $0x126c] sm:$0xf0]  ;;  %v10735_v57 = vld [vmem:[%s20112_s1 + $0x1360] sm:$0xf]  ;;  %6462 = vmatpush.bf16.msra.mxu0 %v10368_v43  ;;  %6475 = vmatpush.bf16.msra.mxu1 %v10496_v44  ;;  %v10480_v61 = vor.u32 %v13035_v54, %v10479_v52 }
  0x9c   :  { %v13099_v58 = vld [vmem:[%s20112_s1 + $0x136c] sm:$0xf0]  ;;  %6488 = vmatpush.bf16.msra.mxu2 %v10624_v45  ;;  %v10608_v62 = vor.u32 %v13067_v56, %v10607_v55  ;;  %v10335_v63 = vld [vmem:[%s20112_s1 + $0x1040] sm:$0xf]  ;;  %6501 = vmatpush.bf16.msra.mxu3 %v10752_v53 }
  0x9d   :  { %v12999_v3 = vld [vmem:[%s20112_s1 + $0x104c] sm:$0xf0]  ;;  %v10463_v4 = vld [vmem:[%s20112_s1 + $0x1140] sm:$0xf]  ;;  %v10736_v5 = vor.u32 %v13099_v58, %v10735_v57 }
  0x9e   :  { %v13031_v6 = vld [vmem:[%s20112_s1 + $0x114c] sm:$0xf0]  ;;  %v10591_v7 = vld [vmem:[%s20112_s1 + $0x1240] sm:$0xf]  ;;  %v10336_v11 = vor.u32 %v12999_v3, %v10335_v63 }
  0x9f   :  { %v13063_v8 = vld [vmem:[%s20112_s1 + $0x124c] sm:$0xf0]  ;;  %v10719_v9 = vld [vmem:[%s20112_s1 + $0x1340] sm:$0xf]  ;;  %6463 = vmatpush.bf16.msra.mxu0 %v10352_v59  ;;  %6476 = vmatpush.bf16.msra.mxu1 %v10480_v61  ;;  %v10464_v13 = vor.u32 %v13031_v6, %v10463_v4 }
  0xa0   :  { %v13095_v10 = vld [vmem:[%s20112_s1 + $0x134c] sm:$0xf0]  ;;  %6489 = vmatpush.bf16.msra.mxu2 %v10608_v62  ;;  %v10592_v14 = vor.u32 %v13063_v8, %v10591_v7  ;;  %v10319_v18 = vld [vmem:[%s20112_s1 + $0x1020] sm:$0xf]  ;;  %6502 = vmatpush.bf16.msra.mxu3 %v10736_v5 }
  0xa1   :  { %v12995_v19 = vld [vmem:[%s20112_s1 + $0x102c] sm:$0xf0]  ;;  %v10447_v20 = vld [vmem:[%s20112_s1 + $0x1120] sm:$0xf]  ;;  %v10720_v21 = vor.u32 %v13095_v10, %v10719_v9 }
  0xa2   :  { %v13027_v22 = vld [vmem:[%s20112_s1 + $0x112c] sm:$0xf0]  ;;  %v10575_v23 = vld [vmem:[%s20112_s1 + $0x1220] sm:$0xf]  ;;  %v10320_v30 = vor.u32 %v12995_v19, %v10319_v18 }
  0xa3   :  { %v13059_v24 = vld [vmem:[%s20112_s1 + $0x122c] sm:$0xf0]  ;;  %v10703_v25 = vld [vmem:[%s20112_s1 + $0x1320] sm:$0xf]  ;;  %6464 = vmatpush.bf16.msra.mxu0 %v10336_v11  ;;  %6477 = vmatpush.bf16.msra.mxu1 %v10464_v13  ;;  %v10448_v33 = vor.u32 %v13027_v22, %v10447_v20 }
  0xa4   :  { %v13091_v26 = vld [vmem:[%s20112_s1 + $0x132c] sm:$0xf0]  ;;  %v10303_v31 = vld [vmem:[%s20112_s1 + $0x1000] sm:$0xf]  ;;  %6490 = vmatpush.bf16.msra.mxu2 %v10592_v14  ;;  %v10576_v35 = vor.u32 %v13059_v24, %v10575_v23  ;;  %6503 = vmatpush.bf16.msra.mxu3 %v10720_v21 }
  0xa5   :  { %v12991_v32 = vld [vmem:[%s20112_s1 + $0x100c] sm:$0xf0]  ;;  %v10431_v36 = vld [vmem:[%s20112_s1 + $0x1100] sm:$0xf]  ;;  %v10704_v39 = vor.u32 %v13091_v26, %v10703_v25 }
  0xa6   :  { %v13023_v37 = vld [vmem:[%s20112_s1 + $0x110c] sm:$0xf0]  ;;  %v10559_v38 = vld [vmem:[%s20112_s1 + $0x1200] sm:$0xf]  ;;  %v10304_v50 = vor.u32 %v12991_v32, %v10303_v31 }
  0xa7   :  { %v13055_v40 = vld [vmem:[%s20112_s1 + $0x120c] sm:$0xf0]  ;;  %v10687_v41 = vld [vmem:[%s20112_s1 + $0x1300] sm:$0xf]  ;;  %6465 = vmatpush.bf16.msra.mxu0 %v10320_v30  ;;  %6478 = vmatpush.bf16.msra.mxu1 %v10448_v33  ;;  %v10432_v54 = vor.u32 %v13023_v37, %v10431_v36 }
  0xa8   :  { %v13087_v42 = vld [vmem:[%s20112_s1 + $0x130c] sm:$0xf0]  ;;  %v10927_v43 = vld [vmem:[%s20112_s1 + $0x14e0] sm:$0xf]  ;;  %6491 = vmatpush.bf16.msra.mxu2 %v10576_v35  ;;  %v10560_v55 = vor.u32 %v13055_v40, %v10559_v38  ;;  %6504 = vmatpush.bf16.msra.mxu3 %v10704_v39 }
  0xa9   :  { %v13147_v44 = vld [vmem:[%s20112_s1 + $0x14ec] sm:$0xf0]  ;;  %v11055_v45 = vld [vmem:[%s20112_s1 + $0x15e0] sm:$0xf]  ;;  %v10688_v58 = vor.u32 %v13087_v42, %v10687_v41 }
  0xaa   :  { %v13179_v51 = vld [vmem:[%s20112_s1 + $0x15ec] sm:$0xf0]  ;;  %v11183_v52 = vld [vmem:[%s20112_s1 + $0x16e0] sm:$0xf]  ;;  %v10928_v59 = vor.u32 %v13147_v44, %v10927_v43 }
  0xab   :  { %v13211_v53 = vld [vmem:[%s20112_s1 + $0x16ec] sm:$0xf0]  ;;  %v11311_v56 = vld [vmem:[%s20112_s1 + $0x17e0] sm:$0xf]  ;;  %v11056_v61 = vor.u32 %v13179_v51, %v11055_v45  ;;  %6466 = vmatpush.bf16.msra.mxu0 %v10304_v50  ;;  %6479 = vmatpush.bf16.msra.mxu1 %v10432_v54 }
  0xac   :  { %v13243_v57 = vld [vmem:[%s20112_s1 + $0x17ec] sm:$0xf0]  ;;  %v11184_v62 = vor.u32 %v13211_v53, %v11183_v52  ;;  %v10911_v63 = vld [vmem:[%s20112_s1 + $0x14c0] sm:$0xf]  ;;  %6492 = vmatpush.bf16.msra.mxu2 %v10560_v55  ;;  %6505 = vmatpush.bf16.msra.mxu3 %v10688_v58 }
  0xad   :  { %v13143_v3 = vld [vmem:[%s20112_s1 + $0x14cc] sm:$0xf0]  ;;  %v11039_v4 = vld [vmem:[%s20112_s1 + $0x15c0] sm:$0xf]  ;;  %v11312_v5 = vor.u32 %v13243_v57, %v11311_v56 }
  0xae   :  { %v13175_v6 = vld [vmem:[%s20112_s1 + $0x15cc] sm:$0xf0]  ;;  %v11167_v7 = vld [vmem:[%s20112_s1 + $0x16c0] sm:$0xf]  ;;  %v10912_v19 = vor.u32 %v13143_v3, %v10911_v63 }
  0xaf   :  { %v13207_v8 = vld [vmem:[%s20112_s1 + $0x16cc] sm:$0xf0]  ;;  %v14678_v9 = vld [vmem:[#allocation1] sm:$0xff]  ;;  %6511 = vmatpush.bf16.msrb.mxu0 %v10928_v59  ;;  %6524 = vmatpush.bf16.msrb.mxu1 %v11056_v61  ;;  %v11040_v20 = vor.u32 %v13175_v6, %v11039_v4 }
  0xb0   :  { %v11295_v10 = vld [vmem:[%s20112_s1 + $0x17c0] sm:$0xf]  ;;  %v13239_v11 = vld [vmem:[%s20112_s1 + $0x17cc] sm:$0xf0]  ;;  %6537 = vmatpush.bf16.msrb.mxu2 %v11184_v62  ;;  %v11168_v21 = vor.u32 %v13207_v8, %v11167_v7  ;;  %6550 = vmatpush.bf16.msrb.mxu3 %v11312_v5 }
  0xb1   :  { %v14686_v13 = vld [vmem:[#allocation1 + $0x12] sm:$0xff]  ;;  %v14688_v14 = vld [vmem:[#allocation1 + $0x9] sm:$0xff]  ;;  %v14690_v18 = vld [vmem:[#allocation1 + $0x1b] sm:$0xff]  ;;  %6467 = vmatmul.bf16.vlgmr.msra.gmra.mxu0 %v14678_v9  ;;  %v11296_v25 = vor.u32 %v13239_v11, %v11295_v10 }
  0xb2   :  { %v10895_v22 = vld [vmem:[%s20112_s1 + $0x14a0] sm:$0xf]  ;;  %v13139_v23 = vld [vmem:[%s20112_s1 + $0x14ac] sm:$0xf0]  ;;  %6493 = vmatmul.bf16.vlgmr.msra.gmra.mxu2 %v14686_v13  ;;  %6480 = vmatmul.bf16.vlgmr.msra.gmra.mxu1 %v14688_v14 }
  0xb3   :  { %v11023_v24 = vld [vmem:[%s20112_s1 + $0x15a0] sm:$0xf]  ;;  %v13171_v26 = vld [vmem:[%s20112_s1 + $0x15ac] sm:$0xf0]  ;;  %6506 = vmatmul.bf16.vlgmr.msra.gmra.mxu3 %v14690_v18  ;;  %6512 = vmatpush.bf16.msrb.mxu0 %v10912_v19  ;;  %v10896_v35 = vor.u32 %v13139_v23, %v10895_v22 }
  0xb4   :  { %v11151_v30 = vld [vmem:[%s20112_s1 + $0x16a0] sm:$0xf]  ;;  %v13203_v31 = vld [vmem:[%s20112_s1 + $0x16ac] sm:$0xf0]  ;;  %6525 = vmatpush.bf16.msrb.mxu1 %v11040_v20  ;;  %6538 = vmatpush.bf16.msrb.mxu2 %v11168_v21  ;;  %v11024_v36 = vor.u32 %v13171_v26, %v11023_v24 }
  0xb5   :  { %v11279_v32 = vld [vmem:[%s20112_s1 + $0x17a0] sm:$0xf]  ;;  %v13235_v33 = vld [vmem:[%s20112_s1 + $0x17ac] sm:$0xf0]  ;;  %v11152_v37 = vor.u32 %v13203_v31, %v11151_v30  ;;  %6551 = vmatpush.bf16.msrb.mxu3 %v11296_v25 }
  0xb6   :  { %v10879_v38 = vld [vmem:[%s20112_s1 + $0x1480] sm:$0xf]  ;;  %v13135_v39 = vld [vmem:[%s20112_s1 + $0x148c] sm:$0xf0]  ;;  %v11280_v41 = vor.u32 %v13235_v33, %v11279_v32 }
  0xb7   :  { %v11007_v40 = vld [vmem:[%s20112_s1 + $0x1580] sm:$0xf]  ;;  %v13167_v42 = vld [vmem:[%s20112_s1 + $0x158c] sm:$0xf0]  ;;  %6513 = vmatpush.bf16.msrb.mxu0 %v10896_v35  ;;  %v10880_v51 = vor.u32 %v13135_v39, %v10879_v38 }
  0xb8   :  { %v11135_v43 = vld [vmem:[%s20112_s1 + $0x1680] sm:$0xf]  ;;  %v13199_v44 = vld [vmem:[%s20112_s1 + $0x168c] sm:$0xf0]  ;;  %6526 = vmatpush.bf16.msrb.mxu1 %v11024_v36  ;;  %6539 = vmatpush.bf16.msrb.mxu2 %v11152_v37  ;;  %v11008_v52 = vor.u32 %v13167_v42, %v11007_v40 }
  0xb9   :  { %v11263_v45 = vld [vmem:[%s20112_s1 + $0x1780] sm:$0xf]  ;;  %v13231_v50 = vld [vmem:[%s20112_s1 + $0x178c] sm:$0xf0]  ;;  %v11136_v53 = vor.u32 %v13199_v44, %v11135_v43  ;;  %6552 = vmatpush.bf16.msrb.mxu3 %v11280_v41 }
  0xba   :  { %v10863_v54 = vld [vmem:[%s20112_s1 + $0x1460] sm:$0xf]  ;;  %v13131_v55 = vld [vmem:[%s20112_s1 + $0x146c] sm:$0xf0]  ;;  %v11264_v57 = vor.u32 %v13231_v50, %v11263_v45 }
  0xbb   :  { %v10991_v56 = vld [vmem:[%s20112_s1 + $0x1560] sm:$0xf]  ;;  %v13163_v58 = vld [vmem:[%s20112_s1 + $0x156c] sm:$0xf0]  ;;  %6514 = vmatpush.bf16.msrb.mxu0 %v10880_v51  ;;  %v10864_v3 = vor.u32 %v13131_v55, %v10863_v54 }
  0xbc   :  { %v11119_v59 = vld [vmem:[%s20112_s1 + $0x1660] sm:$0xf]  ;;  %v13195_v61 = vld [vmem:[%s20112_s1 + $0x166c] sm:$0xf0]  ;;  %6527 = vmatpush.bf16.msrb.mxu1 %v11008_v52  ;;  %6540 = vmatpush.bf16.msrb.mxu2 %v11136_v53  ;;  %v10992_v5 = vor.u32 %v13163_v58, %v10991_v56  ;;  %v6260_v52 = vpop.f32.mrf.mxu0 }
  0xbd   :  { %v11247_v62 = vld [vmem:[%s20112_s1 + $0x1760] sm:$0xf]  ;;  %v13227_v63 = vld [vmem:[%s20112_s1 + $0x176c] sm:$0xf0]  ;;  %v11120_v6 = vor.u32 %v13195_v61, %v11119_v59  ;;  %6553 = vmatpush.bf16.msrb.mxu3 %v11264_v57  ;;  %v6273_v61 = vpop.f32.mrf.mxu1 }
  0xbe   :  { %v10847_v4 = vld [vmem:[%s20112_s1 + $0x1440] sm:$0xf]  ;;  %v13127_v7 = vld [vmem:[%s20112_s1 + $0x144c] sm:$0xf0]  ;;  %v11248_v11 = vor.u32 %v13227_v63, %v11247_v62 }
  0xbf   :  { %v10975_v8 = vld [vmem:[%s20112_s1 + $0x1540] sm:$0xf]  ;;  %v13159_v10 = vld [vmem:[%s20112_s1 + $0x154c] sm:$0xf0]  ;;  %6515 = vmatpush.bf16.msrb.mxu0 %v10864_v3  ;;  %v10848_v24 = vor.u32 %v13127_v7, %v10847_v4  ;;  %v14855_v4 = vld [vmem:[#allocation1 + $0x24] sm:$0xff] }
  0xc0   :  { %v11103_v19 = vld [vmem:[%s20112_s1 + $0x1640] sm:$0xf]  ;;  %v13191_v20 = vld [vmem:[%s20112_s1 + $0x164c] sm:$0xf0]  ;;  %6528 = vmatpush.bf16.msrb.mxu1 %v10992_v5  ;;  %6541 = vmatpush.bf16.msrb.mxu2 %v11120_v6  ;;  %v10976_v30 = vor.u32 %v13159_v10, %v10975_v8  ;;  %v14857_v5 = vld [vmem:[#allocation1 + $0x36] sm:$0xff] }
  0xc1   :  { %v1049_v21 = vld [vmem:[%s20113_s2] sm:$0xf]  ;;  %v13223_v23 = vld [vmem:[%s20112_s1 + $0x174c] sm:$0xf0]  ;;  %v11104_v31 = vor.u32 %v13191_v20, %v11103_v19  ;;  %6554 = vmatpush.bf16.msrb.mxu3 %v11248_v11  ;;  %v24_v10 = vld [vmem:[%s20111_s0 + $0x18] sm:$0xff] }
  0xc2   :  { %v11231_v22 = vld [vmem:[%s20112_s1 + $0x1740] sm:$0xf]  ;;  %v13123_v26 = vld [vmem:[%s20112_s1 + $0x142c] sm:$0xf0]  ;;  %v1051_v35 = vperm.slane %v1049_v21, 0 }
  0xc3   :  { %v10831_v25 = vld [vmem:[%s20112_s1 + $0x1420] sm:$0xf]  ;;  %v13155_v33 = vld [vmem:[%s20112_s1 + $0x152c] sm:$0xf0]  ;;  %v11232_v36 = vor.u32 %v13223_v23, %v11231_v22  ;;  %6516 = vmatpush.bf16.msrb.mxu0 %v10848_v24 }
  0xc4   :  { %v10959_v32 = vld [vmem:[%s20112_s1 + $0x1520] sm:$0xf]  ;;  %v13187_v38 = vld [vmem:[%s20112_s1 + $0x162c] sm:$0xf0]  ;;  %v10832_v43 = vor.u32 %v13123_v26, %v10831_v25  ;;  %6529 = vmatpush.bf16.msrb.mxu1 %v10976_v30  ;;  %6542 = vmatpush.bf16.msrb.mxu2 %v11104_v31  ;;  %v6261_v59 = vadd.f32 %v6260_v52, %v1051_v35  ;;  %v6286_v25 = vpop.f32.mrf.mxu2 }
  0xc5   :  { %v11087_v37 = vld [vmem:[%s20112_s1 + $0x1620] sm:$0xf]  ;;  %v13219_v40 = vld [vmem:[%s20112_s1 + $0x172c] sm:$0xf0]  ;;  %v10960_v53 = vor.u32 %v13155_v33, %v10959_v32  ;;  %6555 = vmatpush.bf16.msrb.mxu3 %v11232_v36  ;;  %v6299_v32 = vpop.f32.mrf.mxu3 }
  0xc6   :  { %v11215_v39 = vld [vmem:[%s20112_s1 + $0x1720] sm:$0xf]  ;;  %v13119_v42 = vld [vmem:[%s20112_s1 + $0x140c] sm:$0xf0]  ;;  %v11088_v54 = vor.u32 %v13187_v38, %v11087_v37  ;;  %v6274_v8 = vadd.f32 %v6273_v61, %v6261_v59 }
  0xc7   :  { %v10815_v41 = vld [vmem:[%s20112_s1 + $0x1400] sm:$0xf]  ;;  %v13151_v45 = vld [vmem:[%s20112_s1 + $0x150c] sm:$0xf0]  ;;  %v11216_v62 = vor.u32 %v13219_v40, %v11215_v39  ;;  %6517 = vmatpush.bf16.msrb.mxu0 %v10832_v43 }
  0xc8   :  { %v10943_v44 = vld [vmem:[%s20112_s1 + $0x1500] sm:$0xf]  ;;  %v13183_v51 = vld [vmem:[%s20112_s1 + $0x160c] sm:$0xf0]  ;;  %v10816_v11 = vor.u32 %v13119_v42, %v10815_v41  ;;  %6530 = vmatpush.bf16.msrb.mxu1 %v10960_v53  ;;  %6543 = vmatpush.bf16.msrb.mxu2 %v11088_v54  ;;  %v6287_v31 = vadd.f32 %v6286_v25, %v6274_v8 }
  0xc9   :  { %v11071_v50 = vld [vmem:[%s20112_s1 + $0x1600] sm:$0xf]  ;;  %v13215_v56 = vld [vmem:[%s20112_s1 + $0x170c] sm:$0xf0]  ;;  %v10944_v21 = vor.u32 %v13151_v45, %v10943_v44  ;;  %6556 = vmatpush.bf16.msrb.mxu3 %v11216_v62  ;;  %v6262_v44 = vpop.f32.mrf.mxu0 }
  0xca   :  { %v11199_v55 = vld [vmem:[%s20112_s1 + $0x1700] sm:$0xf]  ;;  %v13275_v58 = vld [vmem:[%s20112_s1 + $0x18ec] sm:$0xf0]  ;;  %v11072_v22 = vor.u32 %v13183_v51, %v11071_v50  ;;  %v6300_v43 = vadd.f32 %v6299_v32, %v6287_v31  ;;  %v6275_v51 = vpop.f32.mrf.mxu1 }
  0xcb   :  { %v11439_v57 = vld [vmem:[%s20112_s1 + $0x18e0] sm:$0xf]  ;;  %v13307_v3 = vld [vmem:[%s20112_s1 + $0x19ec] sm:$0xf0]  ;;  %v11200_v26 = vor.u32 %v13215_v56, %v11199_v55  ;;  %6518 = vmatpush.bf16.msrb.mxu0 %v10816_v11 }
  0xcc   :  { %v11567_v63 = vld [vmem:[%s20112_s1 + $0x19e0] sm:$0xf]  ;;  %v14859_v6 = vld [vmem:[#allocation1 + $0x2d] sm:$0xff]  ;;  %v11440_v30 = vor.u32 %v13275_v58, %v11439_v57  ;;  %6531 = vmatpush.bf16.msrb.mxu1 %v10944_v21  ;;  %6544 = vmatpush.bf16.msrb.mxu2 %v11072_v22  ;;  %v6288_v8 = vpop.f32.mrf.mxu2 }
  0xcd   :  { %v14861_v7 = vld [vmem:[#allocation1 + $0x3f] sm:$0xff]  ;;  %v13339_v20 = vld [vmem:[%s20112_s1 + $0x1aec] sm:$0xf0]  ;;  %v11568_v33 = vor.u32 %v13307_v3, %v11567_v63  ;;  %6557 = vmatpush.bf16.msrb.mxu3 %v11200_v26  ;;  %v6301_v11 = vpop.f32.mrf.mxu3 }
  0xce   :  { %v11695_v19 = vld [vmem:[%s20112_s1 + $0x1ae0] sm:$0xf]  ;;  %1090 = vst [vmem:[#allocation1] ss:$9 sm:$0xff] %v24_v10  ;;  %v13371_v24 = vld [vmem:[%s20112_s1 + $0x1bec] sm:$0xf0]  ;;  %6519 = vmatmul.bf16.vlgmr.msrb.gmra.mxu0 %v14855_v4 }
  0xcf   :  { %v11823_v23 = vld [vmem:[%s20112_s1 + $0x1be0] sm:$0xf]  ;;  %v11696_v35 = vor.u32 %v13339_v20, %v11695_v19  ;;  %v13271_v37 = vld [vmem:[%s20112_s1 + $0x18cc] sm:$0xf0]  ;;  %6563 = vmatpush.bf16.msra.mxu0 %v11440_v30  ;;  %6545 = vmatmul.bf16.vlgmr.msrb.gmra.mxu2 %v14857_v5 }
  0xd0   :  { %v11423_v36 = vld [vmem:[%s20112_s1 + $0x18c0] sm:$0xf]  ;;  %v11824_v39 = vor.u32 %v13371_v24, %v11823_v23  ;;  %v13303_v40 = vld [vmem:[%s20112_s1 + $0x19cc] sm:$0xf0]  ;;  %6576 = vmatpush.bf16.msra.mxu1 %v11568_v33  ;;  %6558 = vmatmul.bf16.vlgmr.msrb.gmra.mxu3 %v14861_v7 }
  0xd1   :  { %v11551_v38 = vld [vmem:[%s20112_s1 + $0x19c0] sm:$0xf]  ;;  %v13335_v42 = vld [vmem:[%s20112_s1 + $0x1acc] sm:$0xf0]  ;;  %v11424_v52 = vor.u32 %v13271_v37, %v11423_v36  ;;  %6589 = vmatpush.bf16.msra.mxu2 %v11696_v35  ;;  %6532 = vmatmul.bf16.vlgmr.msrb.gmra.mxu1 %v14859_v6  ;;  %v6312_v35 = vpop.f32.mrf.mxu0 }
  0xd2   :  { %v11679_v41 = vld [vmem:[%s20112_s1 + $0x1ac0] sm:$0xf]  ;;  %v13367_v50 = vld [vmem:[%s20112_s1 + $0x1bcc] sm:$0xf0]  ;;  %v11552_v53 = vor.u32 %v13303_v40, %v11551_v38  ;;  %6602 = vmatpush.bf16.msra.mxu3 %v11824_v39 }
  0xd3   :  { %v11807_v45 = vld [vmem:[%s20112_s1 + $0x1bc0] sm:$0xf]  ;;  %v11680_v54 = vor.u32 %v13335_v42, %v11679_v41  ;;  %v13267_v56 = vld [vmem:[%s20112_s1 + $0x18ac] sm:$0xf0]  ;;  %6564 = vmatpush.bf16.msra.mxu0 %v11424_v52  ;;  %v6313_v41 = vadd.f32 %v6312_v35, %v6300_v43  ;;  %v6325_v42 = vpop.f32.mrf.mxu1 }
  0xd4   :  { %v11407_v55 = vld [vmem:[%s20112_s1 + $0x18a0] sm:$0xf]  ;;  %v11808_v58 = vor.u32 %v13367_v50, %v11807_v45  ;;  %v13299_v59 = vld [vmem:[%s20112_s1 + $0x19ac] sm:$0xf0]  ;;  %6577 = vmatpush.bf16.msra.mxu1 %v11552_v53 }
  0xd5   :  { %v11535_v57 = vld [vmem:[%s20112_s1 + $0x19a0] sm:$0xf]  ;;  %v13331_v62 = vld [vmem:[%s20112_s1 + $0x1aac] sm:$0xf0]  ;;  %v11408_v10 = vor.u32 %v13267_v56, %v11407_v55  ;;  %6590 = vmatpush.bf16.msra.mxu2 %v11680_v54  ;;  %v6326_v53 = vadd.f32 %v6325_v42, %v6313_v41  ;;  %v6351_v11 = vpop.f32.mrf.mxu3 }
  0xd6   :  { %v11663_v61 = vld [vmem:[%s20112_s1 + $0x1aa0] sm:$0xf]  ;;  %v13363_v3 = vld [vmem:[%s20112_s1 + $0x1bac] sm:$0xf0]  ;;  %v11536_v19 = vor.u32 %v13299_v59, %v11535_v57  ;;  %6603 = vmatpush.bf16.msra.mxu3 %v11808_v58 }
  0xd7   :  { %v11791_v63 = vld [vmem:[%s20112_s1 + $0x1ba0] sm:$0xf]  ;;  %v11664_v20 = vor.u32 %v13331_v62, %v11663_v61  ;;  %v13263_v22 = vld [vmem:[%s20112_s1 + $0x188c] sm:$0xf0]  ;;  %6565 = vmatpush.bf16.msra.mxu0 %v11408_v10  ;;  %v6338_v61 = vpop.f32.mrf.mxu2 }
  0xd8   :  { %v11391_v21 = vld [vmem:[%s20112_s1 + $0x1880] sm:$0xf]  ;;  %v11792_v24 = vor.u32 %v13363_v3, %v11791_v63  ;;  %v13295_v25 = vld [vmem:[%s20112_s1 + $0x198c] sm:$0xf0]  ;;  %6578 = vmatpush.bf16.msra.mxu1 %v11536_v19  ;;  %v6339_v10 = vadd.f32 %v6338_v61, %v6326_v53 }
  0xd9   :  { %v11519_v23 = vld [vmem:[%s20112_s1 + $0x1980] sm:$0xf]  ;;  %v13327_v30 = vld [vmem:[%s20112_s1 + $0x1a8c] sm:$0xf0]  ;;  %v11392_v33 = vor.u32 %v13263_v22, %v11391_v21  ;;  %6591 = vmatpush.bf16.msra.mxu2 %v11664_v20 }
  0xda   :  { %v11647_v26 = vld [vmem:[%s20112_s1 + $0x1a80] sm:$0xf]  ;;  %v13359_v32 = vld [vmem:[%s20112_s1 + $0x1b8c] sm:$0xf0]  ;;  %v11520_v36 = vor.u32 %v13295_v25, %v11519_v23  ;;  %6604 = vmatpush.bf16.msra.mxu3 %v11792_v24  ;;  %v15002_v22 = vadd.f32 %v6351_v11, %v6339_v10  ;;  %v6314_v23 = vpop.f32.mrf.mxu0 }
  0xdb   :  { %v11775_v31 = vld [vmem:[%s20112_s1 + $0x1b80] sm:$0xf]  ;;  %v11648_v37 = vor.u32 %v13327_v30, %v11647_v26  ;;  %v13259_v39 = vld [vmem:[%s20112_s1 + $0x186c] sm:$0xf0]  ;;  %6566 = vmatpush.bf16.msra.mxu0 %v11392_v33 }
  0xdc   :  { %v11375_v38 = vld [vmem:[%s20112_s1 + $0x1860] sm:$0xf]  ;;  %v11776_v44 = vor.u32 %v13359_v32, %v11775_v31  ;;  %v13291_v45 = vld [vmem:[%s20112_s1 + $0x196c] sm:$0xf0]  ;;  %6579 = vmatpush.bf16.msra.mxu1 %v11520_v36  ;;  %v6327_v32 = vpop.f32.mrf.mxu1 }
  0xdd   :  { %v11503_v40 = vld [vmem:[%s20112_s1 + $0x1960] sm:$0xf]  ;;  %v13323_v51 = vld [vmem:[%s20112_s1 + $0x1a6c] sm:$0xf0]  ;;  %v11376_v54 = vor.u32 %v13259_v39, %v11375_v38  ;;  %6592 = vmatpush.bf16.msra.mxu2 %v11648_v37 }
  0xde   :  { %v11631_v50 = vld [vmem:[%s20112_s1 + $0x1a60] sm:$0xf]  ;;  %v13355_v43 = vld [vmem:[%s20112_s1 + $0x1b6c] sm:$0xf0]  ;;  %v11504_v55 = vor.u32 %v13291_v45, %v11503_v40  ;;  %6605 = vmatpush.bf16.msra.mxu3 %v11776_v44 }
  0xdf   :  { %v11759_v52 = vld [vmem:[%s20112_s1 + $0x1b60] sm:$0xf]  ;;  %v11632_v56 = vor.u32 %v13323_v51, %v11631_v50  ;;  %v13255_v58 = vld [vmem:[%s20112_s1 + $0x184c] sm:$0xf0]  ;;  %6567 = vmatpush.bf16.msra.mxu0 %v11376_v54 }
  0xe0   :  { %v11359_v57 = vld [vmem:[%s20112_s1 + $0x1840] sm:$0xf]  ;;  %v11760_v62 = vor.u32 %v13355_v43, %v11759_v52  ;;  %v13287_v63 = vld [vmem:[%s20112_s1 + $0x194c] sm:$0xf0]  ;;  %6580 = vmatpush.bf16.msra.mxu1 %v11504_v55  ;;  %v6340_v43 = vpop.f32.mrf.mxu2 }
  0xe1   :  { %v11487_v59 = vld [vmem:[%s20112_s1 + $0x1940] sm:$0xf]  ;;  %v13319_v8 = vld [vmem:[%s20112_s1 + $0x1a4c] sm:$0xf0]  ;;  %v11360_v21 = vor.u32 %v13255_v58, %v11359_v57  ;;  %6593 = vmatpush.bf16.msra.mxu2 %v11632_v56  ;;  %v6353_v57 = vpop.f32.mrf.mxu3 }
  0xe2   :  { %v11615_v3 = vld [vmem:[%s20112_s1 + $0x1a40] sm:$0xf]  ;;  %v13351_v20 = vld [vmem:[%s20112_s1 + $0x1b4c] sm:$0xf0]  ;;  %v11488_v24 = vor.u32 %v13287_v63, %v11487_v59  ;;  %6606 = vmatpush.bf16.msra.mxu3 %v11760_v62 }
  0xe3   :  { %v11743_v19 = vld [vmem:[%s20112_s1 + $0x1b40] sm:$0xf]  ;;  %v11616_v25 = vor.u32 %v13319_v8, %v11615_v3  ;;  %v13251_v30 = vld [vmem:[%s20112_s1 + $0x182c] sm:$0xf0]  ;;  %6568 = vmatpush.bf16.msra.mxu0 %v11360_v21 }
  0xe4   :  { %v11343_v26 = vld [vmem:[%s20112_s1 + $0x1820] sm:$0xf]  ;;  %v11744_v33 = vor.u32 %v13351_v20, %v11743_v19  ;;  %v13283_v35 = vld [vmem:[%s20112_s1 + $0x192c] sm:$0xf0]  ;;  %6581 = vmatpush.bf16.msra.mxu1 %v11488_v24 }
  0xe5   :  { %v11471_v31 = vld [vmem:[%s20112_s1 + $0x1920] sm:$0xf]  ;;  %v13315_v37 = vld [vmem:[%s20112_s1 + $0x1a2c] sm:$0xf0]  ;;  %v11344_v40 = vor.u32 %v13251_v30, %v11343_v26  ;;  %6594 = vmatpush.bf16.msra.mxu2 %v11616_v25 }
  0xe6   :  { %v11599_v36 = vld [vmem:[%s20112_s1 + $0x1a20] sm:$0xf]  ;;  %v13347_v39 = vld [vmem:[%s20112_s1 + $0x1b2c] sm:$0xf0]  ;;  %v11472_v44 = vor.u32 %v13283_v35, %v11471_v31  ;;  %6607 = vmatpush.bf16.msra.mxu3 %v11744_v33 }
  0xe7   :  { %v11727_v38 = vld [vmem:[%s20112_s1 + $0x1b20] sm:$0xf]  ;;  %v13247_v42 = vld [vmem:[%s20112_s1 + $0x180c] sm:$0xf0]  ;;  %v11600_v45 = vor.u32 %v13315_v37, %v11599_v36  ;;  %6569 = vmatpush.bf16.msra.mxu0 %v11344_v40 }
  0xe8   :  { %v11327_v41 = vld [vmem:[%s20112_s1 + $0x1800] sm:$0xf]  ;;  %v13279_v51 = vld [vmem:[%s20112_s1 + $0x190c] sm:$0xf0]  ;;  %v11728_v53 = vor.u32 %v13347_v39, %v11727_v38  ;;  %6582 = vmatpush.bf16.msra.mxu1 %v11472_v44 }
  0xe9   :  { %v11455_v50 = vld [vmem:[%s20112_s1 + $0x1900] sm:$0xf]  ;;  %v13311_v54 = vld [vmem:[%s20112_s1 + $0x1a0c] sm:$0xf0]  ;;  %v11328_v62 = vor.u32 %v13247_v42, %v11327_v41  ;;  %6595 = vmatpush.bf16.msra.mxu2 %v11600_v45 }
  0xea   :  { %v11583_v52 = vld [vmem:[%s20112_s1 + $0x1a00] sm:$0xf]  ;;  %v13343_v56 = vld [vmem:[%s20112_s1 + $0x1b0c] sm:$0xf0]  ;;  %v11456_v10 = vor.u32 %v13279_v51, %v11455_v50  ;;  %6608 = vmatpush.bf16.msra.mxu3 %v11728_v53 }
  0xeb   :  { %v11711_v55 = vld [vmem:[%s20112_s1 + $0x1b00] sm:$0xf]  ;;  %v13403_v59 = vld [vmem:[%s20112_s1 + $0x1cec] sm:$0xf0]  ;;  %v11584_v11 = vor.u32 %v13311_v54, %v11583_v52  ;;  %6570 = vmatpush.bf16.msra.mxu0 %v11328_v62 }
  0xec   :  { %v11951_v58 = vld [vmem:[%s20112_s1 + $0x1ce0] sm:$0xf]  ;;  %v13435_v63 = vld [vmem:[%s20112_s1 + $0x1dec] sm:$0xf0]  ;;  %v11712_v21 = vor.u32 %v13343_v56, %v11711_v55  ;;  %6583 = vmatpush.bf16.msra.mxu1 %v11456_v10 }
  0xed   :  { %v12079_v61 = vld [vmem:[%s20112_s1 + $0x1de0] sm:$0xf]  ;;  %v13467_v8 = vld [vmem:[%s20112_s1 + $0x1eec] sm:$0xf0]  ;;  %v11952_v23 = vor.u32 %v13403_v59, %v11951_v58  ;;  %6596 = vmatpush.bf16.msra.mxu2 %v11584_v11 }
  0xee   :  { %v12207_v3 = vld [vmem:[%s20112_s1 + $0x1ee0] sm:$0xf]  ;;  %v13499_v20 = vld [vmem:[%s20112_s1 + $0x1fec] sm:$0xf0]  ;;  %v12080_v24 = vor.u32 %v13435_v63, %v12079_v61  ;;  %6609 = vmatpush.bf16.msra.mxu3 %v11712_v21  ;;  %v6364_v21 = vpop.f32.mrf.mxu0 }
  0xef   :  { %v12335_v19 = vld [vmem:[%s20112_s1 + $0x1fe0] sm:$0xf]  ;;  %v12208_v25 = vor.u32 %v13467_v8, %v12207_v3  ;;  %v13399_v30 = vld [vmem:[%s20112_s1 + $0x1ccc] sm:$0xf0]  ;;  %6615 = vmatpush.bf16.msrb.mxu0 %v11952_v23 }
  0xf0   :  { %v11935_v26 = vld [vmem:[%s20112_s1 + $0x1cc0] sm:$0xf]  ;;  %v12336_v32 = vor.u32 %v13499_v20, %v12335_v19  ;;  %v13431_v33 = vld [vmem:[%s20112_s1 + $0x1dcc] sm:$0xf0]  ;;  %6628 = vmatpush.bf16.msrb.mxu1 %v12080_v24 }
  0xf1   :  { %v12063_v31 = vld [vmem:[%s20112_s1 + $0x1dc0] sm:$0xf]  ;;  %v13463_v36 = vld [vmem:[%s20112_s1 + $0x1ecc] sm:$0xf0]  ;;  %v11936_v44 = vor.u32 %v13399_v30, %v11935_v26  ;;  %6641 = vmatpush.bf16.msrb.mxu2 %v12208_v25  ;;  %v6365_v25 = vadd.f32 %v6364_v21, %v15002_v22  ;;  %v6377_v30 = vpop.f32.mrf.mxu1 }
  0xf2   :  { %v12191_v35 = vld [vmem:[%s20112_s1 + $0x1ec0] sm:$0xf]  ;;  %v13495_v39 = vld [vmem:[%s20112_s1 + $0x1fcc] sm:$0xf0]  ;;  %v12064_v45 = vor.u32 %v13431_v33, %v12063_v31  ;;  %6654 = vmatpush.bf16.msrb.mxu3 %v12336_v32 }
  0xf3   :  { %v1091_v37 = vld [vmem:[#allocation1] sm:$0xff]  ;;  %v1093_v40 = vld [vmem:[#allocation1 + $0x12] sm:$0xff]  ;;  %v1092_v41 = vld [vmem:[#allocation1 + $0x9] sm:$0xff]  ;;  %v12192_v50 = vor.u32 %v13463_v36, %v12191_v35  ;;  %6616 = vmatpush.bf16.msrb.mxu0 %v11936_v44 }
  0xf4   :  { %v12319_v38 = vld [vmem:[%s20112_s1 + $0x1fc0] sm:$0xf]  ;;  %v13395_v52 = vld [vmem:[%s20112_s1 + $0x1cac] sm:$0xf0]  ;;  %6571 = vmatmul.bf16.vlgmr.msra.gmra.mxu0 %v1091_v37  ;;  %6597 = vmatmul.bf16.vlgmr.msra.gmra.mxu2 %v1093_v40  ;;  %v6378_v37 = vadd.f32 %v6377_v30, %v6365_v25 }
  0xf5   :  { %v1094_v42 = vld [vmem:[#allocation1 + $0x1b] sm:$0xff]  ;;  %v12320_v53 = vor.u32 %v13495_v39, %v12319_v38  ;;  %v13427_v54 = vld [vmem:[%s20112_s1 + $0x1dac] sm:$0xf0]  ;;  %6584 = vmatmul.bf16.vlgmr.msra.gmra.mxu1 %v1092_v41  ;;  %6642 = vmatpush.bf16.msrb.mxu2 %v12192_v50 }
  0xf6   :  { %v11919_v51 = vld [vmem:[%s20112_s1 + $0x1ca0] sm:$0xf]  ;;  %v13459_v56 = vld [vmem:[%s20112_s1 + $0x1eac] sm:$0xf0]  ;;  %6610 = vmatmul.bf16.vlgmr.msra.gmra.mxu3 %v1094_v42  ;;  %6629 = vmatpush.bf16.msrb.mxu1 %v12064_v45 }
  0xf7   :  { %v12047_v43 = vld [vmem:[%s20112_s1 + $0x1da0] sm:$0xf]  ;;  %v13491_v58 = vld [vmem:[%s20112_s1 + $0x1fac] sm:$0xf0]  ;;  %v11920_v59 = vor.u32 %v13395_v52, %v11919_v51  ;;  %6655 = vmatpush.bf16.msrb.mxu3 %v12320_v53 }
  0xf8   :  { %v12175_v55 = vld [vmem:[%s20112_s1 + $0x1ea0] sm:$0xf]  ;;  %v12048_v61 = vor.u32 %v13427_v54, %v12047_v43  ;;  %v13391_v3 = vld [vmem:[%s20112_s1 + $0x1c8c] sm:$0xf0]  ;;  %v6390_v54 = vpop.f32.mrf.mxu2 }
  0xf9   :  { %v12303_v57 = vld [vmem:[%s20112_s1 + $0x1fa0] sm:$0xf]  ;;  %v12176_v62 = vor.u32 %v13459_v56, %v12175_v55  ;;  %v13423_v11 = vld [vmem:[%s20112_s1 + $0x1d8c] sm:$0xf0]  ;;  %6617 = vmatpush.bf16.msrb.mxu0 %v11920_v59  ;;  %v6403_v59 = vpop.f32.mrf.mxu3 }
  0xfa   :  { %v11903_v63 = vld [vmem:[%s20112_s1 + $0x1c80] sm:$0xf]  ;;  %v12304_v10 = vor.u32 %v13491_v58, %v12303_v57  ;;  %v13455_v20 = vld [vmem:[%s20112_s1 + $0x1e8c] sm:$0xf0]  ;;  %6630 = vmatpush.bf16.msrb.mxu1 %v12048_v61  ;;  %v6391_v58 = vadd.f32 %v6390_v54, %v6378_v37 }
  0xfb   :  { %v12031_v8 = vld [vmem:[%s20112_s1 + $0x1d80] sm:$0xf]  ;;  %v13487_v24 = vld [vmem:[%s20112_s1 + $0x1f8c] sm:$0xf0]  ;;  %v11904_v26 = vor.u32 %v13391_v3, %v11903_v63  ;;  %6643 = vmatpush.bf16.msrb.mxu2 %v12176_v62  ;;  %v6366_v63 = vpop.f32.mrf.mxu0 }
  0xfc   :  { %v12159_v19 = vld [vmem:[%s20112_s1 + $0x1e80] sm:$0xf]  ;;  %v12032_v31 = vor.u32 %v13423_v11, %v12031_v8  ;;  %v13387_v35 = vld [vmem:[%s20112_s1 + $0x1c6c] sm:$0xf0]  ;;  %6656 = vmatpush.bf16.msrb.mxu3 %v12304_v10  ;;  %v6379_v8 = vpop.f32.mrf.mxu1  ;;  %v15197_v10 = vadd.f32 %v6403_v59, %v6391_v58 }
  0xfd   :  { %v12287_v23 = vld [vmem:[%s20112_s1 + $0x1f80] sm:$0xf]  ;;  %v12160_v32 = vor.u32 %v13455_v20, %v12159_v19  ;;  %v13419_v38 = vld [vmem:[%s20112_s1 + $0x1d6c] sm:$0xf0]  ;;  %6618 = vmatpush.bf16.msrb.mxu0 %v11904_v26 }
  0xfe   :  { %v11887_v33 = vld [vmem:[%s20112_s1 + $0x1c60] sm:$0xf]  ;;  %v12288_v22 = vor.u32 %v13487_v24, %v12287_v23  ;;  %v13451_v40 = vld [vmem:[%s20112_s1 + $0x1e6c] sm:$0xf0]  ;;  %6631 = vmatpush.bf16.msrb.mxu1 %v12032_v31 }
  0xff   :  { %v12015_v36 = vld [vmem:[%s20112_s1 + $0x1d60] sm:$0xf]  ;;  %v13483_v42 = vld [vmem:[%s20112_s1 + $0x1f6c] sm:$0xf0]  ;;  %v11888_v44 = vor.u32 %v13387_v35, %v11887_v33  ;;  %6644 = vmatpush.bf16.msrb.mxu2 %v12160_v32 }
 0x100   :  { %v12143_v39 = vld [vmem:[%s20112_s1 + $0x1e60] sm:$0xf]  ;;  %v12016_v45 = vor.u32 %v13419_v38, %v12015_v36  ;;  %v13383_v52 = vld [vmem:[%s20112_s1 + $0x1c4c] sm:$0xf0]  ;;  %6657 = vmatpush.bf16.msrb.mxu3 %v12288_v22 }
 0x101   :  { %v12271_v41 = vld [vmem:[%s20112_s1 + $0x1f60] sm:$0xf]  ;;  %v12144_v50 = vor.u32 %v13451_v40, %v12143_v39  ;;  %v13415_v55 = vld [vmem:[%s20112_s1 + $0x1d4c] sm:$0xf0]  ;;  %6619 = vmatpush.bf16.msrb.mxu0 %v11888_v44 }
 0x102   :  { %v11871_v51 = vld [vmem:[%s20112_s1 + $0x1c40] sm:$0xf]  ;;  %v12272_v53 = vor.u32 %v13483_v42, %v12271_v41  ;;  %v13447_v57 = vld [vmem:[%s20112_s1 + $0x1e4c] sm:$0xf0]  ;;  %6632 = vmatpush.bf16.msrb.mxu1 %v12016_v45 }
 0x103   :  { %v11999_v43 = vld [vmem:[%s20112_s1 + $0x1d40] sm:$0xf]  ;;  %v13479_v62 = vld [vmem:[%s20112_s1 + $0x1f4c] sm:$0xf0]  ;;  %v11872_v3 = vor.u32 %v13383_v52, %v11871_v51  ;;  %6645 = vmatpush.bf16.msrb.mxu2 %v12144_v50  ;;  %v6392_v50 = vpop.f32.mrf.mxu2  ;;  %v12505_v51 = vld [vmem:[%s20112_s1 + $0xe4] sm:$0xf] }
 0x104   :  { %v12127_v56 = vld [vmem:[%s20112_s1 + $0x1e40] sm:$0xf]  ;;  %v12000_v11 = vor.u32 %v13415_v55, %v11999_v43  ;;  %v13379_v21 = vld [vmem:[%s20112_s1 + $0x1c2c] sm:$0xf0]  ;;  %6658 = vmatpush.bf16.msrb.mxu3 %v12272_v53  ;;  %v8369_v52 = vld [vmem:[%s20112_s1 + $0xf0] sm:$0xf0]  ;;  %v6405_v53 = vpop.f32.mrf.mxu3 }
 0x105   :  { %v12255_v61 = vld [vmem:[%s20112_s1 + $0x1f40] sm:$0xf]  ;;  %v12128_v19 = vor.u32 %v13447_v57, %v12127_v56  ;;  %v13411_v25 = vld [vmem:[%s20112_s1 + $0x1d2c] sm:$0xf0]  ;;  %6620 = vmatpush.bf16.msrb.mxu0 %v11872_v3  ;;  %v12537_v43 = vld [vmem:[%s20112_s1 + $0x1e4] sm:$0xf]  ;;  %v8372_v3 = vor.u32 %v12505_v51, %v8369_v52 }
 0x106   :  { %v11855_v20 = vld [vmem:[%s20112_s1 + $0x1c20] sm:$0xf]  ;;  %v12256_v24 = vor.u32 %v13479_v62, %v12255_v61  ;;  %v13443_v30 = vld [vmem:[%s20112_s1 + $0x1e2c] sm:$0xf0]  ;;  %6633 = vmatpush.bf16.msrb.mxu1 %v12000_v11  ;;  %v8497_v55 = vld [vmem:[%s20112_s1 + $0x1f0] sm:$0xf0] }
 0x107   :  { %v11983_v23 = vld [vmem:[%s20112_s1 + $0x1d20] sm:$0xf]  ;;  %v13475_v32 = vld [vmem:[%s20112_s1 + $0x1f2c] sm:$0xf0]  ;;  %v11856_v33 = vor.u32 %v13379_v21, %v11855_v20  ;;  %6646 = vmatpush.bf16.msrb.mxu2 %v12128_v19  ;;  %v12569_v56 = vld [vmem:[%s20112_s1 + $0x2e4] sm:$0xf]  ;;  %v8500_v8 = vor.u32 %v12537_v43, %v8497_v55 }
 0x108   :  { %v12111_v26 = vld [vmem:[%s20112_s1 + $0x1e20] sm:$0xf]  ;;  %v13375_v36 = vld [vmem:[%s20112_s1 + $0x1c0c] sm:$0xf0]  ;;  %v11984_v22 = vor.u32 %v13411_v25, %v11983_v23  ;;  %6659 = vmatpush.bf16.msrb.mxu3 %v12256_v24  ;;  %v8625_v57 = vld [vmem:[%s20112_s1 + $0x2f0] sm:$0xf0] }
 0x109   :  { %v12239_v31 = vld [vmem:[%s20112_s1 + $0x1f20] sm:$0xf]  ;;  %v12112_v37 = vor.u32 %v13443_v30, %v12111_v26  ;;  %v13407_v39 = vld [vmem:[%s20112_s1 + $0x1d0c] sm:$0xf0]  ;;  %6621 = vmatpush.bf16.msrb.mxu0 %v11856_v33  ;;  %v12601_v61 = vld [vmem:[%s20112_s1 + $0x3e4] sm:$0xf]  ;;  %v8628_v11 = vor.u32 %v12569_v56, %v8625_v57 }
 0x10a   :  { %v11839_v35 = vld [vmem:[%s20112_s1 + $0x1c00] sm:$0xf]  ;;  %v12240_v41 = vor.u32 %v13475_v32, %v12239_v31  ;;  %v13439_v42 = vld [vmem:[%s20112_s1 + $0x1e0c] sm:$0xf0]  ;;  %6634 = vmatpush.bf16.msrb.mxu1 %v11984_v22  ;;  %v8753_v62 = vld [vmem:[%s20112_s1 + $0x3f0] sm:$0xf0] }
 0x10b   :  { %v11967_v38 = vld [vmem:[%s20112_s1 + $0x1d00] sm:$0xf]  ;;  %v13471_v45 = vld [vmem:[%s20112_s1 + $0x1f0c] sm:$0xf0]  ;;  %v11840_v54 = vor.u32 %v13375_v36, %v11839_v35  ;;  %6647 = vmatpush.bf16.msrb.mxu2 %v12112_v37  ;;  %v12501_v19 = vld [vmem:[%s20112_s1 + $0xc4] sm:$0xf]  ;;  %v8756_v23 = vor.u32 %v12601_v61, %v8753_v62 }
 0x10c   :  { %v12095_v40 = vld [vmem:[%s20112_s1 + $0x1e00] sm:$0xf]  ;;  %v11968_v58 = vor.u32 %v13407_v39, %v11967_v38  ;;  %6660 = vmatpush.bf16.msrb.mxu3 %v12240_v41  ;;  %v8353_v20 = vld [vmem:[%s20112_s1 + $0xd0] sm:$0xf0]  ;;  %v12533_v21 = vld [vmem:[%s20112_s1 + $0x1c4] sm:$0xf] }
 0x10d   :  { %v12223_v44 = vld [vmem:[%s20112_s1 + $0x1f00] sm:$0xf]  ;;  %v12096_v59 = vor.u32 %v13439_v42, %v12095_v40  ;;  %6622 = vmatpush.bf16.msrb.mxu0 %v11840_v54  ;;  %v8481_v24 = vld [vmem:[%s20112_s1 + $0x1d0] sm:$0xf0]  ;;  %v12565_v25 = vld [vmem:[%s20112_s1 + $0x2c4] sm:$0xf]  ;;  %v8356_v22 = vor.u32 %v12501_v19, %v8353_v20  ;;  %v6429_v20 = vpop.f32.mrf.mxu1 }
 0x10e   :  { %v12224_v63 = vor.u32 %v13471_v45, %v12223_v44  ;;  %v8609_v26 = vld [vmem:[%s20112_s1 + $0x2d0] sm:$0xf0]  ;;  %6635 = vmatpush.bf16.msrb.mxu1 %v11968_v58  ;;  %v1095_v30 = vld [vmem:[#allocation1 + $0x24] sm:$0xff]  ;;  %v8484_v37 = vor.u32 %v12533_v21, %v8481_v24 }
 0x10f   :  { %6648 = vmatpush.bf16.msrb.mxu2 %v12096_v59  ;;  %v12597_v31 = vld [vmem:[%s20112_s1 + $0x3c4] sm:$0xf]  ;;  %v8737_v32 = vld [vmem:[%s20112_s1 + $0x3d0] sm:$0xf0]  ;;  %v8612_v38 = vor.u32 %v12565_v25, %v8609_v26 }
 0x110   :  { %6661 = vmatpush.bf16.msrb.mxu3 %v12224_v63  ;;  %v1097_v33 = vld [vmem:[#allocation1 + $0x36] sm:$0xff]  ;;  %v1096_v35 = vld [vmem:[#allocation1 + $0x2d] sm:$0xff]  ;;  %v1098_v36 = vld [vmem:[#allocation1 + $0x3f] sm:$0xff]  ;;  %6623 = vmatmul.bf16.vlgmr.msrb.gmra.mxu0 %v1095_v30  ;;  %v8740_v42 = vor.u32 %v12597_v31, %v8737_v32  ;;  %v6416_v63 = vpop.f32.mrf.mxu0 }
 0x111   :  { %6667 = vmatpush.bf16.msra.mxu0 %v8372_v3  ;;  %v12497_v39 = vld [vmem:[%s20112_s1 + $0xa4] sm:$0xf]  ;;  %v8337_v40 = vld [vmem:[%s20112_s1 + $0xb0] sm:$0xf0]  ;;  %6636 = vmatmul.bf16.vlgmr.msrb.gmra.mxu1 %v1096_v35 }
 0x112   :  { %6680 = vmatpush.bf16.msra.mxu1 %v8500_v8  ;;  %v12529_v41 = vld [vmem:[%s20112_s1 + $0x1a4] sm:$0xf]  ;;  %v8465_v44 = vld [vmem:[%s20112_s1 + $0x1b0] sm:$0xf0]  ;;  %6649 = vmatmul.bf16.vlgmr.msrb.gmra.mxu2 %v1097_v33  ;;  %v8340_v43 = vor.u32 %v12497_v39, %v8337_v40 }
 0x113   :  { %6693 = vmatpush.bf16.msra.mxu2 %v8628_v11  ;;  %v12561_v45 = vld [vmem:[%s20112_s1 + $0x2a4] sm:$0xf]  ;;  %v8593_v50 = vld [vmem:[%s20112_s1 + $0x2b0] sm:$0xf0]  ;;  %6662 = vmatmul.bf16.vlgmr.msrb.gmra.mxu3 %v1098_v36  ;;  %v8468_v53 = vor.u32 %v12529_v41, %v8465_v44  ;;  %v6417_v11 = vadd.f32 %v6416_v63, %v15197_v10 }
 0x114   :  { %6706 = vmatpush.bf16.msra.mxu3 %v8756_v23  ;;  %v12593_v51 = vld [vmem:[%s20112_s1 + $0x3a4] sm:$0xf]  ;;  %v8721_v52 = vld [vmem:[%s20112_s1 + $0x3b0] sm:$0xf0]  ;;  %v8596_v54 = vor.u32 %v12561_v45, %v8593_v50  ;;  %v6442_v44 = vpop.f32.mrf.mxu2 }
 0x115   :  { %6668 = vmatpush.bf16.msra.mxu0 %v8356_v22  ;;  %v12493_v55 = vld [vmem:[%s20112_s1 + $0x84] sm:$0xf]  ;;  %v8321_v56 = vld [vmem:[%s20112_s1 + $0x90] sm:$0xf0]  ;;  %v8724_v58 = vor.u32 %v12593_v51, %v8721_v52  ;;  %v6430_v30 = vadd.f32 %v6429_v20, %v6417_v11 }
 0x116   :  { %6681 = vmatpush.bf16.msra.mxu1 %v8484_v37  ;;  %v12525_v57 = vld [vmem:[%s20112_s1 + $0x184] sm:$0xf]  ;;  %v8449_v59 = vld [vmem:[%s20112_s1 + $0x190] sm:$0xf0]  ;;  %v8324_v19 = vor.u32 %v12493_v55, %v8321_v56 }
 0x117   :  { %6694 = vmatpush.bf16.msra.mxu2 %v8612_v38  ;;  %v12557_v61 = vld [vmem:[%s20112_s1 + $0x284] sm:$0xf]  ;;  %v8577_v62 = vld [vmem:[%s20112_s1 + $0x290] sm:$0xf0]  ;;  %v8452_v21 = vor.u32 %v12525_v57, %v8449_v59  ;;  %v6443_v52 = vadd.f32 %v6442_v44, %v6430_v30  ;;  %v6431_v57 = vpop.f32.mrf.mxu1 }
 0x118   :  { %6707 = vmatpush.bf16.msra.mxu3 %v8740_v42  ;;  %v12589_v3 = vld [vmem:[%s20112_s1 + $0x384] sm:$0xf]  ;;  %v8705_v8 = vld [vmem:[%s20112_s1 + $0x390] sm:$0xf0]  ;;  %v8580_v23 = vor.u32 %v12557_v61, %v8577_v62  ;;  %v6418_v55 = vpop.f32.mrf.mxu0 }
 0x119   :  { %6669 = vmatpush.bf16.msra.mxu0 %v8340_v43  ;;  %v12489_v24 = vld [vmem:[%s20112_s1 + $0x64] sm:$0xf]  ;;  %v8305_v25 = vld [vmem:[%s20112_s1 + $0x70] sm:$0xf0]  ;;  %v8708_v10 = vor.u32 %v12589_v3, %v8705_v8  ;;  %v6455_v43 = vpop.f32.mrf.mxu3 }
 0x11a   :  { %6682 = vmatpush.bf16.msra.mxu1 %v8468_v53  ;;  %v12521_v26 = vld [vmem:[%s20112_s1 + $0x164] sm:$0xf]  ;;  %v8433_v31 = vld [vmem:[%s20112_s1 + $0x170] sm:$0xf0]  ;;  %v8308_v22 = vor.u32 %v12489_v24, %v8305_v25 }
 0x11b   :  { %6695 = vmatpush.bf16.msra.mxu2 %v8596_v54  ;;  %v12553_v32 = vld [vmem:[%s20112_s1 + $0x264] sm:$0xf]  ;;  %v8561_v33 = vld [vmem:[%s20112_s1 + $0x270] sm:$0xf0]  ;;  %v8436_v37 = vor.u32 %v12521_v26, %v8433_v31 }
 0x11c   :  { %6708 = vmatpush.bf16.msra.mxu3 %v8724_v58  ;;  %v12585_v35 = vld [vmem:[%s20112_s1 + $0x364] sm:$0xf]  ;;  %v8689_v36 = vld [vmem:[%s20112_s1 + $0x370] sm:$0xf0]  ;;  %v8564_v38 = vor.u32 %v12553_v32, %v8561_v33  ;;  %v15392_v58 = vadd.f32 %v6455_v43, %v6443_v52 }
 0x11d   :  { %6670 = vmatpush.bf16.msra.mxu0 %v8324_v19  ;;  %v12485_v39 = vld [vmem:[%s20112_s1 + $0x44] sm:$0xf]  ;;  %v8289_v40 = vld [vmem:[%s20112_s1 + $0x50] sm:$0xf0]  ;;  %v8692_v42 = vor.u32 %v12585_v35, %v8689_v36 }
 0x11e   :  { %6683 = vmatpush.bf16.msra.mxu1 %v8452_v21  ;;  %v12517_v41 = vld [vmem:[%s20112_s1 + $0x144] sm:$0xf]  ;;  %v8417_v45 = vld [vmem:[%s20112_s1 + $0x150] sm:$0xf0]  ;;  %v8292_v56 = vor.u32 %v12485_v39, %v8289_v40 }
 0x11f   :  { %6696 = vmatpush.bf16.msra.mxu2 %v8580_v23  ;;  %v12549_v50 = vld [vmem:[%s20112_s1 + $0x244] sm:$0xf]  ;;  %v8545_v51 = vld [vmem:[%s20112_s1 + $0x250] sm:$0xf0]  ;;  %v8420_v59 = vor.u32 %v12517_v41, %v8417_v45 }
 0x120   :  { %6709 = vmatpush.bf16.msra.mxu3 %v8708_v10  ;;  %v12581_v53 = vld [vmem:[%s20112_s1 + $0x344] sm:$0xf]  ;;  %v8673_v54 = vld [vmem:[%s20112_s1 + $0x350] sm:$0xf0]  ;;  %v8548_v61 = vor.u32 %v12549_v50, %v8545_v51 }
 0x121   :  { %6671 = vmatpush.bf16.msra.mxu0 %v8308_v22  ;;  %v12481_v62 = vld [vmem:[%s20112_s1 + $0x24] sm:$0xf]  ;;  %v8273_v63 = vld [vmem:[%s20112_s1 + $0x30] sm:$0xf0]  ;;  %v8676_v8 = vor.u32 %v12581_v53, %v8673_v54 }
 0x122   :  { %6684 = vmatpush.bf16.msra.mxu1 %v8436_v37  ;;  %v12513_v3 = vld [vmem:[%s20112_s1 + $0x124] sm:$0xf]  ;;  %v8401_v11 = vld [vmem:[%s20112_s1 + $0x130] sm:$0xf0]  ;;  %v8276_v24 = vor.u32 %v12481_v62, %v8273_v63 }
 0x123   :  { %6697 = vmatpush.bf16.msra.mxu2 %v8564_v38  ;;  %v12545_v19 = vld [vmem:[%s20112_s1 + $0x224] sm:$0xf]  ;;  %v8529_v20 = vld [vmem:[%s20112_s1 + $0x230] sm:$0xf0]  ;;  %v8404_v10 = vor.u32 %v12513_v3, %v8401_v11  ;;  %v6444_v38 = vpop.f32.mrf.mxu2 }
 0x124   :  { %6710 = vmatpush.bf16.msra.mxu3 %v8692_v42  ;;  %v12577_v21 = vld [vmem:[%s20112_s1 + $0x324] sm:$0xf]  ;;  %v8657_v23 = vld [vmem:[%s20112_s1 + $0x330] sm:$0xf0]  ;;  %v8532_v30 = vor.u32 %v12545_v19, %v8529_v20  ;;  %v6457_v42 = vpop.f32.mrf.mxu3 }
 0x125   :  { %6672 = vmatpush.bf16.msra.mxu0 %v8292_v56  ;;  %v12477_v25 = vld [vmem:[%s20112_s1 + $0x4] sm:$0xf]  ;;  %v8257_v26 = vld [vmem:[%s20112_s1 + $0x10] sm:$0xf0]  ;;  %v8660_v35 = vor.u32 %v12577_v21, %v8657_v23 }
 0x126   :  { %6685 = vmatpush.bf16.msra.mxu1 %v8420_v59  ;;  %v12509_v31 = vld [vmem:[%s20112_s1 + $0x104] sm:$0xf]  ;;  %v8385_v32 = vld [vmem:[%s20112_s1 + $0x110] sm:$0xf0]  ;;  %v8260_v44 = vor.u32 %v12477_v25, %v8257_v26 }
 0x127   :  { %6698 = vmatpush.bf16.msra.mxu2 %v8548_v61  ;;  %v12541_v33 = vld [vmem:[%s20112_s1 + $0x204] sm:$0xf]  ;;  %v8513_v36 = vld [vmem:[%s20112_s1 + $0x210] sm:$0xf0]  ;;  %v8388_v52 = vor.u32 %v12509_v31, %v8385_v32 }
 0x128   :  { %6711 = vmatpush.bf16.msra.mxu3 %v8676_v8  ;;  %v12573_v22 = vld [vmem:[%s20112_s1 + $0x304] sm:$0xf]  ;;  %v8641_v37 = vld [vmem:[%s20112_s1 + $0x310] sm:$0xf0]  ;;  %v8516_v43 = vor.u32 %v12541_v33, %v8513_v36 }
 0x129   :  { %v12633_v39 = vld [vmem:[%s20112_s1 + $0x4e4] sm:$0xf]  ;;  %v8881_v40 = vld [vmem:[%s20112_s1 + $0x4f0] sm:$0xf0]  ;;  %6673 = vmatpush.bf16.msra.mxu0 %v8276_v24  ;;  %v8644_v55 = vor.u32 %v12573_v22, %v8641_v37 }
 0x12a   :  { %v12665_v41 = vld [vmem:[%s20112_s1 + $0x5e4] sm:$0xf]  ;;  %v9009_v45 = vld [vmem:[%s20112_s1 + $0x5f0] sm:$0xf0]  ;;  %6686 = vmatpush.bf16.msra.mxu1 %v8404_v10  ;;  %v8884_v56 = vor.u32 %v12633_v39, %v8881_v40 }
 0x12b   :  { %v12697_v50 = vld [vmem:[%s20112_s1 + $0x6e4] sm:$0xf]  ;;  %v9137_v51 = vld [vmem:[%s20112_s1 + $0x6f0] sm:$0xf0]  ;;  %6699 = vmatpush.bf16.msra.mxu2 %v8532_v30  ;;  %v9012_v57 = vor.u32 %v12665_v41, %v9009_v45 }
 0x12c   :  { %v12729_v53 = vld [vmem:[%s20112_s1 + $0x7e4] sm:$0xf]  ;;  %v9265_v54 = vld [vmem:[%s20112_s1 + $0x7f0] sm:$0xf0]  ;;  %6712 = vmatpush.bf16.msra.mxu3 %v8660_v35  ;;  %v9140_v59 = vor.u32 %v12697_v50, %v9137_v51 }
 0x12d   :  { %v12629_v61 = vld [vmem:[%s20112_s1 + $0x4c4] sm:$0xf]  ;;  %v8865_v62 = vld [vmem:[%s20112_s1 + $0x4d0] sm:$0xf0]  ;;  %6674 = vmatpush.bf16.msra.mxu0 %v8260_v44  ;;  %v9268_v3 = vor.u32 %v12729_v53, %v9265_v54 }
 0x12e   :  { %v12661_v63 = vld [vmem:[%s20112_s1 + $0x5c4] sm:$0xf]  ;;  %v8993_v8 = vld [vmem:[%s20112_s1 + $0x5d0] sm:$0xf0]  ;;  %6687 = vmatpush.bf16.msra.mxu1 %v8388_v52  ;;  %v8868_v23 = vor.u32 %v12629_v61, %v8865_v62  ;;  %v6468_v52 = vpop.f32.mrf.mxu0 }
 0x12f   :  { %v12693_v11 = vld [vmem:[%s20112_s1 + $0x6c4] sm:$0xf]  ;;  %v9121_v19 = vld [vmem:[%s20112_s1 + $0x6d0] sm:$0xf0]  ;;  %6700 = vmatpush.bf16.msra.mxu2 %v8516_v43  ;;  %v8996_v24 = vor.u32 %v12661_v63, %v8993_v8  ;;  %v6469_v54 = vadd.f32 %v6468_v52, %v15392_v58 }
 0x130   :  { %v12725_v20 = vld [vmem:[%s20112_s1 + $0x7c4] sm:$0xf]  ;;  %v9249_v21 = vld [vmem:[%s20112_s1 + $0x7d0] sm:$0xf0]  ;;  %6713 = vmatpush.bf16.msra.mxu3 %v8644_v55  ;;  %v9124_v25 = vor.u32 %v12693_v11, %v9121_v19  ;;  %6675 = vmatmul.bf16.vlgmr.msra.gmra.mxu0 %v13939_v28 }
 0x131   :  { %6719 = vmatpush.bf16.msrb.mxu0 %v8884_v56  ;;  %v12625_v26 = vld [vmem:[%s20112_s1 + $0x4a4] sm:$0xf]  ;;  %v8849_v10 = vld [vmem:[%s20112_s1 + $0x4b0] sm:$0xf0]  ;;  %v9252_v31 = vor.u32 %v12725_v20, %v9249_v21  ;;  %6688 = vmatmul.bf16.vlgmr.msra.gmra.mxu1 %v13949_v34  ;;  %v6481_v56 = vpop.f32.mrf.mxu1 }
 0x132   :  { %6732 = vmatpush.bf16.msrb.mxu1 %v9012_v57  ;;  %v12657_v30 = vld [vmem:[%s20112_s1 + $0x5a4] sm:$0xf]  ;;  %v8977_v32 = vld [vmem:[%s20112_s1 + $0x5b0] sm:$0xf0]  ;;  %6701 = vmatmul.bf16.vlgmr.msra.gmra.mxu2 %v13937_v27  ;;  %v8852_v37 = vor.u32 %v12625_v26, %v8849_v10 }
 0x133   :  { %6745 = vmatpush.bf16.msrb.mxu2 %v9140_v59  ;;  %v12689_v33 = vld [vmem:[%s20112_s1 + $0x6a4] sm:$0xf]  ;;  %v9105_v35 = vld [vmem:[%s20112_s1 + $0x6b0] sm:$0xf0]  ;;  %6714 = vmatmul.bf16.vlgmr.msra.gmra.mxu3 %v13941_v29  ;;  %v8980_v38 = vor.u32 %v12657_v30, %v8977_v32 }
 0x134   :  { %6758 = vmatpush.bf16.msrb.mxu3 %v9268_v3  ;;  %v12721_v36 = vld [vmem:[%s20112_s1 + $0x7a4] sm:$0xf]  ;;  %v9233_v22 = vld [vmem:[%s20112_s1 + $0x7b0] sm:$0xf0]  ;;  %v9108_v39 = vor.u32 %v12689_v33, %v9105_v35  ;;  %v6482_v3 = vadd.f32 %v6481_v56, %v6469_v54 }
 0x135   :  { %6720 = vmatpush.bf16.msrb.mxu0 %v8868_v23  ;;  %v12621_v40 = vld [vmem:[%s20112_s1 + $0x484] sm:$0xf]  ;;  %v8833_v41 = vld [vmem:[%s20112_s1 + $0x490] sm:$0xf0]  ;;  %v9236_v44 = vor.u32 %v12721_v36, %v9233_v22  ;;  %v6494_v32 = vpop.f32.mrf.mxu2 }
 0x136   :  { %6733 = vmatpush.bf16.msrb.mxu1 %v8996_v24  ;;  %v12653_v42 = vld [vmem:[%s20112_s1 + $0x584] sm:$0xf]  ;;  %v8961_v45 = vld [vmem:[%s20112_s1 + $0x590] sm:$0xf0]  ;;  %v8836_v55 = vor.u32 %v12621_v40, %v8833_v41  ;;  %v6495_v22 = vadd.f32 %v6494_v32, %v6482_v3  ;;  %v6470_v40 = vpop.f32.mrf.mxu0 }
 0x137   :  { %6746 = vmatpush.bf16.msrb.mxu2 %v9124_v25  ;;  %v12685_v50 = vld [vmem:[%s20112_s1 + $0x684] sm:$0xf]  ;;  %v9089_v51 = vld [vmem:[%s20112_s1 + $0x690] sm:$0xf0]  ;;  %v8964_v57 = vor.u32 %v12653_v42, %v8961_v45 }
 0x138   :  { %6759 = vmatpush.bf16.msrb.mxu3 %v9252_v31  ;;  %v12717_v43 = vld [vmem:[%s20112_s1 + $0x784] sm:$0xf]  ;;  %v9217_v53 = vld [vmem:[%s20112_s1 + $0x790] sm:$0xf0]  ;;  %v9092_v59 = vor.u32 %v12685_v50, %v9089_v51 }
 0x139   :  { %6721 = vmatpush.bf16.msrb.mxu0 %v8852_v37  ;;  %v12617_v61 = vld [vmem:[%s20112_s1 + $0x464] sm:$0xf]  ;;  %v8817_v62 = vld [vmem:[%s20112_s1 + $0x470] sm:$0xf0]  ;;  %v9220_v58 = vor.u32 %v12717_v43, %v9217_v53  ;;  %v6507_v37 = vpop.f32.mrf.mxu3  ;;  %v6483_v42 = vpop.f32.mrf.mxu1 }
 0x13a   :  { %6734 = vmatpush.bf16.msrb.mxu1 %v8980_v38  ;;  %v12649_v63 = vld [vmem:[%s20112_s1 + $0x564] sm:$0xf]  ;;  %v8945_v8 = vld [vmem:[%s20112_s1 + $0x570] sm:$0xf0]  ;;  %v8820_v23 = vor.u32 %v12617_v61, %v8817_v62 }
 0x13b   :  { %6747 = vmatpush.bf16.msrb.mxu2 %v9108_v39  ;;  %v12681_v11 = vld [vmem:[%s20112_s1 + $0x664] sm:$0xf]  ;;  %v9073_v19 = vld [vmem:[%s20112_s1 + $0x670] sm:$0xf0]  ;;  %v8948_v24 = vor.u32 %v12649_v63, %v8945_v8 }
 0x13c   :  { %6760 = vmatpush.bf16.msrb.mxu3 %v9236_v44  ;;  %v12713_v20 = vld [vmem:[%s20112_s1 + $0x764] sm:$0xf]  ;;  %v9201_v21 = vld [vmem:[%s20112_s1 + $0x770] sm:$0xf0]  ;;  %v9076_v25 = vor.u32 %v12681_v11, %v9073_v19  ;;  %v15591_v44 = vadd.f32 %v6507_v37, %v6495_v22 }
 0x13d   :  { %6722 = vmatpush.bf16.msrb.mxu0 %v8836_v55  ;;  %v12613_v26 = vld [vmem:[%s20112_s1 + $0x444] sm:$0xf]  ;;  %v8801_v10 = vld [vmem:[%s20112_s1 + $0x450] sm:$0xf0]  ;;  %v9204_v31 = vor.u32 %v12713_v20, %v9201_v21 }
 0x13e   :  { %6735 = vmatpush.bf16.msrb.mxu1 %v8964_v57  ;;  %v12645_v30 = vld [vmem:[%s20112_s1 + $0x544] sm:$0xf]  ;;  %v8929_v33 = vld [vmem:[%s20112_s1 + $0x550] sm:$0xf0]  ;;  %v8804_v41 = vor.u32 %v12613_v26, %v8801_v10 }
 0x13f   :  { %6748 = vmatpush.bf16.msrb.mxu2 %v9092_v59  ;;  %v12677_v35 = vld [vmem:[%s20112_s1 + $0x644] sm:$0xf]  ;;  %v9057_v36 = vld [vmem:[%s20112_s1 + $0x650] sm:$0xf0]  ;;  %v8932_v45 = vor.u32 %v12645_v30, %v8929_v33 }
 0x140   :  { %6761 = vmatpush.bf16.msrb.mxu3 %v9220_v58  ;;  %v12709_v38 = vld [vmem:[%s20112_s1 + $0x744] sm:$0xf]  ;;  %v9185_v39 = vld [vmem:[%s20112_s1 + $0x750] sm:$0xf0]  ;;  %v9060_v50 = vor.u32 %v12677_v35, %v9057_v36 }
 0x141   :  { %6723 = vmatpush.bf16.msrb.mxu0 %v8820_v23  ;;  %v12609_v51 = vld [vmem:[%s20112_s1 + $0x424] sm:$0xf]  ;;  %v8785_v52 = vld [vmem:[%s20112_s1 + $0x430] sm:$0xf0]  ;;  %v9188_v53 = vor.u32 %v12709_v38, %v9185_v39 }
 0x142   :  { %6736 = vmatpush.bf16.msrb.mxu1 %v8948_v24  ;;  %v12641_v43 = vld [vmem:[%s20112_s1 + $0x524] sm:$0xf]  ;;  %v8913_v54 = vld [vmem:[%s20112_s1 + $0x530] sm:$0xf0]  ;;  %v8788_v61 = vor.u32 %v12609_v51, %v8785_v52 }
 0x143   :  { %6749 = vmatpush.bf16.msrb.mxu2 %v9076_v25  ;;  %v12673_v55 = vld [vmem:[%s20112_s1 + $0x624] sm:$0xf]  ;;  %v9041_v56 = vld [vmem:[%s20112_s1 + $0x630] sm:$0xf0]  ;;  %v8916_v58 = vor.u32 %v12641_v43, %v8913_v54  ;;  %v6496_v25 = vpop.f32.mrf.mxu2 }
 0x144   :  { %6762 = vmatpush.bf16.msrb.mxu3 %v9204_v31  ;;  %v12705_v57 = vld [vmem:[%s20112_s1 + $0x724] sm:$0xf]  ;;  %v9169_v59 = vld [vmem:[%s20112_s1 + $0x730] sm:$0xf0]  ;;  %v9044_v3 = vor.u32 %v12673_v55, %v9041_v56  ;;  %v6509_v31 = vpop.f32.mrf.mxu3 }
 0x145   :  { %6724 = vmatpush.bf16.msrb.mxu0 %v8804_v41  ;;  %v12605_v62 = vld [vmem:[%s20112_s1 + $0x404] sm:$0xf]  ;;  %v8769_v63 = vld [vmem:[%s20112_s1 + $0x410] sm:$0xf0]  ;;  %v9172_v20 = vor.u32 %v12705_v57, %v9169_v59 }
 0x146   :  { %6737 = vmatpush.bf16.msrb.mxu1 %v8932_v45  ;;  %v12637_v8 = vld [vmem:[%s20112_s1 + $0x504] sm:$0xf]  ;;  %v8897_v11 = vld [vmem:[%s20112_s1 + $0x510] sm:$0xf0]  ;;  %v8772_v32 = vor.u32 %v12605_v62, %v8769_v63 }
 0x147   :  { %6750 = vmatpush.bf16.msrb.mxu2 %v9060_v50  ;;  %v12669_v19 = vld [vmem:[%s20112_s1 + $0x604] sm:$0xf]  ;;  %v9025_v21 = vld [vmem:[%s20112_s1 + $0x610] sm:$0xf0]  ;;  %v8900_v22 = vor.u32 %v12637_v8, %v8897_v11 }
 0x148   :  { %6763 = vmatpush.bf16.msrb.mxu3 %v9188_v53  ;;  %v12701_v23 = vld [vmem:[%s20112_s1 + $0x704] sm:$0xf]  ;;  %v9153_v24 = vld [vmem:[%s20112_s1 + $0x710] sm:$0xf0]  ;;  %v9028_v37 = vor.u32 %v12669_v19, %v9025_v21 }
 0x149   :  { %v12761_v26 = vld [vmem:[%s20112_s1 + $0x8e4] sm:$0xf]  ;;  %v9393_v10 = vld [vmem:[%s20112_s1 + $0x8f0] sm:$0xf0]  ;;  %6725 = vmatpush.bf16.msrb.mxu0 %v8788_v61  ;;  %v9156_v40 = vor.u32 %v12701_v23, %v9153_v24 }
 0x14a   :  { %v12793_v30 = vld [vmem:[%s20112_s1 + $0x9e4] sm:$0xf]  ;;  %v9521_v33 = vld [vmem:[%s20112_s1 + $0x9f0] sm:$0xf0]  ;;  %6738 = vmatpush.bf16.msrb.mxu1 %v8916_v58  ;;  %v9396_v41 = vor.u32 %v12761_v26, %v9393_v10 }
 0x14b   :  { %v12825_v35 = vld [vmem:[%s20112_s1 + $0xae4] sm:$0xf]  ;;  %v9649_v36 = vld [vmem:[%s20112_s1 + $0xaf0] sm:$0xf0]  ;;  %6751 = vmatpush.bf16.msrb.mxu2 %v9044_v3  ;;  %v9524_v42 = vor.u32 %v12793_v30, %v9521_v33 }
 0x14c   :  { %v12857_v38 = vld [vmem:[%s20112_s1 + $0xbe4] sm:$0xf]  ;;  %v9777_v39 = vld [vmem:[%s20112_s1 + $0xbf0] sm:$0xf0]  ;;  %6764 = vmatpush.bf16.msrb.mxu3 %v9172_v20  ;;  %v9652_v45 = vor.u32 %v12825_v35, %v9649_v36 }
 0x14d   :  { %v12757_v50 = vld [vmem:[%s20112_s1 + $0x8c4] sm:$0xf]  ;;  %v9377_v51 = vld [vmem:[%s20112_s1 + $0x8d0] sm:$0xf0]  ;;  %6726 = vmatpush.bf16.msrb.mxu0 %v8772_v32  ;;  %v9780_v43 = vor.u32 %v12857_v38, %v9777_v39 }
 0x14e   :  { %v12789_v52 = vld [vmem:[%s20112_s1 + $0x9c4] sm:$0xf]  ;;  %v9505_v53 = vld [vmem:[%s20112_s1 + $0x9d0] sm:$0xf0]  ;;  %6739 = vmatpush.bf16.msrb.mxu1 %v8900_v22  ;;  %v9380_v59 = vor.u32 %v12757_v50, %v9377_v51  ;;  %v6520_v22 = vpop.f32.mrf.mxu0 }
 0x14f   :  { %v12821_v54 = vld [vmem:[%s20112_s1 + $0xac4] sm:$0xf]  ;;  %v9633_v55 = vld [vmem:[%s20112_s1 + $0xad0] sm:$0xf0]  ;;  %6752 = vmatpush.bf16.msrb.mxu2 %v9028_v37  ;;  %v9508_v61 = vor.u32 %v12789_v52, %v9505_v53  ;;  %v6521_v39 = vadd.f32 %v6520_v22, %v15591_v44 }
 0x150   :  { %v12853_v56 = vld [vmem:[%s20112_s1 + $0xbc4] sm:$0xf]  ;;  %v9761_v57 = vld [vmem:[%s20112_s1 + $0xbd0] sm:$0xf0]  ;;  %6765 = vmatpush.bf16.msrb.mxu3 %v9156_v40  ;;  %v9636_v62 = vor.u32 %v12821_v54, %v9633_v55  ;;  %6727 = vmatmul.bf16.vlgmr.msrb.gmra.mxu0 %v14017_v0 }
 0x151   :  { %6771 = vmatpush.bf16.msra.mxu0 %v9396_v41  ;;  %v12753_v63 = vld [vmem:[%s20112_s1 + $0x8a4] sm:$0xf]  ;;  %v9361_v58 = vld [vmem:[%s20112_s1 + $0x8b0] sm:$0xf0]  ;;  %v9764_v8 = vor.u32 %v12853_v56, %v9761_v57  ;;  %6740 = vmatmul.bf16.vlgmr.msrb.gmra.mxu1 %v14021_v2  ;;  %v6533_v41 = vpop.f32.mrf.mxu1 }
 0x152   :  { %6784 = vmatpush.bf16.msra.mxu1 %v9524_v42  ;;  %v12785_v3 = vld [vmem:[%s20112_s1 + $0x9a4] sm:$0xf]  ;;  %6753 = vmatmul.bf16.vlgmr.msrb.gmra.mxu2 %v14012_v60  ;;  %v9489_v11 = vld [vmem:[%s20112_s1 + $0x9b0] sm:$0xf0]  ;;  %v9364_v24 = vor.u32 %v12753_v63, %v9361_v58 }
 0x153   :  { %6797 = vmatpush.bf16.msra.mxu2 %v9652_v45  ;;  %v12817_v19 = vld [vmem:[%s20112_s1 + $0xaa4] sm:$0xf]  ;;  %v9617_v20 = vld [vmem:[%s20112_s1 + $0xab0] sm:$0xf0]  ;;  %6766 = vmatmul.bf16.vlgmr.msrb.gmra.mxu3 %v14019_v1  ;;  %v9492_v25 = vor.u32 %v12785_v3, %v9489_v11  ;;  %v6546_v11 = vpop.f32.mrf.mxu2 }
 0x154   :  { %6810 = vmatpush.bf16.msra.mxu3 %v9780_v43  ;;  %v12849_v21 = vld [vmem:[%s20112_s1 + $0xba4] sm:$0xf]  ;;  %v9745_v23 = vld [vmem:[%s20112_s1 + $0xbb0] sm:$0xf0]  ;;  %v9620_v26 = vor.u32 %v12817_v19, %v9617_v20  ;;  %v6534_v43 = vadd.f32 %v6533_v41, %v6521_v39 }
 0x155   :  { %6772 = vmatpush.bf16.msra.mxu0 %v9380_v59  ;;  %v12749_v10 = vld [vmem:[%s20112_s1 + $0x884] sm:$0xf]  ;;  %v9345_v30 = vld [vmem:[%s20112_s1 + $0x890] sm:$0xf0]  ;;  %v9748_v32 = vor.u32 %v12849_v21, %v9745_v23 }
 0x156   :  { %6785 = vmatpush.bf16.msra.mxu1 %v9508_v61  ;;  %v12781_v31 = vld [vmem:[%s20112_s1 + $0x984] sm:$0xf]  ;;  %v9473_v33 = vld [vmem:[%s20112_s1 + $0x990] sm:$0xf0]  ;;  %v9348_v40 = vor.u32 %v12749_v10, %v9345_v30  ;;  %v6547_v23 = vadd.f32 %v6546_v11, %v6534_v43  ;;  %v6522_v10 = vpop.f32.mrf.mxu0 }
 0x157   :  { %6798 = vmatpush.bf16.msra.mxu2 %v9636_v62  ;;  %v12813_v35 = vld [vmem:[%s20112_s1 + $0xa84] sm:$0xf]  ;;  %v9601_v36 = vld [vmem:[%s20112_s1 + $0xa90] sm:$0xf0]  ;;  %v9476_v42 = vor.u32 %v12781_v31, %v9473_v33 }
 0x158   :  { %6811 = vmatpush.bf16.msra.mxu3 %v9764_v8  ;;  %v12845_v37 = vld [vmem:[%s20112_s1 + $0xb84] sm:$0xf]  ;;  %v9729_v38 = vld [vmem:[%s20112_s1 + $0xb90] sm:$0xf0]  ;;  %v9604_v45 = vor.u32 %v12813_v35, %v9601_v36 }
 0x159   :  { %6773 = vmatpush.bf16.msra.mxu0 %v9364_v24  ;;  %v12745_v50 = vld [vmem:[%s20112_s1 + $0x864] sm:$0xf]  ;;  %v9329_v51 = vld [vmem:[%s20112_s1 + $0x870] sm:$0xf0]  ;;  %v9732_v44 = vor.u32 %v12845_v37, %v9729_v38  ;;  %v6559_v24 = vpop.f32.mrf.mxu3  ;;  %v6535_v31 = vpop.f32.mrf.mxu1 }
 0x15a   :  { %6786 = vmatpush.bf16.msra.mxu1 %v9492_v25  ;;  %v12777_v52 = vld [vmem:[%s20112_s1 + $0x964] sm:$0xf]  ;;  %v9457_v53 = vld [vmem:[%s20112_s1 + $0x970] sm:$0xf0]  ;;  %v9332_v59 = vor.u32 %v12745_v50, %v9329_v51 }
 0x15b   :  { %6799 = vmatpush.bf16.msra.mxu2 %v9620_v26  ;;  %v12809_v54 = vld [vmem:[%s20112_s1 + $0xa64] sm:$0xf]  ;;  %v9585_v55 = vld [vmem:[%s20112_s1 + $0xa70] sm:$0xf0]  ;;  %v9460_v61 = vor.u32 %v12777_v52, %v9457_v53 }
 0x15c   :  { %6812 = vmatpush.bf16.msra.mxu3 %v9748_v32  ;;  %v12841_v56 = vld [vmem:[%s20112_s1 + $0xb64] sm:$0xf]  ;;  %v9713_v57 = vld [vmem:[%s20112_s1 + $0xb70] sm:$0xf0]  ;;  %v9588_v62 = vor.u32 %v12809_v54, %v9585_v55  ;;  %v15790_v32 = vadd.f32 %v6559_v24, %v6547_v23 }
 0x15d   :  { %6774 = vmatpush.bf16.msra.mxu0 %v9348_v40  ;;  %v12741_v63 = vld [vmem:[%s20112_s1 + $0x844] sm:$0xf]  ;;  %v9313_v58 = vld [vmem:[%s20112_s1 + $0x850] sm:$0xf0]  ;;  %v9716_v8 = vor.u32 %v12841_v56, %v9713_v57 }
 0x15e   :  { %6787 = vmatpush.bf16.msra.mxu1 %v9476_v42  ;;  %v12773_v3 = vld [vmem:[%s20112_s1 + $0x944] sm:$0xf]  ;;  %v9441_v19 = vld [vmem:[%s20112_s1 + $0x950] sm:$0xf0]  ;;  %v9316_v30 = vor.u32 %v12741_v63, %v9313_v58 }
 0x15f   :  { %6800 = vmatpush.bf16.msra.mxu2 %v9604_v45  ;;  %v12805_v20 = vld [vmem:[%s20112_s1 + $0xa44] sm:$0xf]  ;;  %v9569_v21 = vld [vmem:[%s20112_s1 + $0xa50] sm:$0xf0]  ;;  %v9444_v33 = vor.u32 %v12773_v3, %v9441_v19 }
 0x160   :  { %6813 = vmatpush.bf16.msra.mxu3 %v9732_v44  ;;  %v12837_v25 = vld [vmem:[%s20112_s1 + $0xb44] sm:$0xf]  ;;  %v9697_v26 = vld [vmem:[%s20112_s1 + $0xb50] sm:$0xf0]  ;;  %v9572_v35 = vor.u32 %v12805_v20, %v9569_v21 }
 0x161   :  { %6775 = vmatpush.bf16.msra.mxu0 %v9332_v59  ;;  %v12737_v36 = vld [vmem:[%s20112_s1 + $0x824] sm:$0xf]  ;;  %v9297_v22 = vld [vmem:[%s20112_s1 + $0x830] sm:$0xf0]  ;;  %v9700_v38 = vor.u32 %v12837_v25, %v9697_v26 }
 0x162   :  { %6788 = vmatpush.bf16.msra.mxu1 %v9460_v61  ;;  %v12769_v37 = vld [vmem:[%s20112_s1 + $0x924] sm:$0xf]  ;;  %v9425_v39 = vld [vmem:[%s20112_s1 + $0x930] sm:$0xf0]  ;;  %v9300_v50 = vor.u32 %v12737_v36, %v9297_v22 }
 0x163   :  { %6801 = vmatpush.bf16.msra.mxu2 %v9588_v62  ;;  %v12801_v40 = vld [vmem:[%s20112_s1 + $0xa24] sm:$0xf]  ;;  %v9553_v41 = vld [vmem:[%s20112_s1 + $0xa30] sm:$0xf0]  ;;  %v9428_v44 = vor.u32 %v12769_v37, %v9425_v39  ;;  %v6548_v62 = vpop.f32.mrf.mxu2 }
 0x164   :  { %6814 = vmatpush.bf16.msra.mxu3 %v9716_v8  ;;  %v12833_v42 = vld [vmem:[%s20112_s1 + $0xb24] sm:$0xf]  ;;  %v9681_v45 = vld [vmem:[%s20112_s1 + $0xb30] sm:$0xf0]  ;;  %v9556_v43 = vor.u32 %v12801_v40, %v9553_v41  ;;  %v6561_v8 = vpop.f32.mrf.mxu3 }
 0x165   :  { %6776 = vmatpush.bf16.msra.mxu0 %v9316_v30  ;;  %v12733_v51 = vld [vmem:[%s20112_s1 + $0x804] sm:$0xf]  ;;  %v9281_v52 = vld [vmem:[%s20112_s1 + $0x810] sm:$0xf0]  ;;  %v9684_v56 = vor.u32 %v12833_v42, %v9681_v45 }
 0x166   :  { %6789 = vmatpush.bf16.msra.mxu1 %v9444_v33  ;;  %v12765_v53 = vld [vmem:[%s20112_s1 + $0x904] sm:$0xf]  ;;  %v9409_v54 = vld [vmem:[%s20112_s1 + $0x910] sm:$0xf0]  ;;  %v9284_v11 = vor.u32 %v12733_v51, %v9281_v52 }
 0x167   :  { %6802 = vmatpush.bf16.msra.mxu2 %v9572_v35  ;;  %v12797_v55 = vld [vmem:[%s20112_s1 + $0xa04] sm:$0xf]  ;;  %v9537_v57 = vld [vmem:[%s20112_s1 + $0xa10] sm:$0xf0]  ;;  %v9412_v23 = vor.u32 %v12765_v53, %v9409_v54 }
 0x168   :  { %6815 = vmatpush.bf16.msra.mxu3 %v9700_v38  ;;  %v12829_v59 = vld [vmem:[%s20112_s1 + $0xb04] sm:$0xf]  ;;  %v9665_v61 = vld [vmem:[%s20112_s1 + $0xb10] sm:$0xf0]  ;;  %v9540_v24 = vor.u32 %v12797_v55, %v9537_v57 }
 0x169   :  { %v12889_v63 = vld [vmem:[%s20112_s1 + $0xce4] sm:$0xf]  ;;  %v9905_v58 = vld [vmem:[%s20112_s1 + $0xcf0] sm:$0xf0]  ;;  %6777 = vmatpush.bf16.msra.mxu0 %v9300_v50  ;;  %v9668_v10 = vor.u32 %v12829_v59, %v9665_v61 }
 0x16a   :  { %v12921_v3 = vld [vmem:[%s20112_s1 + $0xde4] sm:$0xf]  ;;  %v10033_v19 = vld [vmem:[%s20112_s1 + $0xdf0] sm:$0xf0]  ;;  %6790 = vmatpush.bf16.msra.mxu1 %v9428_v44  ;;  %v9908_v30 = vor.u32 %v12889_v63, %v9905_v58 }
 0x16b   :  { %v12953_v20 = vld [vmem:[%s20112_s1 + $0xee4] sm:$0xf]  ;;  %v10161_v21 = vld [vmem:[%s20112_s1 + $0xef0] sm:$0xf0]  ;;  %6803 = vmatpush.bf16.msra.mxu2 %v9556_v43  ;;  %v10036_v31 = vor.u32 %v12921_v3, %v10033_v19 }
 0x16c   :  { %v12985_v25 = vld [vmem:[%s20112_s1 + $0xfe4] sm:$0xf]  ;;  %v10289_v26 = vld [vmem:[%s20112_s1 + $0xff0] sm:$0xf0]  ;;  %6816 = vmatpush.bf16.msra.mxu3 %v9684_v56  ;;  %v10164_v33 = vor.u32 %v12953_v20, %v10161_v21 }
 0x16d   :  { %v12885_v35 = vld [vmem:[%s20112_s1 + $0xcc4] sm:$0xf]  ;;  %v9889_v36 = vld [vmem:[%s20112_s1 + $0xcd0] sm:$0xf0]  ;;  %6778 = vmatpush.bf16.msra.mxu0 %v9284_v11  ;;  %v10292_v37 = vor.u32 %v12985_v25, %v10289_v26 }
 0x16e   :  { %v12917_v22 = vld [vmem:[%s20112_s1 + $0xdc4] sm:$0xf]  ;;  %v10017_v38 = vld [vmem:[%s20112_s1 + $0xdd0] sm:$0xf0]  ;;  %6791 = vmatpush.bf16.msra.mxu1 %v9412_v23  ;;  %v9892_v45 = vor.u32 %v12885_v35, %v9889_v36 }
 0x16f   :  { %v12949_v39 = vld [vmem:[%s20112_s1 + $0xec4] sm:$0xf]  ;;  %v10145_v40 = vld [vmem:[%s20112_s1 + $0xed0] sm:$0xf0]  ;;  %6804 = vmatpush.bf16.msra.mxu2 %v9540_v24  ;;  %v10020_v50 = vor.u32 %v12917_v22, %v10017_v38 }
 0x170   :  { %v12981_v41 = vld [vmem:[%s20112_s1 + $0xfc4] sm:$0xf]  ;;  %v10273_v42 = vld [vmem:[%s20112_s1 + $0xfd0] sm:$0xf0]  ;;  %6817 = vmatpush.bf16.msra.mxu3 %v9668_v10  ;;  %v10148_v51 = vor.u32 %v12949_v39, %v10145_v40  ;;  %6779 = vmatmul.bf16.vlgmr.msra.gmra.mxu0 %v14267_v12 }
 0x171   :  { %6823 = vmatpush.bf16.msrb.mxu0 %v9908_v30  ;;  %v12881_v52 = vld [vmem:[%s20112_s1 + $0xca4] sm:$0xf]  ;;  %v9873_v44 = vld [vmem:[%s20112_s1 + $0xcb0] sm:$0xf0]  ;;  %v10276_v53 = vor.u32 %v12981_v41, %v10273_v42  ;;  %6792 = vmatmul.bf16.vlgmr.msra.gmra.mxu1 %v14277_v16  ;;  %v6572_v23 = vpop.f32.mrf.mxu0 }
 0x172   :  { %6836 = vmatpush.bf16.msrb.mxu1 %v10036_v31  ;;  %v12913_v43 = vld [vmem:[%s20112_s1 + $0xda4] sm:$0xf]  ;;  %v10001_v54 = vld [vmem:[%s20112_s1 + $0xdb0] sm:$0xf0]  ;;  %6805 = vmatmul.bf16.vlgmr.msra.gmra.mxu2 %v14275_v15  ;;  %v9876_v61 = vor.u32 %v12881_v52, %v9873_v44  ;;  %v6573_v26 = vadd.f32 %v6572_v23, %v15790_v32  ;;  %v6585_v30 = vpop.f32.mrf.mxu1 }
 0x173   :  { %6849 = vmatpush.bf16.msrb.mxu2 %v10164_v33  ;;  %v12945_v55 = vld [vmem:[%s20112_s1 + $0xea4] sm:$0xf]  ;;  %v10129_v56 = vld [vmem:[%s20112_s1 + $0xeb0] sm:$0xf0]  ;;  %6818 = vmatmul.bf16.vlgmr.msra.gmra.mxu3 %v14279_v17  ;;  %v10004_v62 = vor.u32 %v12913_v43, %v10001_v54 }
 0x174   :  { %6862 = vmatpush.bf16.msrb.mxu3 %v10292_v37  ;;  %v12977_v57 = vld [vmem:[%s20112_s1 + $0xfa4] sm:$0xf]  ;;  %v10257_v59 = vld [vmem:[%s20112_s1 + $0xfb0] sm:$0xf0]  ;;  %v10132_v63 = vor.u32 %v12945_v55, %v10129_v56  ;;  %v6586_v37 = vadd.f32 %v6585_v30, %v6573_v26 }
 0x175   :  { %6824 = vmatpush.bf16.msrb.mxu0 %v9892_v45  ;;  %v12877_v58 = vld [vmem:[%s20112_s1 + $0xc84] sm:$0xf]  ;;  %v9857_v3 = vld [vmem:[%s20112_s1 + $0xc90] sm:$0xf0]  ;;  %v10260_v11 = vor.u32 %v12977_v57, %v10257_v59 }
 0x176   :  { %6837 = vmatpush.bf16.msrb.mxu1 %v10020_v50  ;;  %v12909_v8 = vld [vmem:[%s20112_s1 + $0xd84] sm:$0xf]  ;;  %v9985_v19 = vld [vmem:[%s20112_s1 + $0xd90] sm:$0xf0]  ;;  %v9860_v10 = vor.u32 %v12877_v58, %v9857_v3 }
 0x177   :  { %6850 = vmatpush.bf16.msrb.mxu2 %v10148_v51  ;;  %v12941_v20 = vld [vmem:[%s20112_s1 + $0xe84] sm:$0xf]  ;;  %v10113_v21 = vld [vmem:[%s20112_s1 + $0xe90] sm:$0xf0]  ;;  %v9988_v31 = vor.u32 %v12909_v8, %v9985_v19  ;;  %v6598_v54 = vpop.f32.mrf.mxu2 }
 0x178   :  { %6863 = vmatpush.bf16.msrb.mxu3 %v10276_v53  ;;  %v12973_v24 = vld [vmem:[%s20112_s1 + $0xf84] sm:$0xf]  ;;  %v10241_v25 = vld [vmem:[%s20112_s1 + $0xf90] sm:$0xf0]  ;;  %v10116_v33 = vor.u32 %v12941_v20, %v10113_v21  ;;  %v6599_v59 = vadd.f32 %v6598_v54, %v6586_v37 }
 0x179   :  { %6825 = vmatpush.bf16.msrb.mxu0 %v9876_v61  ;;  %v12873_v35 = vld [vmem:[%s20112_s1 + $0xc64] sm:$0xf]  ;;  %v9841_v36 = vld [vmem:[%s20112_s1 + $0xc70] sm:$0xf0]  ;;  %v10244_v32 = vor.u32 %v12973_v24, %v10241_v25  ;;  %v6611_v61 = vpop.f32.mrf.mxu3  ;;  %v6574_v58 = vpop.f32.mrf.mxu0 }
 0x17a   :  { %6838 = vmatpush.bf16.msrb.mxu1 %v10004_v62  ;;  %v12905_v22 = vld [vmem:[%s20112_s1 + $0xd64] sm:$0xf]  ;;  %v9969_v38 = vld [vmem:[%s20112_s1 + $0xd70] sm:$0xf0]  ;;  %v9844_v45 = vor.u32 %v12873_v35, %v9841_v36  ;;  %v6587_v8 = vpop.f32.mrf.mxu1 }
 0x17b   :  { %6851 = vmatpush.bf16.msrb.mxu2 %v10132_v63  ;;  %v12937_v39 = vld [vmem:[%s20112_s1 + $0xe64] sm:$0xf]  ;;  %v10097_v40 = vld [vmem:[%s20112_s1 + $0xe70] sm:$0xf0]  ;;  %v9972_v50 = vor.u32 %v12905_v22, %v9969_v38 }
 0x17c   :  { %6864 = vmatpush.bf16.msrb.mxu3 %v10260_v11  ;;  %v12969_v41 = vld [vmem:[%s20112_s1 + $0xf64] sm:$0xf]  ;;  %v10225_v42 = vld [vmem:[%s20112_s1 + $0xf70] sm:$0xf0]  ;;  %v10100_v51 = vor.u32 %v12937_v39, %v10097_v40  ;;  %v15989_v11 = vadd.f32 %v6611_v61, %v6599_v59 }
 0x17d   :  { %6826 = vmatpush.bf16.msrb.mxu0 %v9860_v10  ;;  %v12869_v52 = vld [vmem:[%s20112_s1 + $0xc44] sm:$0xf]  ;;  %v9825_v44 = vld [vmem:[%s20112_s1 + $0xc50] sm:$0xf0]  ;;  %v10228_v53 = vor.u32 %v12969_v41, %v10225_v42 }
 0x17e   :  { %6839 = vmatpush.bf16.msrb.mxu1 %v9988_v31  ;;  %v12901_v43 = vld [vmem:[%s20112_s1 + $0xd44] sm:$0xf]  ;;  %v9953_v55 = vld [vmem:[%s20112_s1 + $0xd50] sm:$0xf0]  ;;  %v9828_v3 = vor.u32 %v12869_v52, %v9825_v44 }
 0x17f   :  { %6852 = vmatpush.bf16.msrb.mxu2 %v10116_v33  ;;  %v12933_v56 = vld [vmem:[%s20112_s1 + $0xe44] sm:$0xf]  ;;  %v10081_v57 = vld [vmem:[%s20112_s1 + $0xe50] sm:$0xf0]  ;;  %v9956_v19 = vor.u32 %v12901_v43, %v9953_v55 }
 0x180   :  { %6865 = vmatpush.bf16.msrb.mxu3 %v10244_v32  ;;  %v12965_v62 = vld [vmem:[%s20112_s1 + $0xf44] sm:$0xf]  ;;  %v10209_v63 = vld [vmem:[%s20112_s1 + $0xf50] sm:$0xf0]  ;;  %v10084_v20 = vor.u32 %v12933_v56, %v10081_v57 }
 0x181   :  { %6827 = vmatpush.bf16.msrb.mxu0 %v9844_v45  ;;  %v12865_v21 = vld [vmem:[%s20112_s1 + $0xc24] sm:$0xf]  ;;  %v9809_v23 = vld [vmem:[%s20112_s1 + $0xc30] sm:$0xf0]  ;;  %v10212_v25 = vor.u32 %v12965_v62, %v10209_v63 }
 0x182   :  { %6840 = vmatpush.bf16.msrb.mxu1 %v9972_v50  ;;  %v12897_v24 = vld [vmem:[%s20112_s1 + $0xd24] sm:$0xf]  ;;  %v9937_v26 = vld [vmem:[%s20112_s1 + $0xd30] sm:$0xf0]  ;;  %v9812_v35 = vor.u32 %v12865_v21, %v9809_v23 }
 0x183   :  { %6853 = vmatpush.bf16.msrb.mxu2 %v10100_v51  ;;  %v12929_v10 = vld [vmem:[%s20112_s1 + $0xe24] sm:$0xf]  ;;  %v10065_v30 = vld [vmem:[%s20112_s1 + $0xe30] sm:$0xf0]  ;;  %v9940_v32 = vor.u32 %v12897_v24, %v9937_v26  ;;  %v6600_v51 = vpop.f32.mrf.mxu2 }
 0x184   :  { %6866 = vmatpush.bf16.msrb.mxu3 %v10228_v53  ;;  %v12961_v31 = vld [vmem:[%s20112_s1 + $0xf24] sm:$0xf]  ;;  %v10193_v33 = vld [vmem:[%s20112_s1 + $0xf30] sm:$0xf0]  ;;  %v10068_v37 = vor.u32 %v12929_v10, %v10065_v30  ;;  %v6613_v53 = vpop.f32.mrf.mxu3 }
 0x185   :  { %6828 = vmatpush.bf16.msrb.mxu0 %v9828_v3  ;;  %v12861_v36 = vld [vmem:[%s20112_s1 + $0xc04] sm:$0xf]  ;;  %v9793_v22 = vld [vmem:[%s20112_s1 + $0xc10] sm:$0xf0]  ;;  %v10196_v41 = vor.u32 %v12961_v31, %v10193_v33 }
 0x186   :  { %6841 = vmatpush.bf16.msrb.mxu1 %v9956_v19  ;;  %v12893_v38 = vld [vmem:[%s20112_s1 + $0xd04] sm:$0xf]  ;;  %v9921_v39 = vld [vmem:[%s20112_s1 + $0xd10] sm:$0xf0]  ;;  %v9796_v54 = vor.u32 %v12861_v36, %v9793_v22 }
 0x187   :  { %6854 = vmatpush.bf16.msrb.mxu2 %v10084_v20  ;;  %v12925_v40 = vld [vmem:[%s20112_s1 + $0xe04] sm:$0xf]  ;;  %v10049_v42 = vld [vmem:[%s20112_s1 + $0xe10] sm:$0xf0]  ;;  %v9924_v59 = vor.u32 %v12893_v38, %v9921_v39 }
 0x188   :  { %6867 = vmatpush.bf16.msrb.mxu3 %v10212_v25  ;;  %v12957_v45 = vld [vmem:[%s20112_s1 + $0xf04] sm:$0xf]  ;;  %v10177_v50 = vld [vmem:[%s20112_s1 + $0xf10] sm:$0xf0]  ;;  %v10052_v61 = vor.u32 %v12925_v40, %v10049_v42 }
 0x189   :  { %v13017_v52 = vld [vmem:[%s20112_s1 + $0x10e4] sm:$0xf]  ;;  %v10417_v44 = vld [vmem:[%s20112_s1 + $0x10f0] sm:$0xf0]  ;;  %6829 = vmatpush.bf16.msrb.mxu0 %v9812_v35  ;;  %v10180_v58 = vor.u32 %v12957_v45, %v10177_v50 }
 0x18a   :  { %v13049_v43 = vld [vmem:[%s20112_s1 + $0x11e4] sm:$0xf]  ;;  %v10545_v55 = vld [vmem:[%s20112_s1 + $0x11f0] sm:$0xf0]  ;;  %6842 = vmatpush.bf16.msrb.mxu1 %v9940_v32  ;;  %v10420_v3 = vor.u32 %v13017_v52, %v10417_v44 }
 0x18b   :  { %v13081_v56 = vld [vmem:[%s20112_s1 + $0x12e4] sm:$0xf]  ;;  %v10673_v57 = vld [vmem:[%s20112_s1 + $0x12f0] sm:$0xf0]  ;;  %6855 = vmatpush.bf16.msrb.mxu2 %v10068_v37  ;;  %v10548_v8 = vor.u32 %v13049_v43, %v10545_v55 }
 0x18c   :  { %v13113_v62 = vld [vmem:[%s20112_s1 + $0x13e4] sm:$0xf]  ;;  %v10801_v63 = vld [vmem:[%s20112_s1 + $0x13f0] sm:$0xf0]  ;;  %6868 = vmatpush.bf16.msrb.mxu3 %v10196_v41  ;;  %v10676_v19 = vor.u32 %v13081_v56, %v10673_v57 }
 0x18d   :  { %v13013_v20 = vld [vmem:[%s20112_s1 + $0x10c4] sm:$0xf]  ;;  %v10401_v21 = vld [vmem:[%s20112_s1 + $0x10d0] sm:$0xf0]  ;;  %6830 = vmatpush.bf16.msrb.mxu0 %v9796_v54  ;;  %v10804_v24 = vor.u32 %v13113_v62, %v10801_v63 }
 0x18e   :  { %v13045_v23 = vld [vmem:[%s20112_s1 + $0x11c4] sm:$0xf]  ;;  %v10529_v25 = vld [vmem:[%s20112_s1 + $0x11d0] sm:$0xf0]  ;;  %6843 = vmatpush.bf16.msrb.mxu1 %v9924_v59  ;;  %v10404_v33 = vor.u32 %v13013_v20, %v10401_v21  ;;  %v6624_v59 = vpop.f32.mrf.mxu0 }
 0x18f   :  { %v13077_v26 = vld [vmem:[%s20112_s1 + $0x12c4] sm:$0xf]  ;;  %v10657_v10 = vld [vmem:[%s20112_s1 + $0x12d0] sm:$0xf0]  ;;  %6856 = vmatpush.bf16.msrb.mxu2 %v10052_v61  ;;  %v10532_v35 = vor.u32 %v13045_v23, %v10529_v25  ;;  %v6625_v63 = vadd.f32 %v6624_v59, %v15989_v11 }
 0x190   :  { %v13109_v30 = vld [vmem:[%s20112_s1 + $0x13c4] sm:$0xf]  ;;  %v10785_v31 = vld [vmem:[%s20112_s1 + $0x13d0] sm:$0xf0]  ;;  %6869 = vmatpush.bf16.msrb.mxu3 %v10180_v58  ;;  %v10660_v36 = vor.u32 %v13077_v26, %v10657_v10  ;;  %6831 = vmatmul.bf16.vlgmr.msrb.gmra.mxu0 %v14441_v46 }
 0x191   :  { %6875 = vmatpush.bf16.msra.mxu0 %v10420_v3  ;;  %v13009_v22 = vld [vmem:[%s20112_s1 + $0x10a4] sm:$0xf]  ;;  %v10385_v32 = vld [vmem:[%s20112_s1 + $0x10b0] sm:$0xf0]  ;;  %v10788_v38 = vor.u32 %v13109_v30, %v10785_v31  ;;  %6844 = vmatmul.bf16.vlgmr.msrb.gmra.mxu1 %v14445_v48  ;;  %v6637_v3 = vpop.f32.mrf.mxu1 }
 0x192   :  { %6888 = vmatpush.bf16.msra.mxu1 %v10548_v8  ;;  %v13041_v37 = vld [vmem:[%s20112_s1 + $0x11a4] sm:$0xf]  ;;  %v10513_v39 = vld [vmem:[%s20112_s1 + $0x11b0] sm:$0xf0]  ;;  %6857 = vmatmul.bf16.vlgmr.msrb.gmra.mxu2 %v14443_v47  ;;  %v10388_v50 = vor.u32 %v13009_v22, %v10385_v32 }
 0x193   :  { %6901 = vmatpush.bf16.msra.mxu2 %v10676_v19  ;;  %v13073_v40 = vld [vmem:[%s20112_s1 + $0x12a4] sm:$0xf]  ;;  %v10641_v41 = vld [vmem:[%s20112_s1 + $0x12b0] sm:$0xf0]  ;;  %6870 = vmatmul.bf16.vlgmr.msrb.gmra.mxu3 %v14447_v49  ;;  %v10516_v51 = vor.u32 %v13041_v37, %v10513_v39 }
 0x194   :  { %6914 = vmatpush.bf16.msra.mxu3 %v10804_v24  ;;  %v13105_v42 = vld [vmem:[%s20112_s1 + $0x13a4] sm:$0xf]  ;;  %v10769_v45 = vld [vmem:[%s20112_s1 + $0x13b0] sm:$0xf0]  ;;  %v10644_v52 = vor.u32 %v13073_v40, %v10641_v41  ;;  %v6638_v24 = vadd.f32 %v6637_v3, %v6625_v63 }
 0x195   :  { %6876 = vmatpush.bf16.msra.mxu0 %v10404_v33  ;;  %v13005_v44 = vld [vmem:[%s20112_s1 + $0x1084] sm:$0xf]  ;;  %v10369_v43 = vld [vmem:[%s20112_s1 + $0x1090] sm:$0xf0]  ;;  %v10772_v54 = vor.u32 %v13105_v42, %v10769_v45  ;;  %v6650_v39 = vpop.f32.mrf.mxu2 }
 0x196   :  { %6889 = vmatpush.bf16.msra.mxu1 %v10532_v35  ;;  %v13037_v53 = vld [vmem:[%s20112_s1 + $0x1184] sm:$0xf]  ;;  %v10497_v55 = vld [vmem:[%s20112_s1 + $0x1190] sm:$0xf0]  ;;  %v10372_v58 = vor.u32 %v13005_v44, %v10369_v43  ;;  %v6651_v45 = vadd.f32 %v6650_v39, %v6638_v24  ;;  %v6626_v44 = vpop.f32.mrf.mxu0 }
 0x197   :  { %6902 = vmatpush.bf16.msra.mxu2 %v10660_v36  ;;  %v13069_v56 = vld [vmem:[%s20112_s1 + $0x1284] sm:$0xf]  ;;  %v10625_v57 = vld [vmem:[%s20112_s1 + $0x1290] sm:$0xf0]  ;;  %v10500_v8 = vor.u32 %v13037_v53, %v10497_v55 }
 0x198   :  { %6915 = vmatpush.bf16.msra.mxu3 %v10788_v38  ;;  %v13101_v61 = vld [vmem:[%s20112_s1 + $0x1384] sm:$0xf]  ;;  %v10753_v62 = vld [vmem:[%s20112_s1 + $0x1390] sm:$0xf0]  ;;  %v10628_v19 = vor.u32 %v13069_v56, %v10625_v57 }
 0x199   :  { %6877 = vmatpush.bf16.msra.mxu0 %v10388_v50  ;;  %v13001_v20 = vld [vmem:[%s20112_s1 + $0x1064] sm:$0xf]  ;;  %v10353_v21 = vld [vmem:[%s20112_s1 + $0x1070] sm:$0xf0]  ;;  %v10756_v11 = vor.u32 %v13101_v61, %v10753_v62  ;;  %v6663_v50 = vpop.f32.mrf.mxu3  ;;  %v6639_v53 = vpop.f32.mrf.mxu1 }
 0x19a   :  { %6890 = vmatpush.bf16.msra.mxu1 %v10516_v51  ;;  %v13033_v23 = vld [vmem:[%s20112_s1 + $0x1164] sm:$0xf]  ;;  %v10481_v25 = vld [vmem:[%s20112_s1 + $0x1170] sm:$0xf0]  ;;  %v10356_v33 = vor.u32 %v13001_v20, %v10353_v21 }
 0x19b   :  { %6903 = vmatpush.bf16.msra.mxu2 %v10644_v52  ;;  %v13065_v26 = vld [vmem:[%s20112_s1 + $0x1264] sm:$0xf]  ;;  %v10609_v10 = vld [vmem:[%s20112_s1 + $0x1270] sm:$0xf0]  ;;  %v10484_v35 = vor.u32 %v13033_v23, %v10481_v25 }
 0x19c   :  { %6916 = vmatpush.bf16.msra.mxu3 %v10772_v54  ;;  %v13097_v30 = vld [vmem:[%s20112_s1 + $0x1364] sm:$0xf]  ;;  %v10737_v31 = vld [vmem:[%s20112_s1 + $0x1370] sm:$0xf0]  ;;  %v10612_v36 = vor.u32 %v13065_v26, %v10609_v10  ;;  %v16188_v54 = vadd.f32 %v6663_v50, %v6651_v45 }
 0x19d   :  { %6878 = vmatpush.bf16.msra.mxu0 %v10372_v58  ;;  %v12997_v22 = vld [vmem:[%s20112_s1 + $0x1044] sm:$0xf]  ;;  %v10337_v32 = vld [vmem:[%s20112_s1 + $0x1050] sm:$0xf0]  ;;  %v10740_v38 = vor.u32 %v13097_v30, %v10737_v31 }
 0x19e   :  { %6891 = vmatpush.bf16.msra.mxu1 %v10500_v8  ;;  %v13029_v37 = vld [vmem:[%s20112_s1 + $0x1144] sm:$0xf]  ;;  %v10465_v40 = vld [vmem:[%s20112_s1 + $0x1150] sm:$0xf0]  ;;  %v10340_v43 = vor.u32 %v12997_v22, %v10337_v32 }
 0x19f   :  { %6904 = vmatpush.bf16.msra.mxu2 %v10628_v19  ;;  %v13061_v41 = vld [vmem:[%s20112_s1 + $0x1244] sm:$0xf]  ;;  %v10593_v42 = vld [vmem:[%s20112_s1 + $0x1250] sm:$0xf0]  ;;  %v10468_v55 = vor.u32 %v13029_v37, %v10465_v40 }
 0x1a0   :  { %6917 = vmatpush.bf16.msra.mxu3 %v10756_v11  ;;  %v13093_v51 = vld [vmem:[%s20112_s1 + $0x1344] sm:$0xf]  ;;  %v10721_v52 = vld [vmem:[%s20112_s1 + $0x1350] sm:$0xf0]  ;;  %v10596_v56 = vor.u32 %v13061_v41, %v10593_v42 }
 0x1a1   :  { %6879 = vmatpush.bf16.msra.mxu0 %v10356_v33  ;;  %v12993_v57 = vld [vmem:[%s20112_s1 + $0x1024] sm:$0xf]  ;;  %v10321_v59 = vld [vmem:[%s20112_s1 + $0x1030] sm:$0xf0]  ;;  %v10724_v62 = vor.u32 %v13093_v51, %v10721_v52 }
 0x1a2   :  { %6892 = vmatpush.bf16.msra.mxu1 %v10484_v35  ;;  %v13025_v61 = vld [vmem:[%s20112_s1 + $0x1124] sm:$0xf]  ;;  %v10449_v63 = vld [vmem:[%s20112_s1 + $0x1130] sm:$0xf0]  ;;  %v10324_v20 = vor.u32 %v12993_v57, %v10321_v59 }
 0x1a3   :  { %6905 = vmatpush.bf16.msra.mxu2 %v10612_v36  ;;  %v13057_v58 = vld [vmem:[%s20112_s1 + $0x1224] sm:$0xf]  ;;  %v10577_v3 = vld [vmem:[%s20112_s1 + $0x1230] sm:$0xf0]  ;;  %v10452_v11 = vor.u32 %v13025_v61, %v10449_v63  ;;  %v6652_v36 = vpop.f32.mrf.mxu2 }
 0x1a4   :  { %6918 = vmatpush.bf16.msra.mxu3 %v10740_v38  ;;  %v13089_v8 = vld [vmem:[%s20112_s1 + $0x1324] sm:$0xf]  ;;  %v10705_v19 = vld [vmem:[%s20112_s1 + $0x1330] sm:$0xf0]  ;;  %v10580_v24 = vor.u32 %v13057_v58, %v10577_v3  ;;  %v6665_v38 = vpop.f32.mrf.mxu3 }
 0x1a5   :  { %6880 = vmatpush.bf16.msra.mxu0 %v10340_v43  ;;  %v12989_v21 = vld [vmem:[%s20112_s1 + $0x1004] sm:$0xf]  ;;  %v10305_v23 = vld [vmem:[%s20112_s1 + $0x1010] sm:$0xf0]  ;;  %v10708_v30 = vor.u32 %v13089_v8, %v10705_v19 }
 0x1a6   :  { %6893 = vmatpush.bf16.msra.mxu1 %v10468_v55  ;;  %v13021_v25 = vld [vmem:[%s20112_s1 + $0x1104] sm:$0xf]  ;;  %v10433_v26 = vld [vmem:[%s20112_s1 + $0x1110] sm:$0xf0]  ;;  %v10308_v39 = vor.u32 %v12989_v21, %v10305_v23 }
 0x1a7   :  { %6906 = vmatpush.bf16.msra.mxu2 %v10596_v56  ;;  %v13053_v10 = vld [vmem:[%s20112_s1 + $0x1204] sm:$0xf]  ;;  %v10561_v31 = vld [vmem:[%s20112_s1 + $0x1210] sm:$0xf0]  ;;  %v10436_v45 = vor.u32 %v13021_v25, %v10433_v26 }
 0x1a8   :  { %6919 = vmatpush.bf16.msra.mxu3 %v10724_v62  ;;  %v13085_v33 = vld [vmem:[%s20112_s1 + $0x1304] sm:$0xf]  ;;  %v10689_v35 = vld [vmem:[%s20112_s1 + $0x1310] sm:$0xf0]  ;;  %v10564_v50 = vor.u32 %v13053_v10, %v10561_v31 }
 0x1a9   :  { %v13145_v22 = vld [vmem:[%s20112_s1 + $0x14e4] sm:$0xf]  ;;  %v10929_v32 = vld [vmem:[%s20112_s1 + $0x14f0] sm:$0xf0]  ;;  %6881 = vmatpush.bf16.msra.mxu0 %v10324_v20  ;;  %v10692_v44 = vor.u32 %v13085_v33, %v10689_v35 }
 0x1aa   :  { %v13177_v37 = vld [vmem:[%s20112_s1 + $0x15e4] sm:$0xf]  ;;  %v11057_v40 = vld [vmem:[%s20112_s1 + $0x15f0] sm:$0xf0]  ;;  %6894 = vmatpush.bf16.msra.mxu1 %v10452_v11  ;;  %v10932_v43 = vor.u32 %v13145_v22, %v10929_v32 }
 0x1ab   :  { %v13209_v41 = vld [vmem:[%s20112_s1 + $0x16e4] sm:$0xf]  ;;  %v11185_v42 = vld [vmem:[%s20112_s1 + $0x16f0] sm:$0xf0]  ;;  %6907 = vmatpush.bf16.msra.mxu2 %v10580_v24  ;;  %v11060_v53 = vor.u32 %v13177_v37, %v11057_v40 }
 0x1ac   :  { %v13241_v51 = vld [vmem:[%s20112_s1 + $0x17e4] sm:$0xf]  ;;  %v11313_v52 = vld [vmem:[%s20112_s1 + $0x17f0] sm:$0xf0]  ;;  %6920 = vmatpush.bf16.msra.mxu3 %v10708_v30  ;;  %v11188_v55 = vor.u32 %v13209_v41, %v11185_v42 }
 0x1ad   :  { %v13141_v56 = vld [vmem:[%s20112_s1 + $0x14c4] sm:$0xf]  ;;  %v10913_v57 = vld [vmem:[%s20112_s1 + $0x14d0] sm:$0xf0]  ;;  %6882 = vmatpush.bf16.msra.mxu0 %v10308_v39  ;;  %v11316_v61 = vor.u32 %v13241_v51, %v11313_v52  ;;  %v13535_v39 = vld [vmem:[%s20113_s2] sm:$0xf] }
 0x1ae   :  { %v13173_v59 = vld [vmem:[%s20112_s1 + $0x15c4] sm:$0xf]  ;;  %v11041_v62 = vld [vmem:[%s20112_s1 + $0x15d0] sm:$0xf0]  ;;  %6895 = vmatpush.bf16.msra.mxu1 %v10436_v45  ;;  %v10916_v19 = vor.u32 %v13141_v56, %v10913_v57  ;;  %v1052_v40 = vperm.slane %v13535_v39, 1 }
 0x1af   :  { %v13205_v63 = vld [vmem:[%s20112_s1 + $0x16c4] sm:$0xf]  ;;  %v11169_v58 = vld [vmem:[%s20112_s1 + $0x16d0] sm:$0xf0]  ;;  %6908 = vmatpush.bf16.msra.mxu2 %v10564_v50  ;;  %v11044_v20 = vor.u32 %v13173_v59, %v11041_v62  ;;  %v6689_v62 = vpop.f32.mrf.mxu1 }
 0x1b0   :  { %v13237_v3 = vld [vmem:[%s20112_s1 + $0x17c4] sm:$0xf]  ;;  %v11297_v8 = vld [vmem:[%s20112_s1 + $0x17d0] sm:$0xf0]  ;;  %6921 = vmatpush.bf16.msra.mxu3 %v10692_v44  ;;  %v11172_v21 = vor.u32 %v13205_v63, %v11169_v58  ;;  %6883 = vmatmul.bf16.vlgmr.msra.gmra.mxu0 %v14678_v9 }
 0x1b1   :  { %6927 = vmatpush.bf16.msrb.mxu0 %v10932_v43  ;;  %v13137_v23 = vld [vmem:[%s20112_s1 + $0x14a4] sm:$0xf]  ;;  %v10897_v11 = vld [vmem:[%s20112_s1 + $0x14b0] sm:$0xf0]  ;;  %v11300_v25 = vor.u32 %v13237_v3, %v11297_v8  ;;  %6896 = vmatmul.bf16.vlgmr.msra.gmra.mxu1 %v14688_v14  ;;  %v6676_v43 = vpop.f32.mrf.mxu0 }
 0x1b2   :  { %6940 = vmatpush.bf16.msrb.mxu1 %v11060_v53  ;;  %v13169_v24 = vld [vmem:[%s20112_s1 + $0x15a4] sm:$0xf]  ;;  %v11025_v26 = vld [vmem:[%s20112_s1 + $0x15b0] sm:$0xf0]  ;;  %6909 = vmatmul.bf16.vlgmr.msra.gmra.mxu2 %v14686_v13  ;;  %v10900_v35 = vor.u32 %v13137_v23, %v10897_v11 }
 0x1b3   :  { %6953 = vmatpush.bf16.msrb.mxu2 %v11188_v55  ;;  %v13201_v10 = vld [vmem:[%s20112_s1 + $0x16a4] sm:$0xf]  ;;  %v11153_v30 = vld [vmem:[%s20112_s1 + $0x16b0] sm:$0xf0]  ;;  %6922 = vmatmul.bf16.vlgmr.msra.gmra.mxu3 %v14690_v18  ;;  %v11028_v22 = vor.u32 %v13169_v24, %v11025_v26 }
 0x1b4   :  { %6966 = vmatpush.bf16.msrb.mxu3 %v11316_v61  ;;  %v13233_v31 = vld [vmem:[%s20112_s1 + $0x17a4] sm:$0xf]  ;;  %v11281_v33 = vld [vmem:[%s20112_s1 + $0x17b0] sm:$0xf0]  ;;  %v11156_v32 = vor.u32 %v13201_v10, %v11153_v30  ;;  %v6677_v61 = vadd.f32 %v6676_v43, %v1052_v40 }
 0x1b5   :  { %6928 = vmatpush.bf16.msrb.mxu0 %v10916_v19  ;;  %v13133_v36 = vld [vmem:[%s20112_s1 + $0x1484] sm:$0xf]  ;;  %v10881_v37 = vld [vmem:[%s20112_s1 + $0x1490] sm:$0xf0]  ;;  %v11284_v41 = vor.u32 %v13233_v31, %v11281_v33  ;;  %v6702_v30 = vpop.f32.mrf.mxu2 }
 0x1b6   :  { %6941 = vmatpush.bf16.msrb.mxu1 %v11044_v20  ;;  %v13165_v38 = vld [vmem:[%s20112_s1 + $0x1584] sm:$0xf]  ;;  %v11009_v42 = vld [vmem:[%s20112_s1 + $0x1590] sm:$0xf0]  ;;  %v10884_v44 = vor.u32 %v13133_v36, %v10881_v37 }
 0x1b7   :  { %6954 = vmatpush.bf16.msrb.mxu2 %v11172_v21  ;;  %v13197_v45 = vld [vmem:[%s20112_s1 + $0x1684] sm:$0xf]  ;;  %v11137_v50 = vld [vmem:[%s20112_s1 + $0x1690] sm:$0xf0]  ;;  %v11012_v53 = vor.u32 %v13165_v38, %v11009_v42  ;;  %v6690_v21 = vadd.f32 %v6689_v62, %v6677_v61 }
 0x1b8   :  { %6967 = vmatpush.bf16.msrb.mxu3 %v11300_v25  ;;  %v13229_v51 = vld [vmem:[%s20112_s1 + $0x1784] sm:$0xf]  ;;  %v11265_v52 = vld [vmem:[%s20112_s1 + $0x1790] sm:$0xf0]  ;;  %v11140_v55 = vor.u32 %v13197_v45, %v11137_v50 }
 0x1b9   :  { %6929 = vmatpush.bf16.msrb.mxu0 %v10900_v35  ;;  %v13129_v56 = vld [vmem:[%s20112_s1 + $0x1464] sm:$0xf]  ;;  %v10865_v57 = vld [vmem:[%s20112_s1 + $0x1470] sm:$0xf0]  ;;  %v11268_v63 = vor.u32 %v13229_v51, %v11265_v52 }
 0x1ba   :  { %6942 = vmatpush.bf16.msrb.mxu1 %v11028_v22  ;;  %v13161_v59 = vld [vmem:[%s20112_s1 + $0x1564] sm:$0xf]  ;;  %v10993_v58 = vld [vmem:[%s20112_s1 + $0x1570] sm:$0xf0]  ;;  %v10868_v23 = vor.u32 %v13129_v56, %v10865_v57  ;;  %v6703_v22 = vadd.f32 %v6702_v30, %v6690_v21 }
 0x1bb   :  { %6955 = vmatpush.bf16.msrb.mxu2 %v11156_v32  ;;  %v13193_v3 = vld [vmem:[%s20112_s1 + $0x1664] sm:$0xf]  ;;  %v11121_v8 = vld [vmem:[%s20112_s1 + $0x1670] sm:$0xf0]  ;;  %v10996_v11 = vor.u32 %v13161_v59, %v10993_v58  ;;  %v6715_v32 = vpop.f32.mrf.mxu3 }
 0x1bc   :  { %6968 = vmatpush.bf16.msrb.mxu3 %v11284_v41  ;;  %v13225_v19 = vld [vmem:[%s20112_s1 + $0x1764] sm:$0xf]  ;;  %v11249_v20 = vld [vmem:[%s20112_s1 + $0x1770] sm:$0xf0]  ;;  %v11124_v24 = vor.u32 %v13193_v3, %v11121_v8  ;;  %v16389_v40 = vadd.f32 %v6715_v32, %v6703_v22  ;;  %v6678_v41 = vpop.f32.mrf.mxu0 }
 0x1bd   :  { %6930 = vmatpush.bf16.msrb.mxu0 %v10884_v44  ;;  %v13125_v25 = vld [vmem:[%s20112_s1 + $0x1444] sm:$0xf]  ;;  %v10849_v26 = vld [vmem:[%s20112_s1 + $0x1450] sm:$0xf0]  ;;  %v11252_v31 = vor.u32 %v13225_v19, %v11249_v20  ;;  %v6691_v44 = vpop.f32.mrf.mxu1  ;;  %v6704_v21 = vpop.f32.mrf.mxu2 }
 0x1be   :  { %6943 = vmatpush.bf16.msrb.mxu1 %v11012_v53  ;;  %v13157_v10 = vld [vmem:[%s20112_s1 + $0x1544] sm:$0xf]  ;;  %v10977_v33 = vld [vmem:[%s20112_s1 + $0x1550] sm:$0xf0]  ;;  %v10852_v39 = vor.u32 %v13125_v25, %v10849_v26 }
 0x1bf   :  { %6956 = vmatpush.bf16.msrb.mxu2 %v11140_v55  ;;  %v13189_v35 = vld [vmem:[%s20112_s1 + $0x1644] sm:$0xf]  ;;  %v11105_v36 = vld [vmem:[%s20112_s1 + $0x1650] sm:$0xf0]  ;;  %v10980_v42 = vor.u32 %v13157_v10, %v10977_v33 }
 0x1c0   :  { %6969 = vmatpush.bf16.msrb.mxu3 %v11268_v63  ;;  %v13221_v37 = vld [vmem:[%s20112_s1 + $0x1744] sm:$0xf]  ;;  %v11233_v38 = vld [vmem:[%s20112_s1 + $0x1750] sm:$0xf0]  ;;  %v11108_v45 = vor.u32 %v13189_v35, %v11105_v36 }
 0x1c1   :  { %6931 = vmatpush.bf16.msrb.mxu0 %v10868_v23  ;;  %v13121_v50 = vld [vmem:[%s20112_s1 + $0x1424] sm:$0xf]  ;;  %v10833_v51 = vld [vmem:[%s20112_s1 + $0x1430] sm:$0xf0]  ;;  %v11236_v43 = vor.u32 %v13221_v37, %v11233_v38 }
 0x1c2   :  { %6944 = vmatpush.bf16.msrb.mxu1 %v10996_v11  ;;  %v13153_v52 = vld [vmem:[%s20112_s1 + $0x1524] sm:$0xf]  ;;  %v10961_v53 = vld [vmem:[%s20112_s1 + $0x1530] sm:$0xf0]  ;;  %v10836_v61 = vor.u32 %v13121_v50, %v10833_v51 }
 0x1c3   :  { %6957 = vmatpush.bf16.msrb.mxu2 %v11124_v24  ;;  %v13185_v55 = vld [vmem:[%s20112_s1 + $0x1624] sm:$0xf]  ;;  %v11089_v56 = vld [vmem:[%s20112_s1 + $0x1630] sm:$0xf0]  ;;  %v10964_v58 = vor.u32 %v13153_v52, %v10961_v53  ;;  %v6717_v26 = vpop.f32.mrf.mxu3 }
 0x1c4   :  { %6970 = vmatpush.bf16.msrb.mxu3 %v11252_v31  ;;  %v13217_v57 = vld [vmem:[%s20112_s1 + $0x1724] sm:$0xf]  ;;  %v11217_v59 = vld [vmem:[%s20112_s1 + $0x1730] sm:$0xf0]  ;;  %v11092_v3 = vor.u32 %v13185_v55, %v11089_v56 }
 0x1c5   :  { %6932 = vmatpush.bf16.msrb.mxu0 %v10852_v39  ;;  %v13117_v62 = vld [vmem:[%s20112_s1 + $0x1404] sm:$0xf]  ;;  %v10817_v63 = vld [vmem:[%s20112_s1 + $0x1410] sm:$0xf0]  ;;  %v11220_v23 = vor.u32 %v13217_v57, %v11217_v59 }
 0x1c6   :  { %6945 = vmatpush.bf16.msrb.mxu1 %v10980_v42  ;;  %v13149_v8 = vld [vmem:[%s20112_s1 + $0x1504] sm:$0xf]  ;;  %v10945_v19 = vld [vmem:[%s20112_s1 + $0x1510] sm:$0xf0]  ;;  %v10820_v33 = vor.u32 %v13117_v62, %v10817_v63 }
 0x1c7   :  { %6958 = vmatpush.bf16.msrb.mxu2 %v11108_v45  ;;  %v13181_v20 = vld [vmem:[%s20112_s1 + $0x1604] sm:$0xf]  ;;  %v11073_v11 = vld [vmem:[%s20112_s1 + $0x1610] sm:$0xf0]  ;;  %v10948_v32 = vor.u32 %v13149_v8, %v10945_v19 }
 0x1c8   :  { %6971 = vmatpush.bf16.msrb.mxu3 %v11236_v43  ;;  %v13213_v24 = vld [vmem:[%s20112_s1 + $0x1704] sm:$0xf]  ;;  %v11201_v25 = vld [vmem:[%s20112_s1 + $0x1710] sm:$0xf0]  ;;  %v11076_v37 = vor.u32 %v13181_v20, %v11073_v11 }
 0x1c9   :  { %v13273_v10 = vld [vmem:[%s20112_s1 + $0x18e4] sm:$0xf]  ;;  %v11441_v30 = vld [vmem:[%s20112_s1 + $0x18f0] sm:$0xf0]  ;;  %6933 = vmatpush.bf16.msrb.mxu0 %v10836_v61  ;;  %v11204_v41 = vor.u32 %v13213_v24, %v11201_v25 }
 0x1ca   :  { %v13305_v31 = vld [vmem:[%s20112_s1 + $0x19e4] sm:$0xf]  ;;  %v11569_v35 = vld [vmem:[%s20112_s1 + $0x19f0] sm:$0xf0]  ;;  %6946 = vmatpush.bf16.msrb.mxu1 %v10964_v58  ;;  %v11444_v42 = vor.u32 %v13273_v10, %v11441_v30 }
 0x1cb   :  { %v13337_v36 = vld [vmem:[%s20112_s1 + $0x1ae4] sm:$0xf]  ;;  %v11697_v22 = vld [vmem:[%s20112_s1 + $0x1af0] sm:$0xf0]  ;;  %6959 = vmatpush.bf16.msrb.mxu2 %v11092_v3  ;;  %v11572_v45 = vor.u32 %v13305_v31, %v11569_v35 }
 0x1cc   :  { %v13369_v38 = vld [vmem:[%s20112_s1 + $0x1be4] sm:$0xf]  ;;  %v11825_v39 = vld [vmem:[%s20112_s1 + $0x1bf0] sm:$0xf0]  ;;  %6972 = vmatpush.bf16.msrb.mxu3 %v11220_v23  ;;  %v11700_v50 = vor.u32 %v13337_v36, %v11697_v22 }
 0x1cd   :  { %v13269_v51 = vld [vmem:[%s20112_s1 + $0x18c4] sm:$0xf]  ;;  %v11425_v52 = vld [vmem:[%s20112_s1 + $0x18d0] sm:$0xf0]  ;;  %6934 = vmatpush.bf16.msrb.mxu0 %v10820_v33  ;;  %v11828_v43 = vor.u32 %v13369_v38, %v11825_v39 }
 0x1ce   :  { %v13301_v44 = vld [vmem:[%s20112_s1 + $0x19c4] sm:$0xf]  ;;  %v11553_v53 = vld [vmem:[%s20112_s1 + $0x19d0] sm:$0xf0]  ;;  %6947 = vmatpush.bf16.msrb.mxu1 %v10948_v32  ;;  %v11428_v61 = vor.u32 %v13269_v51, %v11425_v52 }
 0x1cf   :  { %v13333_v55 = vld [vmem:[%s20112_s1 + $0x1ac4] sm:$0xf]  ;;  %v11681_v56 = vld [vmem:[%s20112_s1 + $0x1ad0] sm:$0xf0]  ;;  %6960 = vmatpush.bf16.msrb.mxu2 %v11076_v37  ;;  %v11556_v62 = vor.u32 %v13301_v44, %v11553_v53 }
 0x1d0   :  { %v13365_v57 = vld [vmem:[%s20112_s1 + $0x1bc4] sm:$0xf]  ;;  %v11809_v59 = vld [vmem:[%s20112_s1 + $0x1bd0] sm:$0xf0]  ;;  %6973 = vmatpush.bf16.msrb.mxu3 %v11204_v41  ;;  %v11684_v63 = vor.u32 %v13333_v55, %v11681_v56  ;;  %6935 = vmatmul.bf16.vlgmr.msrb.gmra.mxu0 %v14855_v4  ;;  %v6728_v41 = vpop.f32.mrf.mxu0 }
 0x1d1   :  { %6979 = vmatpush.bf16.msra.mxu0 %v11444_v42  ;;  %v13265_v58 = vld [vmem:[%s20112_s1 + $0x18a4] sm:$0xf]  ;;  %v11409_v3 = vld [vmem:[%s20112_s1 + $0x18b0] sm:$0xf0]  ;;  %v11812_v19 = vor.u32 %v13365_v57, %v11809_v59  ;;  %6948 = vmatmul.bf16.vlgmr.msrb.gmra.mxu1 %v14859_v6  ;;  %v6729_v44 = vadd.f32 %v6728_v41, %v16389_v40 }
 0x1d2   :  { %6992 = vmatpush.bf16.msra.mxu1 %v11572_v45  ;;  %v13297_v8 = vld [vmem:[%s20112_s1 + $0x19a4] sm:$0xf]  ;;  %v11537_v20 = vld [vmem:[%s20112_s1 + $0x19b0] sm:$0xf0]  ;;  %6961 = vmatmul.bf16.vlgmr.msrb.gmra.mxu2 %v14857_v5  ;;  %v11412_v25 = vor.u32 %v13265_v58, %v11409_v3 }
 0x1d3   :  { %7005 = vmatpush.bf16.msra.mxu2 %v11700_v50  ;;  %v13329_v21 = vld [vmem:[%s20112_s1 + $0x1aa4] sm:$0xf]  ;;  %v11665_v23 = vld [vmem:[%s20112_s1 + $0x1ab0] sm:$0xf0]  ;;  %6974 = vmatmul.bf16.vlgmr.msrb.gmra.mxu3 %v14861_v7  ;;  %v11540_v26 = vor.u32 %v13297_v8, %v11537_v20 }
 0x1d4   :  { %7018 = vmatpush.bf16.msra.mxu3 %v11828_v43  ;;  %v13361_v11 = vld [vmem:[%s20112_s1 + $0x1ba4] sm:$0xf]  ;;  %v11793_v24 = vld [vmem:[%s20112_s1 + $0x1bb0] sm:$0xf0]  ;;  %v11668_v10 = vor.u32 %v13329_v21, %v11665_v23  ;;  %v6741_v43 = vpop.f32.mrf.mxu1 }
 0x1d5   :  { %6980 = vmatpush.bf16.msra.mxu0 %v11428_v61  ;;  %v13261_v30 = vld [vmem:[%s20112_s1 + $0x1884] sm:$0xf]  ;;  %v11393_v31 = vld [vmem:[%s20112_s1 + $0x1890] sm:$0xf0]  ;;  %v11796_v35 = vor.u32 %v13361_v11, %v11793_v24  ;;  %v6742_v61 = vadd.f32 %v6741_v43, %v6729_v44  ;;  %v6754_v20 = vpop.f32.mrf.mxu2 }
 0x1d6   :  { %6993 = vmatpush.bf16.msra.mxu1 %v11556_v62  ;;  %v13293_v33 = vld [vmem:[%s20112_s1 + $0x1984] sm:$0xf]  ;;  %v11521_v36 = vld [vmem:[%s20112_s1 + $0x1990] sm:$0xf0]  ;;  %v11396_v39 = vor.u32 %v13261_v30, %v11393_v31 }
 0x1d7   :  { %7006 = vmatpush.bf16.msra.mxu2 %v11684_v63  ;;  %v13325_v22 = vld [vmem:[%s20112_s1 + $0x1a84] sm:$0xf]  ;;  %v11649_v32 = vld [vmem:[%s20112_s1 + $0x1a90] sm:$0xf0]  ;;  %v11524_v42 = vor.u32 %v13293_v33, %v11521_v36 }
 0x1d8   :  { %7019 = vmatpush.bf16.msra.mxu3 %v11812_v19  ;;  %v13357_v37 = vld [vmem:[%s20112_s1 + $0x1b84] sm:$0xf]  ;;  %v11777_v38 = vld [vmem:[%s20112_s1 + $0x1b90] sm:$0xf0]  ;;  %v11652_v45 = vor.u32 %v13325_v22, %v11649_v32 }
 0x1d9   :  { %6981 = vmatpush.bf16.msra.mxu0 %v11412_v25  ;;  %v13257_v50 = vld [vmem:[%s20112_s1 + $0x1864] sm:$0xf]  ;;  %v11377_v51 = vld [vmem:[%s20112_s1 + $0x1870] sm:$0xf0]  ;;  %v11780_v53 = vor.u32 %v13357_v37, %v11777_v38  ;;  %v6755_v25 = vadd.f32 %v6754_v20, %v6742_v61 }
 0x1da   :  { %6994 = vmatpush.bf16.msra.mxu1 %v11540_v26  ;;  %v13289_v52 = vld [vmem:[%s20112_s1 + $0x1964] sm:$0xf]  ;;  %v11505_v55 = vld [vmem:[%s20112_s1 + $0x1970] sm:$0xf0]  ;;  %v11380_v62 = vor.u32 %v13257_v50, %v11377_v51  ;;  %v6767_v26 = vpop.f32.mrf.mxu3 }
 0x1db   :  { %7007 = vmatpush.bf16.msra.mxu2 %v11668_v10  ;;  %v13321_v56 = vld [vmem:[%s20112_s1 + $0x1a64] sm:$0xf]  ;;  %v11633_v57 = vld [vmem:[%s20112_s1 + $0x1a70] sm:$0xf0]  ;;  %v11508_v63 = vor.u32 %v13289_v52, %v11505_v55  ;;  %v16588_v33 = vadd.f32 %v6767_v26, %v6755_v25 }
 0x1dc   :  { %7020 = vmatpush.bf16.msra.mxu3 %v11796_v35  ;;  %v13353_v59 = vld [vmem:[%s20112_s1 + $0x1b64] sm:$0xf]  ;;  %v11761_v40 = vld [vmem:[%s20112_s1 + $0x1b70] sm:$0xf0]  ;;  %v11636_v58 = vor.u32 %v13321_v56, %v11633_v57  ;;  %v6730_v35 = vpop.f32.mrf.mxu0 }
 0x1dd   :  { %6982 = vmatpush.bf16.msra.mxu0 %v11396_v39  ;;  %v13253_v3 = vld [vmem:[%s20112_s1 + $0x1844] sm:$0xf]  ;;  %v11361_v8 = vld [vmem:[%s20112_s1 + $0x1850] sm:$0xf0]  ;;  %v11764_v21 = vor.u32 %v13353_v59, %v11761_v40  ;;  %v6743_v39 = vpop.f32.mrf.mxu1  ;;  %v6756_v61 = vpop.f32.mrf.mxu2 }
 0x1de   :  { %6995 = vmatpush.bf16.msra.mxu1 %v11524_v42  ;;  %v13285_v19 = vld [vmem:[%s20112_s1 + $0x1944] sm:$0xf]  ;;  %v11489_v23 = vld [vmem:[%s20112_s1 + $0x1950] sm:$0xf0]  ;;  %v11364_v31 = vor.u32 %v13253_v3, %v11361_v8 }
 0x1df   :  { %7008 = vmatpush.bf16.msra.mxu2 %v11652_v45  ;;  %v13317_v11 = vld [vmem:[%s20112_s1 + $0x1a44] sm:$0xf]  ;;  %v11617_v24 = vld [vmem:[%s20112_s1 + $0x1a50] sm:$0xf0]  ;;  %v11492_v36 = vor.u32 %v13285_v19, %v11489_v23 }
 0x1e0   :  { %7021 = vmatpush.bf16.msra.mxu3 %v11780_v53  ;;  %v13349_v10 = vld [vmem:[%s20112_s1 + $0x1b44] sm:$0xf]  ;;  %v11745_v30 = vld [vmem:[%s20112_s1 + $0x1b50] sm:$0xf0]  ;;  %v11620_v22 = vor.u32 %v13317_v11, %v11617_v24 }
 0x1e1   :  { %6983 = vmatpush.bf16.msra.mxu0 %v11380_v62  ;;  %v13249_v32 = vld [vmem:[%s20112_s1 + $0x1824] sm:$0xf]  ;;  %v11345_v37 = vld [vmem:[%s20112_s1 + $0x1830] sm:$0xf0]  ;;  %v11748_v41 = vor.u32 %v13349_v10, %v11745_v30 }
 0x1e2   :  { %6996 = vmatpush.bf16.msra.mxu1 %v11508_v63  ;;  %v13281_v38 = vld [vmem:[%s20112_s1 + $0x1924] sm:$0xf]  ;;  %v11473_v42 = vld [vmem:[%s20112_s1 + $0x1930] sm:$0xf0]  ;;  %v11348_v44 = vor.u32 %v13249_v32, %v11345_v37  ;;  %v6769_v8 = vpop.f32.mrf.mxu3 }
 0x1e3   :  { %7009 = vmatpush.bf16.msra.mxu2 %v11636_v58  ;;  %v13313_v45 = vld [vmem:[%s20112_s1 + $0x1a24] sm:$0xf]  ;;  %v11601_v50 = vld [vmem:[%s20112_s1 + $0x1a30] sm:$0xf0]  ;;  %v11476_v55 = vor.u32 %v13281_v38, %v11473_v42 }
 0x1e4   :  { %7022 = vmatpush.bf16.msra.mxu3 %v11764_v21  ;;  %v13345_v51 = vld [vmem:[%s20112_s1 + $0x1b24] sm:$0xf]  ;;  %v11729_v52 = vld [vmem:[%s20112_s1 + $0x1b30] sm:$0xf0]  ;;  %v11604_v56 = vor.u32 %v13313_v45, %v11601_v50 }
 0x1e5   :  { %6984 = vmatpush.bf16.msra.mxu0 %v11364_v31  ;;  %v13245_v43 = vld [vmem:[%s20112_s1 + $0x1804] sm:$0xf]  ;;  %v11329_v53 = vld [vmem:[%s20112_s1 + $0x1810] sm:$0xf0]  ;;  %v11732_v62 = vor.u32 %v13345_v51, %v11729_v52 }
 0x1e6   :  { %6997 = vmatpush.bf16.msra.mxu1 %v11492_v36  ;;  %v13277_v57 = vld [vmem:[%s20112_s1 + $0x1904] sm:$0xf]  ;;  %v11457_v59 = vld [vmem:[%s20112_s1 + $0x1910] sm:$0xf0]  ;;  %v11332_v23 = vor.u32 %v13245_v43, %v11329_v53 }
 0x1e7   :  { %7010 = vmatpush.bf16.msra.mxu2 %v11620_v22  ;;  %v13309_v40 = vld [vmem:[%s20112_s1 + $0x1a04] sm:$0xf]  ;;  %v11585_v63 = vld [vmem:[%s20112_s1 + $0x1a10] sm:$0xf0]  ;;  %v11460_v26 = vor.u32 %v13277_v57, %v11457_v59 }
 0x1e8   :  { %7023 = vmatpush.bf16.msra.mxu3 %v11748_v41  ;;  %v13341_v58 = vld [vmem:[%s20112_s1 + $0x1b04] sm:$0xf]  ;;  %v11713_v3 = vld [vmem:[%s20112_s1 + $0x1b10] sm:$0xf0]  ;;  %v11588_v10 = vor.u32 %v13309_v40, %v11585_v63 }
 0x1e9   :  { %v13401_v19 = vld [vmem:[%s20112_s1 + $0x1ce4] sm:$0xf]  ;;  %v11953_v20 = vld [vmem:[%s20112_s1 + $0x1cf0] sm:$0xf0]  ;;  %6985 = vmatpush.bf16.msra.mxu0 %v11348_v44  ;;  %v11716_v35 = vor.u32 %v13341_v58, %v11713_v3  ;;  %v13538_v3 = vld [vmem:[#allocation1 + $0x9] sm:$0xff] }
 0x1ea   :  { %v13433_v21 = vld [vmem:[%s20112_s1 + $0x1de4] sm:$0xf]  ;;  %v12081_v11 = vld [vmem:[%s20112_s1 + $0x1df0] sm:$0xf0]  ;;  %6998 = vmatpush.bf16.msra.mxu1 %v11476_v55  ;;  %v11956_v36 = vor.u32 %v13401_v19, %v11953_v20  ;;  %v13539_v20 = vld [vmem:[#allocation1 + $0x1b] sm:$0xff] }
 0x1eb   :  { %v13465_v24 = vld [vmem:[%s20112_s1 + $0x1ee4] sm:$0xf]  ;;  %v12209_v25 = vld [vmem:[%s20112_s1 + $0x1ef0] sm:$0xf0]  ;;  %7011 = vmatpush.bf16.msra.mxu2 %v11604_v56  ;;  %v12084_v22 = vor.u32 %v13433_v21, %v12081_v11 }
 0x1ec   :  { %v13497_v30 = vld [vmem:[%s20112_s1 + $0x1fe4] sm:$0xf]  ;;  %v12337_v31 = vld [vmem:[%s20112_s1 + $0x1ff0] sm:$0xf0]  ;;  %7024 = vmatpush.bf16.msra.mxu3 %v11732_v62  ;;  %v12212_v32 = vor.u32 %v13465_v24, %v12209_v25 }
 0x1ed   :  { %v13397_v37 = vld [vmem:[%s20112_s1 + $0x1cc4] sm:$0xf]  ;;  %v11937_v38 = vld [vmem:[%s20112_s1 + $0x1cd0] sm:$0xf0]  ;;  %6986 = vmatpush.bf16.msra.mxu0 %v11332_v23  ;;  %v12340_v41 = vor.u32 %v13497_v30, %v12337_v31 }
 0x1ee   :  { %v13429_v39 = vld [vmem:[%s20112_s1 + $0x1dc4] sm:$0xf]  ;;  %v12065_v42 = vld [vmem:[%s20112_s1 + $0x1dd0] sm:$0xf0]  ;;  %6999 = vmatpush.bf16.msra.mxu1 %v11460_v26  ;;  %v11940_v44 = vor.u32 %v13397_v37, %v11937_v38 }
 0x1ef   :  { %v13461_v45 = vld [vmem:[%s20112_s1 + $0x1ec4] sm:$0xf]  ;;  %v12193_v50 = vld [vmem:[%s20112_s1 + $0x1ed0] sm:$0xf0]  ;;  %7012 = vmatpush.bf16.msra.mxu2 %v11588_v10  ;;  %v12068_v43 = vor.u32 %v13429_v39, %v12065_v42  ;;  %v6793_v39 = vpop.f32.mrf.mxu1 }
 0x1f0   :  { %v13493_v51 = vld [vmem:[%s20112_s1 + $0x1fc4] sm:$0xf]  ;;  %v12321_v52 = vld [vmem:[%s20112_s1 + $0x1fd0] sm:$0xf0]  ;;  %7025 = vmatpush.bf16.msra.mxu3 %v11716_v35  ;;  %v12196_v53 = vor.u32 %v13461_v45, %v12193_v50 }
 0x1f1   :  { %7031 = vmatpush.bf16.msrb.mxu0 %v11956_v36  ;;  %v13393_v55 = vld [vmem:[%s20112_s1 + $0x1ca4] sm:$0xf]  ;;  %v11921_v56 = vld [vmem:[%s20112_s1 + $0x1cb0] sm:$0xf0]  ;;  %v12324_v40 = vor.u32 %v13493_v51, %v12321_v52  ;;  %7000 = vmatmul.bf16.vlgmr.msra.gmra.mxu1 %v13538_v3  ;;  %v6780_v36 = vpop.f32.mrf.mxu0 }
 0x1f2   :  { %7044 = vmatpush.bf16.msrb.mxu1 %v12084_v22  ;;  %v13425_v57 = vld [vmem:[%s20112_s1 + $0x1da4] sm:$0xf]  ;;  %v12049_v61 = vld [vmem:[%s20112_s1 + $0x1db0] sm:$0xf0]  ;;  %v11924_v21 = vor.u32 %v13393_v55, %v11921_v56  ;;  %v6781_v37 = vadd.f32 %v6780_v36, %v16588_v33 }
 0x1f3   :  { %7057 = vmatpush.bf16.msrb.mxu2 %v12212_v32  ;;  %v13536_v59 = vld [vmem:[#allocation1] sm:$0xff]  ;;  %v12177_v63 = vld [vmem:[%s20112_s1 + $0x1eb0] sm:$0xf0]  ;;  %7026 = vmatmul.bf16.vlgmr.msra.gmra.mxu3 %v13539_v20  ;;  %v12052_v23 = vor.u32 %v13425_v57, %v12049_v61 }
 0x1f4   :  { %7070 = vmatpush.bf16.msrb.mxu3 %v12340_v41  ;;  %6987 = vmatmul.bf16.vlgmr.msra.gmra.mxu0 %v13536_v59  ;;  %v13457_v62 = vld [vmem:[%s20112_s1 + $0x1ea4] sm:$0xf]  ;;  %v13537_v58 = vld [vmem:[#allocation1 + $0x12] sm:$0xff]  ;;  %v6794_v52 = vadd.f32 %v6793_v39, %v6781_v37 }
 0x1f5   :  { %7013 = vmatmul.bf16.vlgmr.msra.gmra.mxu2 %v13537_v58  ;;  %v13489_v8 = vld [vmem:[%s20112_s1 + $0x1fa4] sm:$0xf]  ;;  %v12305_v19 = vld [vmem:[%s20112_s1 + $0x1fb0] sm:$0xf0]  ;;  %7032 = vmatpush.bf16.msrb.mxu0 %v11940_v44  ;;  %v12180_v11 = vor.u32 %v13457_v62, %v12177_v63  ;;  %v6806_v3 = vpop.f32.mrf.mxu2 }
 0x1f6   :  { %7045 = vmatpush.bf16.msrb.mxu1 %v12068_v43  ;;  %v13389_v24 = vld [vmem:[%s20112_s1 + $0x1c84] sm:$0xf]  ;;  %v11905_v25 = vld [vmem:[%s20112_s1 + $0x1c90] sm:$0xf0]  ;;  %v12308_v10 = vor.u32 %v13489_v8, %v12305_v19 }
 0x1f7   :  { %7058 = vmatpush.bf16.msrb.mxu2 %v12196_v53  ;;  %v13421_v26 = vld [vmem:[%s20112_s1 + $0x1d84] sm:$0xf]  ;;  %v12033_v30 = vld [vmem:[%s20112_s1 + $0x1d90] sm:$0xf0]  ;;  %v11908_v38 = vor.u32 %v13389_v24, %v11905_v25 }
 0x1f8   :  { %7071 = vmatpush.bf16.msrb.mxu3 %v12324_v40  ;;  %v13453_v31 = vld [vmem:[%s20112_s1 + $0x1e84] sm:$0xf]  ;;  %v12161_v35 = vld [vmem:[%s20112_s1 + $0x1e90] sm:$0xf0]  ;;  %v12036_v41 = vor.u32 %v13421_v26, %v12033_v30 }
 0x1f9   :  { %v13485_v22 = vld [vmem:[%s20112_s1 + $0x1f84] sm:$0xf]  ;;  %v12289_v32 = vld [vmem:[%s20112_s1 + $0x1f90] sm:$0xf0]  ;;  %7033 = vmatpush.bf16.msrb.mxu0 %v11924_v21  ;;  %v12164_v42 = vor.u32 %v13453_v31, %v12161_v35  ;;  %v6807_v21 = vadd.f32 %v6806_v3, %v6794_v52  ;;  %v6782_v25 = vpop.f32.mrf.mxu0 }
 0x1fa   :  { %7046 = vmatpush.bf16.msrb.mxu1 %v12052_v23  ;;  %v13385_v45 = vld [vmem:[%s20112_s1 + $0x1c64] sm:$0xf]  ;;  %v11889_v50 = vld [vmem:[%s20112_s1 + $0x1c70] sm:$0xf0]  ;;  %v12292_v33 = vor.u32 %v13485_v22, %v12289_v32  ;;  %v6819_v23 = vpop.f32.mrf.mxu3  ;;  %v12604_v25 = vld [vmem:[%s20112_s1 + $0x3f4] sm:$0xf0] }
 0x1fb   :  { %7059 = vmatpush.bf16.msrb.mxu2 %v12180_v11  ;;  %v13417_v51 = vld [vmem:[%s20112_s1 + $0x1d64] sm:$0xf]  ;;  %v12017_v44 = vld [vmem:[%s20112_s1 + $0x1d70] sm:$0xf0]  ;;  %v11892_v57 = vor.u32 %v13385_v45, %v11889_v50  ;;  %v16783_v30 = vadd.f32 %v6819_v23, %v6807_v21  ;;  %v12572_v21 = vld [vmem:[%s20112_s1 + $0x2f4] sm:$0xf0] }
 0x1fc   :  { %7072 = vmatpush.bf16.msrb.mxu3 %v12308_v10  ;;  %v13449_v43 = vld [vmem:[%s20112_s1 + $0x1e64] sm:$0xf]  ;;  %v12145_v53 = vld [vmem:[%s20112_s1 + $0x1e70] sm:$0xf0]  ;;  %v12020_v59 = vor.u32 %v13417_v51, %v12017_v44  ;;  %v6795_v10 = vpop.f32.mrf.mxu1 }
 0x1fd   :  { %v13481_v55 = vld [vmem:[%s20112_s1 + $0x1f64] sm:$0xf]  ;;  %v12273_v56 = vld [vmem:[%s20112_s1 + $0x1f70] sm:$0xf0]  ;;  %7034 = vmatpush.bf16.msrb.mxu0 %v11908_v38  ;;  %v12148_v40 = vor.u32 %v13449_v43, %v12145_v53 }
 0x1fe   :  { %7047 = vmatpush.bf16.msrb.mxu1 %v12036_v41  ;;  %v13381_v61 = vld [vmem:[%s20112_s1 + $0x1c44] sm:$0xf]  ;;  %v11873_v62 = vld [vmem:[%s20112_s1 + $0x1c50] sm:$0xf0]  ;;  %v12276_v58 = vor.u32 %v13481_v55, %v12273_v56 }
 0x1ff   :  { %7060 = vmatpush.bf16.msrb.mxu2 %v12164_v42  ;;  %v13413_v63 = vld [vmem:[%s20112_s1 + $0x1d44] sm:$0xf]  ;;  %v12001_v8 = vld [vmem:[%s20112_s1 + $0x1d50] sm:$0xf0]  ;;  %v11876_v26 = vor.u32 %v13381_v61, %v11873_v62  ;;  %v6808_v61 = vpop.f32.mrf.mxu2  ;;  %v8375_v62 = vld [vmem:[%s20112_s1 + $0xe8] sm:$0xf] }
 0x200   :  { %7073 = vmatpush.bf16.msrb.mxu3 %v12292_v33  ;;  %v13445_v19 = vld [vmem:[%s20112_s1 + $0x1e44] sm:$0xf]  ;;  %v12129_v20 = vld [vmem:[%s20112_s1 + $0x1e50] sm:$0xf0]  ;;  %v12004_v31 = vor.u32 %v13413_v63, %v12001_v8  ;;  %v12508_v63 = vld [vmem:[%s20112_s1 + $0xf4] sm:$0xf0] }
 0x201   :  { %v13477_v11 = vld [vmem:[%s20112_s1 + $0x1f44] sm:$0xf]  ;;  %v12257_v24 = vld [vmem:[%s20112_s1 + $0x1f50] sm:$0xf0]  ;;  %7035 = vmatpush.bf16.msrb.mxu0 %v11892_v57  ;;  %v12132_v35 = vor.u32 %v13445_v19, %v12129_v20  ;;  %v12540_v19 = vld [vmem:[%s20112_s1 + $0x1f4] sm:$0xf0]  ;;  %v8376_v10 = vor.u32 %v12508_v63, %v8375_v62 }
 0x202   :  { %7048 = vmatpush.bf16.msrb.mxu1 %v12020_v59  ;;  %v13377_v36 = vld [vmem:[%s20112_s1 + $0x1c24] sm:$0xf]  ;;  %v11857_v22 = vld [vmem:[%s20112_s1 + $0x1c30] sm:$0xf0]  ;;  %v12260_v37 = vor.u32 %v13477_v11, %v12257_v24  ;;  %v6821_v3 = vpop.f32.mrf.mxu3  ;;  %v8631_v20 = vld [vmem:[%s20112_s1 + $0x2e8] sm:$0xf] }
 0x203   :  { %7061 = vmatpush.bf16.msrb.mxu2 %v12148_v40  ;;  %v13409_v32 = vld [vmem:[%s20112_s1 + $0x1d24] sm:$0xf]  ;;  %v11985_v38 = vld [vmem:[%s20112_s1 + $0x1d30] sm:$0xf0]  ;;  %v11860_v50 = vor.u32 %v13377_v36, %v11857_v22  ;;  %v8759_v24 = vld [vmem:[%s20112_s1 + $0x3e8] sm:$0xf] }
 0x204   :  { %7074 = vmatpush.bf16.msrb.mxu3 %v12276_v58  ;;  %v13441_v39 = vld [vmem:[%s20112_s1 + $0x1e24] sm:$0xf]  ;;  %v12113_v41 = vld [vmem:[%s20112_s1 + $0x1e30] sm:$0xf0]  ;;  %v11988_v52 = vor.u32 %v13409_v32, %v11985_v38  ;;  %v8503_v58 = vld [vmem:[%s20112_s1 + $0x1e8] sm:$0xf] }
 0x205   :  { %v13473_v42 = vld [vmem:[%s20112_s1 + $0x1f24] sm:$0xf]  ;;  %v12241_v45 = vld [vmem:[%s20112_s1 + $0x1f30] sm:$0xf0]  ;;  %7036 = vmatpush.bf16.msrb.mxu0 %v11876_v26  ;;  %v12116_v44 = vor.u32 %v13441_v39, %v12113_v41  ;;  %v8359_v36 = vld [vmem:[%s20112_s1 + $0xc8] sm:$0xf] }
 0x206   :  { %v13373_v51 = vld [vmem:[%s20112_s1 + $0x1c04] sm:$0xf]  ;;  %v11841_v33 = vld [vmem:[%s20112_s1 + $0x1c10] sm:$0xf0]  ;;  %7049 = vmatpush.bf16.msrb.mxu1 %v12004_v31  ;;  %v12244_v56 = vor.u32 %v13473_v42, %v12241_v45  ;;  %v8504_v31 = vor.u32 %v12540_v19, %v8503_v58  ;;  %v12504_v22 = vld [vmem:[%s20112_s1 + $0xd4] sm:$0xf0] }
 0x207   :  { %7062 = vmatpush.bf16.msrb.mxu2 %v12132_v35  ;;  %v13405_v43 = vld [vmem:[%s20112_s1 + $0x1d04] sm:$0xf]  ;;  %v11969_v53 = vld [vmem:[%s20112_s1 + $0x1d10] sm:$0xf0]  ;;  %v11844_v8 = vor.u32 %v13373_v51, %v11841_v33  ;;  %v8632_v35 = vor.u32 %v12572_v21, %v8631_v20  ;;  %v8487_v32 = vld [vmem:[%s20112_s1 + $0x1c8] sm:$0xf] }
 0x208   :  { %v13437_v55 = vld [vmem:[%s20112_s1 + $0x1e04] sm:$0xf]  ;;  %7075 = vmatpush.bf16.msrb.mxu3 %v12260_v37  ;;  %v12097_v57 = vld [vmem:[%s20112_s1 + $0x1e10] sm:$0xf0]  ;;  %v11972_v23 = vor.u32 %v13405_v43, %v11969_v53  ;;  %v8760_v37 = vor.u32 %v12604_v25, %v8759_v24  ;;  %v12536_v38 = vld [vmem:[%s20112_s1 + $0x1d4] sm:$0xf0] }
 0x209   :  { %v13469_v59 = vld [vmem:[%s20112_s1 + $0x1f04] sm:$0xf]  ;;  %v12225_v40 = vld [vmem:[%s20112_s1 + $0x1f10] sm:$0xf0]  ;;  %7037 = vmatpush.bf16.msrb.mxu0 %v11860_v50  ;;  %v12100_v11 = vor.u32 %v13437_v55, %v12097_v57  ;;  %v8615_v39 = vld [vmem:[%s20112_s1 + $0x2c8] sm:$0xf]  ;;  %v8360_v50 = vor.u32 %v12504_v22, %v8359_v36  ;;  %v8488_v51 = vor.u32 %v12536_v38, %v8487_v32 }
 0x20a   :  { %7050 = vmatpush.bf16.msrb.mxu1 %v11988_v52  ;;  %v12228_v26 = vor.u32 %v13469_v59, %v12225_v40  ;;  %v12568_v41 = vld [vmem:[%s20112_s1 + $0x2d4] sm:$0xf0]  ;;  %v8743_v42 = vld [vmem:[%s20112_s1 + $0x3c8] sm:$0xf]  ;;  %v13542_v61 = vld [vmem:[#allocation1 + $0x2d] sm:$0xff] }
 0x20b   :  { %7063 = vmatpush.bf16.msrb.mxu2 %v12116_v44  ;;  %v12600_v45 = vld [vmem:[%s20112_s1 + $0x3d4] sm:$0xf0]  ;;  %v8616_v33 = vor.u32 %v12568_v41, %v8615_v39  ;;  %v8343_v52 = vld [vmem:[%s20112_s1 + $0xa8] sm:$0xf]  ;;  %v13543_v58 = vld [vmem:[#allocation1 + $0x3f] sm:$0xff] }
 0x20c   :  { %7076 = vmatpush.bf16.msrb.mxu3 %v12244_v56  ;;  %v12500_v44 = vld [vmem:[%s20112_s1 + $0xb4] sm:$0xf0]  ;;  %v8471_v43 = vld [vmem:[%s20112_s1 + $0x1a8] sm:$0xf]  ;;  %v8744_v55 = vor.u32 %v12600_v45, %v8743_v42 }
 0x20d   :  { %7038 = vmatpush.bf16.msrb.mxu0 %v11844_v8  ;;  %v13540_v53 = vld [vmem:[#allocation1 + $0x24] sm:$0xff]  ;;  %v12532_v56 = vld [vmem:[%s20112_s1 + $0x1b4] sm:$0xf0]  ;;  %v8344_v3 = vor.u32 %v12500_v44, %v8343_v52 }
 0x20e   :  { %7051 = vmatpush.bf16.msrb.mxu1 %v11972_v23  ;;  %v8599_v57 = vld [vmem:[%s20112_s1 + $0x2a8] sm:$0xf]  ;;  %v12564_v59 = vld [vmem:[%s20112_s1 + $0x2b4] sm:$0xf0]  ;;  %v8472_v8 = vor.u32 %v12532_v56, %v8471_v43  ;;  %v6845_v32 = vpop.f32.mrf.mxu1 }
 0x20f   :  { %7064 = vmatpush.bf16.msrb.mxu2 %v12100_v11  ;;  %v13541_v40 = vld [vmem:[#allocation1 + $0x36] sm:$0xff]  ;;  %v8727_v62 = vld [vmem:[%s20112_s1 + $0x3a8] sm:$0xf]  ;;  %v8600_v19 = vor.u32 %v12564_v59, %v8599_v57 }
 0x210   :  { %7077 = vmatpush.bf16.msrb.mxu3 %v12228_v26  ;;  %7039 = vmatmul.bf16.vlgmr.msrb.gmra.mxu0 %v13540_v53  ;;  %v12596_v63 = vld [vmem:[%s20112_s1 + $0x3b4] sm:$0xf0]  ;;  %v8327_v20 = vld [vmem:[%s20112_s1 + $0x88] sm:$0xf] }
 0x211   :  { %7083 = vmatpush.bf16.msra.mxu0 %v8376_v10  ;;  %7052 = vmatmul.bf16.vlgmr.msrb.gmra.mxu1 %v13542_v61  ;;  %v12496_v21 = vld [vmem:[%s20112_s1 + $0x94] sm:$0xf0]  ;;  %v8455_v23 = vld [vmem:[%s20112_s1 + $0x188] sm:$0xf]  ;;  %v8728_v11 = vor.u32 %v12596_v63, %v8727_v62  ;;  %v6832_v10 = vpop.f32.mrf.mxu0 }
 0x212   :  { %7096 = vmatpush.bf16.msra.mxu1 %v8504_v31  ;;  %7065 = vmatmul.bf16.vlgmr.msrb.gmra.mxu2 %v13541_v40  ;;  %v12528_v24 = vld [vmem:[%s20112_s1 + $0x194] sm:$0xf0]  ;;  %v8583_v25 = vld [vmem:[%s20112_s1 + $0x288] sm:$0xf]  ;;  %v6833_v36 = vadd.f32 %v6832_v10, %v16783_v30  ;;  %v8328_v22 = vor.u32 %v12496_v21, %v8327_v20 }
 0x213   :  { %7109 = vmatpush.bf16.msra.mxu2 %v8632_v35  ;;  %7078 = vmatmul.bf16.vlgmr.msrb.gmra.mxu3 %v13543_v58  ;;  %v12560_v26 = vld [vmem:[%s20112_s1 + $0x294] sm:$0xf0]  ;;  %v8711_v31 = vld [vmem:[%s20112_s1 + $0x388] sm:$0xf] }
 0x214   :  { %7122 = vmatpush.bf16.msra.mxu3 %v8760_v37  ;;  %v12592_v35 = vld [vmem:[%s20112_s1 + $0x394] sm:$0xf0]  ;;  %v8456_v37 = vor.u32 %v12528_v24, %v8455_v23  ;;  %v8584_v38 = vor.u32 %v12560_v26, %v8583_v25  ;;  %v8311_v39 = vld [vmem:[%s20112_s1 + $0x68] sm:$0xf]  ;;  %v6846_v45 = vadd.f32 %v6845_v32, %v6833_v36 }
 0x215   :  { %7084 = vmatpush.bf16.msra.mxu0 %v8360_v50  ;;  %v12492_v41 = vld [vmem:[%s20112_s1 + $0x74] sm:$0xf0]  ;;  %v8439_v42 = vld [vmem:[%s20112_s1 + $0x168] sm:$0xf]  ;;  %v8712_v30 = vor.u32 %v12592_v35, %v8711_v31  ;;  %v6858_v61 = vpop.f32.mrf.mxu2 }
 0x216   :  { %7097 = vmatpush.bf16.msra.mxu1 %v8488_v51  ;;  %v12524_v50 = vld [vmem:[%s20112_s1 + $0x174] sm:$0xf0]  ;;  %v8567_v51 = vld [vmem:[%s20112_s1 + $0x268] sm:$0xf]  ;;  %v8312_v43 = vor.u32 %v12492_v41, %v8311_v39 }
 0x217   :  { %7110 = vmatpush.bf16.msra.mxu2 %v8616_v33  ;;  %v12556_v33 = vld [vmem:[%s20112_s1 + $0x274] sm:$0xf0]  ;;  %v8695_v52 = vld [vmem:[%s20112_s1 + $0x368] sm:$0xf]  ;;  %v8440_v53 = vor.u32 %v12524_v50, %v8439_v42 }
 0x218   :  { %7123 = vmatpush.bf16.msra.mxu3 %v8744_v55  ;;  %v12588_v44 = vld [vmem:[%s20112_s1 + $0x374] sm:$0xf0]  ;;  %v8568_v55 = vor.u32 %v12556_v33, %v8567_v51  ;;  %v8295_v56 = vld [vmem:[%s20112_s1 + $0x48] sm:$0xf] }
 0x219   :  { %7085 = vmatpush.bf16.msra.mxu0 %v8344_v3  ;;  %v12488_v57 = vld [vmem:[%s20112_s1 + $0x54] sm:$0xf0]  ;;  %v8423_v59 = vld [vmem:[%s20112_s1 + $0x148] sm:$0xf]  ;;  %v8696_v40 = vor.u32 %v12588_v44, %v8695_v52  ;;  %v6859_v3 = vadd.f32 %v6858_v61, %v6846_v45  ;;  %v6834_v21 = vpop.f32.mrf.mxu0 }
 0x21a   :  { %7098 = vmatpush.bf16.msra.mxu1 %v8472_v8  ;;  %v12520_v62 = vld [vmem:[%s20112_s1 + $0x154] sm:$0xf0]  ;;  %v8551_v63 = vld [vmem:[%s20112_s1 + $0x248] sm:$0xf]  ;;  %v6871_v8 = vpop.f32.mrf.mxu3  ;;  %v8296_v23 = vor.u32 %v12488_v57, %v8295_v56 }
 0x21b   :  { %7111 = vmatpush.bf16.msra.mxu2 %v8600_v19  ;;  %v12552_v58 = vld [vmem:[%s20112_s1 + $0x254] sm:$0xf0]  ;;  %v8679_v19 = vld [vmem:[%s20112_s1 + $0x348] sm:$0xf]  ;;  %v16978_v24 = vadd.f32 %v6871_v8, %v6859_v3  ;;  %v8424_v25 = vor.u32 %v12520_v62, %v8423_v59 }
 0x21c   :  { %7124 = vmatpush.bf16.msra.mxu3 %v8728_v11  ;;  %v12584_v20 = vld [vmem:[%s20112_s1 + $0x354] sm:$0xf0]  ;;  %v6847_v11 = vpop.f32.mrf.mxu1  ;;  %v8552_v26 = vor.u32 %v12552_v58, %v8551_v63  ;;  %v8279_v10 = vld [vmem:[%s20112_s1 + $0x28] sm:$0xf] }
 0x21d   :  { %7086 = vmatpush.bf16.msra.mxu0 %v8328_v22  ;;  %v12484_v31 = vld [vmem:[%s20112_s1 + $0x34] sm:$0xf0]  ;;  %v8407_v35 = vld [vmem:[%s20112_s1 + $0x128] sm:$0xf]  ;;  %v8680_v36 = vor.u32 %v12584_v20, %v8679_v19  ;;  %v6860_v56 = vpop.f32.mrf.mxu2 }
 0x21e   :  { %7099 = vmatpush.bf16.msra.mxu1 %v8456_v37  ;;  %v12516_v22 = vld [vmem:[%s20112_s1 + $0x134] sm:$0xf0]  ;;  %v8535_v32 = vld [vmem:[%s20112_s1 + $0x228] sm:$0xf]  ;;  %v8280_v41 = vor.u32 %v12484_v31, %v8279_v10 }
 0x21f   :  { %7112 = vmatpush.bf16.msra.mxu2 %v8584_v38  ;;  %v12548_v37 = vld [vmem:[%s20112_s1 + $0x234] sm:$0xf0]  ;;  %v8663_v38 = vld [vmem:[%s20112_s1 + $0x328] sm:$0xf]  ;;  %v8408_v45 = vor.u32 %v12516_v22, %v8407_v35 }
 0x220   :  { %7125 = vmatpush.bf16.msra.mxu3 %v8712_v30  ;;  %v12580_v39 = vld [vmem:[%s20112_s1 + $0x334] sm:$0xf0]  ;;  %v8263_v42 = vld [vmem:[%s20112_s1 + $0x8] sm:$0xf]  ;;  %v8536_v50 = vor.u32 %v12548_v37, %v8535_v32 }
 0x221   :  { %7087 = vmatpush.bf16.msra.mxu0 %v8312_v43  ;;  %v12480_v30 = vld [vmem:[%s20112_s1 + $0x14] sm:$0xf0]  ;;  %v8391_v51 = vld [vmem:[%s20112_s1 + $0x108] sm:$0xf]  ;;  %v8664_v44 = vor.u32 %v12580_v39, %v8663_v38 }
 0x222   :  { %7100 = vmatpush.bf16.msra.mxu1 %v8440_v53  ;;  %v12512_v33 = vld [vmem:[%s20112_s1 + $0x114] sm:$0xf0]  ;;  %v8519_v52 = vld [vmem:[%s20112_s1 + $0x208] sm:$0xf]  ;;  %v6873_v61 = vpop.f32.mrf.mxu3  ;;  %v8264_v62 = vor.u32 %v12480_v30, %v8263_v42 }
 0x223   :  { %7113 = vmatpush.bf16.msra.mxu2 %v8568_v55  ;;  %v12544_v43 = vld [vmem:[%s20112_s1 + $0x214] sm:$0xf0]  ;;  %v8647_v53 = vld [vmem:[%s20112_s1 + $0x308] sm:$0xf]  ;;  %v8392_v8 = vor.u32 %v12512_v33, %v8391_v51 }
 0x224   :  { %7126 = vmatpush.bf16.msra.mxu3 %v8696_v40  ;;  %v12576_v55 = vld [vmem:[%s20112_s1 + $0x314] sm:$0xf0]  ;;  %v8887_v57 = vld [vmem:[%s20112_s1 + $0x4e8] sm:$0xf]  ;;  %v8520_v19 = vor.u32 %v12544_v43, %v8519_v52 }
 0x225   :  { %7088 = vmatpush.bf16.msra.mxu0 %v8296_v23  ;;  %v12636_v59 = vld [vmem:[%s20112_s1 + $0x4f4] sm:$0xf0]  ;;  %v9015_v40 = vld [vmem:[%s20112_s1 + $0x5e8] sm:$0xf]  ;;  %v8648_v23 = vor.u32 %v12576_v55, %v8647_v53 }
 0x226   :  { %7101 = vmatpush.bf16.msra.mxu1 %v8424_v25  ;;  %v12668_v63 = vld [vmem:[%s20112_s1 + $0x5f4] sm:$0xf0]  ;;  %v9143_v58 = vld [vmem:[%s20112_s1 + $0x6e8] sm:$0xf]  ;;  %v8888_v11 = vor.u32 %v12636_v59, %v8887_v57 }
 0x227   :  { %7114 = vmatpush.bf16.msra.mxu2 %v8552_v26  ;;  %v12700_v3 = vld [vmem:[%s20112_s1 + $0x6f4] sm:$0xf0]  ;;  %v9271_v20 = vld [vmem:[%s20112_s1 + $0x7e8] sm:$0xf]  ;;  %v9016_v25 = vor.u32 %v12668_v63, %v9015_v40 }
 0x228   :  { %7127 = vmatpush.bf16.msra.mxu3 %v8680_v36  ;;  %v12732_v21 = vld [vmem:[%s20112_s1 + $0x7f4] sm:$0xf0]  ;;  %v9144_v26 = vor.u32 %v12700_v3, %v9143_v58  ;;  %v8871_v10 = vld [vmem:[%s20112_s1 + $0x4c8] sm:$0xf] }
 0x229   :  { %7089 = vmatpush.bf16.msra.mxu0 %v8280_v41  ;;  %v12632_v31 = vld [vmem:[%s20112_s1 + $0x4d4] sm:$0xf0]  ;;  %v8999_v35 = vld [vmem:[%s20112_s1 + $0x5c8] sm:$0xf]  ;;  %v9272_v36 = vor.u32 %v12732_v21, %v9271_v20 }
 0x22a   :  { %7102 = vmatpush.bf16.msra.mxu1 %v8408_v45  ;;  %v12664_v22 = vld [vmem:[%s20112_s1 + $0x5d4] sm:$0xf0]  ;;  %v9127_v32 = vld [vmem:[%s20112_s1 + $0x6c8] sm:$0xf]  ;;  %v8872_v41 = vor.u32 %v12632_v31, %v8871_v10 }
 0x22b   :  { %7115 = vmatpush.bf16.msra.mxu2 %v8536_v50  ;;  %v12696_v37 = vld [vmem:[%s20112_s1 + $0x6d4] sm:$0xf0]  ;;  %v9255_v38 = vld [vmem:[%s20112_s1 + $0x7c8] sm:$0xf]  ;;  %v9000_v42 = vor.u32 %v12664_v22, %v8999_v35 }
 0x22c   :  { %7128 = vmatpush.bf16.msra.mxu3 %v8664_v44  ;;  %v12728_v39 = vld [vmem:[%s20112_s1 + $0x7d4] sm:$0xf0]  ;;  %v9128_v30 = vor.u32 %v12696_v37, %v9127_v32  ;;  %v8855_v45 = vld [vmem:[%s20112_s1 + $0x4a8] sm:$0xf] }
 0x22d   :  { %7090 = vmatpush.bf16.msra.mxu0 %v8264_v62  ;;  %v12628_v50 = vld [vmem:[%s20112_s1 + $0x4b4] sm:$0xf0]  ;;  %v8983_v51 = vld [vmem:[%s20112_s1 + $0x5a8] sm:$0xf]  ;;  %v9256_v33 = vor.u32 %v12728_v39, %v9255_v38 }
 0x22e   :  { %7103 = vmatpush.bf16.msra.mxu1 %v8392_v8  ;;  %v12660_v52 = vld [vmem:[%s20112_s1 + $0x5b4] sm:$0xf0]  ;;  %v9111_v44 = vld [vmem:[%s20112_s1 + $0x6a8] sm:$0xf]  ;;  %v8856_v56 = vor.u32 %v12628_v50, %v8855_v45 }
 0x22f   :  { %7116 = vmatpush.bf16.msra.mxu2 %v8520_v19  ;;  %v12692_v43 = vld [vmem:[%s20112_s1 + $0x6b4] sm:$0xf0]  ;;  %v9239_v53 = vld [vmem:[%s20112_s1 + $0x7a8] sm:$0xf]  ;;  %v8984_v57 = vor.u32 %v12660_v52, %v8983_v51  ;;  %v6884_v19 = vpop.f32.mrf.mxu0 }
 0x230   :  { %7129 = vmatpush.bf16.msra.mxu3 %v8648_v23  ;;  %v12724_v55 = vld [vmem:[%s20112_s1 + $0x7b4] sm:$0xf0]  ;;  %7091 = vmatmul.bf16.vlgmr.msra.gmra.mxu0 %v13939_v28  ;;  %v9112_v59 = vor.u32 %v12692_v43, %v9111_v44  ;;  %v8839_v40 = vld [vmem:[%s20112_s1 + $0x488] sm:$0xf]  ;;  %v6885_v23 = vadd.f32 %v6884_v19, %v16978_v24 }
 0x231   :  { %7135 = vmatpush.bf16.msrb.mxu0 %v8888_v11  ;;  %7104 = vmatmul.bf16.vlgmr.msra.gmra.mxu1 %v13949_v34  ;;  %v12624_v61 = vld [vmem:[%s20112_s1 + $0x494] sm:$0xf0]  ;;  %v8967_v62 = vld [vmem:[%s20112_s1 + $0x588] sm:$0xf]  ;;  %v9240_v63 = vor.u32 %v12724_v55, %v9239_v53 }
 0x232   :  { %7148 = vmatpush.bf16.msrb.mxu1 %v9016_v25  ;;  %7117 = vmatmul.bf16.vlgmr.msra.gmra.mxu2 %v13937_v27  ;;  %v12656_v58 = vld [vmem:[%s20112_s1 + $0x594] sm:$0xf0]  ;;  %v9095_v3 = vld [vmem:[%s20112_s1 + $0x688] sm:$0xf]  ;;  %v8840_v11 = vor.u32 %v12624_v61, %v8839_v40  ;;  %v6897_v25 = vpop.f32.mrf.mxu1 }
 0x233   :  { %7161 = vmatpush.bf16.msrb.mxu2 %v9144_v26  ;;  %7130 = vmatmul.bf16.vlgmr.msra.gmra.mxu3 %v13941_v29  ;;  %v12688_v8 = vld [vmem:[%s20112_s1 + $0x694] sm:$0xf0]  ;;  %v9223_v20 = vld [vmem:[%s20112_s1 + $0x788] sm:$0xf]  ;;  %v8968_v26 = vor.u32 %v12656_v58, %v8967_v62  ;;  %v6898_v22 = vadd.f32 %v6897_v25, %v6885_v23 }
 0x234   :  { %7174 = vmatpush.bf16.msrb.mxu3 %v9272_v36  ;;  %v12720_v21 = vld [vmem:[%s20112_s1 + $0x794] sm:$0xf0]  ;;  %v9096_v10 = vor.u32 %v12688_v8, %v9095_v3  ;;  %v8823_v31 = vld [vmem:[%s20112_s1 + $0x468] sm:$0xf] }
 0x235   :  { %7136 = vmatpush.bf16.msrb.mxu0 %v8872_v41  ;;  %v12620_v35 = vld [vmem:[%s20112_s1 + $0x474] sm:$0xf0]  ;;  %v8951_v36 = vld [vmem:[%s20112_s1 + $0x568] sm:$0xf]  ;;  %v9224_v24 = vor.u32 %v12720_v21, %v9223_v20  ;;  %v6910_v44 = vpop.f32.mrf.mxu2 }
 0x236   :  { %7149 = vmatpush.bf16.msrb.mxu1 %v9000_v42  ;;  %v12652_v32 = vld [vmem:[%s20112_s1 + $0x574] sm:$0xf0]  ;;  %v9079_v37 = vld [vmem:[%s20112_s1 + $0x668] sm:$0xf]  ;;  %v8824_v42 = vor.u32 %v12620_v35, %v8823_v31 }
 0x237   :  { %7162 = vmatpush.bf16.msrb.mxu2 %v9128_v30  ;;  %v12684_v38 = vld [vmem:[%s20112_s1 + $0x674] sm:$0xf0]  ;;  %v9207_v39 = vld [vmem:[%s20112_s1 + $0x768] sm:$0xf]  ;;  %v8952_v30 = vor.u32 %v12652_v32, %v8951_v36  ;;  %v6886_v61 = vpop.f32.mrf.mxu0 }
 0x238   :  { %7175 = vmatpush.bf16.msrb.mxu3 %v9256_v33  ;;  %v12716_v41 = vld [vmem:[%s20112_s1 + $0x774] sm:$0xf0]  ;;  %v9080_v45 = vor.u32 %v12684_v38, %v9079_v37  ;;  %v8807_v50 = vld [vmem:[%s20112_s1 + $0x448] sm:$0xf] }
 0x239   :  { %7137 = vmatpush.bf16.msrb.mxu0 %v8856_v56  ;;  %v12616_v51 = vld [vmem:[%s20112_s1 + $0x454] sm:$0xf0]  ;;  %v8935_v33 = vld [vmem:[%s20112_s1 + $0x548] sm:$0xf]  ;;  %v9208_v52 = vor.u32 %v12716_v41, %v9207_v39  ;;  %v6911_v56 = vadd.f32 %v6910_v44, %v6898_v22 }
 0x23a   :  { %7150 = vmatpush.bf16.msrb.mxu1 %v8984_v57  ;;  %v12648_v43 = vld [vmem:[%s20112_s1 + $0x554] sm:$0xf0]  ;;  %v9063_v53 = vld [vmem:[%s20112_s1 + $0x648] sm:$0xf]  ;;  %v6923_v57 = vpop.f32.mrf.mxu3  ;;  %v8808_v62 = vor.u32 %v12616_v51, %v8807_v50 }
 0x23b   :  { %7163 = vmatpush.bf16.msrb.mxu2 %v9112_v59  ;;  %v12680_v55 = vld [vmem:[%s20112_s1 + $0x654] sm:$0xf0]  ;;  %v9191_v59 = vld [vmem:[%s20112_s1 + $0x748] sm:$0xf]  ;;  %v17177_v58 = vadd.f32 %v6923_v57, %v6911_v56  ;;  %v8936_v3 = vor.u32 %v12648_v43, %v8935_v33 }
 0x23c   :  { %7176 = vmatpush.bf16.msrb.mxu3 %v9240_v63  ;;  %v12712_v40 = vld [vmem:[%s20112_s1 + $0x754] sm:$0xf0]  ;;  %v6899_v63 = vpop.f32.mrf.mxu1  ;;  %v9064_v8 = vor.u32 %v12680_v55, %v9063_v53  ;;  %v8791_v19 = vld [vmem:[%s20112_s1 + $0x428] sm:$0xf] }
 0x23d   :  { %7138 = vmatpush.bf16.msrb.mxu0 %v8840_v11  ;;  %v12612_v20 = vld [vmem:[%s20112_s1 + $0x434] sm:$0xf0]  ;;  %v8919_v21 = vld [vmem:[%s20112_s1 + $0x528] sm:$0xf]  ;;  %v9192_v23 = vor.u32 %v12712_v40, %v9191_v59  ;;  %v6912_v50 = vpop.f32.mrf.mxu2 }
 0x23e   :  { %7151 = vmatpush.bf16.msrb.mxu1 %v8968_v26  ;;  %v12644_v11 = vld [vmem:[%s20112_s1 + $0x534] sm:$0xf0]  ;;  %v9047_v25 = vld [vmem:[%s20112_s1 + $0x628] sm:$0xf]  ;;  %v8792_v35 = vor.u32 %v12612_v20, %v8791_v19 }
 0x23f   :  { %7164 = vmatpush.bf16.msrb.mxu2 %v9096_v10  ;;  %v12676_v26 = vld [vmem:[%s20112_s1 + $0x634] sm:$0xf0]  ;;  %v9175_v10 = vld [vmem:[%s20112_s1 + $0x728] sm:$0xf]  ;;  %v8920_v22 = vor.u32 %v12644_v11, %v8919_v21 }
 0x240   :  { %7177 = vmatpush.bf16.msrb.mxu3 %v9224_v24  ;;  %v12708_v31 = vld [vmem:[%s20112_s1 + $0x734] sm:$0xf0]  ;;  %v8775_v36 = vld [vmem:[%s20112_s1 + $0x408] sm:$0xf]  ;;  %v9048_v32 = vor.u32 %v12676_v26, %v9047_v25 }
 0x241   :  { %7139 = vmatpush.bf16.msrb.mxu0 %v8824_v42  ;;  %v12608_v24 = vld [vmem:[%s20112_s1 + $0x414] sm:$0xf0]  ;;  %v8903_v37 = vld [vmem:[%s20112_s1 + $0x508] sm:$0xf]  ;;  %v9176_v41 = vor.u32 %v12708_v31, %v9175_v10 }
 0x242   :  { %7152 = vmatpush.bf16.msrb.mxu1 %v8952_v30  ;;  %v12640_v38 = vld [vmem:[%s20112_s1 + $0x514] sm:$0xf0]  ;;  %v9031_v39 = vld [vmem:[%s20112_s1 + $0x608] sm:$0xf]  ;;  %v6925_v44 = vpop.f32.mrf.mxu3  ;;  %v8776_v43 = vor.u32 %v12608_v24, %v8775_v36 }
 0x243   :  { %7165 = vmatpush.bf16.msrb.mxu2 %v9080_v45  ;;  %v12672_v42 = vld [vmem:[%s20112_s1 + $0x614] sm:$0xf0]  ;;  %v9159_v30 = vld [vmem:[%s20112_s1 + $0x708] sm:$0xf]  ;;  %v8904_v57 = vor.u32 %v12640_v38, %v8903_v37 }
 0x244   :  { %7178 = vmatpush.bf16.msrb.mxu3 %v9208_v52  ;;  %v12704_v45 = vld [vmem:[%s20112_s1 + $0x714] sm:$0xf0]  ;;  %v9399_v51 = vld [vmem:[%s20112_s1 + $0x8e8] sm:$0xf]  ;;  %v9032_v59 = vor.u32 %v12672_v42, %v9031_v39 }
 0x245   :  { %7140 = vmatpush.bf16.msrb.mxu0 %v8808_v62  ;;  %v12764_v33 = vld [vmem:[%s20112_s1 + $0x8f4] sm:$0xf0]  ;;  %v9527_v52 = vld [vmem:[%s20112_s1 + $0x9e8] sm:$0xf]  ;;  %v9160_v62 = vor.u32 %v12704_v45, %v9159_v30 }
 0x246   :  { %7153 = vmatpush.bf16.msrb.mxu1 %v8936_v3  ;;  %v12796_v53 = vld [vmem:[%s20112_s1 + $0x9f4] sm:$0xf0]  ;;  %v9655_v55 = vld [vmem:[%s20112_s1 + $0xae8] sm:$0xf]  ;;  %v9400_v63 = vor.u32 %v12764_v33, %v9399_v51 }
 0x247   :  { %7166 = vmatpush.bf16.msrb.mxu2 %v9064_v8  ;;  %v12828_v56 = vld [vmem:[%s20112_s1 + $0xaf4] sm:$0xf0]  ;;  %v9783_v40 = vld [vmem:[%s20112_s1 + $0xbe8] sm:$0xf]  ;;  %v9528_v3 = vor.u32 %v12796_v53, %v9527_v52 }
 0x248   :  { %7179 = vmatpush.bf16.msrb.mxu3 %v9192_v23  ;;  %v12860_v61 = vld [vmem:[%s20112_s1 + $0xbf4] sm:$0xf0]  ;;  %v9656_v8 = vor.u32 %v12828_v56, %v9655_v55  ;;  %v9383_v19 = vld [vmem:[%s20112_s1 + $0x8c8] sm:$0xf] }
 0x249   :  { %7141 = vmatpush.bf16.msrb.mxu0 %v8792_v35  ;;  %v12760_v20 = vld [vmem:[%s20112_s1 + $0x8d4] sm:$0xf0]  ;;  %v9511_v21 = vld [vmem:[%s20112_s1 + $0x9c8] sm:$0xf]  ;;  %v9784_v23 = vor.u32 %v12860_v61, %v9783_v40 }
 0x24a   :  { %7154 = vmatpush.bf16.msrb.mxu1 %v8920_v22  ;;  %v12792_v11 = vld [vmem:[%s20112_s1 + $0x9d4] sm:$0xf0]  ;;  %v9639_v25 = vld [vmem:[%s20112_s1 + $0xac8] sm:$0xf]  ;;  %v9384_v35 = vor.u32 %v12760_v20, %v9383_v19 }
 0x24b   :  { %7167 = vmatpush.bf16.msrb.mxu2 %v9048_v32  ;;  %v12824_v26 = vld [vmem:[%s20112_s1 + $0xad4] sm:$0xf0]  ;;  %v9767_v10 = vld [vmem:[%s20112_s1 + $0xbc8] sm:$0xf]  ;;  %v9512_v36 = vor.u32 %v12792_v11, %v9511_v21 }
 0x24c   :  { %7180 = vmatpush.bf16.msrb.mxu3 %v9176_v41  ;;  %v12856_v31 = vld [vmem:[%s20112_s1 + $0xbd4] sm:$0xf0]  ;;  %v9640_v24 = vor.u32 %v12824_v26, %v9639_v25  ;;  %v9367_v22 = vld [vmem:[%s20112_s1 + $0x8a8] sm:$0xf] }
 0x24d   :  { %7142 = vmatpush.bf16.msrb.mxu0 %v8776_v43  ;;  %v12756_v32 = vld [vmem:[%s20112_s1 + $0x8b4] sm:$0xf0]  ;;  %v9495_v37 = vld [vmem:[%s20112_s1 + $0x9a8] sm:$0xf]  ;;  %v9768_v38 = vor.u32 %v12856_v31, %v9767_v10 }
 0x24e   :  { %7155 = vmatpush.bf16.msrb.mxu1 %v8904_v57  ;;  %v12788_v39 = vld [vmem:[%s20112_s1 + $0x9b4] sm:$0xf0]  ;;  %v9623_v41 = vld [vmem:[%s20112_s1 + $0xaa8] sm:$0xf]  ;;  %v9368_v50 = vor.u32 %v12756_v32, %v9367_v22 }
 0x24f   :  { %7168 = vmatpush.bf16.msrb.mxu2 %v9032_v59  ;;  %v12820_v42 = vld [vmem:[%s20112_s1 + $0xab4] sm:$0xf0]  ;;  %v9751_v30 = vld [vmem:[%s20112_s1 + $0xba8] sm:$0xf]  ;;  %v9496_v51 = vor.u32 %v12788_v39, %v9495_v37  ;;  %v6936_v59 = vpop.f32.mrf.mxu0 }
 0x250   :  { %7181 = vmatpush.bf16.msrb.mxu3 %v9160_v62  ;;  %v12852_v45 = vld [vmem:[%s20112_s1 + $0xbb4] sm:$0xf0]  ;;  %7143 = vmatmul.bf16.vlgmr.msrb.gmra.mxu0 %v14017_v0  ;;  %v9624_v33 = vor.u32 %v12820_v42, %v9623_v41  ;;  %v9351_v52 = vld [vmem:[%s20112_s1 + $0x888] sm:$0xf]  ;;  %v6937_v62 = vadd.f32 %v6936_v59, %v17177_v58 }
 0x251   :  { %7187 = vmatpush.bf16.msra.mxu0 %v9400_v63  ;;  %7156 = vmatmul.bf16.vlgmr.msrb.gmra.mxu1 %v14021_v2  ;;  %v12752_v44 = vld [vmem:[%s20112_s1 + $0x894] sm:$0xf0]  ;;  %v9479_v43 = vld [vmem:[%s20112_s1 + $0x988] sm:$0xf]  ;;  %v9752_v53 = vor.u32 %v12852_v45, %v9751_v30 }
 0x252   :  { %7200 = vmatpush.bf16.msra.mxu1 %v9528_v3  ;;  %7169 = vmatmul.bf16.vlgmr.msrb.gmra.mxu2 %v14012_v60  ;;  %v12784_v55 = vld [vmem:[%s20112_s1 + $0x994] sm:$0xf0]  ;;  %v9607_v56 = vld [vmem:[%s20112_s1 + $0xa88] sm:$0xf]  ;;  %v9352_v63 = vor.u32 %v12752_v44, %v9351_v52  ;;  %v6949_v3 = vpop.f32.mrf.mxu1 }
 0x253   :  { %7213 = vmatpush.bf16.msra.mxu2 %v9656_v8  ;;  %7182 = vmatmul.bf16.vlgmr.msrb.gmra.mxu3 %v14019_v1  ;;  %v12816_v57 = vld [vmem:[%s20112_s1 + $0xa94] sm:$0xf0]  ;;  %v9735_v40 = vld [vmem:[%s20112_s1 + $0xb88] sm:$0xf]  ;;  %v9480_v8 = vor.u32 %v12784_v55, %v9479_v43  ;;  %v6950_v11 = vadd.f32 %v6949_v3, %v6937_v62 }
 0x254   :  { %7226 = vmatpush.bf16.msra.mxu3 %v9784_v23  ;;  %v12848_v61 = vld [vmem:[%s20112_s1 + $0xb94] sm:$0xf0]  ;;  %v9608_v19 = vor.u32 %v12816_v57, %v9607_v56  ;;  %v9335_v20 = vld [vmem:[%s20112_s1 + $0x868] sm:$0xf] }
 0x255   :  { %7188 = vmatpush.bf16.msra.mxu0 %v9384_v35  ;;  %v12748_v21 = vld [vmem:[%s20112_s1 + $0x874] sm:$0xf0]  ;;  %v9463_v23 = vld [vmem:[%s20112_s1 + $0x968] sm:$0xf]  ;;  %v9736_v58 = vor.u32 %v12848_v61, %v9735_v40  ;;  %v6962_v41 = vpop.f32.mrf.mxu2 }
 0x256   :  { %7201 = vmatpush.bf16.msra.mxu1 %v9512_v36  ;;  %v12780_v25 = vld [vmem:[%s20112_s1 + $0x974] sm:$0xf0]  ;;  %v9591_v26 = vld [vmem:[%s20112_s1 + $0xa68] sm:$0xf]  ;;  %v9336_v36 = vor.u32 %v12748_v21, %v9335_v20 }
 0x257   :  { %7214 = vmatpush.bf16.msra.mxu2 %v9640_v24  ;;  %v12812_v10 = vld [vmem:[%s20112_s1 + $0xa74] sm:$0xf0]  ;;  %v9719_v31 = vld [vmem:[%s20112_s1 + $0xb68] sm:$0xf]  ;;  %v9464_v24 = vor.u32 %v12780_v25, %v9463_v23  ;;  %v6938_v44 = vpop.f32.mrf.mxu0 }
 0x258   :  { %7227 = vmatpush.bf16.msra.mxu3 %v9768_v38  ;;  %v12844_v35 = vld [vmem:[%s20112_s1 + $0xb74] sm:$0xf0]  ;;  %v9592_v22 = vor.u32 %v12812_v10, %v9591_v26  ;;  %v9319_v32 = vld [vmem:[%s20112_s1 + $0x848] sm:$0xf] }
 0x259   :  { %7189 = vmatpush.bf16.msra.mxu0 %v9368_v50  ;;  %v12744_v37 = vld [vmem:[%s20112_s1 + $0x854] sm:$0xf0]  ;;  %v9447_v38 = vld [vmem:[%s20112_s1 + $0x948] sm:$0xf]  ;;  %v9720_v39 = vor.u32 %v12844_v35, %v9719_v31  ;;  %v6963_v50 = vadd.f32 %v6962_v41, %v6950_v11 }
 0x25a   :  { %7202 = vmatpush.bf16.msra.mxu1 %v9496_v51  ;;  %v12776_v42 = vld [vmem:[%s20112_s1 + $0x954] sm:$0xf0]  ;;  %v9575_v30 = vld [vmem:[%s20112_s1 + $0xa48] sm:$0xf]  ;;  %v6975_v51 = vpop.f32.mrf.mxu3  ;;  %v9320_v43 = vor.u32 %v12744_v37, %v9319_v32 }
 0x25b   :  { %7215 = vmatpush.bf16.msra.mxu2 %v9624_v33  ;;  %v12808_v45 = vld [vmem:[%s20112_s1 + $0xa54] sm:$0xf0]  ;;  %v9703_v33 = vld [vmem:[%s20112_s1 + $0xb48] sm:$0xf]  ;;  %v17376_v55 = vadd.f32 %v6975_v51, %v6963_v50  ;;  %v9448_v56 = vor.u32 %v12776_v42, %v9447_v38 }
 0x25c   :  { %7228 = vmatpush.bf16.msra.mxu3 %v9752_v53  ;;  %v12840_v52 = vld [vmem:[%s20112_s1 + $0xb54] sm:$0xf0]  ;;  %v6951_v53 = vpop.f32.mrf.mxu1  ;;  %v9576_v57 = vor.u32 %v12808_v45, %v9575_v30  ;;  %v9303_v59 = vld [vmem:[%s20112_s1 + $0x828] sm:$0xf] }
 0x25d   :  { %7190 = vmatpush.bf16.msra.mxu0 %v9352_v63  ;;  %v12740_v40 = vld [vmem:[%s20112_s1 + $0x834] sm:$0xf0]  ;;  %v9431_v61 = vld [vmem:[%s20112_s1 + $0x928] sm:$0xf]  ;;  %v9704_v62 = vor.u32 %v12840_v52, %v9703_v33  ;;  %v6964_v32 = vpop.f32.mrf.mxu2 }
 0x25e   :  { %7203 = vmatpush.bf16.msra.mxu1 %v9480_v8  ;;  %v12772_v63 = vld [vmem:[%s20112_s1 + $0x934] sm:$0xf0]  ;;  %v9559_v3 = vld [vmem:[%s20112_s1 + $0xa28] sm:$0xf]  ;;  %v9304_v21 = vor.u32 %v12740_v40, %v9303_v59 }
 0x25f   :  { %7216 = vmatpush.bf16.msra.mxu2 %v9608_v19  ;;  %v12804_v8 = vld [vmem:[%s20112_s1 + $0xa34] sm:$0xf0]  ;;  %v9687_v19 = vld [vmem:[%s20112_s1 + $0xb28] sm:$0xf]  ;;  %v9432_v11 = vor.u32 %v12772_v63, %v9431_v61 }
 0x260   :  { %7229 = vmatpush.bf16.msra.mxu3 %v9736_v58  ;;  %v12836_v20 = vld [vmem:[%s20112_s1 + $0xb34] sm:$0xf0]  ;;  %v9287_v23 = vld [vmem:[%s20112_s1 + $0x808] sm:$0xf]  ;;  %v9560_v25 = vor.u32 %v12804_v8, %v9559_v3 }
 0x261   :  { %7191 = vmatpush.bf16.msra.mxu0 %v9336_v36  ;;  %v12736_v58 = vld [vmem:[%s20112_s1 + $0x814] sm:$0xf0]  ;;  %v9415_v26 = vld [vmem:[%s20112_s1 + $0x908] sm:$0xf]  ;;  %v9688_v35 = vor.u32 %v12836_v20, %v9687_v19 }
 0x262   :  { %7204 = vmatpush.bf16.msra.mxu1 %v9464_v24  ;;  %v12768_v10 = vld [vmem:[%s20112_s1 + $0x914] sm:$0xf0]  ;;  %v9543_v31 = vld [vmem:[%s20112_s1 + $0xa08] sm:$0xf]  ;;  %v6977_v41 = vpop.f32.mrf.mxu3  ;;  %v9288_v42 = vor.u32 %v12736_v58, %v9287_v23 }
 0x263   :  { %7217 = vmatpush.bf16.msra.mxu2 %v9592_v22  ;;  %v12800_v36 = vld [vmem:[%s20112_s1 + $0xa14] sm:$0xf0]  ;;  %v9671_v24 = vld [vmem:[%s20112_s1 + $0xb08] sm:$0xf]  ;;  %v9416_v51 = vor.u32 %v12768_v10, %v9415_v26 }
 0x264   :  { %7230 = vmatpush.bf16.msra.mxu3 %v9720_v39  ;;  %v12832_v22 = vld [vmem:[%s20112_s1 + $0xb14] sm:$0xf0]  ;;  %v9911_v37 = vld [vmem:[%s20112_s1 + $0xce8] sm:$0xf]  ;;  %v9544_v33 = vor.u32 %v12800_v36, %v9543_v31 }
 0x265   :  { %7192 = vmatpush.bf16.msra.mxu0 %v9320_v43  ;;  %v12892_v38 = vld [vmem:[%s20112_s1 + $0xcf4] sm:$0xf0]  ;;  %v10039_v39 = vld [vmem:[%s20112_s1 + $0xde8] sm:$0xf]  ;;  %v9672_v43 = vor.u32 %v12832_v22, %v9671_v24 }
 0x266   :  { %7205 = vmatpush.bf16.msra.mxu1 %v9448_v56  ;;  %v12924_v30 = vld [vmem:[%s20112_s1 + $0xdf4] sm:$0xf0]  ;;  %v10167_v45 = vld [vmem:[%s20112_s1 + $0xee8] sm:$0xf]  ;;  %v9912_v53 = vor.u32 %v12892_v38, %v9911_v37 }
 0x267   :  { %7218 = vmatpush.bf16.msra.mxu2 %v9576_v57  ;;  %v12956_v50 = vld [vmem:[%s20112_s1 + $0xef4] sm:$0xf0]  ;;  %v10295_v52 = vld [vmem:[%s20112_s1 + $0xfe8] sm:$0xf]  ;;  %v10040_v56 = vor.u32 %v12924_v30, %v10039_v39 }
 0x268   :  { %7231 = vmatpush.bf16.msra.mxu3 %v9704_v62  ;;  %v12988_v44 = vld [vmem:[%s20112_s1 + $0xff4] sm:$0xf0]  ;;  %v10168_v57 = vor.u32 %v12956_v50, %v10167_v45  ;;  %v9895_v59 = vld [vmem:[%s20112_s1 + $0xcc8] sm:$0xf] }
 0x269   :  { %7193 = vmatpush.bf16.msra.mxu0 %v9304_v21  ;;  %v12888_v40 = vld [vmem:[%s20112_s1 + $0xcd4] sm:$0xf0]  ;;  %v10023_v61 = vld [vmem:[%s20112_s1 + $0xdc8] sm:$0xf]  ;;  %v10296_v62 = vor.u32 %v12988_v44, %v10295_v52 }
 0x26a   :  { %7206 = vmatpush.bf16.msra.mxu1 %v9432_v11  ;;  %v12920_v63 = vld [vmem:[%s20112_s1 + $0xdd4] sm:$0xf0]  ;;  %v10151_v3 = vld [vmem:[%s20112_s1 + $0xec8] sm:$0xf]  ;;  %v9896_v21 = vor.u32 %v12888_v40, %v9895_v59 }
 0x26b   :  { %7219 = vmatpush.bf16.msra.mxu2 %v9560_v25  ;;  %v12952_v8 = vld [vmem:[%s20112_s1 + $0xed4] sm:$0xf0]  ;;  %v10279_v19 = vld [vmem:[%s20112_s1 + $0xfc8] sm:$0xf]  ;;  %v10024_v23 = vor.u32 %v12920_v63, %v10023_v61 }
 0x26c   :  { %7232 = vmatpush.bf16.msra.mxu3 %v9688_v35  ;;  %v12984_v20 = vld [vmem:[%s20112_s1 + $0xfd4] sm:$0xf0]  ;;  %v10152_v58 = vor.u32 %v12952_v8, %v10151_v3  ;;  %v9879_v11 = vld [vmem:[%s20112_s1 + $0xca8] sm:$0xf] }
 0x26d   :  { %7194 = vmatpush.bf16.msra.mxu0 %v9288_v42  ;;  %v12884_v25 = vld [vmem:[%s20112_s1 + $0xcb4] sm:$0xf0]  ;;  %v10007_v26 = vld [vmem:[%s20112_s1 + $0xda8] sm:$0xf]  ;;  %v10280_v10 = vor.u32 %v12984_v20, %v10279_v19 }
 0x26e   :  { %7207 = vmatpush.bf16.msra.mxu1 %v9416_v51  ;;  %v12916_v31 = vld [vmem:[%s20112_s1 + $0xdb4] sm:$0xf0]  ;;  %v10135_v35 = vld [vmem:[%s20112_s1 + $0xea8] sm:$0xf]  ;;  %v9880_v32 = vor.u32 %v12884_v25, %v9879_v11 }
 0x26f   :  { %7220 = vmatpush.bf16.msra.mxu2 %v9544_v33  ;;  %v12948_v36 = vld [vmem:[%s20112_s1 + $0xeb4] sm:$0xf0]  ;;  %v10263_v24 = vld [vmem:[%s20112_s1 + $0xfa8] sm:$0xf]  ;;  %v10008_v37 = vor.u32 %v12916_v31, %v10007_v26 }
 0x270   :  { %7233 = vmatpush.bf16.msra.mxu3 %v9672_v43  ;;  %7195 = vmatmul.bf16.vlgmr.msra.gmra.mxu0 %v14267_v12  ;;  %v12980_v22 = vld [vmem:[%s20112_s1 + $0xfb4] sm:$0xf0]  ;;  %v10136_v38 = vor.u32 %v12948_v36, %v10135_v35  ;;  %v9863_v39 = vld [vmem:[%s20112_s1 + $0xc88] sm:$0xf] }
 0x271   :  { %7239 = vmatpush.bf16.msrb.mxu0 %v9912_v53  ;;  %7208 = vmatmul.bf16.vlgmr.msra.gmra.mxu1 %v14277_v16  ;;  %v12880_v41 = vld [vmem:[%s20112_s1 + $0xc94] sm:$0xf0]  ;;  %v9991_v42 = vld [vmem:[%s20112_s1 + $0xd88] sm:$0xf]  ;;  %v10264_v30 = vor.u32 %v12980_v22, %v10263_v24  ;;  %v6988_v33 = vpop.f32.mrf.mxu0 }
 0x272   :  { %7252 = vmatpush.bf16.msrb.mxu1 %v10040_v56  ;;  %7221 = vmatmul.bf16.vlgmr.msra.gmra.mxu2 %v14275_v15  ;;  %v12912_v45 = vld [vmem:[%s20112_s1 + $0xd94] sm:$0xf0]  ;;  %v10119_v50 = vld [vmem:[%s20112_s1 + $0xe88] sm:$0xf]  ;;  %v6989_v43 = vadd.f32 %v6988_v33, %v17376_v55  ;;  %v9864_v53 = vor.u32 %v12880_v41, %v9863_v39  ;;  %v7001_v56 = vpop.f32.mrf.mxu1 }
 0x273   :  { %7265 = vmatpush.bf16.msrb.mxu2 %v10168_v57  ;;  %7234 = vmatmul.bf16.vlgmr.msra.gmra.mxu3 %v14279_v17  ;;  %v12944_v51 = vld [vmem:[%s20112_s1 + $0xe94] sm:$0xf0]  ;;  %v10247_v52 = vld [vmem:[%s20112_s1 + $0xf88] sm:$0xf]  ;;  %v9992_v57 = vor.u32 %v12912_v45, %v9991_v42 }
 0x274   :  { %7278 = vmatpush.bf16.msrb.mxu3 %v10296_v62  ;;  %v12976_v44 = vld [vmem:[%s20112_s1 + $0xf94] sm:$0xf0]  ;;  %v10120_v59 = vor.u32 %v12944_v51, %v10119_v50  ;;  %v9847_v40 = vld [vmem:[%s20112_s1 + $0xc68] sm:$0xf]  ;;  %v7002_v63 = vadd.f32 %v7001_v56, %v6989_v43 }
 0x275   :  { %7240 = vmatpush.bf16.msrb.mxu0 %v9896_v21  ;;  %v12876_v61 = vld [vmem:[%s20112_s1 + $0xc74] sm:$0xf0]  ;;  %v9975_v62 = vld [vmem:[%s20112_s1 + $0xd68] sm:$0xf]  ;;  %v10248_v55 = vor.u32 %v12976_v44, %v10247_v52 }
 0x276   :  { %7253 = vmatpush.bf16.msrb.mxu1 %v10024_v23  ;;  %v12908_v3 = vld [vmem:[%s20112_s1 + $0xd74] sm:$0xf0]  ;;  %v10103_v8 = vld [vmem:[%s20112_s1 + $0xe68] sm:$0xf]  ;;  %v9848_v23 = vor.u32 %v12876_v61, %v9847_v40 }
 0x277   :  { %7266 = vmatpush.bf16.msrb.mxu2 %v10152_v58  ;;  %v12940_v19 = vld [vmem:[%s20112_s1 + $0xe74] sm:$0xf0]  ;;  %v10231_v20 = vld [vmem:[%s20112_s1 + $0xf68] sm:$0xf]  ;;  %v9976_v58 = vor.u32 %v12908_v3, %v9975_v62 }
 0x278   :  { %7279 = vmatpush.bf16.msrb.mxu3 %v10280_v10  ;;  %v12972_v21 = vld [vmem:[%s20112_s1 + $0xf74] sm:$0xf0]  ;;  %v10104_v11 = vor.u32 %v12940_v19, %v10103_v8  ;;  %v9831_v25 = vld [vmem:[%s20112_s1 + $0xc48] sm:$0xf]  ;;  %v7014_v35 = vpop.f32.mrf.mxu2 }
 0x279   :  { %7241 = vmatpush.bf16.msrb.mxu0 %v9880_v32  ;;  %v12872_v26 = vld [vmem:[%s20112_s1 + $0xc54] sm:$0xf0]  ;;  %v9959_v10 = vld [vmem:[%s20112_s1 + $0xd48] sm:$0xf]  ;;  %v10232_v31 = vor.u32 %v12972_v21, %v10231_v20  ;;  %v7015_v32 = vadd.f32 %v7014_v35, %v7002_v63  ;;  %v6990_v41 = vpop.f32.mrf.mxu0 }
 0x27a   :  { %7254 = vmatpush.bf16.msrb.mxu1 %v10008_v37  ;;  %v12904_v36 = vld [vmem:[%s20112_s1 + $0xd54] sm:$0xf0]  ;;  %v10087_v24 = vld [vmem:[%s20112_s1 + $0xe48] sm:$0xf]  ;;  %v7027_v37 = vpop.f32.mrf.mxu3  ;;  %v9832_v42 = vor.u32 %v12872_v26, %v9831_v25 }
 0x27b   :  { %7267 = vmatpush.bf16.msrb.mxu2 %v10136_v38  ;;  %v12936_v22 = vld [vmem:[%s20112_s1 + $0xe54] sm:$0xf0]  ;;  %v10215_v38 = vld [vmem:[%s20112_s1 + $0xf48] sm:$0xf]  ;;  %v17575_v45 = vadd.f32 %v7027_v37, %v7015_v32  ;;  %v9960_v50 = vor.u32 %v12904_v36, %v9959_v10 }
 0x27c   :  { %7280 = vmatpush.bf16.msrb.mxu3 %v10264_v30  ;;  %v12968_v39 = vld [vmem:[%s20112_s1 + $0xf54] sm:$0xf0]  ;;  %v7003_v30 = vpop.f32.mrf.mxu1  ;;  %v10088_v51 = vor.u32 %v12936_v22, %v10087_v24  ;;  %v9815_v33 = vld [vmem:[%s20112_s1 + $0xc28] sm:$0xf] }
 0x27d   :  { %7242 = vmatpush.bf16.msrb.mxu0 %v9864_v53  ;;  %v12868_v52 = vld [vmem:[%s20112_s1 + $0xc34] sm:$0xf0]  ;;  %v9943_v44 = vld [vmem:[%s20112_s1 + $0xd28] sm:$0xf]  ;;  %v10216_v43 = vor.u32 %v12968_v39, %v10215_v38 }
 0x27e   :  { %7255 = vmatpush.bf16.msrb.mxu1 %v9992_v57  ;;  %v12900_v53 = vld [vmem:[%s20112_s1 + $0xd34] sm:$0xf0]  ;;  %v10071_v56 = vld [vmem:[%s20112_s1 + $0xe28] sm:$0xf]  ;;  %v9816_v61 = vor.u32 %v12868_v52, %v9815_v33 }
 0x27f   :  { %7268 = vmatpush.bf16.msrb.mxu2 %v10120_v59  ;;  %v12932_v57 = vld [vmem:[%s20112_s1 + $0xe34] sm:$0xf0]  ;;  %v10199_v59 = vld [vmem:[%s20112_s1 + $0xf28] sm:$0xf]  ;;  %v9944_v63 = vor.u32 %v12900_v53, %v9943_v44 }
 0x280   :  { %7281 = vmatpush.bf16.msrb.mxu3 %v10248_v55  ;;  %v12964_v40 = vld [vmem:[%s20112_s1 + $0xf34] sm:$0xf0]  ;;  %v9799_v62 = vld [vmem:[%s20112_s1 + $0xc08] sm:$0xf]  ;;  %v10072_v3 = vor.u32 %v12932_v57, %v10071_v56  ;;  %v7016_v25 = vpop.f32.mrf.mxu2 }
 0x281   :  { %7243 = vmatpush.bf16.msrb.mxu0 %v9848_v23  ;;  %v12864_v55 = vld [vmem:[%s20112_s1 + $0xc14] sm:$0xf0]  ;;  %v9927_v8 = vld [vmem:[%s20112_s1 + $0xd08] sm:$0xf]  ;;  %v10200_v21 = vor.u32 %v12964_v40, %v10199_v59 }
 0x282   :  { %7256 = vmatpush.bf16.msrb.mxu1 %v9976_v58  ;;  %v12896_v19 = vld [vmem:[%s20112_s1 + $0xd14] sm:$0xf0]  ;;  %v10055_v20 = vld [vmem:[%s20112_s1 + $0xe08] sm:$0xf]  ;;  %v7029_v35 = vpop.f32.mrf.mxu3  ;;  %v9800_v36 = vor.u32 %v12864_v55, %v9799_v62 }
 0x283   :  { %7269 = vmatpush.bf16.msrb.mxu2 %v10104_v11  ;;  %v12928_v23 = vld [vmem:[%s20112_s1 + $0xe14] sm:$0xf0]  ;;  %v10183_v58 = vld [vmem:[%s20112_s1 + $0xf08] sm:$0xf]  ;;  %v9928_v37 = vor.u32 %v12896_v19, %v9927_v8 }
 0x284   :  { %7282 = vmatpush.bf16.msrb.mxu3 %v10232_v31  ;;  %v12960_v11 = vld [vmem:[%s20112_s1 + $0xf14] sm:$0xf0]  ;;  %v10423_v26 = vld [vmem:[%s20112_s1 + $0x10e8] sm:$0xf]  ;;  %v10056_v38 = vor.u32 %v12928_v23, %v10055_v20 }
 0x285   :  { %7244 = vmatpush.bf16.msrb.mxu0 %v9832_v42  ;;  %v13020_v10 = vld [vmem:[%s20112_s1 + $0x10f4] sm:$0xf0]  ;;  %v10551_v31 = vld [vmem:[%s20112_s1 + $0x11e8] sm:$0xf]  ;;  %v10184_v42 = vor.u32 %v12960_v11, %v10183_v58 }
 0x286   :  { %7257 = vmatpush.bf16.msrb.mxu1 %v9960_v50  ;;  %v13052_v24 = vld [vmem:[%s20112_s1 + $0x11f4] sm:$0xf0]  ;;  %v10679_v22 = vld [vmem:[%s20112_s1 + $0x12e8] sm:$0xf]  ;;  %v10424_v30 = vor.u32 %v13020_v10, %v10423_v26 }
 0x287   :  { %7270 = vmatpush.bf16.msrb.mxu2 %v10088_v51  ;;  %v13084_v32 = vld [vmem:[%s20112_s1 + $0x12f4] sm:$0xf0]  ;;  %v10807_v39 = vld [vmem:[%s20112_s1 + $0x13e8] sm:$0xf]  ;;  %v10552_v50 = vor.u32 %v13052_v24, %v10551_v31 }
 0x288   :  { %7283 = vmatpush.bf16.msrb.mxu3 %v10216_v43  ;;  %v13116_v41 = vld [vmem:[%s20112_s1 + $0x13f4] sm:$0xf0]  ;;  %v10680_v51 = vor.u32 %v13084_v32, %v10679_v22  ;;  %v10407_v33 = vld [vmem:[%s20112_s1 + $0x10c8] sm:$0xf] }
 0x289   :  { %7245 = vmatpush.bf16.msrb.mxu0 %v9816_v61  ;;  %v13016_v52 = vld [vmem:[%s20112_s1 + $0x10d4] sm:$0xf0]  ;;  %v10535_v44 = vld [vmem:[%s20112_s1 + $0x11c8] sm:$0xf]  ;;  %v10808_v43 = vor.u32 %v13116_v41, %v10807_v39 }
 0x28a   :  { %7258 = vmatpush.bf16.msrb.mxu1 %v9944_v63  ;;  %v13048_v53 = vld [vmem:[%s20112_s1 + $0x11d4] sm:$0xf0]  ;;  %v10663_v56 = vld [vmem:[%s20112_s1 + $0x12c8] sm:$0xf]  ;;  %v10408_v61 = vor.u32 %v13016_v52, %v10407_v33 }
 0x28b   :  { %7271 = vmatpush.bf16.msrb.mxu2 %v10072_v3  ;;  %v13080_v57 = vld [vmem:[%s20112_s1 + $0x12d4] sm:$0xf0]  ;;  %v10791_v59 = vld [vmem:[%s20112_s1 + $0x13c8] sm:$0xf]  ;;  %v10536_v62 = vor.u32 %v13048_v53, %v10535_v44 }
 0x28c   :  { %7284 = vmatpush.bf16.msrb.mxu3 %v10200_v21  ;;  %v13112_v40 = vld [vmem:[%s20112_s1 + $0x13d4] sm:$0xf0]  ;;  %v10664_v55 = vor.u32 %v13080_v57, %v10663_v56  ;;  %v10391_v63 = vld [vmem:[%s20112_s1 + $0x10a8] sm:$0xf] }
 0x28d   :  { %7246 = vmatpush.bf16.msrb.mxu0 %v9800_v36  ;;  %v13012_v3 = vld [vmem:[%s20112_s1 + $0x10b4] sm:$0xf0]  ;;  %v10519_v8 = vld [vmem:[%s20112_s1 + $0x11a8] sm:$0xf]  ;;  %v10792_v19 = vor.u32 %v13112_v40, %v10791_v59 }
 0x28e   :  { %7259 = vmatpush.bf16.msrb.mxu1 %v9928_v37  ;;  %v13044_v20 = vld [vmem:[%s20112_s1 + $0x11b4] sm:$0xf0]  ;;  %v10647_v21 = vld [vmem:[%s20112_s1 + $0x12a8] sm:$0xf]  ;;  %v10392_v25 = vor.u32 %v13012_v3, %v10391_v63 }
 0x28f   :  { %7272 = vmatpush.bf16.msrb.mxu2 %v10056_v38  ;;  %v13076_v23 = vld [vmem:[%s20112_s1 + $0x12b4] sm:$0xf0]  ;;  %v10775_v58 = vld [vmem:[%s20112_s1 + $0x13a8] sm:$0xf]  ;;  %v10520_v26 = vor.u32 %v13044_v20, %v10519_v8  ;;  %v7040_v38 = vpop.f32.mrf.mxu0 }
 0x290   :  { %7285 = vmatpush.bf16.msrb.mxu3 %v10184_v42  ;;  %7247 = vmatmul.bf16.vlgmr.msrb.gmra.mxu0 %v14441_v46  ;;  %v13108_v11 = vld [vmem:[%s20112_s1 + $0x13b4] sm:$0xf0]  ;;  %v10648_v10 = vor.u32 %v13076_v23, %v10647_v21  ;;  %v10375_v31 = vld [vmem:[%s20112_s1 + $0x1088] sm:$0xf]  ;;  %v7041_v42 = vadd.f32 %v7040_v38, %v17575_v45 }
 0x291   :  { %7291 = vmatpush.bf16.msra.mxu0 %v10424_v30  ;;  %7260 = vmatmul.bf16.vlgmr.msrb.gmra.mxu1 %v14445_v48  ;;  %v13008_v35 = vld [vmem:[%s20112_s1 + $0x1094] sm:$0xf0]  ;;  %v10503_v36 = vld [vmem:[%s20112_s1 + $0x1188] sm:$0xf]  ;;  %v10776_v24 = vor.u32 %v13108_v11, %v10775_v58 }
 0x292   :  { %7304 = vmatpush.bf16.msra.mxu1 %v10552_v50  ;;  %7273 = vmatmul.bf16.vlgmr.msrb.gmra.mxu2 %v14443_v47  ;;  %v13040_v22 = vld [vmem:[%s20112_s1 + $0x1194] sm:$0xf0]  ;;  %v10631_v32 = vld [vmem:[%s20112_s1 + $0x1288] sm:$0xf]  ;;  %v10376_v30 = vor.u32 %v13008_v35, %v10375_v31  ;;  %v7053_v50 = vpop.f32.mrf.mxu1 }
 0x293   :  { %7317 = vmatpush.bf16.msra.mxu2 %v10680_v51  ;;  %7286 = vmatmul.bf16.vlgmr.msrb.gmra.mxu3 %v14447_v49  ;;  %v13072_v37 = vld [vmem:[%s20112_s1 + $0x1294] sm:$0xf0]  ;;  %v10759_v39 = vld [vmem:[%s20112_s1 + $0x1388] sm:$0xf]  ;;  %v10504_v51 = vor.u32 %v13040_v22, %v10503_v36  ;;  %v7054_v53 = vadd.f32 %v7053_v50, %v7041_v42 }
 0x294   :  { %7330 = vmatpush.bf16.msra.mxu3 %v10808_v43  ;;  %v13104_v41 = vld [vmem:[%s20112_s1 + $0x1394] sm:$0xf0]  ;;  %v10632_v33 = vor.u32 %v13072_v37, %v10631_v32  ;;  %v10359_v52 = vld [vmem:[%s20112_s1 + $0x1068] sm:$0xf] }
 0x295   :  { %7292 = vmatpush.bf16.msra.mxu0 %v10408_v61  ;;  %v13004_v44 = vld [vmem:[%s20112_s1 + $0x1074] sm:$0xf0]  ;;  %v10487_v43 = vld [vmem:[%s20112_s1 + $0x1168] sm:$0xf]  ;;  %v10760_v45 = vor.u32 %v13104_v41, %v10759_v39  ;;  %v7066_v21 = vpop.f32.mrf.mxu2 }
 0x296   :  { %7305 = vmatpush.bf16.msra.mxu1 %v10536_v62  ;;  %v13036_v56 = vld [vmem:[%s20112_s1 + $0x1174] sm:$0xf0]  ;;  %v10615_v57 = vld [vmem:[%s20112_s1 + $0x1268] sm:$0xf]  ;;  %v10360_v62 = vor.u32 %v13004_v44, %v10359_v52 }
 0x297   :  { %7318 = vmatpush.bf16.msra.mxu2 %v10664_v55  ;;  %v13068_v59 = vld [vmem:[%s20112_s1 + $0x1274] sm:$0xf0]  ;;  %v10743_v40 = vld [vmem:[%s20112_s1 + $0x1368] sm:$0xf]  ;;  %v10488_v55 = vor.u32 %v13036_v56, %v10487_v43  ;;  %v7042_v35 = vpop.f32.mrf.mxu0 }
 0x298   :  { %7331 = vmatpush.bf16.msra.mxu3 %v10792_v19  ;;  %v13100_v61 = vld [vmem:[%s20112_s1 + $0x1374] sm:$0xf0]  ;;  %v10616_v63 = vor.u32 %v13068_v59, %v10615_v57  ;;  %v10343_v3 = vld [vmem:[%s20112_s1 + $0x1048] sm:$0xf] }
 0x299   :  { %7293 = vmatpush.bf16.msra.mxu0 %v10392_v25  ;;  %v13000_v8 = vld [vmem:[%s20112_s1 + $0x1054] sm:$0xf0]  ;;  %v10471_v19 = vld [vmem:[%s20112_s1 + $0x1148] sm:$0xf]  ;;  %v10744_v20 = vor.u32 %v13100_v61, %v10743_v40  ;;  %v7067_v25 = vadd.f32 %v7066_v21, %v7054_v53 }
 0x29a   :  { %7306 = vmatpush.bf16.msra.mxu1 %v10520_v26  ;;  %v13032_v23 = vld [vmem:[%s20112_s1 + $0x1154] sm:$0xf0]  ;;  %v10599_v58 = vld [vmem:[%s20112_s1 + $0x1248] sm:$0xf]  ;;  %v7079_v26 = vpop.f32.mrf.mxu3  ;;  %v10344_v36 = vor.u32 %v13000_v8, %v10343_v3 }
 0x29b   :  { %7319 = vmatpush.bf16.msra.mxu2 %v10648_v10  ;;  %v13064_v11 = vld [vmem:[%s20112_s1 + $0x1254] sm:$0xf0]  ;;  %v10727_v10 = vld [vmem:[%s20112_s1 + $0x1348] sm:$0xf]  ;;  %v17774_v22 = vadd.f32 %v7079_v26, %v7067_v25  ;;  %v10472_v32 = vor.u32 %v13032_v23, %v10471_v19 }
 0x29c   :  { %7332 = vmatpush.bf16.msra.mxu3 %v10776_v24  ;;  %v13096_v31 = vld [vmem:[%s20112_s1 + $0x1354] sm:$0xf0]  ;;  %v7055_v24 = vpop.f32.mrf.mxu1  ;;  %v10600_v37 = vor.u32 %v13064_v11, %v10599_v58  ;;  %v10327_v38 = vld [vmem:[%s20112_s1 + $0x1028] sm:$0xf] }
 0x29d   :  { %7294 = vmatpush.bf16.msra.mxu0 %v10376_v30  ;;  %v12996_v39 = vld [vmem:[%s20112_s1 + $0x1034] sm:$0xf0]  ;;  %v10455_v41 = vld [vmem:[%s20112_s1 + $0x1128] sm:$0xf]  ;;  %v10728_v42 = vor.u32 %v13096_v31, %v10727_v10  ;;  %v7068_v3 = vpop.f32.mrf.mxu2 }
 0x29e   :  { %7307 = vmatpush.bf16.msra.mxu1 %v10504_v51  ;;  %v13028_v30 = vld [vmem:[%s20112_s1 + $0x1134] sm:$0xf0]  ;;  %v10583_v50 = vld [vmem:[%s20112_s1 + $0x1228] sm:$0xf]  ;;  %v10328_v44 = vor.u32 %v12996_v39, %v10327_v38 }
 0x29f   :  { %7320 = vmatpush.bf16.msra.mxu2 %v10632_v33  ;;  %v13060_v51 = vld [vmem:[%s20112_s1 + $0x1234] sm:$0xf0]  ;;  %v10711_v33 = vld [vmem:[%s20112_s1 + $0x1328] sm:$0xf]  ;;  %v10456_v53 = vor.u32 %v13028_v30, %v10455_v41 }
 0x2a0   :  { %7333 = vmatpush.bf16.msra.mxu3 %v10760_v45  ;;  %v13092_v52 = vld [vmem:[%s20112_s1 + $0x1334] sm:$0xf0]  ;;  %v10311_v43 = vld [vmem:[%s20112_s1 + $0x1008] sm:$0xf]  ;;  %v10584_v56 = vor.u32 %v13060_v51, %v10583_v50 }
 0x2a1   :  { %7295 = vmatpush.bf16.msra.mxu0 %v10360_v62  ;;  %v12992_v45 = vld [vmem:[%s20112_s1 + $0x1014] sm:$0xf0]  ;;  %v10439_v57 = vld [vmem:[%s20112_s1 + $0x1108] sm:$0xf]  ;;  %v10712_v61 = vor.u32 %v13092_v52, %v10711_v33 }
 0x2a2   :  { %7308 = vmatpush.bf16.msra.mxu1 %v10488_v55  ;;  %v13024_v59 = vld [vmem:[%s20112_s1 + $0x1114] sm:$0xf0]  ;;  %v10567_v40 = vld [vmem:[%s20112_s1 + $0x1208] sm:$0xf]  ;;  %v7081_v21 = vpop.f32.mrf.mxu3  ;;  %v10312_v23 = vor.u32 %v12992_v45, %v10311_v43 }
 0x2a3   :  { %7321 = vmatpush.bf16.msra.mxu2 %v10616_v63  ;;  %v13056_v62 = vld [vmem:[%s20112_s1 + $0x1214] sm:$0xf0]  ;;  %v10695_v55 = vld [vmem:[%s20112_s1 + $0x1308] sm:$0xf]  ;;  %v10440_v26 = vor.u32 %v13024_v59, %v10439_v57 }
 0x2a4   :  { %7334 = vmatpush.bf16.msra.mxu3 %v10744_v20  ;;  %v13088_v63 = vld [vmem:[%s20112_s1 + $0x1314] sm:$0xf0]  ;;  %v10935_v8 = vld [vmem:[%s20112_s1 + $0x14e8] sm:$0xf]  ;;  %v10568_v10 = vor.u32 %v13056_v62, %v10567_v40 }
 0x2a5   :  { %7296 = vmatpush.bf16.msra.mxu0 %v10344_v36  ;;  %v13148_v19 = vld [vmem:[%s20112_s1 + $0x14f4] sm:$0xf0]  ;;  %v11063_v20 = vld [vmem:[%s20112_s1 + $0x15e8] sm:$0xf]  ;;  %v10696_v36 = vor.u32 %v13088_v63, %v10695_v55 }
 0x2a6   :  { %7309 = vmatpush.bf16.msra.mxu1 %v10472_v32  ;;  %v13180_v58 = vld [vmem:[%s20112_s1 + $0x15f4] sm:$0xf0]  ;;  %v11191_v11 = vld [vmem:[%s20112_s1 + $0x16e8] sm:$0xf]  ;;  %v10936_v24 = vor.u32 %v13148_v19, %v10935_v8 }
 0x2a7   :  { %7322 = vmatpush.bf16.msra.mxu2 %v10600_v37  ;;  %v13212_v25 = vld [vmem:[%s20112_s1 + $0x16f4] sm:$0xf0]  ;;  %v11319_v31 = vld [vmem:[%s20112_s1 + $0x17e8] sm:$0xf]  ;;  %v11064_v32 = vor.u32 %v13180_v58, %v11063_v20  ;;  %v13544_v58 = vld [vmem:[%s20113_s2] sm:$0xf] }
 0x2a8   :  { %7335 = vmatpush.bf16.msra.mxu3 %v10728_v42  ;;  %v13244_v35 = vld [vmem:[%s20112_s1 + $0x17f4] sm:$0xf0]  ;;  %v11192_v37 = vor.u32 %v13212_v25, %v11191_v11  ;;  %v10919_v38 = vld [vmem:[%s20112_s1 + $0x14c8] sm:$0xf]  ;;  %v1053_v11 = vperm.slane %v13544_v58, 2 }
 0x2a9   :  { %7297 = vmatpush.bf16.msra.mxu0 %v10328_v44  ;;  %v13144_v39 = vld [vmem:[%s20112_s1 + $0x14d4] sm:$0xf0]  ;;  %v11047_v41 = vld [vmem:[%s20112_s1 + $0x15c8] sm:$0xf]  ;;  %v11320_v42 = vor.u32 %v13244_v35, %v11319_v31 }
 0x2aa   :  { %7310 = vmatpush.bf16.msra.mxu1 %v10456_v53  ;;  %v13176_v30 = vld [vmem:[%s20112_s1 + $0x15d4] sm:$0xf0]  ;;  %v11175_v50 = vld [vmem:[%s20112_s1 + $0x16c8] sm:$0xf]  ;;  %v10920_v44 = vor.u32 %v13144_v39, %v10919_v38 }
 0x2ab   :  { %7323 = vmatpush.bf16.msra.mxu2 %v10584_v56  ;;  %v13208_v51 = vld [vmem:[%s20112_s1 + $0x16d4] sm:$0xf0]  ;;  %v11303_v33 = vld [vmem:[%s20112_s1 + $0x17c8] sm:$0xf]  ;;  %v11048_v43 = vor.u32 %v13176_v30, %v11047_v41 }
 0x2ac   :  { %7336 = vmatpush.bf16.msra.mxu3 %v10712_v61  ;;  %v13240_v52 = vld [vmem:[%s20112_s1 + $0x17d4] sm:$0xf0]  ;;  %v11176_v45 = vor.u32 %v13208_v51, %v11175_v50  ;;  %v10903_v53 = vld [vmem:[%s20112_s1 + $0x14a8] sm:$0xf] }
 0x2ad   :  { %7298 = vmatpush.bf16.msra.mxu0 %v10312_v23  ;;  %v13140_v56 = vld [vmem:[%s20112_s1 + $0x14b4] sm:$0xf0]  ;;  %v11031_v57 = vld [vmem:[%s20112_s1 + $0x15a8] sm:$0xf]  ;;  %v11304_v59 = vor.u32 %v13240_v52, %v11303_v33 }
 0x2ae   :  { %7311 = vmatpush.bf16.msra.mxu1 %v10440_v26  ;;  %v13172_v40 = vld [vmem:[%s20112_s1 + $0x15b4] sm:$0xf0]  ;;  %v11159_v61 = vld [vmem:[%s20112_s1 + $0x16a8] sm:$0xf]  ;;  %v10904_v3 = vor.u32 %v13140_v56, %v10903_v53  ;;  %v7105_v50 = vpop.f32.mrf.mxu1 }
 0x2af   :  { %7324 = vmatpush.bf16.msra.mxu2 %v10568_v10  ;;  %v13204_v62 = vld [vmem:[%s20112_s1 + $0x16b4] sm:$0xf0]  ;;  %v11287_v55 = vld [vmem:[%s20112_s1 + $0x17a8] sm:$0xf]  ;;  %v11032_v19 = vor.u32 %v13172_v40, %v11031_v57 }
 0x2b0   :  { %7337 = vmatpush.bf16.msra.mxu3 %v10696_v36  ;;  %7299 = vmatmul.bf16.vlgmr.msra.gmra.mxu0 %v14678_v9  ;;  %v13236_v63 = vld [vmem:[%s20112_s1 + $0x17b4] sm:$0xf0]  ;;  %v10887_v8 = vld [vmem:[%s20112_s1 + $0x1488] sm:$0xf]  ;;  %v11160_v20 = vor.u32 %v13204_v62, %v11159_v61 }
 0x2b1   :  { %7343 = vmatpush.bf16.msrb.mxu0 %v10936_v24  ;;  %7312 = vmatmul.bf16.vlgmr.msra.gmra.mxu1 %v14688_v14  ;;  %v13136_v21 = vld [vmem:[%s20112_s1 + $0x1494] sm:$0xf0]  ;;  %v11015_v23 = vld [vmem:[%s20112_s1 + $0x1588] sm:$0xf]  ;;  %v11288_v25 = vor.u32 %v13236_v63, %v11287_v55 }
 0x2b2   :  { %7356 = vmatpush.bf16.msrb.mxu1 %v11064_v32  ;;  %7325 = vmatmul.bf16.vlgmr.msra.gmra.mxu2 %v14686_v13  ;;  %v13168_v26 = vld [vmem:[%s20112_s1 + $0x1594] sm:$0xf0]  ;;  %v11143_v10 = vld [vmem:[%s20112_s1 + $0x1688] sm:$0xf]  ;;  %v10888_v24 = vor.u32 %v13136_v21, %v10887_v8  ;;  %v7092_v32 = vpop.f32.mrf.mxu0 }
 0x2b3   :  { %7369 = vmatpush.bf16.msrb.mxu2 %v11192_v37  ;;  %7338 = vmatmul.bf16.vlgmr.msra.gmra.mxu3 %v14690_v18  ;;  %v13200_v31 = vld [vmem:[%s20112_s1 + $0x1694] sm:$0xf0]  ;;  %v11271_v35 = vld [vmem:[%s20112_s1 + $0x1788] sm:$0xf]  ;;  %v11016_v37 = vor.u32 %v13168_v26, %v11015_v23  ;;  %v7093_v30 = vadd.f32 %v7092_v32, %v1053_v11 }
 0x2b4   :  { %7382 = vmatpush.bf16.msrb.mxu3 %v11320_v42  ;;  %v13232_v36 = vld [vmem:[%s20112_s1 + $0x1794] sm:$0xf0]  ;;  %v11144_v38 = vor.u32 %v13200_v31, %v11143_v10  ;;  %v10871_v39 = vld [vmem:[%s20112_s1 + $0x1468] sm:$0xf] }
 0x2b5   :  { %7344 = vmatpush.bf16.msrb.mxu0 %v10920_v44  ;;  %v13132_v41 = vld [vmem:[%s20112_s1 + $0x1474] sm:$0xf0]  ;;  %v10999_v42 = vld [vmem:[%s20112_s1 + $0x1568] sm:$0xf]  ;;  %v11272_v51 = vor.u32 %v13232_v36, %v11271_v35  ;;  %v7106_v53 = vadd.f32 %v7105_v50, %v7093_v30  ;;  %v7118_v55 = vpop.f32.mrf.mxu2 }
 0x2b6   :  { %7357 = vmatpush.bf16.msrb.mxu1 %v11048_v43  ;;  %v13164_v33 = vld [vmem:[%s20112_s1 + $0x1574] sm:$0xf0]  ;;  %v11127_v52 = vld [vmem:[%s20112_s1 + $0x1668] sm:$0xf]  ;;  %v10872_v56 = vor.u32 %v13132_v41, %v10871_v39  ;;  %v7131_v21 = vpop.f32.mrf.mxu3  ;;  %v7107_v32 = vpop.f32.mrf.mxu1 }
 0x2b7   :  { %7370 = vmatpush.bf16.msrb.mxu2 %v11176_v45  ;;  %v13196_v44 = vld [vmem:[%s20112_s1 + $0x1674] sm:$0xf0]  ;;  %v11255_v43 = vld [vmem:[%s20112_s1 + $0x1768] sm:$0xf]  ;;  %v11000_v57 = vor.u32 %v13164_v33, %v10999_v42 }
 0x2b8   :  { %7383 = vmatpush.bf16.msrb.mxu3 %v11304_v59  ;;  %v13228_v45 = vld [vmem:[%s20112_s1 + $0x1774] sm:$0xf0]  ;;  %v11128_v59 = vor.u32 %v13196_v44, %v11127_v52  ;;  %v10855_v40 = vld [vmem:[%s20112_s1 + $0x1448] sm:$0xf] }
 0x2b9   :  { %7345 = vmatpush.bf16.msrb.mxu0 %v10904_v3  ;;  %v13128_v61 = vld [vmem:[%s20112_s1 + $0x1454] sm:$0xf0]  ;;  %v10983_v62 = vld [vmem:[%s20112_s1 + $0x1548] sm:$0xf]  ;;  %v11256_v63 = vor.u32 %v13228_v45, %v11255_v43 }
 0x2ba   :  { %7358 = vmatpush.bf16.msrb.mxu1 %v11032_v19  ;;  %v13160_v3 = vld [vmem:[%s20112_s1 + $0x1554] sm:$0xf0]  ;;  %v11111_v8 = vld [vmem:[%s20112_s1 + $0x1648] sm:$0xf]  ;;  %v10856_v11 = vor.u32 %v13128_v61, %v10855_v40  ;;  %v7094_v26 = vpop.f32.mrf.mxu0 }
 0x2bb   :  { %7371 = vmatpush.bf16.msrb.mxu2 %v11160_v20  ;;  %v13192_v19 = vld [vmem:[%s20112_s1 + $0x1654] sm:$0xf0]  ;;  %v7119_v20 = vadd.f32 %v7118_v55, %v7106_v53  ;;  %v11239_v23 = vld [vmem:[%s20112_s1 + $0x1748] sm:$0xf]  ;;  %v10984_v10 = vor.u32 %v13160_v3, %v10983_v62 }
 0x2bc   :  { %7384 = vmatpush.bf16.msrb.mxu3 %v11288_v25  ;;  %v13224_v58 = vld [vmem:[%s20112_s1 + $0x1754] sm:$0xf0]  ;;  %v11112_v31 = vor.u32 %v13192_v19, %v11111_v8  ;;  %v10839_v35 = vld [vmem:[%s20112_s1 + $0x1428] sm:$0xf] }
 0x2bd   :  { %7346 = vmatpush.bf16.msrb.mxu0 %v10888_v24  ;;  %v17975_v25 = vadd.f32 %v7131_v21, %v7119_v20  ;;  %v13124_v36 = vld [vmem:[%s20112_s1 + $0x1434] sm:$0xf0]  ;;  %v10967_v24 = vld [vmem:[%s20112_s1 + $0x1528] sm:$0xf] }
 0x2be   :  { %7359 = vmatpush.bf16.msrb.mxu1 %v11016_v37  ;;  %v11240_v37 = vor.u32 %v13224_v58, %v11239_v23  ;;  %v11095_v39 = vld [vmem:[%s20112_s1 + $0x1628] sm:$0xf]  ;;  %v13188_v41 = vld [vmem:[%s20112_s1 + $0x1634] sm:$0xf0]  ;;  %v10840_v50 = vor.u32 %v13124_v36, %v10839_v35  ;;  %v7133_v62 = vpop.f32.mrf.mxu3 }
 0x2bf   :  { %7372 = vmatpush.bf16.msrb.mxu2 %v11144_v38  ;;  %v13156_v38 = vld [vmem:[%s20112_s1 + $0x1534] sm:$0xf0]  ;;  %v11223_v42 = vld [vmem:[%s20112_s1 + $0x1728] sm:$0xf]  ;;  %v11096_v44 = vor.u32 %v13188_v41, %v11095_v39 }
 0x2c0   :  { %7385 = vmatpush.bf16.msrb.mxu3 %v11272_v51  ;;  %v13220_v30 = vld [vmem:[%s20112_s1 + $0x1734] sm:$0xf0]  ;;  %v10823_v51 = vld [vmem:[%s20112_s1 + $0x1408] sm:$0xf]  ;;  %v10968_v52 = vor.u32 %v13156_v38, %v10967_v24 }
 0x2c1   :  { %7347 = vmatpush.bf16.msrb.mxu0 %v10872_v56  ;;  %v13120_v33 = vld [vmem:[%s20112_s1 + $0x1414] sm:$0xf0]  ;;  %v10951_v43 = vld [vmem:[%s20112_s1 + $0x1508] sm:$0xf]  ;;  %v7120_v56 = vpop.f32.mrf.mxu2 }
 0x2c2   :  { %7360 = vmatpush.bf16.msrb.mxu1 %v11000_v57  ;;  %v13152_v45 = vld [vmem:[%s20112_s1 + $0x1514] sm:$0xf0]  ;;  %v11079_v53 = vld [vmem:[%s20112_s1 + $0x1608] sm:$0xf]  ;;  %v11224_v57 = vor.u32 %v13220_v30, %v11223_v42  ;;  %v10824_v8 = vor.u32 %v13120_v33, %v10823_v51 }
 0x2c3   :  { %7373 = vmatpush.bf16.msrb.mxu2 %v11128_v59  ;;  %v13184_v59 = vld [vmem:[%s20112_s1 + $0x1614] sm:$0xf0]  ;;  %v11207_v40 = vld [vmem:[%s20112_s1 + $0x1708] sm:$0xf]  ;;  %v10952_v23 = vor.u32 %v13152_v45, %v10951_v43 }
 0x2c4   :  { %7386 = vmatpush.bf16.msrb.mxu3 %v11256_v63  ;;  %v13216_v61 = vld [vmem:[%s20112_s1 + $0x1714] sm:$0xf0]  ;;  %v11447_v55 = vld [vmem:[%s20112_s1 + $0x18e8] sm:$0xf]  ;;  %v11080_v58 = vor.u32 %v13184_v59, %v11079_v53 }
 0x2c5   :  { %7348 = vmatpush.bf16.msrb.mxu0 %v10856_v11  ;;  %v13276_v63 = vld [vmem:[%s20112_s1 + $0x18f4] sm:$0xf0]  ;;  %v11575_v3 = vld [vmem:[%s20112_s1 + $0x19e8] sm:$0xf] }
 0x2c6   :  { %7361 = vmatpush.bf16.msrb.mxu1 %v10984_v10  ;;  %v13308_v19 = vld [vmem:[%s20112_s1 + $0x19f4] sm:$0xf0]  ;;  %v11703_v20 = vld [vmem:[%s20112_s1 + $0x1ae8] sm:$0xf]  ;;  %v11208_v10 = vor.u32 %v13216_v61, %v11207_v40 }
 0x2c7   :  { %7374 = vmatpush.bf16.msrb.mxu2 %v11112_v31  ;;  %v13340_v21 = vld [vmem:[%s20112_s1 + $0x1af4] sm:$0xf0]  ;;  %v11831_v11 = vld [vmem:[%s20112_s1 + $0x1be8] sm:$0xf]  ;;  %v11448_v31 = vor.u32 %v13276_v63, %v11447_v55  ;;  %v11576_v35 = vor.u32 %v13308_v19, %v11575_v3 }
 0x2c8   :  { %7387 = vmatpush.bf16.msrb.mxu3 %v11240_v37  ;;  %v13372_v26 = vld [vmem:[%s20112_s1 + $0x1bf4] sm:$0xf0]  ;;  %v11704_v36 = vor.u32 %v13340_v21, %v11703_v20  ;;  %v11431_v24 = vld [vmem:[%s20112_s1 + $0x18c8] sm:$0xf] }
 0x2c9   :  { %7349 = vmatpush.bf16.msrb.mxu0 %v10840_v50  ;;  %v13272_v32 = vld [vmem:[%s20112_s1 + $0x18d4] sm:$0xf0]  ;;  %v11559_v37 = vld [vmem:[%s20112_s1 + $0x19c8] sm:$0xf]  ;;  %v11832_v38 = vor.u32 %v13372_v26, %v11831_v11 }
 0x2ca   :  { %7362 = vmatpush.bf16.msrb.mxu1 %v10968_v52  ;;  %v13304_v39 = vld [vmem:[%s20112_s1 + $0x19d4] sm:$0xf0]  ;;  %v11687_v41 = vld [vmem:[%s20112_s1 + $0x1ac8] sm:$0xf]  ;;  %v11432_v51 = vor.u32 %v13272_v32, %v11431_v24 }
 0x2cb   :  { %7375 = vmatpush.bf16.msrb.mxu2 %v11096_v44  ;;  %v13336_v42 = vld [vmem:[%s20112_s1 + $0x1ad4] sm:$0xf0]  ;;  %v11815_v30 = vld [vmem:[%s20112_s1 + $0x1bc8] sm:$0xf]  ;;  %v11560_v33 = vor.u32 %v13304_v39, %v11559_v37 }
 0x2cc   :  { %7388 = vmatpush.bf16.msrb.mxu3 %v11224_v57  ;;  %v13368_v50 = vld [vmem:[%s20112_s1 + $0x1bd4] sm:$0xf0]  ;;  %v11688_v52 = vor.u32 %v13336_v42, %v11687_v41  ;;  %v11415_v44 = vld [vmem:[%s20112_s1 + $0x18a8] sm:$0xf] }
 0x2cd   :  { %7350 = vmatpush.bf16.msrb.mxu0 %v10824_v8  ;;  %v13268_v43 = vld [vmem:[%s20112_s1 + $0x18b4] sm:$0xf0]  ;;  %v11543_v45 = vld [vmem:[%s20112_s1 + $0x19a8] sm:$0xf]  ;;  %v11816_v53 = vor.u32 %v13368_v50, %v11815_v30 }
 0x2ce   :  { %7363 = vmatpush.bf16.msrb.mxu1 %v10952_v23  ;;  %v13300_v56 = vld [vmem:[%s20112_s1 + $0x19b4] sm:$0xf0]  ;;  %v11671_v57 = vld [vmem:[%s20112_s1 + $0x1aa8] sm:$0xf]  ;;  %v11416_v62 = vor.u32 %v13268_v43, %v11415_v44  ;;  %v7157_v39 = vpop.f32.mrf.mxu1 }
 0x2cf   :  { %7376 = vmatpush.bf16.msrb.mxu2 %v11080_v58  ;;  %v13332_v59 = vld [vmem:[%s20112_s1 + $0x1ab4] sm:$0xf0]  ;;  %v11799_v40 = vld [vmem:[%s20112_s1 + $0x1ba8] sm:$0xf]  ;;  %v11544_v55 = vor.u32 %v13300_v56, %v11543_v45 }
 0x2d0   :  { %7389 = vmatpush.bf16.msrb.mxu3 %v11208_v10  ;;  %7351 = vmatmul.bf16.vlgmr.msrb.gmra.mxu0 %v14855_v4  ;;  %v13364_v61 = vld [vmem:[%s20112_s1 + $0x1bb4] sm:$0xf0]  ;;  %v11672_v63 = vor.u32 %v13332_v59, %v11671_v57  ;;  %v11399_v3 = vld [vmem:[%s20112_s1 + $0x1888] sm:$0xf] }
 0x2d1   :  { %7395 = vmatpush.bf16.msra.mxu0 %v11448_v31  ;;  %7364 = vmatmul.bf16.vlgmr.msrb.gmra.mxu1 %v14859_v6  ;;  %v13264_v8 = vld [vmem:[%s20112_s1 + $0x1894] sm:$0xf0]  ;;  %v11527_v19 = vld [vmem:[%s20112_s1 + $0x1988] sm:$0xf]  ;;  %v11800_v20 = vor.u32 %v13364_v61, %v11799_v40  ;;  %v7144_v31 = vpop.f32.mrf.mxu0 }
 0x2d2   :  { %7408 = vmatpush.bf16.msra.mxu1 %v11576_v35  ;;  %7377 = vmatmul.bf16.vlgmr.msrb.gmra.mxu2 %v14857_v5  ;;  %v13296_v21 = vld [vmem:[%s20112_s1 + $0x1994] sm:$0xf0]  ;;  %v11655_v23 = vld [vmem:[%s20112_s1 + $0x1a88] sm:$0xf]  ;;  %v11400_v10 = vor.u32 %v13264_v8, %v11399_v3 }
 0x2d3   :  { %7421 = vmatpush.bf16.msra.mxu2 %v11704_v36  ;;  %7390 = vmatmul.bf16.vlgmr.msrb.gmra.mxu3 %v14861_v7  ;;  %v13328_v58 = vld [vmem:[%s20112_s1 + $0x1a94] sm:$0xf0]  ;;  %v11783_v11 = vld [vmem:[%s20112_s1 + $0x1b88] sm:$0xf]  ;;  %v11528_v35 = vor.u32 %v13296_v21, %v11527_v19 }
 0x2d4   :  { %7434 = vmatpush.bf16.msra.mxu3 %v11832_v38  ;;  %v13360_v26 = vld [vmem:[%s20112_s1 + $0x1b94] sm:$0xf0]  ;;  %v11656_v36 = vor.u32 %v13328_v58, %v11655_v23  ;;  %v11383_v24 = vld [vmem:[%s20112_s1 + $0x1868] sm:$0xf]  ;;  %v7145_v38 = vadd.f32 %v7144_v31, %v17975_v25 }
 0x2d5   :  { %7396 = vmatpush.bf16.msra.mxu0 %v11432_v51  ;;  %v13260_v32 = vld [vmem:[%s20112_s1 + $0x1874] sm:$0xf0]  ;;  %v11511_v37 = vld [vmem:[%s20112_s1 + $0x1968] sm:$0xf]  ;;  %v11784_v41 = vor.u32 %v13360_v26, %v11783_v11  ;;  %v7170_v57 = vpop.f32.mrf.mxu2 }
 0x2d6   :  { %7409 = vmatpush.bf16.msra.mxu1 %v11560_v33  ;;  %v13292_v42 = vld [vmem:[%s20112_s1 + $0x1974] sm:$0xf0]  ;;  %v11639_v30 = vld [vmem:[%s20112_s1 + $0x1a68] sm:$0xf]  ;;  %v7158_v33 = vadd.f32 %v7157_v39, %v7145_v38  ;;  %v7159_v31 = vpop.f32.mrf.mxu1 }
 0x2d7   :  { %7422 = vmatpush.bf16.msra.mxu2 %v11688_v52  ;;  %v13324_v50 = vld [vmem:[%s20112_s1 + $0x1a74] sm:$0xf0]  ;;  %v11767_v51 = vld [vmem:[%s20112_s1 + $0x1b68] sm:$0xf]  ;;  %v11384_v52 = vor.u32 %v13260_v32, %v11383_v24  ;;  %v11512_v44 = vor.u32 %v13292_v42, %v11511_v37 }
 0x2d8   :  { %7435 = vmatpush.bf16.msra.mxu3 %v11816_v53  ;;  %v13356_v25 = vld [vmem:[%s20112_s1 + $0x1b74] sm:$0xf0]  ;;  %v11640_v43 = vor.u32 %v13324_v50, %v11639_v30  ;;  %v11367_v45 = vld [vmem:[%s20112_s1 + $0x1848] sm:$0xf] }
 0x2d9   :  { %7397 = vmatpush.bf16.msra.mxu0 %v11416_v62  ;;  %v13256_v53 = vld [vmem:[%s20112_s1 + $0x1854] sm:$0xf0]  ;;  %v11495_v56 = vld [vmem:[%s20112_s1 + $0x1948] sm:$0xf]  ;;  %v11768_v59 = vor.u32 %v13356_v25, %v11767_v51  ;;  %v7146_v21 = vpop.f32.mrf.mxu0 }
 0x2da   :  { %7410 = vmatpush.bf16.msra.mxu1 %v11544_v55  ;;  %v13288_v40 = vld [vmem:[%s20112_s1 + $0x1954] sm:$0xf0]  ;;  %v11623_v61 = vld [vmem:[%s20112_s1 + $0x1a48] sm:$0xf]  ;;  %v7171_v55 = vadd.f32 %v7170_v57, %v7158_v33  ;;  %v11368_v19 = vor.u32 %v13256_v53, %v11367_v45 }
 0x2db   :  { %7423 = vmatpush.bf16.msra.mxu2 %v11672_v63  ;;  %v13320_v62 = vld [vmem:[%s20112_s1 + $0x1a54] sm:$0xf0]  ;;  %v7183_v63 = vpop.f32.mrf.mxu3  ;;  %v11751_v3 = vld [vmem:[%s20112_s1 + $0x1b48] sm:$0xf]  ;;  %v11496_v23 = vor.u32 %v13288_v40, %v11495_v56 }
 0x2dc   :  { %7436 = vmatpush.bf16.msra.mxu3 %v11800_v20  ;;  %v13352_v8 = vld [vmem:[%s20112_s1 + $0x1b54] sm:$0xf0]  ;;  %v18174_v20 = vadd.f32 %v7183_v63, %v7171_v55  ;;  %v11624_v58 = vor.u32 %v13320_v62, %v11623_v61  ;;  %v11351_v11 = vld [vmem:[%s20112_s1 + $0x1828] sm:$0xf] }
 0x2dd   :  { %7398 = vmatpush.bf16.msra.mxu0 %v11400_v10  ;;  %v13252_v26 = vld [vmem:[%s20112_s1 + $0x1834] sm:$0xf0]  ;;  %v11479_v10 = vld [vmem:[%s20112_s1 + $0x1928] sm:$0xf] }
 0x2de   :  { %7411 = vmatpush.bf16.msra.mxu1 %v11528_v35  ;;  %v11752_v35 = vor.u32 %v13352_v8, %v11751_v3  ;;  %v11607_v24 = vld [vmem:[%s20112_s1 + $0x1a28] sm:$0xf]  ;;  %v13316_v32 = vld [vmem:[%s20112_s1 + $0x1a34] sm:$0xf0]  ;;  %v11352_v39 = vor.u32 %v13252_v26, %v11351_v11 }
 0x2df   :  { %7424 = vmatpush.bf16.msra.mxu2 %v11656_v36  ;;  %v13284_v36 = vld [vmem:[%s20112_s1 + $0x1934] sm:$0xf0]  ;;  %v11735_v37 = vld [vmem:[%s20112_s1 + $0x1b28] sm:$0xf]  ;;  %v11608_v50 = vor.u32 %v13316_v32, %v11607_v24 }
 0x2e0   :  { %7437 = vmatpush.bf16.msra.mxu3 %v11784_v41  ;;  %v13348_v38 = vld [vmem:[%s20112_s1 + $0x1b34] sm:$0xf0]  ;;  %v11335_v41 = vld [vmem:[%s20112_s1 + $0x1808] sm:$0xf]  ;;  %v11480_v30 = vor.u32 %v13284_v36, %v11479_v10 }
 0x2e1   :  { %7399 = vmatpush.bf16.msra.mxu0 %v11384_v52  ;;  %v13248_v42 = vld [vmem:[%s20112_s1 + $0x1814] sm:$0xf0]  ;;  %v11463_v51 = vld [vmem:[%s20112_s1 + $0x1908] sm:$0xf]  ;;  %v7172_v52 = vpop.f32.mrf.mxu2 }
 0x2e2   :  { %7412 = vmatpush.bf16.msra.mxu1 %v11512_v44  ;;  %v13280_v25 = vld [vmem:[%s20112_s1 + $0x1914] sm:$0xf0]  ;;  %v11591_v33 = vld [vmem:[%s20112_s1 + $0x1a08] sm:$0xf]  ;;  %v11736_v44 = vor.u32 %v13348_v38, %v11735_v37  ;;  %v11336_v61 = vor.u32 %v13248_v42, %v11335_v41 }
 0x2e3   :  { %7425 = vmatpush.bf16.msra.mxu2 %v11640_v43  ;;  %v13312_v43 = vld [vmem:[%s20112_s1 + $0x1a14] sm:$0xf0]  ;;  %v11719_v45 = vld [vmem:[%s20112_s1 + $0x1b08] sm:$0xf]  ;;  %v7185_v56 = vpop.f32.mrf.mxu3  ;;  %v11464_v3 = vor.u32 %v13280_v25, %v11463_v51 }
 0x2e4   :  { %7438 = vmatpush.bf16.msra.mxu3 %v11768_v59  ;;  %v13344_v53 = vld [vmem:[%s20112_s1 + $0x1b14] sm:$0xf0]  ;;  %v11959_v57 = vld [vmem:[%s20112_s1 + $0x1ce8] sm:$0xf]  ;;  %v11592_v8 = vor.u32 %v13312_v43, %v11591_v33  ;;  %v13545_v33 = vld [vmem:[#allocation1] sm:$0xff] }
 0x2e5   :  { %7400 = vmatpush.bf16.msra.mxu0 %v11368_v19  ;;  %v13404_v59 = vld [vmem:[%s20112_s1 + $0x1cf4] sm:$0xf0]  ;;  %v12087_v40 = vld [vmem:[%s20112_s1 + $0x1de8] sm:$0xf] }
 0x2e6   :  { %7413 = vmatpush.bf16.msra.mxu1 %v11496_v23  ;;  %v13436_v62 = vld [vmem:[%s20112_s1 + $0x1df4] sm:$0xf0]  ;;  %v12215_v55 = vld [vmem:[%s20112_s1 + $0x1ee8] sm:$0xf]  ;;  %v11720_v23 = vor.u32 %v13344_v53, %v11719_v45 }
 0x2e7   :  { %7426 = vmatpush.bf16.msra.mxu2 %v11624_v58  ;;  %v13468_v63 = vld [vmem:[%s20112_s1 + $0x1ef4] sm:$0xf0]  ;;  %v12343_v19 = vld [vmem:[%s20112_s1 + $0x1fe8] sm:$0xf]  ;;  %v11960_v58 = vor.u32 %v13404_v59, %v11959_v57  ;;  %v12088_v11 = vor.u32 %v13436_v62, %v12087_v40 }
 0x2e8   :  { %7439 = vmatpush.bf16.msra.mxu3 %v11752_v35  ;;  %v13500_v21 = vld [vmem:[%s20112_s1 + $0x1ff4] sm:$0xf0]  ;;  %v12216_v26 = vor.u32 %v13468_v63, %v12215_v55  ;;  %v11943_v10 = vld [vmem:[%s20112_s1 + $0x1cc8] sm:$0xf] }
 0x2e9   :  { %7401 = vmatpush.bf16.msra.mxu0 %v11352_v39  ;;  %v13400_v31 = vld [vmem:[%s20112_s1 + $0x1cd4] sm:$0xf0]  ;;  %v12071_v35 = vld [vmem:[%s20112_s1 + $0x1dc8] sm:$0xf]  ;;  %v12344_v36 = vor.u32 %v13500_v21, %v12343_v19 }
 0x2ea   :  { %7414 = vmatpush.bf16.msra.mxu1 %v11480_v30  ;;  %v13432_v24 = vld [vmem:[%s20112_s1 + $0x1dd4] sm:$0xf0]  ;;  %v12199_v32 = vld [vmem:[%s20112_s1 + $0x1ec8] sm:$0xf]  ;;  %v11944_v41 = vor.u32 %v13400_v31, %v11943_v10 }
 0x2eb   :  { %7427 = vmatpush.bf16.msra.mxu2 %v11608_v50  ;;  %v13464_v37 = vld [vmem:[%s20112_s1 + $0x1ed4] sm:$0xf0]  ;;  %v12327_v38 = vld [vmem:[%s20112_s1 + $0x1fc8] sm:$0xf]  ;;  %v12072_v42 = vor.u32 %v13432_v24, %v12071_v35 }
 0x2ec   :  { %7440 = vmatpush.bf16.msra.mxu3 %v11736_v44  ;;  %v13496_v39 = vld [vmem:[%s20112_s1 + $0x1fd4] sm:$0xf0]  ;;  %v12200_v30 = vor.u32 %v13464_v37, %v12199_v32  ;;  %v11927_v50 = vld [vmem:[%s20112_s1 + $0x1ca8] sm:$0xf] }
 0x2ed   :  { %7402 = vmatpush.bf16.msra.mxu0 %v11336_v61  ;;  %v13396_v51 = vld [vmem:[%s20112_s1 + $0x1cb4] sm:$0xf0]  ;;  %v12055_v25 = vld [vmem:[%s20112_s1 + $0x1da8] sm:$0xf]  ;;  %v12328_v52 = vor.u32 %v13496_v39, %v12327_v38 }
 0x2ee   :  { %7415 = vmatpush.bf16.msra.mxu1 %v11464_v3  ;;  %v13428_v44 = vld [vmem:[%s20112_s1 + $0x1db4] sm:$0xf0]  ;;  %v12183_v43 = vld [vmem:[%s20112_s1 + $0x1ea8] sm:$0xf]  ;;  %v11928_v61 = vor.u32 %v13396_v51, %v11927_v50 }
 0x2ef   :  { %7428 = vmatpush.bf16.msra.mxu2 %v11592_v8  ;;  %v13460_v45 = vld [vmem:[%s20112_s1 + $0x1eb4] sm:$0xf0]  ;;  %v13547_v56 = vld [vmem:[#allocation1 + $0x9] sm:$0xff]  ;;  %v12056_v62 = vor.u32 %v13428_v44, %v12055_v25 }
 0x2f0   :  { %7441 = vmatpush.bf16.msra.mxu3 %v11720_v23  ;;  %7403 = vmatmul.bf16.vlgmr.msra.gmra.mxu0 %v13545_v33  ;;  %v13546_v53 = vld [vmem:[#allocation1 + $0x12] sm:$0xff]  ;;  %v12311_v57 = vld [vmem:[%s20112_s1 + $0x1fa8] sm:$0xf]  ;;  %v13548_v40 = vld [vmem:[#allocation1 + $0x1b] sm:$0xff]  ;;  %v12184_v55 = vor.u32 %v13460_v45, %v12183_v43 }
 0x2f1   :  { %7447 = vmatpush.bf16.msrb.mxu0 %v11960_v58  ;;  %7416 = vmatmul.bf16.vlgmr.msra.gmra.mxu1 %v13547_v56  ;;  %v13492_v59 = vld [vmem:[%s20112_s1 + $0x1fb4] sm:$0xf0]  ;;  %v11911_v63 = vld [vmem:[%s20112_s1 + $0x1c88] sm:$0xf] }
 0x2f2   :  { %7460 = vmatpush.bf16.msrb.mxu1 %v12088_v11  ;;  %7429 = vmatmul.bf16.vlgmr.msra.gmra.mxu2 %v13546_v53  ;;  %v13392_v3 = vld [vmem:[%s20112_s1 + $0x1c94] sm:$0xf0]  ;;  %v12039_v8 = vld [vmem:[%s20112_s1 + $0x1d88] sm:$0xf]  ;;  %v12312_v19 = vor.u32 %v13492_v59, %v12311_v57  ;;  %v7196_v11 = vpop.f32.mrf.mxu0 }
 0x2f3   :  { %7473 = vmatpush.bf16.msrb.mxu2 %v12216_v26  ;;  %7442 = vmatmul.bf16.vlgmr.msra.gmra.mxu3 %v13548_v40  ;;  %v13424_v21 = vld [vmem:[%s20112_s1 + $0x1d94] sm:$0xf0]  ;;  %v12167_v23 = vld [vmem:[%s20112_s1 + $0x1e88] sm:$0xf]  ;;  %v7197_v31 = vadd.f32 %v7196_v11, %v18174_v20  ;;  %v11912_v35 = vor.u32 %v13392_v3, %v11911_v63 }
 0x2f4   :  { %7486 = vmatpush.bf16.msrb.mxu3 %v12344_v36  ;;  %v13456_v58 = vld [vmem:[%s20112_s1 + $0x1e94] sm:$0xf0]  ;;  %v12295_v26 = vld [vmem:[%s20112_s1 + $0x1f88] sm:$0xf]  ;;  %v7209_v36 = vpop.f32.mrf.mxu1  ;;  %v12040_v24 = vor.u32 %v13424_v21, %v12039_v8 }
 0x2f5   :  { %7448 = vmatpush.bf16.msrb.mxu0 %v11944_v41  ;;  %v13488_v10 = vld [vmem:[%s20112_s1 + $0x1f94] sm:$0xf0]  ;;  %v12168_v32 = vor.u32 %v13456_v58, %v12167_v23  ;;  %v11895_v37 = vld [vmem:[%s20112_s1 + $0x1c68] sm:$0xf]  ;;  %v7210_v41 = vadd.f32 %v7209_v36, %v7197_v31  ;;  %v7222_v57 = vpop.f32.mrf.mxu2 }
 0x2f6   :  { %7461 = vmatpush.bf16.msrb.mxu1 %v12072_v42  ;;  %v13388_v38 = vld [vmem:[%s20112_s1 + $0x1c74] sm:$0xf0]  ;;  %v12023_v39 = vld [vmem:[%s20112_s1 + $0x1d68] sm:$0xf]  ;;  %v12296_v20 = vor.u32 %v13488_v10, %v12295_v26 }
 0x2f7   :  { %7474 = vmatpush.bf16.msrb.mxu2 %v12200_v30  ;;  %v13420_v42 = vld [vmem:[%s20112_s1 + $0x1d74] sm:$0xf0]  ;;  %v12151_v30 = vld [vmem:[%s20112_s1 + $0x1e68] sm:$0xf]  ;;  %v11896_v33 = vor.u32 %v13388_v38, %v11895_v37 }
 0x2f8   :  { %7487 = vmatpush.bf16.msrb.mxu3 %v12328_v52  ;;  %v13452_v50 = vld [vmem:[%s20112_s1 + $0x1e74] sm:$0xf0]  ;;  %v12279_v51 = vld [vmem:[%s20112_s1 + $0x1f68] sm:$0xf]  ;;  %v12024_v52 = vor.u32 %v13420_v42, %v12023_v39 }
 0x2f9   :  { %7449 = vmatpush.bf16.msrb.mxu0 %v11928_v61  ;;  %v13484_v25 = vld [vmem:[%s20112_s1 + $0x1f74] sm:$0xf0]  ;;  %v12152_v44 = vor.u32 %v13452_v50, %v12151_v30  ;;  %v11879_v43 = vld [vmem:[%s20112_s1 + $0x1c48] sm:$0xf] }
 0x2fa   :  { %7462 = vmatpush.bf16.msrb.mxu1 %v12056_v62  ;;  %v13384_v45 = vld [vmem:[%s20112_s1 + $0x1c54] sm:$0xf0]  ;;  %v12007_v53 = vld [vmem:[%s20112_s1 + $0x1d48] sm:$0xf]  ;;  %v12280_v56 = vor.u32 %v13484_v25, %v12279_v51  ;;  %v7223_v62 = vadd.f32 %v7222_v57, %v7210_v41  ;;  %v7198_v8 = vpop.f32.mrf.mxu0  ;;  %v12538_v57 = vld [vmem:[%s20112_s1 + $0x1ec] sm:$0xf] }
 0x2fb   :  { %7475 = vmatpush.bf16.msrb.mxu2 %v12184_v55  ;;  %v13416_v59 = vld [vmem:[%s20112_s1 + $0x1d54] sm:$0xf0]  ;;  %v12135_v40 = vld [vmem:[%s20112_s1 + $0x1e48] sm:$0xf]  ;;  %v7235_v55 = vpop.f32.mrf.mxu3  ;;  %v12602_v8 = vld [vmem:[%s20112_s1 + $0x3ec] sm:$0xf] }
 0x2fc   :  { %7488 = vmatpush.bf16.msrb.mxu3 %v12312_v19  ;;  %v13448_v61 = vld [vmem:[%s20112_s1 + $0x1e54] sm:$0xf0]  ;;  %v12263_v63 = vld [vmem:[%s20112_s1 + $0x1f48] sm:$0xf]  ;;  %v11880_v19 = vor.u32 %v13384_v45, %v11879_v43  ;;  %v7211_v21 = vpop.f32.mrf.mxu1  ;;  %v18369_v23 = vadd.f32 %v7235_v55, %v7223_v62  ;;  %v12008_v58 = vor.u32 %v13416_v59, %v12007_v53  ;;  %v12506_v53 = vld [vmem:[%s20112_s1 + $0xec] sm:$0xf] }
 0x2fd   :  { %7450 = vmatpush.bf16.msrb.mxu0 %v11912_v35  ;;  %v13480_v3 = vld [vmem:[%s20112_s1 + $0x1f54] sm:$0xf0]  ;;  %v12136_v11 = vor.u32 %v13448_v61, %v12135_v40  ;;  %v11863_v26 = vld [vmem:[%s20112_s1 + $0x1c28] sm:$0xf]  ;;  %v7224_v45 = vpop.f32.mrf.mxu2  ;;  %v8505_v61 = vld [vmem:[%s20112_s1 + $0x1f8] sm:$0xf0] }
 0x2fe   :  { %7463 = vmatpush.bf16.msrb.mxu1 %v12040_v24  ;;  %v13380_v10 = vld [vmem:[%s20112_s1 + $0x1c34] sm:$0xf0]  ;;  %v11991_v31 = vld [vmem:[%s20112_s1 + $0x1d28] sm:$0xf]  ;;  %v12264_v35 = vor.u32 %v13480_v3, %v12263_v63  ;;  %v12570_v62 = vld [vmem:[%s20112_s1 + $0x2ec] sm:$0xf] }
 0x2ff   :  { %7476 = vmatpush.bf16.msrb.mxu2 %v12168_v32  ;;  %v13412_v36 = vld [vmem:[%s20112_s1 + $0x1d34] sm:$0xf0]  ;;  %v12119_v24 = vld [vmem:[%s20112_s1 + $0x1e28] sm:$0xf]  ;;  %v11864_v39 = vor.u32 %v13380_v10, %v11863_v26  ;;  %v8633_v55 = vld [vmem:[%s20112_s1 + $0x2f8] sm:$0xf0] }
 0x300   :  { %7489 = vmatpush.bf16.msrb.mxu3 %v12296_v20  ;;  %v13444_v32 = vld [vmem:[%s20112_s1 + $0x1e34] sm:$0xf0]  ;;  %v12247_v37 = vld [vmem:[%s20112_s1 + $0x1f28] sm:$0xf]  ;;  %v11992_v42 = vor.u32 %v13412_v36, %v11991_v31  ;;  %v8636_v26 = vor.u32 %v12570_v62, %v8633_v55  ;;  %v12502_v10 = vld [vmem:[%s20112_s1 + $0xcc] sm:$0xf] }
 0x301   :  { %7451 = vmatpush.bf16.msrb.mxu0 %v11896_v33  ;;  %v13476_v38 = vld [vmem:[%s20112_s1 + $0x1f34] sm:$0xf0]  ;;  %v11847_v20 = vld [vmem:[%s20112_s1 + $0x1c08] sm:$0xf]  ;;  %v12120_v30 = vor.u32 %v13444_v32, %v12119_v24  ;;  %v8361_v31 = vld [vmem:[%s20112_s1 + $0xd8] sm:$0xf0] }
 0x302   :  { %7464 = vmatpush.bf16.msrb.mxu1 %v12024_v52  ;;  %v13376_v41 = vld [vmem:[%s20112_s1 + $0x1c14] sm:$0xf0]  ;;  %v11975_v50 = vld [vmem:[%s20112_s1 + $0x1d08] sm:$0xf]  ;;  %v12248_v33 = vor.u32 %v13476_v38, %v12247_v37  ;;  %v8489_v24 = vld [vmem:[%s20112_s1 + $0x1d8] sm:$0xf0] }
 0x303   :  { %7477 = vmatpush.bf16.msrb.mxu2 %v12152_v44  ;;  %v13408_v51 = vld [vmem:[%s20112_s1 + $0x1d14] sm:$0xf0]  ;;  %v12103_v25 = vld [vmem:[%s20112_s1 + $0x1e08] sm:$0xf]  ;;  %v7237_v59 = vpop.f32.mrf.mxu3  ;;  %v11848_v40 = vor.u32 %v13376_v41, %v11847_v20  ;;  %v12566_v32 = vld [vmem:[%s20112_s1 + $0x2cc] sm:$0xf]  ;;  %v8364_v20 = vor.u32 %v12502_v10, %v8361_v31 }
 0x304   :  { %7490 = vmatpush.bf16.msrb.mxu3 %v12280_v56  ;;  %v13440_v52 = vld [vmem:[%s20112_s1 + $0x1e14] sm:$0xf0]  ;;  %v12231_v44 = vld [vmem:[%s20112_s1 + $0x1f08] sm:$0xf]  ;;  %v8377_v56 = vld [vmem:[%s20112_s1 + $0xf8] sm:$0xf0]  ;;  %v11976_v63 = vor.u32 %v13408_v51, %v11975_v50 }
 0x305   :  { %7452 = vmatpush.bf16.msrb.mxu0 %v11880_v19  ;;  %v13472_v43 = vld [vmem:[%s20112_s1 + $0x1f14] sm:$0xf0]  ;;  %v12104_v3 = vor.u32 %v13440_v52, %v12103_v25  ;;  %v8761_v19 = vld [vmem:[%s20112_s1 + $0x3f8] sm:$0xf0]  ;;  %v12598_v38 = vld [vmem:[%s20112_s1 + $0x3cc] sm:$0xf] }
 0x306   :  { %7465 = vmatpush.bf16.msrb.mxu1 %v12008_v58  ;;  %v12232_v21 = vor.u32 %v13472_v43, %v12231_v44  ;;  %v8380_v58 = vor.u32 %v12506_v53, %v8377_v56  ;;  %v8764_v36 = vor.u32 %v12602_v8, %v8761_v19  ;;  %v8617_v37 = vld [vmem:[%s20112_s1 + $0x2d8] sm:$0xf0]  ;;  %v12530_v51 = vld [vmem:[%s20112_s1 + $0x1ac] sm:$0xf]  ;;  %v13549_v25 = vld [vmem:[#allocation1 + $0x24] sm:$0xff] }
 0x307   :  { %7478 = vmatpush.bf16.msrb.mxu2 %v12136_v11  ;;  %v8508_v11 = vor.u32 %v12538_v57, %v8505_v61  ;;  %v8345_v50 = vld [vmem:[%s20112_s1 + $0xb8] sm:$0xf0]  ;;  %v12562_v44 = vld [vmem:[%s20112_s1 + $0x2ac] sm:$0xf] }
 0x308   :  { %7491 = vmatpush.bf16.msrb.mxu3 %v12264_v35  ;;  %v12534_v35 = vld [vmem:[%s20112_s1 + $0x1cc] sm:$0xf]  ;;  %v8473_v52 = vld [vmem:[%s20112_s1 + $0x1b8] sm:$0xf0] }
 0x309   :  { %7453 = vmatpush.bf16.msrb.mxu0 %v11864_v39  ;;  %v8745_v39 = vld [vmem:[%s20112_s1 + $0x3d8] sm:$0xf0]  ;;  %v8492_v41 = vor.u32 %v12534_v35, %v8489_v24  ;;  %v13551_v53 = vld [vmem:[#allocation1 + $0x2d] sm:$0xff]  ;;  %v8476_v61 = vor.u32 %v12530_v51, %v8473_v52 }
 0x30a   :  { %7466 = vmatpush.bf16.msrb.mxu1 %v11992_v42  ;;  %v8620_v42 = vor.u32 %v12566_v32, %v8617_v37  ;;  %v8601_v43 = vld [vmem:[%s20112_s1 + $0x2b8] sm:$0xf0]  ;;  %v12594_v56 = vld [vmem:[%s20112_s1 + $0x3ac] sm:$0xf] }
 0x30b   :  { %7479 = vmatpush.bf16.msrb.mxu2 %v12120_v30  ;;  %v12498_v30 = vld [vmem:[%s20112_s1 + $0xac] sm:$0xf]  ;;  %v13550_v45 = vld [vmem:[#allocation1 + $0x36] sm:$0xff]  ;;  %v13552_v59 = vld [vmem:[#allocation1 + $0x3f] sm:$0xff]  ;;  %v8604_v62 = vor.u32 %v12562_v44, %v8601_v43 }
 0x30c   :  { %7492 = vmatpush.bf16.msrb.mxu3 %v12248_v33  ;;  %v8748_v33 = vor.u32 %v12598_v38, %v8745_v39  ;;  %v8729_v57 = vld [vmem:[%s20112_s1 + $0x3b8] sm:$0xf0]  ;;  %v12494_v55 = vld [vmem:[%s20112_s1 + $0x8c] sm:$0xf] }
 0x30d   :  { %7454 = vmatpush.bf16.msrb.mxu0 %v11848_v40  ;;  %v8348_v40 = vor.u32 %v12498_v30, %v8345_v50  ;;  %v8732_v8 = vor.u32 %v12594_v56, %v8729_v57  ;;  %v8457_v19 = vld [vmem:[%s20112_s1 + $0x198] sm:$0xf0]  ;;  %v12490_v37 = vld [vmem:[%s20112_s1 + $0x6c] sm:$0xf] }
 0x30e   :  { %7467 = vmatpush.bf16.msrb.mxu1 %v11976_v63  ;;  %v8329_v63 = vld [vmem:[%s20112_s1 + $0x98] sm:$0xf0]  ;;  %v12522_v39 = vld [vmem:[%s20112_s1 + $0x16c] sm:$0xf] }
 0x30f   :  { %7480 = vmatpush.bf16.msrb.mxu2 %v12104_v3  ;;  %v12526_v3 = vld [vmem:[%s20112_s1 + $0x18c] sm:$0xf]  ;;  %v8713_v10 = vld [vmem:[%s20112_s1 + $0x398] sm:$0xf0]  ;;  %v8332_v35 = vor.u32 %v12494_v55, %v8329_v63 }
 0x310   :  { %7493 = vmatpush.bf16.msrb.mxu3 %v12232_v21  ;;  %7455 = vmatmul.bf16.vlgmr.msrb.gmra.mxu0 %v13549_v25  ;;  %v12558_v21 = vld [vmem:[%s20112_s1 + $0x28c] sm:$0xf]  ;;  %v8460_v24 = vor.u32 %v12526_v3, %v8457_v19  ;;  %v8313_v38 = vld [vmem:[%s20112_s1 + $0x78] sm:$0xf0] }
 0x311   :  { %7499 = vmatpush.bf16.msra.mxu0 %v8380_v58  ;;  %7468 = vmatmul.bf16.vlgmr.msrb.gmra.mxu1 %v13551_v53  ;;  %v8585_v58 = vld [vmem:[%s20112_s1 + $0x298] sm:$0xf0]  ;;  %v12586_v50 = vld [vmem:[%s20112_s1 + $0x36c] sm:$0xf]  ;;  %v8316_v25 = vor.u32 %v12490_v37, %v8313_v38 }
 0x312   :  { %7512 = vmatpush.bf16.msra.mxu1 %v8508_v11  ;;  %7481 = vmatmul.bf16.vlgmr.msrb.gmra.mxu2 %v13550_v45  ;;  %v7248_v11 = vpop.f32.mrf.mxu0  ;;  %v8588_v32 = vor.u32 %v12558_v21, %v8585_v58  ;;  %v8569_v30 = vld [vmem:[%s20112_s1 + $0x278] sm:$0xf0]  ;;  %v12486_v44 = vld [vmem:[%s20112_s1 + $0x4c] sm:$0xf] }
 0x313   :  { %7525 = vmatpush.bf16.msra.mxu2 %v8636_v26  ;;  %7494 = vmatmul.bf16.vlgmr.msrb.gmra.mxu3 %v13552_v59  ;;  %v12590_v26 = vld [vmem:[%s20112_s1 + $0x38c] sm:$0xf]  ;;  %v7249_v31 = vadd.f32 %v7248_v11, %v18369_v23  ;;  %v8697_v51 = vld [vmem:[%s20112_s1 + $0x378] sm:$0xf0] }
 0x314   :  { %7538 = vmatpush.bf16.msra.mxu3 %v8764_v36  ;;  %v7261_v36 = vpop.f32.mrf.mxu1  ;;  %v8716_v23 = vor.u32 %v12590_v26, %v8713_v10  ;;  %v8297_v43 = vld [vmem:[%s20112_s1 + $0x58] sm:$0xf0]  ;;  %v12518_v45 = vld [vmem:[%s20112_s1 + $0x14c] sm:$0xf]  ;;  %v8700_v53 = vor.u32 %v12586_v50, %v8697_v51 }
 0x315   :  { %7500 = vmatpush.bf16.msra.mxu0 %v8364_v20  ;;  %v7262_v20 = vadd.f32 %v7261_v36, %v7249_v31  ;;  %v7274_v56 = vpop.f32.mrf.mxu2  ;;  %v8425_v57 = vld [vmem:[%s20112_s1 + $0x158] sm:$0xf0]  ;;  %v12550_v59 = vld [vmem:[%s20112_s1 + $0x24c] sm:$0xf] }
 0x316   :  { %7513 = vmatpush.bf16.msra.mxu1 %v8492_v41  ;;  %v8441_v41 = vld [vmem:[%s20112_s1 + $0x178] sm:$0xf0]  ;;  %v12582_v55 = vld [vmem:[%s20112_s1 + $0x34c] sm:$0xf]  ;;  %v8428_v58 = vor.u32 %v12518_v45, %v8425_v57 }
 0x317   :  { %7526 = vmatpush.bf16.msra.mxu2 %v8620_v42  ;;  %v12554_v42 = vld [vmem:[%s20112_s1 + $0x26c] sm:$0xf]  ;;  %v8681_v63 = vld [vmem:[%s20112_s1 + $0x358] sm:$0xf0] }
 0x318   :  { %7539 = vmatpush.bf16.msra.mxu3 %v8748_v33  ;;  %v8444_v33 = vor.u32 %v12522_v39, %v8441_v41  ;;  %v8572_v52 = vor.u32 %v12554_v42, %v8569_v30  ;;  %v12482_v26 = vld [vmem:[%s20112_s1 + $0x2c] sm:$0xf]  ;;  %v8281_v10 = vld [vmem:[%s20112_s1 + $0x38] sm:$0xf0] }
 0x319   :  { %7501 = vmatpush.bf16.msra.mxu0 %v8348_v40  ;;  %v8553_v40 = vld [vmem:[%s20112_s1 + $0x258] sm:$0xf0]  ;;  %v12514_v31 = vld [vmem:[%s20112_s1 + $0x12c] sm:$0xf]  ;;  %v8284_v39 = vor.u32 %v12482_v26, %v8281_v10 }
 0x31a   :  { %7514 = vmatpush.bf16.msra.mxu1 %v8476_v61  ;;  %v7275_v61 = vadd.f32 %v7274_v56, %v7262_v20  ;;  %v7250_v3 = vpop.f32.mrf.mxu0  ;;  %v8556_v11 = vor.u32 %v12550_v59, %v8553_v40  ;;  %v8409_v36 = vld [vmem:[%s20112_s1 + $0x138] sm:$0xf0]  ;;  %v12578_v37 = vld [vmem:[%s20112_s1 + $0x32c] sm:$0xf] }
 0x31b   :  { %7527 = vmatpush.bf16.msra.mxu2 %v8604_v62  ;;  %v7287_v62 = vpop.f32.mrf.mxu3  ;;  %v8665_v38 = vld [vmem:[%s20112_s1 + $0x338] sm:$0xf0]  ;;  %v8412_v41 = vor.u32 %v12514_v31, %v8409_v36  ;;  %v12510_v30 = vld [vmem:[%s20112_s1 + $0x10c] sm:$0xf] }
 0x31c   :  { %7540 = vmatpush.bf16.msra.mxu3 %v8732_v8  ;;  %v8300_v8 = vor.u32 %v12486_v44, %v8297_v43  ;;  %v7263_v19 = vpop.f32.mrf.mxu1  ;;  %v18564_v21 = vadd.f32 %v7287_v62, %v7275_v61  ;;  %v8265_v20 = vld [vmem:[%s20112_s1 + $0x18] sm:$0xf0]  ;;  %v12542_v51 = vld [vmem:[%s20112_s1 + $0x20c] sm:$0xf] }
 0x31d   :  { %7502 = vmatpush.bf16.msra.mxu0 %v8332_v35  ;;  %v8684_v35 = vor.u32 %v12582_v55, %v8681_v63  ;;  %v8393_v50 = vld [vmem:[%s20112_s1 + $0x118] sm:$0xf0]  ;;  %v7276_v43 = vpop.f32.mrf.mxu2  ;;  %v12634_v45 = vld [vmem:[%s20112_s1 + $0x4ec] sm:$0xf] }
 0x31e   :  { %7515 = vmatpush.bf16.msra.mxu1 %v8460_v24  ;;  %v12546_v24 = vld [vmem:[%s20112_s1 + $0x22c] sm:$0xf]  ;;  %v8649_v44 = vld [vmem:[%s20112_s1 + $0x318] sm:$0xf0]  ;;  %v8396_v55 = vor.u32 %v12510_v30, %v8393_v50 }
 0x31f   :  { %7528 = vmatpush.bf16.msra.mxu2 %v8588_v32  ;;  %v8537_v32 = vld [vmem:[%s20112_s1 + $0x238] sm:$0xf0]  ;;  %v12666_v56 = vld [vmem:[%s20112_s1 + $0x5ec] sm:$0xf] }
 0x320   :  { %7541 = vmatpush.bf16.msra.mxu3 %v8716_v23  ;;  %v12478_v23 = vld [vmem:[%s20112_s1 + $0xc] sm:$0xf]  ;;  %v8540_v42 = vor.u32 %v12546_v24, %v8537_v32  ;;  %v9017_v40 = vld [vmem:[%s20112_s1 + $0x5f8] sm:$0xf0] }
 0x321   :  { %7503 = vmatpush.bf16.msra.mxu0 %v8316_v25  ;;  %v8668_v25 = vor.u32 %v12578_v37, %v8665_v38  ;;  %v8268_v59 = vor.u32 %v12478_v23, %v8265_v20  ;;  %v12698_v61 = vld [vmem:[%s20112_s1 + $0x6ec] sm:$0xf]  ;;  %v9145_v62 = vld [vmem:[%s20112_s1 + $0x6f8] sm:$0xf0] }
 0x322   :  { %7516 = vmatpush.bf16.msra.mxu1 %v8444_v33  ;;  %v8521_v33 = vld [vmem:[%s20112_s1 + $0x218] sm:$0xf0]  ;;  %v12730_v3 = vld [vmem:[%s20112_s1 + $0x7ec] sm:$0xf]  ;;  %v9148_v26 = vor.u32 %v12698_v61, %v9145_v62 }
 0x323   :  { %7529 = vmatpush.bf16.msra.mxu2 %v8572_v52  ;;  %v12574_v52 = vld [vmem:[%s20112_s1 + $0x30c] sm:$0xf]  ;;  %v7289_v57 = vpop.f32.mrf.mxu3  ;;  %v8524_v63 = vor.u32 %v12542_v51, %v8521_v33  ;;  %v8873_v31 = vld [vmem:[%s20112_s1 + $0x4d8] sm:$0xf0] }
 0x324   :  { %7542 = vmatpush.bf16.msra.mxu3 %v8700_v53  ;;  %v8889_v53 = vld [vmem:[%s20112_s1 + $0x4f8] sm:$0xf0]  ;;  %v8652_v19 = vor.u32 %v12574_v52, %v8649_v44  ;;  %v12630_v10 = vld [vmem:[%s20112_s1 + $0x4cc] sm:$0xf] }
 0x325   :  { %7504 = vmatpush.bf16.msra.mxu0 %v8300_v8  ;;  %v9273_v8 = vld [vmem:[%s20112_s1 + $0x7f8] sm:$0xf0]  ;;  %v12694_v32 = vld [vmem:[%s20112_s1 + $0x6cc] sm:$0xf]  ;;  %v8876_v23 = vor.u32 %v12630_v10, %v8873_v31 }
 0x326   :  { %7517 = vmatpush.bf16.msra.mxu1 %v8428_v58  ;;  %v8892_v58 = vor.u32 %v12634_v45, %v8889_v53  ;;  %v9276_v36 = vor.u32 %v12730_v3, %v9273_v8  ;;  %v9001_v24 = vld [vmem:[%s20112_s1 + $0x5d8] sm:$0xf0]  ;;  %v12726_v38 = vld [vmem:[%s20112_s1 + $0x7cc] sm:$0xf] }
 0x327   :  { %7530 = vmatpush.bf16.msra.mxu2 %v8556_v11  ;;  %v9020_v11 = vor.u32 %v12666_v56, %v9017_v40  ;;  %v9129_v37 = vld [vmem:[%s20112_s1 + $0x6d8] sm:$0xf0]  ;;  %v12658_v50 = vld [vmem:[%s20112_s1 + $0x5ac] sm:$0xf] }
 0x328   :  { %7543 = vmatpush.bf16.msra.mxu3 %v8684_v35  ;;  %v12662_v35 = vld [vmem:[%s20112_s1 + $0x5cc] sm:$0xf]  ;;  %v8857_v30 = vld [vmem:[%s20112_s1 + $0x4b8] sm:$0xf0] }
 0x329   :  { %7505 = vmatpush.bf16.msra.mxu0 %v8284_v39  ;;  %v9257_v39 = vld [vmem:[%s20112_s1 + $0x7d8] sm:$0xf0]  ;;  %v9004_v20 = vor.u32 %v12662_v35, %v9001_v24  ;;  %v12690_v33 = vld [vmem:[%s20112_s1 + $0x6ac] sm:$0xf] }
 0x32a   :  { %7518 = vmatpush.bf16.msra.mxu1 %v8412_v41  ;;  %v9132_v41 = vor.u32 %v12694_v32, %v9129_v37  ;;  %v9260_v51 = vor.u32 %v12726_v38, %v9257_v39  ;;  %v9113_v52 = vld [vmem:[%s20112_s1 + $0x6b8] sm:$0xf0]  ;;  %v12722_v44 = vld [vmem:[%s20112_s1 + $0x7ac] sm:$0xf] }
 0x32b   :  { %7531 = vmatpush.bf16.msra.mxu2 %v8540_v42  ;;  %v12626_v42 = vld [vmem:[%s20112_s1 + $0x4ac] sm:$0xf]  ;;  %v9241_v43 = vld [vmem:[%s20112_s1 + $0x7b8] sm:$0xf0] }
 0x32c   :  { %7544 = vmatpush.bf16.msra.mxu3 %v8668_v25  ;;  %v8985_v25 = vld [vmem:[%s20112_s1 + $0x5b8] sm:$0xf0]  ;;  %v8860_v45 = vor.u32 %v12626_v42, %v8857_v30  ;;  %v12622_v56 = vld [vmem:[%s20112_s1 + $0x48c] sm:$0xf] }
 0x32d   :  { %7506 = vmatpush.bf16.msra.mxu0 %v8268_v59  ;;  %v8988_v53 = vor.u32 %v12658_v50, %v8985_v25  ;;  %v8841_v57 = vld [vmem:[%s20112_s1 + $0x498] sm:$0xf0]  ;;  %v12686_v59 = vld [vmem:[%s20112_s1 + $0x68c] sm:$0xf]  ;;  %v7300_v61 = vpop.f32.mrf.mxu0 }
 0x32e   :  { %7519 = vmatpush.bf16.msra.mxu1 %v8396_v55  ;;  %v9097_v40 = vld [vmem:[%s20112_s1 + $0x698] sm:$0xf0]  ;;  %v12718_v62 = vld [vmem:[%s20112_s1 + $0x78c] sm:$0xf]  ;;  %v8844_v3 = vor.u32 %v12622_v56, %v8841_v57  ;;  %v7313_v8 = vpop.f32.mrf.mxu1 }
 0x32f   :  { %7532 = vmatpush.bf16.msra.mxu2 %v8524_v63  ;;  %v9225_v55 = vld [vmem:[%s20112_s1 + $0x798] sm:$0xf0]  ;;  %v7301_v63 = vadd.f32 %v7300_v61, %v18564_v21  ;;  %v12650_v10 = vld [vmem:[%s20112_s1 + $0x56c] sm:$0xf] }
 0x330   :  { %7545 = vmatpush.bf16.msra.mxu3 %v8652_v19  ;;  %7507 = vmatmul.bf16.vlgmr.msra.gmra.mxu0 %v13939_v28  ;;  %v12654_v28 = vld [vmem:[%s20112_s1 + $0x58c] sm:$0xf]  ;;  %v9228_v21 = vor.u32 %v12718_v62, %v9225_v55  ;;  %v8953_v35 = vld [vmem:[%s20112_s1 + $0x578] sm:$0xf0] }
 0x331   :  { %7551 = vmatpush.bf16.msrb.mxu0 %v8892_v58  ;;  %7520 = vmatmul.bf16.vlgmr.msra.gmra.mxu1 %v13949_v34  ;;  %v8969_v34 = vld [vmem:[%s20112_s1 + $0x598] sm:$0xf0]  ;;  %v9100_v58 = vor.u32 %v12686_v59, %v9097_v40  ;;  %v7314_v31 = vadd.f32 %v7313_v8, %v7301_v63  ;;  %v12714_v32 = vld [vmem:[%s20112_s1 + $0x76c] sm:$0xf]  ;;  %v8956_v39 = vor.u32 %v12650_v10, %v8953_v35 }
 0x332   :  { %7564 = vmatpush.bf16.msrb.mxu1 %v9020_v11  ;;  %7533 = vmatmul.bf16.vlgmr.msra.gmra.mxu2 %v13937_v27  ;;  %v9116_v27 = vor.u32 %v12690_v33, %v9113_v52  ;;  %v8972_v19 = vor.u32 %v12654_v28, %v8969_v34  ;;  %v12618_v11 = vld [vmem:[%s20112_s1 + $0x46c] sm:$0xf]  ;;  %v9081_v24 = vld [vmem:[%s20112_s1 + $0x678] sm:$0xf0] }
 0x333   :  { %7577 = vmatpush.bf16.msrb.mxu2 %v9148_v26  ;;  %7546 = vmatmul.bf16.vlgmr.msra.gmra.mxu3 %v13941_v29  ;;  %v9244_v29 = vor.u32 %v12722_v44, %v9241_v43  ;;  %v8825_v26 = vld [vmem:[%s20112_s1 + $0x478] sm:$0xf0]  ;;  %v12646_v42 = vld [vmem:[%s20112_s1 + $0x54c] sm:$0xf] }
 0x334   :  { %7590 = vmatpush.bf16.msrb.mxu3 %v9276_v36  ;;  %v12682_v36 = vld [vmem:[%s20112_s1 + $0x66c] sm:$0xf]  ;;  %v9209_v37 = vld [vmem:[%s20112_s1 + $0x778] sm:$0xf0]  ;;  %v8828_v38 = vor.u32 %v12618_v11, %v8825_v26 }
 0x335   :  { %7552 = vmatpush.bf16.msrb.mxu0 %v8876_v23  ;;  %v9084_v23 = vor.u32 %v12682_v36, %v9081_v24  ;;  %v9212_v30 = vor.u32 %v12714_v32, %v9209_v37  ;;  %v7326_v50 = vpop.f32.mrf.mxu2  ;;  %v12678_v25 = vld [vmem:[%s20112_s1 + $0x64c] sm:$0xf]  ;;  %v9065_v33 = vld [vmem:[%s20112_s1 + $0x658] sm:$0xf0] }
 0x336   :  { %7565 = vmatpush.bf16.msrb.mxu1 %v9004_v20  ;;  %v12614_v20 = vld [vmem:[%s20112_s1 + $0x44c] sm:$0xf]  ;;  %v7327_v52 = vadd.f32 %v7326_v50, %v7314_v31  ;;  %v7339_v44 = vpop.f32.mrf.mxu3  ;;  %v7315_v56 = vpop.f32.mrf.mxu1  ;;  %v8793_v59 = vld [vmem:[%s20112_s1 + $0x438] sm:$0xf0] }
 0x337   :  { %7578 = vmatpush.bf16.msrb.mxu2 %v9132_v41  ;;  %v8809_v41 = vld [vmem:[%s20112_s1 + $0x458] sm:$0xf0]  ;;  %v12710_v43 = vld [vmem:[%s20112_s1 + $0x74c] sm:$0xf] }
 0x338   :  { %7591 = vmatpush.bf16.msrb.mxu3 %v9260_v51  ;;  %v8937_v51 = vld [vmem:[%s20112_s1 + $0x558] sm:$0xf0]  ;;  %v18763_v57 = vadd.f32 %v7339_v44, %v7327_v52  ;;  %v12610_v34 = vld [vmem:[%s20112_s1 + $0x42c] sm:$0xf] }
 0x339   :  { %7553 = vmatpush.bf16.msrb.mxu0 %v8860_v45  ;;  %v9193_v45 = vld [vmem:[%s20112_s1 + $0x758] sm:$0xf0]  ;;  %v8940_v28 = vor.u32 %v12646_v42, %v8937_v51  ;;  %v12642_v40 = vld [vmem:[%s20112_s1 + $0x52c] sm:$0xf] }
 0x33a   :  { %7566 = vmatpush.bf16.msrb.mxu1 %v8988_v53  ;;  %v7302_v53 = vpop.f32.mrf.mxu0  ;;  %v9196_v61 = vor.u32 %v12710_v43, %v9193_v45  ;;  %v8921_v62 = vld [vmem:[%s20112_s1 + $0x538] sm:$0xf0]  ;;  %v12674_v55 = vld [vmem:[%s20112_s1 + $0x62c] sm:$0xf] }
 0x33b   :  { %7579 = vmatpush.bf16.msrb.mxu2 %v9116_v27  ;;  %v8812_v27 = vor.u32 %v12614_v20, %v8809_v41  ;;  %v9049_v63 = vld [vmem:[%s20112_s1 + $0x638] sm:$0xf0]  ;;  %v8924_v26 = vor.u32 %v12642_v40, %v8921_v62  ;;  %v12670_v35 = vld [vmem:[%s20112_s1 + $0x60c] sm:$0xf] }
 0x33c   :  { %7592 = vmatpush.bf16.msrb.mxu3 %v9244_v29  ;;  %v9068_v29 = vor.u32 %v12678_v25, %v9065_v33  ;;  %v9177_v8 = vld [vmem:[%s20112_s1 + $0x738] sm:$0xf0]  ;;  %v9052_v10 = vor.u32 %v12674_v55, %v9049_v63  ;;  %v12702_v32 = vld [vmem:[%s20112_s1 + $0x70c] sm:$0xf] }
 0x33d   :  { %7554 = vmatpush.bf16.msrb.mxu0 %v8844_v3  ;;  %v12706_v3 = vld [vmem:[%s20112_s1 + $0x72c] sm:$0xf]  ;;  %v8777_v11 = vld [vmem:[%s20112_s1 + $0x418] sm:$0xf0] }
 0x33e   :  { %7567 = vmatpush.bf16.msrb.mxu1 %v8972_v19  ;;  %v8796_v19 = vor.u32 %v12610_v34, %v8793_v59  ;;  %v8905_v31 = vld [vmem:[%s20112_s1 + $0x518] sm:$0xf0]  ;;  %v9180_v36 = vor.u32 %v12706_v3, %v9177_v8  ;;  %v12794_v20 = vld [vmem:[%s20112_s1 + $0x9ec] sm:$0xf]  ;;  %v7341_v41 = vpop.f32.mrf.mxu3 }
 0x33f   :  { %7580 = vmatpush.bf16.msrb.mxu2 %v9100_v58  ;;  %v12606_v58 = vld [vmem:[%s20112_s1 + $0x40c] sm:$0xf]  ;;  %v9033_v24 = vld [vmem:[%s20112_s1 + $0x618] sm:$0xf0] }
 0x340   :  { %7593 = vmatpush.bf16.msrb.mxu3 %v9228_v21  ;;  %v12638_v21 = vld [vmem:[%s20112_s1 + $0x50c] sm:$0xf]  ;;  %v9161_v37 = vld [vmem:[%s20112_s1 + $0x718] sm:$0xf0]  ;;  %v8780_v42 = vor.u32 %v12606_v58, %v8777_v11  ;;  %v9036_v33 = vor.u32 %v12670_v35, %v9033_v24 }
 0x341   :  { %7555 = vmatpush.bf16.msrb.mxu0 %v8828_v38  ;;  %v7328_v38 = vpop.f32.mrf.mxu2  ;;  %v12826_v50 = vld [vmem:[%s20112_s1 + $0xaec] sm:$0xf]  ;;  %v9657_v51 = vld [vmem:[%s20112_s1 + $0xaf8] sm:$0xf0]  ;;  %v8908_v25 = vor.u32 %v12638_v21, %v8905_v31  ;;  %v9164_v43 = vor.u32 %v12702_v32, %v9161_v37 }
 0x342   :  { %7568 = vmatpush.bf16.msrb.mxu1 %v8956_v39  ;;  %v12762_v39 = vld [vmem:[%s20112_s1 + $0x8ec] sm:$0xf]  ;;  %v9785_v44 = vld [vmem:[%s20112_s1 + $0xbf8] sm:$0xf0] }
 0x343   :  { %7581 = vmatpush.bf16.msrb.mxu2 %v9084_v23  ;;  %v9401_v23 = vld [vmem:[%s20112_s1 + $0x8f8] sm:$0xf0]  ;;  %v12858_v52 = vld [vmem:[%s20112_s1 + $0xbec] sm:$0xf] }
 0x344   :  { %7594 = vmatpush.bf16.msrb.mxu3 %v9212_v30  ;;  %v9529_v30 = vld [vmem:[%s20112_s1 + $0x9f8] sm:$0xf0]  ;;  %v9404_v45 = vor.u32 %v12762_v39, %v9401_v23  ;;  %v12758_v56 = vld [vmem:[%s20112_s1 + $0x8cc] sm:$0xf]  ;;  %v9788_v34 = vor.u32 %v12858_v52, %v9785_v44 }
 0x345   :  { %7556 = vmatpush.bf16.msrb.mxu0 %v8812_v27  ;;  %v9532_v53 = vor.u32 %v12794_v20, %v9529_v30  ;;  %v9660_v27 = vor.u32 %v12826_v50, %v9657_v51  ;;  %v9513_v59 = vld [vmem:[%s20112_s1 + $0x9d8] sm:$0xf0]  ;;  %v12822_v40 = vld [vmem:[%s20112_s1 + $0xacc] sm:$0xf] }
 0x346   :  { %7569 = vmatpush.bf16.msrb.mxu1 %v8940_v28  ;;  %v9385_v28 = vld [vmem:[%s20112_s1 + $0x8d8] sm:$0xf0]  ;;  %v12854_v62 = vld [vmem:[%s20112_s1 + $0xbcc] sm:$0xf] }
 0x347   :  { %7582 = vmatpush.bf16.msrb.mxu2 %v9068_v29  ;;  %v12790_v29 = vld [vmem:[%s20112_s1 + $0x9cc] sm:$0xf]  ;;  %v9769_v55 = vld [vmem:[%s20112_s1 + $0xbd8] sm:$0xf0]  ;;  %v9388_v63 = vor.u32 %v12758_v56, %v9385_v28 }
 0x348   :  { %7595 = vmatpush.bf16.msrb.mxu3 %v9196_v61  ;;  %v9641_v61 = vld [vmem:[%s20112_s1 + $0xad8] sm:$0xf0]  ;;  %v9516_v3 = vor.u32 %v12790_v29, %v9513_v59  ;;  %v12786_v11 = vld [vmem:[%s20112_s1 + $0x9ac] sm:$0xf] }
 0x349   :  { %7557 = vmatpush.bf16.msrb.mxu0 %v8796_v19  ;;  %v9644_v8 = vor.u32 %v12822_v40, %v9641_v61  ;;  %v12754_v19 = vld [vmem:[%s20112_s1 + $0x8ac] sm:$0xf]  ;;  %v9369_v58 = vld [vmem:[%s20112_s1 + $0x8b8] sm:$0xf0] }
 0x34a   :  { %7570 = vmatpush.bf16.msrb.mxu1 %v8924_v26  ;;  %v9772_v26 = vor.u32 %v12854_v62, %v9769_v55  ;;  %v12818_v21 = vld [vmem:[%s20112_s1 + $0xaac] sm:$0xf]  ;;  %v9625_v31 = vld [vmem:[%s20112_s1 + $0xab8] sm:$0xf0] }
 0x34b   :  { %7583 = vmatpush.bf16.msrb.mxu2 %v9052_v10  ;;  %v9497_v10 = vld [vmem:[%s20112_s1 + $0x9b8] sm:$0xf0]  ;;  %v12850_v35 = vld [vmem:[%s20112_s1 + $0xbac] sm:$0xf]  ;;  %v9628_v32 = vor.u32 %v12818_v21, %v9625_v31 }
 0x34c   :  { %7596 = vmatpush.bf16.msrb.mxu3 %v9180_v36  ;;  %v9372_v36 = vor.u32 %v12754_v19, %v9369_v58  ;;  %v9500_v24 = vor.u32 %v12786_v11, %v9497_v10  ;;  %v12750_v37 = vld [vmem:[%s20112_s1 + $0x88c] sm:$0xf]  ;;  %v9353_v38 = vld [vmem:[%s20112_s1 + $0x898] sm:$0xf0] }
 0x34d   :  { %7558 = vmatpush.bf16.msrb.mxu0 %v8780_v42  ;;  %v12814_v39 = vld [vmem:[%s20112_s1 + $0xa8c] sm:$0xf]  ;;  %v9609_v23 = vld [vmem:[%s20112_s1 + $0xa98] sm:$0xf0]  ;;  %v7352_v20 = vpop.f32.mrf.mxu0  ;;  %v9356_v50 = vor.u32 %v12750_v37, %v9353_v38 }
 0x34e   :  { %7571 = vmatpush.bf16.msrb.mxu1 %v8908_v25  ;;  %v12846_v41 = vld [vmem:[%s20112_s1 + $0xb8c] sm:$0xf]  ;;  %v9737_v42 = vld [vmem:[%s20112_s1 + $0xb98] sm:$0xf0]  ;;  %v7353_v30 = vadd.f32 %v7352_v20, %v18763_v57  ;;  %v7365_v51 = vpop.f32.mrf.mxu1 }
 0x34f   :  { %7584 = vmatpush.bf16.msrb.mxu2 %v9036_v33  ;;  %v9612_v33 = vor.u32 %v12814_v39, %v9609_v23  ;;  %v12746_v52 = vld [vmem:[%s20112_s1 + $0x86c] sm:$0xf]  ;;  %v9337_v44 = vld [vmem:[%s20112_s1 + $0x878] sm:$0xf0]  ;;  %v9740_v57 = vor.u32 %v12846_v41, %v9737_v42 }
 0x350   :  { %7597 = vmatpush.bf16.msrb.mxu3 %v9164_v43  ;;  %7559 = vmatmul.bf16.vlgmr.msrb.gmra.mxu0 %v14017_v0  ;;  %v12782_v0 = vld [vmem:[%s20112_s1 + $0x98c] sm:$0xf]  ;;  %v9593_v56 = vld [vmem:[%s20112_s1 + $0xa78] sm:$0xf0] }
 0x351   :  { %7603 = vmatpush.bf16.msra.mxu0 %v9404_v45  ;;  %7572 = vmatmul.bf16.vlgmr.msrb.gmra.mxu1 %v14021_v2  ;;  %v9481_v2 = vld [vmem:[%s20112_s1 + $0x998] sm:$0xf0]  ;;  %v12778_v43 = vld [vmem:[%s20112_s1 + $0x96c] sm:$0xf]  ;;  %v7366_v45 = vadd.f32 %v7365_v51, %v7353_v30 }
 0x352   :  { %7616 = vmatpush.bf16.msra.mxu1 %v9532_v53  ;;  %7585 = vmatmul.bf16.vlgmr.msrb.gmra.mxu2 %v14012_v60  ;;  %v9753_v60 = vld [vmem:[%s20112_s1 + $0xbb8] sm:$0xf0]  ;;  %v9484_v25 = vor.u32 %v12782_v0, %v9481_v2  ;;  %v12842_v28 = vld [vmem:[%s20112_s1 + $0xb6c] sm:$0xf] }
 0x353   :  { %7629 = vmatpush.bf16.msra.mxu2 %v9660_v27  ;;  %7598 = vmatmul.bf16.vlgmr.msrb.gmra.mxu3 %v14019_v1  ;;  %v9756_v1 = vor.u32 %v12850_v35, %v9753_v60  ;;  %v9465_v53 = vld [vmem:[%s20112_s1 + $0x978] sm:$0xf0]  ;;  %v12810_v27 = vld [vmem:[%s20112_s1 + $0xa6c] sm:$0xf] }
 0x354   :  { %7642 = vmatpush.bf16.msra.mxu3 %v9788_v34  ;;  %v9721_v29 = vld [vmem:[%s20112_s1 + $0xb78] sm:$0xf0]  ;;  %v9340_v34 = vor.u32 %v12746_v52, %v9337_v44  ;;  %v9468_v59 = vor.u32 %v12778_v43, %v9465_v53  ;;  %v9596_v40 = vor.u32 %v12810_v27, %v9593_v56  ;;  %v12742_v61 = vld [vmem:[%s20112_s1 + $0x84c] sm:$0xf] }
 0x355   :  { %7604 = vmatpush.bf16.msra.mxu0 %v9388_v63  ;;  %v9321_v62 = vld [vmem:[%s20112_s1 + $0x858] sm:$0xf0]  ;;  %v12774_v55 = vld [vmem:[%s20112_s1 + $0x94c] sm:$0xf]  ;;  %v9724_v63 = vor.u32 %v12842_v28, %v9721_v29  ;;  %v7354_v31 = vpop.f32.mrf.mxu0 }
 0x356   :  { %7617 = vmatpush.bf16.msra.mxu1 %v9516_v3  ;;  %v7378_v3 = vpop.f32.mrf.mxu2  ;;  %v12806_v19 = vld [vmem:[%s20112_s1 + $0xa4c] sm:$0xf]  ;;  %v9577_v58 = vld [vmem:[%s20112_s1 + $0xa58] sm:$0xf0]  ;;  %v9324_v35 = vor.u32 %v12742_v61, %v9321_v62  ;;  %v7367_v60 = vpop.f32.mrf.mxu1 }
 0x357   :  { %7630 = vmatpush.bf16.msra.mxu2 %v9644_v8  ;;  %v9449_v8 = vld [vmem:[%s20112_s1 + $0x958] sm:$0xf0]  ;;  %v7379_v11 = vadd.f32 %v7378_v3, %v7366_v45  ;;  %v12838_v10 = vld [vmem:[%s20112_s1 + $0xb4c] sm:$0xf] }
 0x358   :  { %7643 = vmatpush.bf16.msra.mxu3 %v9772_v26  ;;  %v7391_v26 = vpop.f32.mrf.mxu3  ;;  %v9705_v21 = vld [vmem:[%s20112_s1 + $0xb58] sm:$0xf0]  ;;  %v12738_v37 = vld [vmem:[%s20112_s1 + $0x82c] sm:$0xf] }
 0x359   :  { %7605 = vmatpush.bf16.msra.mxu0 %v9372_v36  ;;  %v18962_v36 = vadd.f32 %v7391_v26, %v7379_v11  ;;  %v9305_v38 = vld [vmem:[%s20112_s1 + $0x838] sm:$0xf0]  ;;  %v12770_v0 = vld [vmem:[%s20112_s1 + $0x92c] sm:$0xf] }
 0x35a   :  { %7618 = vmatpush.bf16.msra.mxu1 %v9500_v24  ;;  %v9452_v24 = vor.u32 %v12774_v55, %v9449_v8  ;;  %v9433_v2 = vld [vmem:[%s20112_s1 + $0x938] sm:$0xf0]  ;;  %v12802_v39 = vld [vmem:[%s20112_s1 + $0xa2c] sm:$0xf]  ;;  %v9308_v42 = vor.u32 %v12738_v37, %v9305_v38 }
 0x35b   :  { %7631 = vmatpush.bf16.msra.mxu2 %v9628_v32  ;;  %v9580_v32 = vor.u32 %v12806_v19, %v9577_v58  ;;  %v9561_v23 = vld [vmem:[%s20112_s1 + $0xa38] sm:$0xf0]  ;;  %v12834_v20 = vld [vmem:[%s20112_s1 + $0xb2c] sm:$0xf]  ;;  %v9436_v51 = vor.u32 %v12770_v0, %v9433_v2 }
 0x35c   :  { %7644 = vmatpush.bf16.msra.mxu3 %v9756_v1  ;;  %v9708_v1 = vor.u32 %v12838_v10, %v9705_v21  ;;  %v9689_v41 = vld [vmem:[%s20112_s1 + $0xb38] sm:$0xf0]  ;;  %v12734_v30 = vld [vmem:[%s20112_s1 + $0x80c] sm:$0xf] }
 0x35d   :  { %7606 = vmatpush.bf16.msra.mxu0 %v9356_v50  ;;  %v9289_v50 = vld [vmem:[%s20112_s1 + $0x818] sm:$0xf0]  ;;  %v12798_v44 = vld [vmem:[%s20112_s1 + $0xa0c] sm:$0xf]  ;;  %v9692_v43 = vor.u32 %v12834_v20, %v9689_v41 }
 0x35e   :  { %7619 = vmatpush.bf16.msra.mxu1 %v9484_v25  ;;  %v9564_v25 = vor.u32 %v12802_v39, %v9561_v23  ;;  %v9417_v52 = vld [vmem:[%s20112_s1 + $0x918] sm:$0xf0]  ;;  %v12830_v45 = vld [vmem:[%s20112_s1 + $0xb0c] sm:$0xf]  ;;  %v7380_v27 = vpop.f32.mrf.mxu2 }
 0x35f   :  { %7632 = vmatpush.bf16.msra.mxu2 %v9612_v33  ;;  %v12766_v33 = vld [vmem:[%s20112_s1 + $0x90c] sm:$0xf]  ;;  %v9673_v53 = vld [vmem:[%s20112_s1 + $0xb18] sm:$0xf0] }
 0x360   :  { %7645 = vmatpush.bf16.msra.mxu3 %v9740_v57  ;;  %v9545_v57 = vld [vmem:[%s20112_s1 + $0xa18] sm:$0xf0]  ;;  %v12890_v56 = vld [vmem:[%s20112_s1 + $0xcec] sm:$0xf]  ;;  %v9420_v55 = vor.u32 %v12766_v33, %v9417_v52  ;;  %v9676_v19 = vor.u32 %v12830_v45, %v9673_v53 }
 0x361   :  { %7607 = vmatpush.bf16.msra.mxu0 %v9340_v34  ;;  %v9913_v28 = vld [vmem:[%s20112_s1 + $0xcf8] sm:$0xf0]  ;;  %v12922_v29 = vld [vmem:[%s20112_s1 + $0xdec] sm:$0xf]  ;;  %v7393_v34 = vpop.f32.mrf.mxu3 }
 0x362   :  { %7620 = vmatpush.bf16.msra.mxu1 %v9468_v59  ;;  %v9292_v59 = vor.u32 %v12734_v30, %v9289_v50  ;;  %v12954_v61 = vld [vmem:[%s20112_s1 + $0xeec] sm:$0xf]  ;;  %v10169_v62 = vld [vmem:[%s20112_s1 + $0xef8] sm:$0xf0]  ;;  %v9916_v58 = vor.u32 %v12890_v56, %v9913_v28 }
 0x363   :  { %7633 = vmatpush.bf16.msra.mxu2 %v9596_v40  ;;  %v10041_v40 = vld [vmem:[%s20112_s1 + $0xdf8] sm:$0xf0]  ;;  %v12986_v3 = vld [vmem:[%s20112_s1 + $0xfec] sm:$0xf]  ;;  %v10172_v26 = vor.u32 %v12954_v61, %v10169_v62 }
 0x364   :  { %7646 = vmatpush.bf16.msra.mxu3 %v9724_v63  ;;  %v9548_v63 = vor.u32 %v12798_v44, %v9545_v57  ;;  %v10297_v8 = vld [vmem:[%s20112_s1 + $0xff8] sm:$0xf0]  ;;  %v10044_v11 = vor.u32 %v12922_v29, %v10041_v40  ;;  %v12886_v10 = vld [vmem:[%s20112_s1 + $0xccc] sm:$0xf] }
 0x365   :  { %7608 = vmatpush.bf16.msra.mxu0 %v9324_v35  ;;  %v9897_v21 = vld [vmem:[%s20112_s1 + $0xcd8] sm:$0xf0]  ;;  %v12918_v31 = vld [vmem:[%s20112_s1 + $0xdcc] sm:$0xf]  ;;  %v10300_v35 = vor.u32 %v12986_v3, %v10297_v8 }
 0x366   :  { %7621 = vmatpush.bf16.msra.mxu1 %v9452_v24  ;;  %v10025_v60 = vld [vmem:[%s20112_s1 + $0xdd8] sm:$0xf0]  ;;  %v12950_v24 = vld [vmem:[%s20112_s1 + $0xecc] sm:$0xf]  ;;  %v9900_v0 = vor.u32 %v12886_v10, %v9897_v21 }
 0x367   :  { %7634 = vmatpush.bf16.msra.mxu2 %v9580_v32  ;;  %v10153_v32 = vld [vmem:[%s20112_s1 + $0xed8] sm:$0xf0]  ;;  %v12982_v37 = vld [vmem:[%s20112_s1 + $0xfcc] sm:$0xf] }
 0x368   :  { %7647 = vmatpush.bf16.msra.mxu3 %v9708_v1  ;;  %v10281_v38 = vld [vmem:[%s20112_s1 + $0xfd8] sm:$0xf0]  ;;  %v10028_v1 = vor.u32 %v12918_v31, %v10025_v60  ;;  %v10156_v2 = vor.u32 %v12950_v24, %v10153_v32  ;;  %v12882_v39 = vld [vmem:[%s20112_s1 + $0xcac] sm:$0xf] }
 0x369   :  { %7609 = vmatpush.bf16.msra.mxu0 %v9308_v42  ;;  %v9881_v23 = vld [vmem:[%s20112_s1 + $0xcb8] sm:$0xf0]  ;;  %v12914_v20 = vld [vmem:[%s20112_s1 + $0xdac] sm:$0xf]  ;;  %v10284_v41 = vor.u32 %v12982_v37, %v10281_v38 }
 0x36a   :  { %7622 = vmatpush.bf16.msra.mxu1 %v9436_v51  ;;  %v10009_v42 = vld [vmem:[%s20112_s1 + $0xdb8] sm:$0xf0]  ;;  %v12946_v30 = vld [vmem:[%s20112_s1 + $0xeac] sm:$0xf] }
 0x36b   :  { %7635 = vmatpush.bf16.msra.mxu2 %v9564_v25  ;;  %v10137_v50 = vld [vmem:[%s20112_s1 + $0xeb8] sm:$0xf0]  ;;  %v9884_v25 = vor.u32 %v12882_v39, %v9881_v23  ;;  %v10012_v33 = vor.u32 %v12914_v20, %v10009_v42  ;;  %v12910_v44 = vld [vmem:[%s20112_s1 + $0xd8c] sm:$0xf] }
 0x36c   :  { %7648 = vmatpush.bf16.msra.mxu3 %v9692_v43  ;;  %v10265_v51 = vld [vmem:[%s20112_s1 + $0xfb8] sm:$0xf0]  ;;  %v10140_v52 = vor.u32 %v12946_v30, %v10137_v50  ;;  %v12942_v57 = vld [vmem:[%s20112_s1 + $0xe8c] sm:$0xf] }
 0x36d   :  { %7610 = vmatpush.bf16.msra.mxu0 %v9292_v59  ;;  %v9993_v43 = vld [vmem:[%s20112_s1 + $0xd98] sm:$0xf0]  ;;  %v7404_v53 = vpop.f32.mrf.mxu0  ;;  %v12974_v27 = vld [vmem:[%s20112_s1 + $0xf8c] sm:$0xf] }
 0x36e   :  { %7623 = vmatpush.bf16.msra.mxu1 %v9420_v55  ;;  %v10121_v45 = vld [vmem:[%s20112_s1 + $0xe98] sm:$0xf0]  ;;  %v7405_v28 = vadd.f32 %v7404_v53, %v18962_v36  ;;  %v7417_v34 = vpop.f32.mrf.mxu1  ;;  %v9996_v59 = vor.u32 %v12910_v44, %v9993_v43  ;;  %v12874_v61 = vld [vmem:[%s20112_s1 + $0xc6c] sm:$0xf] }
 0x36f   :  { %7636 = vmatpush.bf16.msra.mxu2 %v9548_v63  ;;  %v10249_v56 = vld [vmem:[%s20112_s1 + $0xf98] sm:$0xf0]  ;;  %v10124_v40 = vor.u32 %v12942_v57, %v10121_v45  ;;  %v12906_v55 = vld [vmem:[%s20112_s1 + $0xd6c] sm:$0xf] }
 0x370   :  { %7649 = vmatpush.bf16.msra.mxu3 %v9676_v19  ;;  %7611 = vmatmul.bf16.vlgmr.msra.gmra.mxu0 %v14267_v12  ;;  %v12978_v12 = vld [vmem:[%s20112_s1 + $0xfac] sm:$0xf]  ;;  %v9849_v62 = vld [vmem:[%s20112_s1 + $0xc78] sm:$0xf0]  ;;  %v10252_v36 = vor.u32 %v12974_v27, %v10249_v56  ;;  %v7418_v63 = vadd.f32 %v7417_v34, %v7405_v28 }
 0x371   :  { %7655 = vmatpush.bf16.msrb.mxu0 %v9916_v58  ;;  %7624 = vmatmul.bf16.vlgmr.msra.gmra.mxu1 %v14277_v16  ;;  %v9865_v16 = vld [vmem:[%s20112_s1 + $0xc98] sm:$0xf0]  ;;  %v12938_v8 = vld [vmem:[%s20112_s1 + $0xe6c] sm:$0xf] }
 0x372   :  { %7668 = vmatpush.bf16.msrb.mxu1 %v10044_v11  ;;  %7637 = vmatmul.bf16.vlgmr.msra.gmra.mxu2 %v14275_v15  ;;  %v12878_v15 = vld [vmem:[%s20112_s1 + $0xc8c] sm:$0xf]  ;;  %v9977_v3 = vld [vmem:[%s20112_s1 + $0xd78] sm:$0xf0] }
 0x373   :  { %7681 = vmatpush.bf16.msrb.mxu2 %v10172_v26  ;;  %7650 = vmatmul.bf16.vlgmr.msra.gmra.mxu3 %v14279_v17  ;;  %v10268_v17 = vor.u32 %v12978_v12, %v10265_v51  ;;  %v9868_v29 = vor.u32 %v12878_v15, %v9865_v16  ;;  %v10105_v19 = vld [vmem:[%s20112_s1 + $0xe78] sm:$0xf0]  ;;  %v12970_v58 = vld [vmem:[%s20112_s1 + $0xf6c] sm:$0xf]  ;;  %v9852_v26 = vor.u32 %v12874_v61, %v9849_v62 }
 0x374   :  { %7694 = vmatpush.bf16.msrb.mxu3 %v10300_v35  ;;  %v10233_v11 = vld [vmem:[%s20112_s1 + $0xf78] sm:$0xf0]  ;;  %v9980_v10 = vor.u32 %v12906_v55, %v9977_v3  ;;  %v10108_v21 = vor.u32 %v12938_v8, %v10105_v19  ;;  %v12870_v31 = vld [vmem:[%s20112_s1 + $0xc4c] sm:$0xf] }
 0x375   :  { %7656 = vmatpush.bf16.msrb.mxu0 %v9900_v0  ;;  %v9833_v35 = vld [vmem:[%s20112_s1 + $0xc58] sm:$0xf0]  ;;  %v12902_v60 = vld [vmem:[%s20112_s1 + $0xd4c] sm:$0xf]  ;;  %v10236_v24 = vor.u32 %v12970_v58, %v10233_v11  ;;  %v7430_v32 = vpop.f32.mrf.mxu2  ;;  %v7406_v20 = vpop.f32.mrf.mxu0 }
 0x376   :  { %7669 = vmatpush.bf16.msrb.mxu1 %v10028_v1  ;;  %v9961_v37 = vld [vmem:[%s20112_s1 + $0xd58] sm:$0xf0]  ;;  %v12934_v38 = vld [vmem:[%s20112_s1 + $0xe4c] sm:$0xf]  ;;  %v7431_v1 = vadd.f32 %v7430_v32, %v7418_v63  ;;  %v7419_v42 = vpop.f32.mrf.mxu1 }
 0x377   :  { %7682 = vmatpush.bf16.msrb.mxu2 %v10156_v2  ;;  %v10089_v0 = vld [vmem:[%s20112_s1 + $0xe58] sm:$0xf0]  ;;  %v7443_v2 = vpop.f32.mrf.mxu3  ;;  %v12966_v39 = vld [vmem:[%s20112_s1 + $0xf4c] sm:$0xf]  ;;  %v9964_v50 = vor.u32 %v12902_v60, %v9961_v37 }
 0x378   :  { %7695 = vmatpush.bf16.msrb.mxu3 %v10284_v41  ;;  %v10217_v23 = vld [vmem:[%s20112_s1 + $0xf58] sm:$0xf0]  ;;  %v9836_v41 = vor.u32 %v12870_v31, %v9833_v35  ;;  %v19161_v30 = vadd.f32 %v7443_v2, %v7431_v1  ;;  %v10092_v12 = vor.u32 %v12934_v38, %v10089_v0  ;;  %v12866_v51 = vld [vmem:[%s20112_s1 + $0xc2c] sm:$0xf] }
 0x379   :  { %7657 = vmatpush.bf16.msrb.mxu0 %v9884_v25  ;;  %v9817_v25 = vld [vmem:[%s20112_s1 + $0xc38] sm:$0xf0]  ;;  %v12930_v16 = vld [vmem:[%s20112_s1 + $0xe2c] sm:$0xf] }
 0x37a   :  { %7670 = vmatpush.bf16.msrb.mxu1 %v10012_v33  ;;  %v12898_v33 = vld [vmem:[%s20112_s1 + $0xd2c] sm:$0xf]  ;;  %v9945_v15 = vld [vmem:[%s20112_s1 + $0xd38] sm:$0xf0]  ;;  %v9820_v57 = vor.u32 %v12866_v51, %v9817_v25 }
 0x37b   :  { %7683 = vmatpush.bf16.msrb.mxu2 %v10140_v52  ;;  %v10220_v52 = vor.u32 %v12966_v39, %v10217_v23  ;;  %v10073_v44 = vld [vmem:[%s20112_s1 + $0xe38] sm:$0xf0]  ;;  %v12862_v45 = vld [vmem:[%s20112_s1 + $0xc0c] sm:$0xf]  ;;  %v9948_v27 = vor.u32 %v12898_v33, %v9945_v15 }
 0x37c   :  { %7696 = vmatpush.bf16.msrb.mxu3 %v10268_v17  ;;  %v12962_v17 = vld [vmem:[%s20112_s1 + $0xf2c] sm:$0xf]  ;;  %v10201_v43 = vld [vmem:[%s20112_s1 + $0xf38] sm:$0xf0]  ;;  %v10076_v56 = vor.u32 %v12930_v16, %v10073_v44 }
 0x37d   :  { %7658 = vmatpush.bf16.msrb.mxu0 %v9868_v29  ;;  %v9801_v53 = vld [vmem:[%s20112_s1 + $0xc18] sm:$0xf0]  ;;  %v12894_v28 = vld [vmem:[%s20112_s1 + $0xd0c] sm:$0xf]  ;;  %v7432_v55 = vpop.f32.mrf.mxu2 }
 0x37e   :  { %7671 = vmatpush.bf16.msrb.mxu1 %v9996_v59  ;;  %v9929_v29 = vld [vmem:[%s20112_s1 + $0xd18] sm:$0xf0]  ;;  %v12926_v34 = vld [vmem:[%s20112_s1 + $0xe0c] sm:$0xf]  ;;  %v10204_v59 = vor.u32 %v12962_v17, %v10201_v43  ;;  %v9804_v19 = vor.u32 %v12862_v45, %v9801_v53 }
 0x37f   :  { %7684 = vmatpush.bf16.msrb.mxu2 %v10124_v40  ;;  %v10057_v40 = vld [vmem:[%s20112_s1 + $0xe18] sm:$0xf0]  ;;  %v12958_v61 = vld [vmem:[%s20112_s1 + $0xf0c] sm:$0xf]  ;;  %v7445_v8 = vpop.f32.mrf.mxu3 }
 0x380   :  { %7697 = vmatpush.bf16.msrb.mxu3 %v10252_v36  ;;  %v10185_v62 = vld [vmem:[%s20112_s1 + $0xf18] sm:$0xf0]  ;;  %v13018_v36 = vld [vmem:[%s20112_s1 + $0x10ec] sm:$0xf] }
 0x381   :  { %7659 = vmatpush.bf16.msrb.mxu0 %v9852_v26  ;;  %v10425_v63 = vld [vmem:[%s20112_s1 + $0x10f8] sm:$0xf0]  ;;  %v13050_v3 = vld [vmem:[%s20112_s1 + $0x11ec] sm:$0xf]  ;;  %v10188_v60 = vor.u32 %v12958_v61, %v10185_v62 }
 0x382   :  { %7672 = vmatpush.bf16.msrb.mxu1 %v9980_v10  ;;  %v10553_v58 = vld [vmem:[%s20112_s1 + $0x11f8] sm:$0xf0]  ;;  %v13082_v11 = vld [vmem:[%s20112_s1 + $0x12ec] sm:$0xf]  ;;  %v9932_v10 = vor.u32 %v12894_v28, %v9929_v29 }
 0x383   :  { %7685 = vmatpush.bf16.msrb.mxu2 %v10108_v21  ;;  %v10681_v26 = vld [vmem:[%s20112_s1 + $0x12f8] sm:$0xf0]  ;;  %v10060_v21 = vor.u32 %v12926_v34, %v10057_v40  ;;  %v13114_v31 = vld [vmem:[%s20112_s1 + $0x13ec] sm:$0xf]  ;;  %v10556_v32 = vor.u32 %v13050_v3, %v10553_v58 }
 0x384   :  { %7698 = vmatpush.bf16.msrb.mxu3 %v10236_v24  ;;  %v10809_v35 = vld [vmem:[%s20112_s1 + $0x13f8] sm:$0xf0]  ;;  %v10428_v24 = vor.u32 %v13018_v36, %v10425_v63  ;;  %v10684_v37 = vor.u32 %v13082_v11, %v10681_v26  ;;  %v13014_v38 = vld [vmem:[%s20112_s1 + $0x10cc] sm:$0xf] }
 0x385   :  { %7660 = vmatpush.bf16.msrb.mxu0 %v9836_v41  ;;  %v10409_v0 = vld [vmem:[%s20112_s1 + $0x10d8] sm:$0xf0]  ;;  %v13046_v1 = vld [vmem:[%s20112_s1 + $0x11cc] sm:$0xf]  ;;  %v10812_v2 = vor.u32 %v13114_v31, %v10809_v35 }
 0x386   :  { %7673 = vmatpush.bf16.msrb.mxu1 %v9964_v50  ;;  %v10537_v39 = vld [vmem:[%s20112_s1 + $0x11d8] sm:$0xf0]  ;;  %v13078_v23 = vld [vmem:[%s20112_s1 + $0x12cc] sm:$0xf]  ;;  %v10412_v50 = vor.u32 %v13014_v38, %v10409_v0 }
 0x387   :  { %7686 = vmatpush.bf16.msrb.mxu2 %v10092_v12  ;;  %v10665_v20 = vld [vmem:[%s20112_s1 + $0x12d8] sm:$0xf0]  ;;  %v13110_v41 = vld [vmem:[%s20112_s1 + $0x13cc] sm:$0xf]  ;;  %v10540_v12 = vor.u32 %v13046_v1, %v10537_v39 }
 0x388   :  { %7699 = vmatpush.bf16.msrb.mxu3 %v10220_v52  ;;  %v10793_v42 = vld [vmem:[%s20112_s1 + $0x13d8] sm:$0xf0]  ;;  %v10668_v51 = vor.u32 %v13078_v23, %v10665_v20  ;;  %v13010_v25 = vld [vmem:[%s20112_s1 + $0x10ac] sm:$0xf] }
 0x389   :  { %7661 = vmatpush.bf16.msrb.mxu0 %v9820_v57  ;;  %v10393_v33 = vld [vmem:[%s20112_s1 + $0x10b8] sm:$0xf0]  ;;  %v13042_v52 = vld [vmem:[%s20112_s1 + $0x11ac] sm:$0xf]  ;;  %v10796_v15 = vor.u32 %v13110_v41, %v10793_v42 }
 0x38a   :  { %7674 = vmatpush.bf16.msrb.mxu1 %v9948_v27  ;;  %v10521_v16 = vld [vmem:[%s20112_s1 + $0x11b8] sm:$0xf0]  ;;  %v13074_v44 = vld [vmem:[%s20112_s1 + $0x12ac] sm:$0xf]  ;;  %v10396_v57 = vor.u32 %v13010_v25, %v10393_v33 }
 0x38b   :  { %7687 = vmatpush.bf16.msrb.mxu2 %v10076_v56  ;;  %v10649_v17 = vld [vmem:[%s20112_s1 + $0x12b8] sm:$0xf0]  ;;  %v10524_v45 = vor.u32 %v13042_v52, %v10521_v16  ;;  %v13038_v27 = vld [vmem:[%s20112_s1 + $0x118c] sm:$0xf] }
 0x38c   :  { %7700 = vmatpush.bf16.msrb.mxu3 %v10204_v59  ;;  %v10777_v43 = vld [vmem:[%s20112_s1 + $0x13b8] sm:$0xf0]  ;;  %v10652_v53 = vor.u32 %v13074_v44, %v10649_v17  ;;  %v13070_v28 = vld [vmem:[%s20112_s1 + $0x128c] sm:$0xf] }
 0x38d   :  { %7662 = vmatpush.bf16.msrb.mxu0 %v9804_v19  ;;  %v10505_v56 = vld [vmem:[%s20112_s1 + $0x1198] sm:$0xf0]  ;;  %v7456_v34 = vpop.f32.mrf.mxu0  ;;  %v13102_v59 = vld [vmem:[%s20112_s1 + $0x138c] sm:$0xf] }
 0x38e   :  { %7675 = vmatpush.bf16.msrb.mxu1 %v9932_v10  ;;  %v10633_v29 = vld [vmem:[%s20112_s1 + $0x1298] sm:$0xf0]  ;;  %v7457_v61 = vadd.f32 %v7456_v34, %v19161_v30  ;;  %v7469_v55 = vpop.f32.mrf.mxu1  ;;  %v10508_v36 = vor.u32 %v13038_v27, %v10505_v56  ;;  %v13002_v3 = vld [vmem:[%s20112_s1 + $0x106c] sm:$0xf] }
 0x38f   :  { %7688 = vmatpush.bf16.msrb.mxu2 %v10060_v21  ;;  %v10761_v40 = vld [vmem:[%s20112_s1 + $0x1398] sm:$0xf0]  ;;  %v10636_v63 = vor.u32 %v13070_v28, %v10633_v29  ;;  %v13034_v19 = vld [vmem:[%s20112_s1 + $0x116c] sm:$0xf] }
 0x390   :  { %7701 = vmatpush.bf16.msrb.mxu3 %v10188_v60  ;;  %7663 = vmatmul.bf16.vlgmr.msrb.gmra.mxu0 %v14441_v46  ;;  %v13106_v46 = vld [vmem:[%s20112_s1 + $0x13ac] sm:$0xf]  ;;  %v10361_v8 = vld [vmem:[%s20112_s1 + $0x1078] sm:$0xf0]  ;;  %v10764_v30 = vor.u32 %v13102_v59, %v10761_v40  ;;  %v7470_v58 = vadd.f32 %v7469_v55, %v7457_v61 }
 0x391   :  { %7707 = vmatpush.bf16.msra.mxu0 %v10428_v24  ;;  %7676 = vmatmul.bf16.vlgmr.msrb.gmra.mxu1 %v14445_v48  ;;  %v10377_v48 = vld [vmem:[%s20112_s1 + $0x1098] sm:$0xf0]  ;;  %v13066_v26 = vld [vmem:[%s20112_s1 + $0x126c] sm:$0xf]  ;;  %v10364_v35 = vor.u32 %v13002_v3, %v10361_v8 }
 0x392   :  { %7720 = vmatpush.bf16.msra.mxu1 %v10556_v32  ;;  %7689 = vmatmul.bf16.vlgmr.msrb.gmra.mxu2 %v14443_v47  ;;  %v13006_v47 = vld [vmem:[%s20112_s1 + $0x108c] sm:$0xf]  ;;  %v10489_v11 = vld [vmem:[%s20112_s1 + $0x1178] sm:$0xf0] }
 0x393   :  { %7733 = vmatpush.bf16.msra.mxu2 %v10684_v37  ;;  %7702 = vmatmul.bf16.vlgmr.msrb.gmra.mxu3 %v14447_v49  ;;  %v10780_v49 = vor.u32 %v13106_v46, %v10777_v43  ;;  %v10380_v62 = vor.u32 %v13006_v47, %v10377_v48  ;;  %v10617_v10 = vld [vmem:[%s20112_s1 + $0x1278] sm:$0xf0]  ;;  %v13098_v21 = vld [vmem:[%s20112_s1 + $0x136c] sm:$0xf]  ;;  %v10492_v60 = vor.u32 %v13034_v19, %v10489_v11 }
 0x394   :  { %7746 = vmatpush.bf16.msra.mxu3 %v10812_v2  ;;  %v10745_v31 = vld [vmem:[%s20112_s1 + $0x1378] sm:$0xf0]  ;;  %v10620_v24 = vor.u32 %v13066_v26, %v10617_v10  ;;  %v12998_v32 = vld [vmem:[%s20112_s1 + $0x104c] sm:$0xf] }
 0x395   :  { %7708 = vmatpush.bf16.msra.mxu0 %v10412_v50  ;;  %v10345_v37 = vld [vmem:[%s20112_s1 + $0x1058] sm:$0xf0]  ;;  %v13030_v38 = vld [vmem:[%s20112_s1 + $0x114c] sm:$0xf]  ;;  %v10748_v0 = vor.u32 %v13098_v21, %v10745_v31  ;;  %v7482_v1 = vpop.f32.mrf.mxu2 }
 0x396   :  { %7721 = vmatpush.bf16.msra.mxu1 %v10540_v12  ;;  %v10473_v2 = vld [vmem:[%s20112_s1 + $0x1158] sm:$0xf0]  ;;  %v13062_v39 = vld [vmem:[%s20112_s1 + $0x124c] sm:$0xf]  ;;  %v7483_v20 = vadd.f32 %v7482_v1, %v7470_v58  ;;  %v7495_v41 = vpop.f32.mrf.mxu3  ;;  %v7458_v12 = vpop.f32.mrf.mxu0 }
 0x397   :  { %7734 = vmatpush.bf16.msra.mxu2 %v10668_v51  ;;  %v10601_v23 = vld [vmem:[%s20112_s1 + $0x1258] sm:$0xf0]  ;;  %v13094_v42 = vld [vmem:[%s20112_s1 + $0x134c] sm:$0xf]  ;;  %v10348_v51 = vor.u32 %v12998_v32, %v10345_v37  ;;  %v7471_v25 = vpop.f32.mrf.mxu1  ;;  %v10476_v52 = vor.u32 %v13030_v38, %v10473_v2 }
 0x398   :  { %7747 = vmatpush.bf16.msra.mxu3 %v10796_v15  ;;  %v10729_v50 = vld [vmem:[%s20112_s1 + $0x1358] sm:$0xf0]  ;;  %v19360_v33 = vadd.f32 %v7495_v41, %v7483_v20  ;;  %v10604_v15 = vor.u32 %v13062_v39, %v10601_v23  ;;  %v12994_v16 = vld [vmem:[%s20112_s1 + $0x102c] sm:$0xf] }
 0x399   :  { %7709 = vmatpush.bf16.msra.mxu0 %v10396_v57  ;;  %v10329_v44 = vld [vmem:[%s20112_s1 + $0x1038] sm:$0xf0]  ;;  %v13026_v17 = vld [vmem:[%s20112_s1 + $0x112c] sm:$0xf]  ;;  %v10732_v46 = vor.u32 %v13094_v42, %v10729_v50 }
 0x39a   :  { %7722 = vmatpush.bf16.msra.mxu1 %v10524_v45  ;;  %v10457_v43 = vld [vmem:[%s20112_s1 + $0x1138] sm:$0xf0]  ;;  %v13058_v57 = vld [vmem:[%s20112_s1 + $0x122c] sm:$0xf]  ;;  %v10332_v48 = vor.u32 %v12994_v16, %v10329_v44 }
 0x39b   :  { %7735 = vmatpush.bf16.msra.mxu2 %v10652_v53  ;;  %v10585_v45 = vld [vmem:[%s20112_s1 + $0x1238] sm:$0xf0]  ;;  %v13090_v53 = vld [vmem:[%s20112_s1 + $0x132c] sm:$0xf]  ;;  %v10460_v56 = vor.u32 %v13026_v17, %v10457_v43 }
 0x39c   :  { %7748 = vmatpush.bf16.msra.mxu3 %v10780_v49  ;;  %v10713_v47 = vld [vmem:[%s20112_s1 + $0x1338] sm:$0xf0]  ;;  %v12990_v27 = vld [vmem:[%s20112_s1 + $0x100c] sm:$0xf]  ;;  %v10588_v28 = vor.u32 %v13058_v57, %v10585_v45 }
 0x39d   :  { %7710 = vmatpush.bf16.msra.mxu0 %v10380_v62  ;;  %v10313_v49 = vld [vmem:[%s20112_s1 + $0x1018] sm:$0xf0]  ;;  %v13022_v29 = vld [vmem:[%s20112_s1 + $0x110c] sm:$0xf]  ;;  %v10716_v40 = vor.u32 %v13090_v53, %v10713_v47 }
 0x39e   :  { %7723 = vmatpush.bf16.msra.mxu1 %v10508_v36  ;;  %v10441_v34 = vld [vmem:[%s20112_s1 + $0x1118] sm:$0xf0]  ;;  %v13054_v59 = vld [vmem:[%s20112_s1 + $0x120c] sm:$0xf]  ;;  %v7484_v36 = vpop.f32.mrf.mxu2  ;;  %v7497_v19 = vpop.f32.mrf.mxu3 }
 0x39f   :  { %7736 = vmatpush.bf16.msra.mxu2 %v10636_v63  ;;  %v10569_v61 = vld [vmem:[%s20112_s1 + $0x1218] sm:$0xf0]  ;;  %v13086_v62 = vld [vmem:[%s20112_s1 + $0x130c] sm:$0xf]  ;;  %v10444_v10 = vor.u32 %v13022_v29, %v10441_v34 }
 0x3a0   :  { %7749 = vmatpush.bf16.msra.mxu3 %v10764_v30  ;;  %v10697_v55 = vld [vmem:[%s20112_s1 + $0x1318] sm:$0xf0]  ;;  %v13146_v63 = vld [vmem:[%s20112_s1 + $0x14ec] sm:$0xf]  ;;  %v10316_v30 = vor.u32 %v12990_v27, %v10313_v49  ;;  %v10572_v21 = vor.u32 %v13054_v59, %v10569_v61 }
 0x3a1   :  { %7711 = vmatpush.bf16.msra.mxu0 %v10364_v35  ;;  %v10937_v3 = vld [vmem:[%s20112_s1 + $0x14f8] sm:$0xf0]  ;;  %v13178_v8 = vld [vmem:[%s20112_s1 + $0x15ec] sm:$0xf] }
 0x3a2   :  { %7724 = vmatpush.bf16.msra.mxu1 %v10492_v60  ;;  %v11065_v58 = vld [vmem:[%s20112_s1 + $0x15f8] sm:$0xf0]  ;;  %v13210_v11 = vld [vmem:[%s20112_s1 + $0x16ec] sm:$0xf]  ;;  %v10700_v60 = vor.u32 %v13086_v62, %v10697_v55 }
 0x3a3   :  { %7737 = vmatpush.bf16.msra.mxu2 %v10620_v24  ;;  %v11193_v26 = vld [vmem:[%s20112_s1 + $0x16f8] sm:$0xf0]  ;;  %v13242_v31 = vld [vmem:[%s20112_s1 + $0x17ec] sm:$0xf]  ;;  %v10940_v24 = vor.u32 %v13146_v63, %v10937_v3  ;;  %v11068_v32 = vor.u32 %v13178_v8, %v11065_v58 }
 0x3a4   :  { %7750 = vmatpush.bf16.msra.mxu3 %v10748_v0  ;;  %v11321_v35 = vld [vmem:[%s20112_s1 + $0x17f8] sm:$0xf0]  ;;  %v11196_v37 = vor.u32 %v13210_v11, %v11193_v26  ;;  %v13142_v38 = vld [vmem:[%s20112_s1 + $0x14cc] sm:$0xf] }
 0x3a5   :  { %7712 = vmatpush.bf16.msra.mxu0 %v10348_v51  ;;  %v10921_v0 = vld [vmem:[%s20112_s1 + $0x14d8] sm:$0xf0]  ;;  %v13174_v1 = vld [vmem:[%s20112_s1 + $0x15cc] sm:$0xf]  ;;  %v11324_v2 = vor.u32 %v13242_v31, %v11321_v35 }
 0x3a6   :  { %7725 = vmatpush.bf16.msra.mxu1 %v10476_v52  ;;  %v11049_v39 = vld [vmem:[%s20112_s1 + $0x15d8] sm:$0xf0]  ;;  %v13206_v23 = vld [vmem:[%s20112_s1 + $0x16cc] sm:$0xf]  ;;  %v10924_v50 = vor.u32 %v13142_v38, %v10921_v0 }
 0x3a7   :  { %7738 = vmatpush.bf16.msra.mxu2 %v10604_v15  ;;  %v11177_v20 = vld [vmem:[%s20112_s1 + $0x16d8] sm:$0xf0]  ;;  %v13238_v41 = vld [vmem:[%s20112_s1 + $0x17cc] sm:$0xf]  ;;  %v11052_v12 = vor.u32 %v13174_v1, %v11049_v39 }
 0x3a8   :  { %7751 = vmatpush.bf16.msra.mxu3 %v10732_v46  ;;  %v11305_v42 = vld [vmem:[%s20112_s1 + $0x17d8] sm:$0xf0]  ;;  %v11180_v51 = vor.u32 %v13206_v23, %v11177_v20  ;;  %v13138_v25 = vld [vmem:[%s20112_s1 + $0x14ac] sm:$0xf] }
 0x3a9   :  { %7713 = vmatpush.bf16.msra.mxu0 %v10332_v48  ;;  %v10905_v52 = vld [vmem:[%s20112_s1 + $0x14b8] sm:$0xf0]  ;;  %v13170_v15 = vld [vmem:[%s20112_s1 + $0x15ac] sm:$0xf]  ;;  %v11308_v16 = vor.u32 %v13238_v41, %v11305_v42 }
 0x3aa   :  { %7726 = vmatpush.bf16.msra.mxu1 %v10460_v56  ;;  %v11033_v44 = vld [vmem:[%s20112_s1 + $0x15b8] sm:$0xf0]  ;;  %v13202_v17 = vld [vmem:[%s20112_s1 + $0x16ac] sm:$0xf]  ;;  %v10908_v57 = vor.u32 %v13138_v25, %v10905_v52 }
 0x3ab   :  { %7739 = vmatpush.bf16.msra.mxu2 %v10588_v28  ;;  %v11161_v46 = vld [vmem:[%s20112_s1 + $0x16b8] sm:$0xf0]  ;;  %v13134_v45 = vld [vmem:[%s20112_s1 + $0x148c] sm:$0xf] }
 0x3ac   :  { %7752 = vmatpush.bf16.msra.mxu3 %v10716_v40  ;;  %v11289_v43 = vld [vmem:[%s20112_s1 + $0x17b8] sm:$0xf0]  ;;  %v13166_v47 = vld [vmem:[%s20112_s1 + $0x158c] sm:$0xf] }
 0x3ad   :  { %7714 = vmatpush.bf16.msra.mxu0 %v10316_v30  ;;  %v10889_v53 = vld [vmem:[%s20112_s1 + $0x1498] sm:$0xf0]  ;;  %v13198_v56 = vld [vmem:[%s20112_s1 + $0x168c] sm:$0xf]  ;;  %v7508_v40 = vpop.f32.mrf.mxu0 }
 0x3ae   :  { %7727 = vmatpush.bf16.msra.mxu1 %v10444_v10  ;;  %v11017_v49 = vld [vmem:[%s20112_s1 + $0x1598] sm:$0xf0]  ;;  %v13230_v29 = vld [vmem:[%s20112_s1 + $0x178c] sm:$0xf]  ;;  %v10892_v59 = vor.u32 %v13134_v45, %v10889_v53  ;;  %v7521_v8 = vpop.f32.mrf.mxu1 }
 0x3af   :  { %7740 = vmatpush.bf16.msra.mxu2 %v10572_v21  ;;  %v11145_v28 = vld [vmem:[%s20112_s1 + $0x1698] sm:$0xf0]  ;;  %v11020_v61 = vor.u32 %v13166_v47, %v11017_v49  ;;  %v13130_v55 = vld [vmem:[%s20112_s1 + $0x146c] sm:$0xf] }
 0x3b0   :  { %7753 = vmatpush.bf16.msra.mxu3 %v10700_v60  ;;  %7715 = vmatmul.bf16.vlgmr.msra.gmra.mxu0 %v14678_v9  ;;  %v13234_v9 = vld [vmem:[%s20112_s1 + $0x17ac] sm:$0xf]  ;;  %v11273_v34 = vld [vmem:[%s20112_s1 + $0x1798] sm:$0xf0]  ;;  %v11148_v62 = vor.u32 %v13198_v56, %v11145_v28 }
 0x3b1   :  { %7759 = vmatpush.bf16.msrb.mxu0 %v10940_v24  ;;  %7728 = vmatmul.bf16.vlgmr.msra.gmra.mxu1 %v14688_v14  ;;  %v11164_v14 = vor.u32 %v13202_v17, %v11161_v46  ;;  %v11292_v27 = vor.u32 %v13234_v9, %v11289_v43  ;;  %v10873_v36 = vld [vmem:[%s20112_s1 + $0x1478] sm:$0xf0]  ;;  %v13162_v63 = vld [vmem:[%s20112_s1 + $0x156c] sm:$0xf]  ;;  %v11276_v19 = vor.u32 %v13230_v29, %v11273_v34 }
 0x3b2   :  { %7772 = vmatpush.bf16.msrb.mxu1 %v11068_v32  ;;  %7741 = vmatmul.bf16.vlgmr.msra.gmra.mxu2 %v14686_v13  ;;  %v11036_v13 = vor.u32 %v13170_v15, %v11033_v44  ;;  %v11001_v30 = vld [vmem:[%s20112_s1 + $0x1578] sm:$0xf0]  ;;  %v13194_v58 = vld [vmem:[%s20112_s1 + $0x166c] sm:$0xf]  ;;  %v10876_v31 = vor.u32 %v13130_v55, %v10873_v36 }
 0x3b3   :  { %7785 = vmatpush.bf16.msrb.mxu2 %v11196_v37  ;;  %7754 = vmatmul.bf16.vlgmr.msra.gmra.mxu3 %v14690_v18  ;;  %v13553_v18 = vld [vmem:[%s20113_s2] sm:$0xf]  ;;  %v11129_v11 = vld [vmem:[%s20112_s1 + $0x1678] sm:$0xf0]  ;;  %v13226_v26 = vld [vmem:[%s20112_s1 + $0x176c] sm:$0xf]  ;;  %v11004_v35 = vor.u32 %v13162_v63, %v11001_v30 }
 0x3b4   :  { %7798 = vmatpush.bf16.msrb.mxu3 %v11324_v2  ;;  %v1054_v48 = vperm.slane %v13553_v18, 3  ;;  %v11257_v10 = vld [vmem:[%s20112_s1 + $0x1778] sm:$0xf0]  ;;  %v11132_v60 = vor.u32 %v13194_v58, %v11129_v11  ;;  %v13126_v24 = vld [vmem:[%s20112_s1 + $0x144c] sm:$0xf] }
 0x3b5   :  { %7760 = vmatpush.bf16.msrb.mxu0 %v10924_v50  ;;  %v10857_v32 = vld [vmem:[%s20112_s1 + $0x1458] sm:$0xf0]  ;;  %v13158_v37 = vld [vmem:[%s20112_s1 + $0x154c] sm:$0xf]  ;;  %v7534_v38 = vpop.f32.mrf.mxu2  ;;  %v11260_v0 = vor.u32 %v13226_v26, %v11257_v10 }
 0x3b6   :  { %7773 = vmatpush.bf16.msrb.mxu1 %v11052_v12  ;;  %v7509_v3 = vadd.f32 %v7508_v40, %v1054_v48  ;;  %v10985_v1 = vld [vmem:[%s20112_s1 + $0x1558] sm:$0xf0]  ;;  %v13190_v2 = vld [vmem:[%s20112_s1 + $0x164c] sm:$0xf]  ;;  %v7547_v20 = vpop.f32.mrf.mxu3  ;;  %v10860_v50 = vor.u32 %v13126_v24, %v10857_v32  ;;  %v7523_v17 = vpop.f32.mrf.mxu1 }
 0x3b7   :  { %7786 = vmatpush.bf16.msrb.mxu2 %v11180_v51  ;;  %v11113_v39 = vld [vmem:[%s20112_s1 + $0x1658] sm:$0xf0]  ;;  %v13222_v41 = vld [vmem:[%s20112_s1 + $0x174c] sm:$0xf]  ;;  %v7510_v51 = vpop.f32.mrf.mxu0  ;;  %v10988_v25 = vor.u32 %v13158_v37, %v10985_v1 }
 0x3b8   :  { %7799 = vmatpush.bf16.msrb.mxu3 %v11308_v16  ;;  %v7522_v21 = vadd.f32 %v7521_v8, %v7509_v3  ;;  %v11241_v42 = vld [vmem:[%s20112_s1 + $0x1758] sm:$0xf0]  ;;  %v11116_v52 = vor.u32 %v13190_v2, %v11113_v39  ;;  %v13122_v15 = vld [vmem:[%s20112_s1 + $0x142c] sm:$0xf] }
 0x3b9   :  { %7761 = vmatpush.bf16.msrb.mxu0 %v10908_v57  ;;  %v10841_v16 = vld [vmem:[%s20112_s1 + $0x1438] sm:$0xf0]  ;;  %v13154_v44 = vld [vmem:[%s20112_s1 + $0x152c] sm:$0xf]  ;;  %v11244_v46 = vor.u32 %v13222_v41, %v11241_v42 }
 0x3ba   :  { %7774 = vmatpush.bf16.msrb.mxu1 %v11036_v13  ;;  %v7535_v23 = vadd.f32 %v7534_v38, %v7522_v21  ;;  %v10969_v9 = vld [vmem:[%s20112_s1 + $0x1538] sm:$0xf0]  ;;  %v13186_v43 = vld [vmem:[%s20112_s1 + $0x162c] sm:$0xf] }
 0x3bb   :  { %7787 = vmatpush.bf16.msrb.mxu2 %v11164_v14  ;;  %v11097_v57 = vld [vmem:[%s20112_s1 + $0x1638] sm:$0xf0]  ;;  %v13218_v45 = vld [vmem:[%s20112_s1 + $0x172c] sm:$0xf]  ;;  %v10844_v14 = vor.u32 %v13122_v15, %v10841_v16  ;;  %v10972_v18 = vor.u32 %v13154_v44, %v10969_v9 }
 0x3bc   :  { %7800 = vmatpush.bf16.msrb.mxu3 %v11292_v27  ;;  %v19561_v12 = vadd.f32 %v7547_v20, %v7535_v23  ;;  %v11225_v13 = vld [vmem:[%s20112_s1 + $0x1738] sm:$0xf0]  ;;  %v13118_v53 = vld [vmem:[%s20112_s1 + $0x140c] sm:$0xf]  ;;  %v11100_v48 = vor.u32 %v13186_v43, %v11097_v57 }
 0x3bd   :  { %7762 = vmatpush.bf16.msrb.mxu0 %v10892_v59  ;;  %v10825_v47 = vld [vmem:[%s20112_s1 + $0x1418] sm:$0xf0]  ;;  %v13150_v27 = vld [vmem:[%s20112_s1 + $0x150c] sm:$0xf]  ;;  %v7536_v28 = vpop.f32.mrf.mxu2  ;;  %v11228_v29 = vor.u32 %v13218_v45, %v11225_v13 }
 0x3be   :  { %7775 = vmatpush.bf16.msrb.mxu1 %v11020_v61  ;;  %v10953_v49 = vld [vmem:[%s20112_s1 + $0x1518] sm:$0xf0]  ;;  %v13182_v56 = vld [vmem:[%s20112_s1 + $0x160c] sm:$0xf]  ;;  %v7549_v61 = vpop.f32.mrf.mxu3  ;;  %v10828_v63 = vor.u32 %v13118_v53, %v10825_v47 }
 0x3bf   :  { %7788 = vmatpush.bf16.msrb.mxu2 %v11148_v62  ;;  %v11081_v34 = vld [vmem:[%s20112_s1 + $0x1618] sm:$0xf0]  ;;  %v13214_v59 = vld [vmem:[%s20112_s1 + $0x170c] sm:$0xf]  ;;  %v10956_v30 = vor.u32 %v13150_v27, %v10953_v49 }
 0x3c0   :  { %7801 = vmatpush.bf16.msrb.mxu3 %v11276_v19  ;;  %v11209_v40 = vld [vmem:[%s20112_s1 + $0x1718] sm:$0xf0]  ;;  %v13274_v62 = vld [vmem:[%s20112_s1 + $0x18ec] sm:$0xf]  ;;  %v11084_v58 = vor.u32 %v13182_v56, %v11081_v34 }
 0x3c1   :  { %7763 = vmatpush.bf16.msrb.mxu0 %v10876_v31  ;;  %v11449_v55 = vld [vmem:[%s20112_s1 + $0x18f8] sm:$0xf0]  ;;  %v13306_v36 = vld [vmem:[%s20112_s1 + $0x19ec] sm:$0xf]  ;;  %v11212_v10 = vor.u32 %v13214_v59, %v11209_v40 }
 0x3c2   :  { %7776 = vmatpush.bf16.msrb.mxu1 %v11004_v35  ;;  %v11577_v3 = vld [vmem:[%s20112_s1 + $0x19f8] sm:$0xf0]  ;;  %v13338_v8 = vld [vmem:[%s20112_s1 + $0x1aec] sm:$0xf]  ;;  %v11452_v21 = vor.u32 %v13274_v62, %v11449_v55 }
 0x3c3   :  { %7789 = vmatpush.bf16.msrb.mxu2 %v11132_v60  ;;  %v11705_v19 = vld [vmem:[%s20112_s1 + $0x1af8] sm:$0xf0]  ;;  %v13370_v11 = vld [vmem:[%s20112_s1 + $0x1bec] sm:$0xf]  ;;  %v11580_v31 = vor.u32 %v13306_v36, %v11577_v3 }
 0x3c4   :  { %7802 = vmatpush.bf16.msrb.mxu3 %v11260_v0  ;;  %v11833_v26 = vld [vmem:[%s20112_s1 + $0x1bf8] sm:$0xf0]  ;;  %v11708_v35 = vor.u32 %v13338_v8, %v11705_v19  ;;  %v13270_v60 = vld [vmem:[%s20112_s1 + $0x18cc] sm:$0xf] }
 0x3c5   :  { %7764 = vmatpush.bf16.msrb.mxu0 %v10860_v50  ;;  %v11433_v24 = vld [vmem:[%s20112_s1 + $0x18d8] sm:$0xf0]  ;;  %v13302_v32 = vld [vmem:[%s20112_s1 + $0x19cc] sm:$0xf]  ;;  %v11836_v37 = vor.u32 %v13370_v11, %v11833_v26 }
 0x3c6   :  { %7777 = vmatpush.bf16.msrb.mxu1 %v10988_v25  ;;  %v11561_v38 = vld [vmem:[%s20112_s1 + $0x19d8] sm:$0xf0]  ;;  %v13334_v0 = vld [vmem:[%s20112_s1 + $0x1acc] sm:$0xf]  ;;  %v11436_v23 = vor.u32 %v13270_v60, %v11433_v24 }
 0x3c7   :  { %7790 = vmatpush.bf16.msrb.mxu2 %v11116_v52  ;;  %v11689_v1 = vld [vmem:[%s20112_s1 + $0x1ad8] sm:$0xf0]  ;;  %v13366_v2 = vld [vmem:[%s20112_s1 + $0x1bcc] sm:$0xf]  ;;  %v11564_v20 = vor.u32 %v13302_v32, %v11561_v38 }
 0x3c8   :  { %7803 = vmatpush.bf16.msrb.mxu3 %v11244_v46  ;;  %v11817_v39 = vld [vmem:[%s20112_s1 + $0x1bd8] sm:$0xf0]  ;;  %v11692_v41 = vor.u32 %v13334_v0, %v11689_v1  ;;  %v13266_v42 = vld [vmem:[%s20112_s1 + $0x18ac] sm:$0xf] }
 0x3c9   :  { %7765 = vmatpush.bf16.msrb.mxu0 %v10844_v14  ;;  %v11417_v50 = vld [vmem:[%s20112_s1 + $0x18b8] sm:$0xf0]  ;;  %v13298_v51 = vld [vmem:[%s20112_s1 + $0x19ac] sm:$0xf]  ;;  %v11820_v25 = vor.u32 %v13366_v2, %v11817_v39 }
 0x3ca   :  { %7778 = vmatpush.bf16.msrb.mxu1 %v10972_v18  ;;  %v11545_v52 = vld [vmem:[%s20112_s1 + $0x19b8] sm:$0xf0]  ;;  %v13330_v15 = vld [vmem:[%s20112_s1 + $0x1aac] sm:$0xf]  ;;  %v11420_v17 = vor.u32 %v13266_v42, %v11417_v50 }
 0x3cb   :  { %7791 = vmatpush.bf16.msrb.mxu2 %v11100_v48  ;;  %v11673_v16 = vld [vmem:[%s20112_s1 + $0x1ab8] sm:$0xf0]  ;;  %v11548_v46 = vor.u32 %v13298_v51, %v11545_v52  ;;  %v13294_v43 = vld [vmem:[%s20112_s1 + $0x198c] sm:$0xf] }
 0x3cc   :  { %7804 = vmatpush.bf16.msrb.mxu3 %v11228_v29  ;;  %v11801_v44 = vld [vmem:[%s20112_s1 + $0x1bb8] sm:$0xf0]  ;;  %v11676_v9 = vor.u32 %v13330_v15, %v11673_v16  ;;  %v13326_v45 = vld [vmem:[%s20112_s1 + $0x1a8c] sm:$0xf] }
 0x3cd   :  { %7766 = vmatpush.bf16.msrb.mxu0 %v10828_v63  ;;  %v11529_v57 = vld [vmem:[%s20112_s1 + $0x1998] sm:$0xf0]  ;;  %v13358_v14 = vld [vmem:[%s20112_s1 + $0x1b8c] sm:$0xf]  ;;  %v7560_v18 = vpop.f32.mrf.mxu0 }
 0x3ce   :  { %7779 = vmatpush.bf16.msrb.mxu1 %v10956_v30  ;;  %v11657_v13 = vld [vmem:[%s20112_s1 + $0x1a98] sm:$0xf0]  ;;  %v11532_v48 = vor.u32 %v13294_v43, %v11529_v57  ;;  %v13258_v49 = vld [vmem:[%s20112_s1 + $0x186c] sm:$0xf]  ;;  %v7561_v29 = vadd.f32 %v7560_v18, %v19561_v12  ;;  %v7573_v34 = vpop.f32.mrf.mxu1 }
 0x3cf   :  { %7792 = vmatpush.bf16.msrb.mxu2 %v11084_v58  ;;  %v11785_v53 = vld [vmem:[%s20112_s1 + $0x1b98] sm:$0xf0]  ;;  %v11660_v27 = vor.u32 %v13326_v45, %v11657_v13  ;;  %v13290_v28 = vld [vmem:[%s20112_s1 + $0x196c] sm:$0xf] }
 0x3d0   :  { %7805 = vmatpush.bf16.msrb.mxu3 %v11212_v10  ;;  %7767 = vmatmul.bf16.vlgmr.msrb.gmra.mxu0 %v14855_v4  ;;  %v13362_v4 = vld [vmem:[%s20112_s1 + $0x1bac] sm:$0xf]  ;;  %v11385_v56 = vld [vmem:[%s20112_s1 + $0x1878] sm:$0xf0]  ;;  %v11788_v59 = vor.u32 %v13358_v14, %v11785_v53  ;;  %v7574_v36 = vadd.f32 %v7573_v34, %v7561_v29 }
 0x3d1   :  { %7811 = vmatpush.bf16.msra.mxu0 %v11452_v21  ;;  %7780 = vmatmul.bf16.vlgmr.msrb.gmra.mxu1 %v14859_v6  ;;  %v11401_v6 = vld [vmem:[%s20112_s1 + $0x1898] sm:$0xf0]  ;;  %v13322_v61 = vld [vmem:[%s20112_s1 + $0x1a6c] sm:$0xf]  ;;  %v11388_v63 = vor.u32 %v13258_v49, %v11385_v56 }
 0x3d2   :  { %7824 = vmatpush.bf16.msra.mxu1 %v11580_v31  ;;  %7793 = vmatmul.bf16.vlgmr.msrb.gmra.mxu2 %v14857_v5  ;;  %v13262_v5 = vld [vmem:[%s20112_s1 + $0x188c] sm:$0xf]  ;;  %v11513_v40 = vld [vmem:[%s20112_s1 + $0x1978] sm:$0xf0] }
 0x3d3   :  { %7837 = vmatpush.bf16.msra.mxu2 %v11708_v35  ;;  %7806 = vmatmul.bf16.vlgmr.msrb.gmra.mxu3 %v14861_v7  ;;  %v11804_v7 = vor.u32 %v13362_v4, %v11801_v44  ;;  %v11404_v47 = vor.u32 %v13262_v5, %v11401_v6  ;;  %v11641_v62 = vld [vmem:[%s20112_s1 + $0x1a78] sm:$0xf0]  ;;  %v13354_v55 = vld [vmem:[%s20112_s1 + $0x1b6c] sm:$0xf]  ;;  %v11516_v3 = vor.u32 %v13290_v28, %v11513_v40 }
 0x3d4   :  { %7850 = vmatpush.bf16.msra.mxu3 %v11836_v37  ;;  %v11769_v12 = vld [vmem:[%s20112_s1 + $0x1b78] sm:$0xf0]  ;;  %v11644_v8 = vor.u32 %v13322_v61, %v11641_v62  ;;  %v13254_v19 = vld [vmem:[%s20112_s1 + $0x184c] sm:$0xf] }
 0x3d5   :  { %7812 = vmatpush.bf16.msra.mxu0 %v11436_v23  ;;  %v11369_v30 = vld [vmem:[%s20112_s1 + $0x1858] sm:$0xf0]  ;;  %v13286_v58 = vld [vmem:[%s20112_s1 + $0x194c] sm:$0xf]  ;;  %v7586_v11 = vpop.f32.mrf.mxu2  ;;  %v11772_v26 = vor.u32 %v13354_v55, %v11769_v12  ;;  %v7562_v0 = vpop.f32.mrf.mxu0 }
 0x3d6   :  { %7825 = vmatpush.bf16.msra.mxu1 %v11564_v20  ;;  %v11497_v10 = vld [vmem:[%s20112_s1 + $0x1958] sm:$0xf0]  ;;  %v13318_v21 = vld [vmem:[%s20112_s1 + $0x1a4c] sm:$0xf]  ;;  %v7587_v35 = vadd.f32 %v7586_v11, %v7574_v36  ;;  %v7599_v60 = vpop.f32.mrf.mxu3  ;;  %v11372_v37 = vor.u32 %v13254_v19, %v11369_v30 }
 0x3d7   :  { %7838 = vmatpush.bf16.msra.mxu2 %v11692_v41  ;;  %v11625_v31 = vld [vmem:[%s20112_s1 + $0x1a58] sm:$0xf0]  ;;  %v13350_v24 = vld [vmem:[%s20112_s1 + $0x1b4c] sm:$0xf]  ;;  %v11500_v1 = vor.u32 %v13286_v58, %v11497_v10  ;;  %v7575_v41 = vpop.f32.mrf.mxu1 }
 0x3d8   :  { %7851 = vmatpush.bf16.msra.mxu3 %v11820_v25  ;;  %v11753_v32 = vld [vmem:[%s20112_s1 + $0x1b58] sm:$0xf0]  ;;  %v19760_v38 = vadd.f32 %v7599_v60, %v7587_v35  ;;  %v11628_v2 = vor.u32 %v13318_v21, %v11625_v31  ;;  %v13250_v39 = vld [vmem:[%s20112_s1 + $0x182c] sm:$0xf] }
 0x3d9   :  { %7813 = vmatpush.bf16.msra.mxu0 %v11420_v17  ;;  %v11353_v23 = vld [vmem:[%s20112_s1 + $0x1838] sm:$0xf0]  ;;  %v13282_v20 = vld [vmem:[%s20112_s1 + $0x192c] sm:$0xf]  ;;  %v11756_v42 = vor.u32 %v13350_v24, %v11753_v32  ;;  %v13554_v24 = vld [vmem:[#allocation1] sm:$0xff] }
 0x3da   :  { %7826 = vmatpush.bf16.msra.mxu1 %v11548_v46  ;;  %v11481_v50 = vld [vmem:[%s20112_s1 + $0x1938] sm:$0xf0]  ;;  %v13314_v51 = vld [vmem:[%s20112_s1 + $0x1a2c] sm:$0xf]  ;;  %v11356_v16 = vor.u32 %v13250_v39, %v11353_v23 }
 0x3db   :  { %7839 = vmatpush.bf16.msra.mxu2 %v11676_v9  ;;  %v11609_v25 = vld [vmem:[%s20112_s1 + $0x1a38] sm:$0xf0]  ;;  %v13346_v52 = vld [vmem:[%s20112_s1 + $0x1b2c] sm:$0xf]  ;;  %v11484_v17 = vor.u32 %v13282_v20, %v11481_v50 }
 0x3dc   :  { %7852 = vmatpush.bf16.msra.mxu3 %v11804_v7  ;;  %v11737_v15 = vld [vmem:[%s20112_s1 + $0x1b38] sm:$0xf0]  ;;  %v13246_v4 = vld [vmem:[%s20112_s1 + $0x180c] sm:$0xf]  ;;  %v11612_v46 = vor.u32 %v13314_v51, %v11609_v25 }
 0x3dd   :  { %7814 = vmatpush.bf16.msra.mxu0 %v11404_v47  ;;  %v11337_v44 = vld [vmem:[%s20112_s1 + $0x1818] sm:$0xf0]  ;;  %v13278_v9 = vld [vmem:[%s20112_s1 + $0x190c] sm:$0xf]  ;;  %v7588_v43 = vpop.f32.mrf.mxu2  ;;  %v11740_v7 = vor.u32 %v13346_v52, %v11737_v15 }
 0x3de   :  { %7827 = vmatpush.bf16.msra.mxu1 %v11532_v48  ;;  %v11465_v5 = vld [vmem:[%s20112_s1 + $0x1918] sm:$0xf0]  ;;  %v13310_v6 = vld [vmem:[%s20112_s1 + $0x1a0c] sm:$0xf]  ;;  %v7601_v14 = vpop.f32.mrf.mxu3  ;;  %v11340_v48 = vor.u32 %v13246_v4, %v11337_v44 }
 0x3df   :  { %7840 = vmatpush.bf16.msra.mxu2 %v11660_v27  ;;  %v11593_v57 = vld [vmem:[%s20112_s1 + $0x1a18] sm:$0xf0]  ;;  %v13342_v45 = vld [vmem:[%s20112_s1 + $0x1b0c] sm:$0xf]  ;;  %v11468_v28 = vor.u32 %v13278_v9, %v11465_v5 }
 0x3e0   :  { %7853 = vmatpush.bf16.msra.mxu3 %v11788_v59  ;;  %v11721_v13 = vld [vmem:[%s20112_s1 + $0x1b18] sm:$0xf0]  ;;  %v13402_v53 = vld [vmem:[%s20112_s1 + $0x1cec] sm:$0xf]  ;;  %v11596_v29 = vor.u32 %v13310_v6, %v11593_v57 }
 0x3e1   :  { %7815 = vmatpush.bf16.msra.mxu0 %v11388_v63  ;;  %v11961_v47 = vld [vmem:[%s20112_s1 + $0x1cf8] sm:$0xf0]  ;;  %v13434_v18 = vld [vmem:[%s20112_s1 + $0x1dec] sm:$0xf]  ;;  %v11724_v40 = vor.u32 %v13342_v45, %v11721_v13 }
 0x3e2   :  { %7828 = vmatpush.bf16.msra.mxu1 %v11516_v3  ;;  %v12089_v27 = vld [vmem:[%s20112_s1 + $0x1df8] sm:$0xf0]  ;;  %v13466_v49 = vld [vmem:[%s20112_s1 + $0x1eec] sm:$0xf]  ;;  %v11964_v61 = vor.u32 %v13402_v53, %v11961_v47 }
 0x3e3   :  { %7841 = vmatpush.bf16.msra.mxu2 %v11644_v8  ;;  %v12217_v56 = vld [vmem:[%s20112_s1 + $0x1ef8] sm:$0xf0]  ;;  %v13498_v34 = vld [vmem:[%s20112_s1 + $0x1fec] sm:$0xf]  ;;  %v12092_v62 = vor.u32 %v13434_v18, %v12089_v27 }
 0x3e4   :  { %7854 = vmatpush.bf16.msra.mxu3 %v11772_v26  ;;  %v12345_v59 = vld [vmem:[%s20112_s1 + $0x1ff8] sm:$0xf0]  ;;  %v12220_v55 = vor.u32 %v13466_v49, %v12217_v56  ;;  %v13398_v12 = vld [vmem:[%s20112_s1 + $0x1ccc] sm:$0xf] }
 0x3e5   :  { %7816 = vmatpush.bf16.msra.mxu0 %v11372_v37  ;;  %v11945_v36 = vld [vmem:[%s20112_s1 + $0x1cd8] sm:$0xf0]  ;;  %v13430_v63 = vld [vmem:[%s20112_s1 + $0x1dcc] sm:$0xf]  ;;  %v12348_v3 = vor.u32 %v13498_v34, %v12345_v59 }
 0x3e6   :  { %7829 = vmatpush.bf16.msra.mxu1 %v11500_v1  ;;  %v12073_v8 = vld [vmem:[%s20112_s1 + $0x1dd8] sm:$0xf0]  ;;  %v13462_v19 = vld [vmem:[%s20112_s1 + $0x1ecc] sm:$0xf]  ;;  %v11948_v26 = vor.u32 %v13398_v12, %v11945_v36 }
 0x3e7   :  { %7842 = vmatpush.bf16.msra.mxu2 %v11628_v2  ;;  %v12201_v30 = vld [vmem:[%s20112_s1 + $0x1ed8] sm:$0xf0]  ;;  %v13494_v58 = vld [vmem:[%s20112_s1 + $0x1fcc] sm:$0xf]  ;;  %v12076_v10 = vor.u32 %v13430_v63, %v12073_v8  ;;  %v13555_v2 = vld [vmem:[#allocation1 + $0x12] sm:$0xff] }
 0x3e8   :  { %7855 = vmatpush.bf16.msra.mxu3 %v11756_v42  ;;  %v12329_v11 = vld [vmem:[%s20112_s1 + $0x1fd8] sm:$0xf0]  ;;  %v12204_v21 = vor.u32 %v13462_v19, %v12201_v30  ;;  %v13394_v31 = vld [vmem:[%s20112_s1 + $0x1cac] sm:$0xf] }
 0x3e9   :  { %7817 = vmatpush.bf16.msra.mxu0 %v11356_v16  ;;  %v11929_v35 = vld [vmem:[%s20112_s1 + $0x1cb8] sm:$0xf0]  ;;  %v13426_v60 = vld [vmem:[%s20112_s1 + $0x1dac] sm:$0xf]  ;;  %v12332_v32 = vor.u32 %v13494_v58, %v12329_v11 }
 0x3ea   :  { %7830 = vmatpush.bf16.msra.mxu1 %v11484_v17  ;;  %v12057_v37 = vld [vmem:[%s20112_s1 + $0x1db8] sm:$0xf0]  ;;  %v13458_v0 = vld [vmem:[%s20112_s1 + $0x1eac] sm:$0xf]  ;;  %v11932_v42 = vor.u32 %v13394_v31, %v11929_v35 }
 0x3eb   :  { %7843 = vmatpush.bf16.msra.mxu2 %v11612_v46  ;;  %v12185_v1 = vld [vmem:[%s20112_s1 + $0x1eb8] sm:$0xf0]  ;;  %v13556_v39 = vld [vmem:[#allocation1 + $0x9] sm:$0xff]  ;;  %v12060_v50 = vor.u32 %v13426_v60, %v12057_v37 }
 0x3ec   :  { %7856 = vmatpush.bf16.msra.mxu3 %v11740_v7  ;;  %v13490_v23 = vld [vmem:[%s20112_s1 + $0x1fac] sm:$0xf]  ;;  %v12313_v20 = vld [vmem:[%s20112_s1 + $0x1fb8] sm:$0xf0]  ;;  %v12188_v51 = vor.u32 %v13458_v0, %v12185_v1 }
 0x3ed   :  { %7818 = vmatpush.bf16.msra.mxu0 %v11340_v48  ;;  %v13557_v41 = vld [vmem:[#allocation1 + $0x1b] sm:$0xff]  ;;  %v13390_v25 = vld [vmem:[%s20112_s1 + $0x1c8c] sm:$0xf]  ;;  %v12316_v16 = vor.u32 %v13490_v23, %v12313_v20  ;;  %v7612_v46 = vpop.f32.mrf.mxu0 }
 0x3ee   :  { %7831 = vmatpush.bf16.msra.mxu1 %v11468_v28  ;;  %v11913_v52 = vld [vmem:[%s20112_s1 + $0x1c98] sm:$0xf0]  ;;  %v13422_v15 = vld [vmem:[%s20112_s1 + $0x1d8c] sm:$0xf]  ;;  %v7613_v6 = vadd.f32 %v7612_v46, %v19760_v38  ;;  %v7625_v7 = vpop.f32.mrf.mxu1 }
 0x3ef   :  { %7844 = vmatpush.bf16.msra.mxu2 %v11596_v29  ;;  %v12041_v4 = vld [vmem:[%s20112_s1 + $0x1d98] sm:$0xf0]  ;;  %v13454_v44 = vld [vmem:[%s20112_s1 + $0x1e8c] sm:$0xf]  ;;  %v11916_v43 = vor.u32 %v13390_v25, %v11913_v52 }
 0x3f0   :  { %7857 = vmatpush.bf16.msra.mxu3 %v11724_v40  ;;  %7819 = vmatmul.bf16.vlgmr.msra.gmra.mxu0 %v13554_v24  ;;  %v12169_v17 = vld [vmem:[%s20112_s1 + $0x1e98] sm:$0xf0]  ;;  %v13486_v9 = vld [vmem:[%s20112_s1 + $0x1f8c] sm:$0xf]  ;;  %v12044_v57 = vor.u32 %v13422_v15, %v12041_v4  ;;  %v7626_v47 = vadd.f32 %v7625_v7, %v7613_v6 }
 0x3f1   :  { %7863 = vmatpush.bf16.msrb.mxu0 %v11964_v61  ;;  %7832 = vmatmul.bf16.vlgmr.msra.gmra.mxu1 %v13556_v39  ;;  %v12297_v5 = vld [vmem:[%s20112_s1 + $0x1f98] sm:$0xf0]  ;;  %v12172_v45 = vor.u32 %v13454_v44, %v12169_v17  ;;  %v13386_v13 = vld [vmem:[%s20112_s1 + $0x1c6c] sm:$0xf] }
 0x3f2   :  { %7876 = vmatpush.bf16.msrb.mxu1 %v12092_v62  ;;  %7845 = vmatmul.bf16.vlgmr.msra.gmra.mxu2 %v13555_v2  ;;  %v11897_v14 = vld [vmem:[%s20112_s1 + $0x1c78] sm:$0xf0]  ;;  %v13418_v53 = vld [vmem:[%s20112_s1 + $0x1d6c] sm:$0xf]  ;;  %v12300_v38 = vor.u32 %v13486_v9, %v12297_v5 }
 0x3f3   :  { %7889 = vmatpush.bf16.msrb.mxu2 %v12220_v55  ;;  %7858 = vmatmul.bf16.vlgmr.msra.gmra.mxu3 %v13557_v41  ;;  %v12025_v18 = vld [vmem:[%s20112_s1 + $0x1d78] sm:$0xf0]  ;;  %v13450_v48 = vld [vmem:[%s20112_s1 + $0x1e6c] sm:$0xf]  ;;  %v11900_v28 = vor.u32 %v13386_v13, %v11897_v14  ;;  %v13507_v13 = vld [vmem:[%s20114_s3 + $0x30] sm:$0xff] }
 0x3f4   :  { %7902 = vmatpush.bf16.msrb.mxu3 %v12348_v3  ;;  %v12153_v27 = vld [vmem:[%s20112_s1 + $0x1e78] sm:$0xf0]  ;;  %v13482_v49 = vld [vmem:[%s20112_s1 + $0x1f6c] sm:$0xf]  ;;  %v12028_v29 = vor.u32 %v13418_v53, %v12025_v18  ;;  %v13515_v14 = vld [vmem:[%s20114_s3 + $0x70] sm:$0xff] }
 0x3f5   :  { %7864 = vmatpush.bf16.msrb.mxu0 %v11948_v26  ;;  %v12281_v56 = vld [vmem:[%s20112_s1 + $0x1f78] sm:$0xf0]  ;;  %v12156_v34 = vor.u32 %v13450_v48, %v12153_v27  ;;  %v13382_v59 = vld [vmem:[%s20112_s1 + $0x1c4c] sm:$0xf]  ;;  %v7638_v55 = vpop.f32.mrf.mxu2  ;;  %v7614_v58 = vpop.f32.mrf.mxu0  ;;  %v13523_v53 = vld [vmem:[%s20114_s3 + $0xb0] sm:$0xff] }
 0x3f6   :  { %7877 = vmatpush.bf16.msrb.mxu1 %v12076_v10  ;;  %v11881_v40 = vld [vmem:[%s20112_s1 + $0x1c58] sm:$0xf0]  ;;  %v13414_v61 = vld [vmem:[%s20112_s1 + $0x1d4c] sm:$0xf]  ;;  %v12284_v62 = vor.u32 %v13482_v49, %v12281_v56  ;;  %v7639_v3 = vadd.f32 %v7638_v55, %v7626_v47  ;;  %v7651_v8 = vpop.f32.mrf.mxu3  ;;  %v7627_v26 = vpop.f32.mrf.mxu1 }
 0x3f7   :  { %7890 = vmatpush.bf16.msrb.mxu2 %v12204_v21  ;;  %v12009_v12 = vld [vmem:[%s20112_s1 + $0x1d58] sm:$0xf0]  ;;  %v13446_v36 = vld [vmem:[%s20112_s1 + $0x1e4c] sm:$0xf]  ;;  %v11884_v11 = vor.u32 %v13382_v59, %v11881_v40  ;;  %v13513_v40 = vld [vmem:[%s20114_s3 + $0x60] sm:$0xff] }
 0x3f8   :  { %7903 = vmatpush.bf16.msrb.mxu3 %v12332_v32  ;;  %v12137_v63 = vld [vmem:[%s20112_s1 + $0x1e58] sm:$0xf0]  ;;  %v13478_v19 = vld [vmem:[%s20112_s1 + $0x1f4c] sm:$0xf]  ;;  %v19955_v10 = vadd.f32 %v7651_v8, %v7639_v3  ;;  %v12012_v21 = vor.u32 %v13414_v61, %v12009_v12  ;;  %v13521_v61 = vld [vmem:[%s20114_s3 + $0xa0] sm:$0xff] }
 0x3f9   :  { %7865 = vmatpush.bf16.msrb.mxu0 %v11932_v42  ;;  %v12265_v30 = vld [vmem:[%s20112_s1 + $0x1f58] sm:$0xf0]  ;;  %v12140_v31 = vor.u32 %v13446_v36, %v12137_v63  ;;  %v13378_v35 = vld [vmem:[%s20112_s1 + $0x1c2c] sm:$0xf]  ;;  %v13511_v26 = vld [vmem:[%s20114_s3 + $0x50] sm:$0xff] }
 0x3fa   :  { %7878 = vmatpush.bf16.msrb.mxu1 %v12060_v50  ;;  %v11865_v60 = vld [vmem:[%s20112_s1 + $0x1c38] sm:$0xf0]  ;;  %v13410_v24 = vld [vmem:[%s20112_s1 + $0x1d2c] sm:$0xf]  ;;  %v12268_v32 = vor.u32 %v13478_v19, %v12265_v30  ;;  %v13503_v30 = vld [vmem:[%s20114_s3 + $0x10] sm:$0xff] }
 0x3fb   :  { %7891 = vmatpush.bf16.msrb.mxu2 %v12188_v51  ;;  %v11993_v37 = vld [vmem:[%s20112_s1 + $0x1d38] sm:$0xf0]  ;;  %v13442_v0 = vld [vmem:[%s20112_s1 + $0x1e2c] sm:$0xf]  ;;  %v11868_v23 = vor.u32 %v13378_v35, %v11865_v60 }
 0x3fc   :  { %7904 = vmatpush.bf16.msrb.mxu3 %v12316_v16  ;;  %v12121_v1 = vld [vmem:[%s20112_s1 + $0x1e38] sm:$0xf0]  ;;  %v13474_v2 = vld [vmem:[%s20112_s1 + $0x1f2c] sm:$0xf]  ;;  %v11996_v20 = vor.u32 %v13410_v24, %v11993_v37  ;;  %v7915_v37 = vmax.f32 %v16188_v54, 0.0 }
 0x3fd   :  { %7866 = vmatpush.bf16.msrb.mxu0 %v11916_v43  ;;  %v12249_v39 = vld [vmem:[%s20112_s1 + $0x1f38] sm:$0xf0]  ;;  %v12124_v41 = vor.u32 %v13442_v0, %v12121_v1  ;;  %v13374_v42 = vld [vmem:[%s20112_s1 + $0x1c0c] sm:$0xf]  ;;  %v7640_v4 = vpop.f32.mrf.mxu2  ;;  %v13509_v0 = vld [vmem:[%s20114_s3 + $0x40] sm:$0xff] }
 0x3fe   :  { %7879 = vmatpush.bf16.msrb.mxu1 %v12044_v57  ;;  %v11849_v50 = vld [vmem:[%s20112_s1 + $0x1c18] sm:$0xf0]  ;;  %v13406_v51 = vld [vmem:[%s20112_s1 + $0x1d0c] sm:$0xf]  ;;  %v12252_v25 = vor.u32 %v13474_v2, %v12249_v39  ;;  %v7653_v46 = vpop.f32.mrf.mxu3  ;;  %v13517_v1 = vld [vmem:[%s20114_s3 + $0x80] sm:$0xff]  ;;  %v7916_v2 = vmax.f32 %v17774_v22, 0.0 }
 0x3ff   :  { %7892 = vmatpush.bf16.msrb.mxu2 %v12172_v45  ;;  %v11977_v52 = vld [vmem:[%s20112_s1 + $0x1d18] sm:$0xf0]  ;;  %v13438_v15 = vld [vmem:[%s20112_s1 + $0x1e0c] sm:$0xf]  ;;  %v11852_v9 = vor.u32 %v13374_v42, %v11849_v50  ;;  %v7917_v39 = vmax.f32 %v19360_v33, 0.0 }
 0x400   :  { %7905 = vmatpush.bf16.msrb.mxu3 %v12300_v38  ;;  %v12105_v16 = vld [vmem:[%s20112_s1 + $0x1e18] sm:$0xf0]  ;;  %v13470_v44 = vld [vmem:[%s20112_s1 + $0x1f0c] sm:$0xf]  ;;  %v11980_v5 = vor.u32 %v13406_v51, %v11977_v52  ;;  %v13558_v38 = vld [vmem:[#allocation1 + $0x24] sm:$0xff] }
 0x401   :  { %7867 = vmatpush.bf16.msrb.mxu0 %v11900_v28  ;;  %v12233_v17 = vld [vmem:[%s20112_s1 + $0x1f18] sm:$0xf0]  ;;  %v12108_v6 = vor.u32 %v13438_v15, %v12105_v16  ;;  %v13559_v47 = vld [vmem:[#allocation1 + $0x2d] sm:$0xff]  ;;  %v7921_v54 = vpack.c.bf16 %v7917_v39, %v7917_v39 }
 0x402   :  { %7880 = vmatpush.bf16.msrb.mxu1 %v12028_v29  ;;  %v12236_v43 = vor.u32 %v13470_v44, %v12233_v17  ;;  %v13508_v7 = vld [vmem:[%s20114_s3 + $0x38] sm:$0xff]  ;;  %v13506_v27 = vld [vmem:[%s20114_s3 + $0x28] sm:$0xff] }
 0x403   :  { %7893 = vmatpush.bf16.msrb.mxu2 %v12156_v34  ;;  %v13516_v57 = vld [vmem:[%s20114_s3 + $0x78] sm:$0xff]  ;;  %v13514_v49 = vld [vmem:[%s20114_s3 + $0x68] sm:$0xff]  ;;  %v13505_v34 = vld [vmem:[%s20114_s3 + $0x20] sm:$0xff] }
 0x404   :  { %7906 = vmatpush.bf16.msrb.mxu3 %v12284_v62  ;;  %v13524_v45 = vld [vmem:[%s20114_s3 + $0xb8] sm:$0xff]  ;;  %v13522_v56 = vld [vmem:[%s20114_s3 + $0xa8] sm:$0xff] }
 0x405   :  { %7868 = vmatpush.bf16.msrb.mxu0 %v11884_v11  ;;  %v13560_v18 = vld [vmem:[#allocation1 + $0x36] sm:$0xff]  ;;  %v13561_v48 = vld [vmem:[#allocation1 + $0x3f] sm:$0xff]  ;;  %v13518_v35 = vld [vmem:[%s20114_s3 + $0x88] sm:$0xff] }
 0x406   :  { %7881 = vmatpush.bf16.msrb.mxu1 %v12012_v21  ;;  %v13504_v55 = vld [vmem:[%s20114_s3 + $0x18] sm:$0xff]  ;;  %v13502_v21 = vld [vmem:[%s20114_s3 + $0x8] sm:$0xff] }
 0x407   :  { %7894 = vmatpush.bf16.msrb.mxu2 %v12140_v31  ;;  %v13512_v12 = vld [vmem:[%s20114_s3 + $0x58] sm:$0xff]  ;;  %v13510_v31 = vld [vmem:[%s20114_s3 + $0x48] sm:$0xff] }
 0x408   :  { %7907 = vmatpush.bf16.msrb.mxu3 %v12268_v32  ;;  %v13520_v36 = vld [vmem:[%s20114_s3 + $0x98] sm:$0xff]  ;;  %v13501_v32 = vld [vmem:[%s20114_s3] sm:$0xff] }
 0x409   :  { %7869 = vmatpush.bf16.msrb.mxu0 %v11868_v23  ;;  %v7919_v23 = vpack.c.bf16 %v7915_v37, %v7915_v37 }
 0x40a   :  { %7882 = vmatpush.bf16.msrb.mxu1 %v11996_v20  ;;  %v7920_v20 = vpack.c.bf16 %v7916_v2, %v7916_v2 }
 0x40b   :  { %7895 = vmatpush.bf16.msrb.mxu2 %v12124_v41 }
 0x40c   :  { %7908 = vmatpush.bf16.msrb.mxu3 %v12252_v25 }
 0x40d   :  { %7870 = vmatpush.bf16.msrb.mxu0 %v11852_v9  ;;  %v7664_v28 = vpop.f32.mrf.mxu0 }
 0x40e   :  { %7883 = vmatpush.bf16.msrb.mxu1 %v11980_v5  ;;  %v7665_v29 = vadd.f32 %v7664_v28, %v19955_v10  ;;  %v7677_v59 = vpop.f32.mrf.mxu1  ;;  %v13519_v10 = vld [vmem:[%s20114_s3 + $0x90] sm:$0xff] }
 0x40f   :  { %7896 = vmatpush.bf16.msrb.mxu2 %v12108_v6 }
 0x410   :  { %7909 = vmatpush.bf16.msrb.mxu3 %v12236_v43  ;;  %7871 = vmatmul.bf16.vlgmr.msrb.gmra.mxu0 %v13558_v38  ;;  %v7678_v62 = vadd.f32 %v7677_v59, %v7665_v29  ;;  %v13532_v43 = vld [vmem:[%s20114_s3 + $0xf8] sm:$0xff]  ;;  %v13525_v59 = vld [vmem:[%s20114_s3 + $0xc0] sm:$0xff] }
 0x411   :  { %8183 = vmatpush.bf16.msra.mxu0 %v13508_v7  ;;  %7884 = vmatmul.bf16.vlgmr.msrb.gmra.mxu1 %v13559_v47  ;;  %v13528_v38 = vld [vmem:[%s20114_s3 + $0xd8] sm:$0xff] }
 0x412   :  { %8196 = vmatpush.bf16.msra.mxu1 %v13516_v57  ;;  %7897 = vmatmul.bf16.vlgmr.msrb.gmra.mxu2 %v13560_v18  ;;  %v13531_v57 = vld [vmem:[%s20114_s3 + $0xf0] sm:$0xff] }
 0x413   :  { %8209 = vmatpush.bf16.msra.mxu2 %v13524_v45  ;;  %7910 = vmatmul.bf16.vlgmr.msrb.gmra.mxu3 %v13561_v48  ;;  %v13530_v45 = vld [vmem:[%s20114_s3 + $0xe8] sm:$0xff]  ;;  %v13527_v48 = vld [vmem:[%s20114_s3 + $0xd0] sm:$0xff] }
 0x414   :  { %8222 = vmatpush.bf16.msra.mxu3 %v13532_v43 }
 0x415   :  { %8184 = vmatpush.bf16.msra.mxu0 %v13507_v13  ;;  %v7690_v63 = vpop.f32.mrf.mxu2  ;;  %v7666_v19 = vpop.f32.mrf.mxu0 }
 0x416   :  { %8197 = vmatpush.bf16.msra.mxu1 %v13515_v14  ;;  %v7691_v3 = vadd.f32 %v7690_v63, %v7678_v62  ;;  %v7703_v8 = vpop.f32.mrf.mxu3  ;;  %v7679_v58 = vpop.f32.mrf.mxu1 }
 0x417   :  { %8210 = vmatpush.bf16.msra.mxu2 %v13523_v53  ;;  %v13529_v53 = vld [vmem:[%s20114_s3 + $0xe0] sm:$0xff] }
 0x418   :  { %v7704_v11 = vadd.f32 %v7703_v8, %v7691_v3  ;;  %8223 = vmatpush.bf16.msra.mxu3 %v13531_v57 }
 0x419   :  { %8185 = vmatpush.bf16.msra.mxu0 %v13506_v27  ;;  %v13526_v27 = vld [vmem:[%s20114_s3 + $0xc8] sm:$0xff] }
 0x41a   :  { %8198 = vmatpush.bf16.msra.mxu1 %v13514_v49 }
 0x41b   :  { %8211 = vmatpush.bf16.msra.mxu2 %v13522_v56 }
 0x41c   :  { %8224 = vmatpush.bf16.msra.mxu3 %v13530_v45 }
 0x41d   :  { %8186 = vmatpush.bf16.msra.mxu0 %v13505_v34  ;;  %v7692_v60 = vpop.f32.mrf.mxu2 }
 0x41e   :  { %8199 = vmatpush.bf16.msra.mxu1 %v13513_v40  ;;  %v7705_v24 = vpop.f32.mrf.mxu3 }
 0x41f   :  { %8212 = vmatpush.bf16.msra.mxu2 %v13521_v61 }
 0x420   :  { %8225 = vmatpush.bf16.msra.mxu3 %v13529_v53 }
 0x421   :  { %8187 = vmatpush.bf16.msra.mxu0 %v13504_v55 }
 0x422   :  { %8200 = vmatpush.bf16.msra.mxu1 %v13512_v12 }
 0x423   :  { %8213 = vmatpush.bf16.msra.mxu2 %v13520_v36 }
 0x424   :  { %8226 = vmatpush.bf16.msra.mxu3 %v13528_v38 }
 0x425   :  { %8188 = vmatpush.bf16.msra.mxu0 %v13503_v30 }
 0x426   :  { %8201 = vmatpush.bf16.msra.mxu1 %v13511_v26 }
 0x427   :  { %8214 = vmatpush.bf16.msra.mxu2 %v13519_v10 }
 0x428   :  { %8227 = vmatpush.bf16.msra.mxu3 %v13527_v48 }
 0x429   :  { %8189 = vmatpush.bf16.msra.mxu0 %v13502_v21 }
 0x42a   :  { %8202 = vmatpush.bf16.msra.mxu1 %v13510_v31 }
 0x42b   :  { %8215 = vmatpush.bf16.msra.mxu2 %v13518_v35 }
 0x42c   :  { %8228 = vmatpush.bf16.msra.mxu3 %v13526_v27 }
 0x42d   :  { %8190 = vmatpush.bf16.msra.mxu0 %v13501_v32  ;;  %v7716_v41 = vpop.f32.mrf.mxu0 }
 0x42e   :  { %8203 = vmatpush.bf16.msra.mxu1 %v13509_v0  ;;  %v7717_v42 = vadd.f32 %v7716_v41, %v7704_v11  ;;  %v7729_v50 = vpop.f32.mrf.mxu1 }
 0x42f   :  { %8216 = vmatpush.bf16.msra.mxu2 %v13517_v1  ;;  %v13534_v1 = vld [vmem:[%s20115_s4] ss:$0 sm:$0xff] }
 0x430   :  { %8191 = vmatmul.bf16.vlgmr.msra.gmra.mxu0 %v7919_v23  ;;  %v7730_v51 = vadd.f32 %v7729_v50, %v7717_v42  ;;  %8229 = vmatpush.bf16.msra.mxu3 %v13525_v59 }
 0x431   :  { %8204 = vmatmul.bf16.vlgmr.msra.gmra.mxu1 %v7920_v20 }
 0x432   :  { %8217 = vmatmul.bf16.vlgmr.msra.gmra.mxu2 %v7921_v54 }
 0x435   :  { %v7742_v25 = vpop.f32.mrf.mxu2  ;;  %v7718_v16 = vpop.f32.mrf.mxu0 }
 0x436   :  { %v7743_v52 = vadd.f32 %v7742_v25, %v7730_v51  ;;  %v7755_v15 = vpop.f32.mrf.mxu3  ;;  %v7731_v22 = vpop.f32.mrf.mxu1 }
 0x438   :  { %v7756_v4 = vadd.f32 %v7755_v15, %v7743_v52 }
 0x43d   :  { %v7744_v33 = vpop.f32.mrf.mxu2 }
 0x43e   :  { %v7757_v44 = vpop.f32.mrf.mxu3 }
 0x44d   :  { %v7768_v17 = vpop.f32.mrf.mxu0 }
 0x44e   :  { %v7781_v46 = vpop.f32.mrf.mxu1  ;;  %v7769_v56 = vadd.f32 %v7768_v17, %v7756_v4 }
 0x450   :  { %v7782_v40 = vadd.f32 %v7781_v46, %v7769_v56 }
 0x455   :  { %v7794_v9 = vpop.f32.mrf.mxu2  ;;  %v7770_v6 = vpop.f32.mrf.mxu0 }
 0x456   :  { %v7807_v5 = vpop.f32.mrf.mxu3  ;;  %v7783_v7 = vpop.f32.mrf.mxu1  ;;  %v7795_v61 = vadd.f32 %v7794_v9, %v7782_v40 }
 0x458   :  { %v7808_v12 = vadd.f32 %v7807_v5, %v7795_v61 }
 0x45d   :  { %v7796_v13 = vpop.f32.mrf.mxu2 }
 0x45e   :  { %v7809_v14 = vpop.f32.mrf.mxu3 }
 0x46d   :  { %v7820_v47 = vpop.f32.mrf.mxu0 }
 0x46e   :  { %v7833_v18 = vpop.f32.mrf.mxu1  ;;  %v7821_v36 = vadd.f32 %v7820_v47, %v7808_v12 }
 0x470   :  { %v7834_v63 = vadd.f32 %v7833_v18, %v7821_v36 }
 0x475   :  { %v7846_v49 = vpop.f32.mrf.mxu2  ;;  %v7822_v29 = vpop.f32.mrf.mxu0 }
 0x476   :  { %v7859_v28 = vpop.f32.mrf.mxu3  ;;  %v7835_v34 = vpop.f32.mrf.mxu1  ;;  %v7847_v3 = vadd.f32 %v7846_v49, %v7834_v63 }
 0x478   :  { %v7860_v8 = vadd.f32 %v7859_v28, %v7847_v3 }
 0x47d   :  { %v7848_v62 = vpop.f32.mrf.mxu2 }
 0x47e   :  { %v7861_v55 = vpop.f32.mrf.mxu3 }
 0x48d   :  { %v7872_v19 = vpop.f32.mrf.mxu0 }
 0x48e   :  { %v7885_v30 = vpop.f32.mrf.mxu1  ;;  %v7873_v58 = vadd.f32 %v7872_v19, %v7860_v8 }
 0x490   :  { %v7886_v11 = vadd.f32 %v7885_v30, %v7873_v58 }
 0x495   :  { %v7898_v26 = vpop.f32.mrf.mxu2  ;;  %v7874_v31 = vpop.f32.mrf.mxu0 }
 0x496   :  { %v7911_v10 = vpop.f32.mrf.mxu3  ;;  %v7899_v21 = vadd.f32 %v7898_v26, %v7886_v11  ;;  %v7887_v35 = vpop.f32.mrf.mxu1 }
 0x498   :  { %v7912_v60 = vadd.f32 %v7911_v10, %v7899_v21 }
 0x49a   :  { %v7918_v24 = vmax.f32 %v7912_v60, 0.0 }
 0x49c   :  { %v7922_v32 = vpack.c.bf16 %v7918_v24, %v7918_v24 }
 0x49d   :  { %v7900_v37 = vpop.f32.mrf.mxu2 }
 0x49e   :  { %v7913_v0 = vpop.f32.mrf.mxu3  ;;  %8230 = vmatmul.bf16.vlgmr.msra.gmra.mxu3 %v7922_v32 }
 0x4ad   :  { %v8192_v2 = vpop.f32.mrf.mxu0 }
 0x4ae   :  { %v8193_v39 = vadd.f32 %v13534_v1, %v8192_v2  ;;  %v8205_v23 = vpop.f32.mrf.mxu1 }
 0x4b0   :  { %v8206_v20 = vadd.f32 %v8205_v23, %v8193_v39 }
 0x4b5   :  { %v8218_v54 = vpop.f32.mrf.mxu2  ;;  %v8194_v42 = vpop.f32.mrf.mxu0 }
 0x4b6   :  { %v8219_v41 = vadd.f32 %v8218_v54, %v8206_v20  ;;  %v8207_v50 = vpop.f32.mrf.mxu1 }
 0x4bd   :  { %v8220_v51 = vpop.f32.mrf.mxu2 }
 0x521   :  { %v8231_v25 = vpop.f32.mrf.mxu3 }
 0x522   :  { %v8232_v52 = vadd.f32 %v8231_v25, %v8219_v41 }
 0x524   :  { %8236 = vst.msk [vmem:[#allocation2] sm:$0x3] %vm8235_vm0, %v8232_v52 }
 0x525   :  { %8247 = dma.vmem_to_hbm [thread:$0]  %s8243_s23, 32, %s8245_s26, [#allocation3]  }
 0x529   :  { %v8233_v15 = vpop.f32.mrf.mxu3 }
 0x52a   :  { %13586 = dma.done.wait [#allocation3], 32  }
 0x52b   :  { %13587 = vsyncadd [#allocation3], 4294967264 }
 0x52c   :  { %8252 = vsyncpa [#allocation3], 1 }

</bundles_post_ra>
